<compile_context>
chip_gen: v7x
topology: tpu7x:2x2x1
jax: 0.10.0
libtpu: 0.0.40
codegen_flags: <defaults>
</compile_context>

<pallas_src>
import jax
import jax.numpy as jnp
from jax.experimental import pallas as pl
from jax.experimental.pallas import tpu as pltpu

N_BATCH = 2
H = W = 14
PH = PW = 7                      # pooled spatial size (AdaptiveMaxPool2d(7))
NPOS = PH * PW                   # 49 pooled positions
C1, C2 = 64, 128
FLAT = NPOS * C2                 # 6272
HID = 1024
OUT = 2
LEAKY = 0.01

NPAD = 8                         # batch padded to one sublane tile
HID_BLK = 256                    # HID tile per grid step (3.2 MB bf16 w3 slab)
KH = HID // HID_BLK              # 4 total HID blocks
KH2 = KH // 2                    # 2 blocks per parallel half (one half / v7x core)


# ----------------------------------------------------------------------------
# Fused kernel
# ----------------------------------------------------------------------------
def fused_kernel(pat_ref, w1e_ref, b1_ref, bns_ref, bnb_ref, w2_ref, b2_ref,
                 w3_ref, b3_ref, w4_ref, b4_ref, o_ref, feat_ref):
    """grid = (2, KH2): axis 0 = HID half (parallel), axis 1 = HID block (arbitrary).

    pat_ref:  (NPOS*NPAD, 16) f32 4x4 patches, rows p*NPAD + n, lanes = taps.
    w1e_ref:  (4, 16, C1) conv weight embedded per 2x2 pool phase.
    w3_ref:   (FLAT, HID_BLK) bf16 contiguous block of the permuted Linear weight.
    feat_ref: (NPAD, FLAT) bf16 cached pooled features (persists across grid).
    o_ref:    (NPAD, OUT) f32 partial logits for this HID half (resident over k).
    """
    i = pl.program_id(0)
    k = pl.program_id(1)

    # ---- first step per core: compute & cache all 49 pooled-position features
    @pl.when(k == 0)
    def _():
        pat = pat_ref[...]                                      # (392, 16) f32
        m = None
        for f in range(4):                                      # 2x2 pool phases
            z = jnp.dot(pat, w1e_ref[f],
                        preferred_element_type=jnp.float32) + b1_ref[...]
            z = z * bns_ref[...] + bnb_ref[...]                 # folded BN (eval)
            z = jnp.where(z >= 0, z, LEAKY * z)                 # LeakyReLU
            y = jnp.dot(z, w2_ref[...],
                        preferred_element_type=jnp.float32) + b2_ref[...]
            m = y if m is None else jnp.maximum(m, y)           # 2x2 max pool
        m = jnp.where(m >= 0, m, LEAKY * m)                     # (392, 128)
        # Scatter 49 tile-aligned (8,128) position tiles into one lane-major
        # (8, 6272) feature row so the big Linear is a single matmul per step.
        for p in range(NPOS):
            feat_ref[:, p * C2:(p + 1) * C2] = (
                m[p * NPAD:(p + 1) * NPAD, :].astype(jnp.bfloat16))
        o_ref[...] = jnp.zeros_like(o_ref)

    # ---- every step: contract cached features against this HID block of w3
    h = jnp.dot(feat_ref[...], w3_ref[...],
                preferred_element_type=jnp.float32) + b3_ref[...]   # (8, HID_BLK)
    # TODO(synk): Dropout(0.5) is identity in eval mode.
    o_ref[...] += jnp.dot(h, w4_ref[...], preferred_element_type=jnp.float32)

    @pl.when((k == pl.num_programs(1) - 1) & (i == 0))
    def _():
        o_ref[...] += b4_ref[...]                               # add b4 exactly once


# ----------------------------------------------------------------------------
# Wrapper glue
# ----------------------------------------------------------------------------
def _extract_patches(x):
    """x: (N,1,14,14) -> (NPOS*NPAD, 16) f32.

    One 4x4/stride-2 patch per pooled output position over the pad-1 image
    (receptive field of conv3x3(pad 1) followed by 2x2/stride-2 max pool).
    Rows are position-major / padded-batch-minor (p*NPAD + n); lanes are the
    16 taps of the 4x4 window (kh*4 + kw).  Single XLA patch-extraction op.
    """
    n = x.shape[0]
    pat = jax.lax.conv_general_dilated_patches(
        x, filter_shape=(4, 4), window_strides=(2, 2),
        padding=((1, 1), (1, 1)),
        precision=jax.lax.Precision.HIGHEST)                    # (N, 16, 7, 7)
    pat = jnp.pad(pat, ((0, NPAD - n), (0, 0), (0, 0), (0, 0))) # pad batch to 8
    return pat.transpose(2, 3, 0, 1).reshape(NPOS * NPAD, 16)


def prepare_params(params):
    """One-time kernel-ready prep.

    * w1 (9,64) embedded into four (16,64) matrices (one per 2x2 pool phase),
      indexed by the 4x4-patch tap; unused taps get zero rows.
    * w3 (6272,1024), stored in PyTorch flatten order (c*49+p), permuted to
      position-major rows (p*128+c) to match the kernel feature layout, cast
      to bfloat16, and pre-split into KH contiguous (6272, HID_BLK) blocks.
    """
    w1, b1, bns, bnb, w2, b2, w3, b3, w4, b4 = params
    w1e = jnp.zeros((4, 16, C1), w1.dtype)
    for i in range(2):
        for j in range(2):
            for dh in range(3):
                for dw in range(3):
                    w1e = w1e.at[i * 2 + j, (i + dh) * 4 + (j + dw), :].set(
                        w1[dh * 3 + dw])
    w3p = w3.reshape(C2, NPOS, HID).transpose(1, 0, 2).reshape(FLAT, HID)
    w3t = (w3p.reshape(FLAT, KH, HID_BLK).transpose(1, 0, 2)
           .astype(jnp.bfloat16))                               # (KH, FLAT, HID_BLK)
    return (w1e, b1, bns, bnb, w2, b2, w3t, b3, w4, b4)


def net_forward(x, kparams):
    w1e, b1, bns, bnb, w2, b2, w3t, b3, w4, b4 = kparams
    n = x.shape[0]
    patches = _extract_patches(x)                               # (392, 16)

    out = pl.pallas_call(
        fused_kernel,
        out_shape=jax.ShapeDtypeStruct((2, NPAD, OUT), jnp.float32),
        grid=(2, KH2),
        in_specs=[
            pl.BlockSpec((NPOS * NPAD, 16), lambda i, k: (0, 0)),        # patches
            pl.BlockSpec((4, 16, C1), lambda i, k: (0, 0, 0)),           # w1 embedded
            pl.BlockSpec((1, C1), lambda i, k: (0, 0)),                  # b1
            pl.BlockSpec((1, C1), lambda i, k: (0, 0)),                  # bn scale
            pl.BlockSpec((1, C1), lambda i, k: (0, 0)),                  # bn bias
            pl.BlockSpec((C1, C2), lambda i, k: (0, 0)),                 # w2
            pl.BlockSpec((1, C2), lambda i, k: (0, 0)),                  # b2
            pl.BlockSpec((None, FLAT, HID_BLK),
                         lambda i, k: (i * KH2 + k, 0, 0)),              # w3 (bf16)
            pl.BlockSpec((1, HID_BLK), lambda i, k: (0, i * KH2 + k)),   # b3
            pl.BlockSpec((HID_BLK, OUT), lambda i, k: (i * KH2 + k, 0)), # w4
            pl.BlockSpec((1, OUT), lambda i, k: (0, 0)),                 # b4
        ],
        out_specs=pl.BlockSpec((None, NPAD, OUT), lambda i, k: (i, 0, 0)),
        scratch_shapes=[pltpu.VMEM((NPAD, FLAT), jnp.bfloat16)],
        compiler_params=pltpu.CompilerParams(
            dimension_semantics=("parallel", "arbitrary"),
            vmem_limit_bytes=32 * 1024 * 1024),
    )(patches, w1e, b1, bns, bnb, w2, b2, w3t, b3, w4, b4)
    # Sum the two HID-half partial logits (one per TensorCore on v7x).
    return (out[0] + out[1])[:n]


# ----------------------------------------------------------------------------
# Pure-JAX reference (independent path through lax.conv / reduce_window, f32)
# ----------------------------------------------------------------------------
def reference(x, params):
    w1, b1, bns, bnb, w2, b2, w3, b3, w4, b4 = params
    hp = jax.lax.Precision.HIGHEST
    W1 = w1.reshape(3, 3, C1).transpose(2, 0, 1)[:, None, :, :]   # OIHW (64,1,3,3)
    y = jax.lax.conv_general_dilated(
        x, W1, (1, 1), ((1, 1), (1, 1)),
        dimension_numbers=('NCHW', 'OIHW', 'NCHW'), precision=hp)
    y = y + b1.reshape(1, C1, 1, 1)
    y = y * bns.reshape(1, C1, 1, 1) + bnb.reshape(1, C1, 1, 1)
    y = jnp.where(y >= 0, y, LEAKY * y)
    W2 = w2.T[:, :, None, None]                                   # (128,64,1,1)
    y = jax.lax.conv_general_dilated(
        y, W2, (1, 1), ((0, 0), (0, 0)),
        dimension_numbers=('NCHW', 'OIHW', 'NCHW'), precision=hp)
    y = y + b2.reshape(1, C2, 1, 1)
    y = jax.lax.reduce_window(y, -jnp.inf, jax.lax.max,
                              (1, 1, 2, 2), (1, 1, 2, 2), 'VALID')
    y = jnp.where(y >= 0, y, LEAKY * y)
    y = y.reshape(x.shape[0], FLAT)
    h = jnp.dot(y, w3, precision=hp) + b3[0]
    return jnp.dot(h, w4, precision=hp) + b4[0]


def make_params():
    ks = jax.random.split(jax.random.PRNGKey(0), 12)
    f32 = jnp.float32
    w1 = jax.random.normal(ks[0], (9, C1), f32) / 3.0             # Conv2d(1,64,3)
    b1 = jax.random.normal(ks[1], (1, C1), f32) * 0.1
    gamma = jax.random.uniform(ks[2], (C1,), f32, 0.5, 1.5)       # BatchNorm2d(64)
    beta = jax.random.normal(ks[3], (C1,), f32) * 0.1
    rmean = jax.random.normal(ks[4], (C1,), f32) * 0.1
    rvar = jax.random.uniform(ks[5], (C1,), f32, 0.5, 1.5)
    scale = gamma / jnp.sqrt(rvar + 1e-5)
    bn_scale = scale.reshape(1, C1)
    bn_bias = (beta - rmean * scale).reshape(1, C1)
    w2 = jax.random.normal(ks[6], (C1, C2), f32) / 8.0            # Conv2d(64,128,1)
    b2 = jax.random.normal(ks[7], (1, C2), f32) * 0.1
    w3 = jax.random.normal(ks[8], (FLAT, HID), f32) / 79.2        # Linear(6272,1024)
    b3 = jax.random.normal(ks[9], (1, HID), f32) * 0.1
    w4 = jax.random.normal(ks[10], (HID, OUT), f32) / 32.0        # Linear(1024,2)
    b4 = jax.random.normal(ks[11], (1, OUT), f32) * 0.1
    return (w1, b1, bn_scale, bn_bias, w2, b2, w3, b3, w4, b4)


if __name__ == "__main__":
    params = make_params()
    kparams = prepare_params(params)          # one-time: embed w1, permute/bf16 w3
    x = jax.random.normal(jax.random.PRNGKey(0), (N_BATCH, 1, H, W), jnp.float32)

    fwd = jax.jit(net_forward)
    out = jax.block_until_ready(fwd(x, kparams))
    assert out.shape == (N_BATCH, OUT) and out.dtype == jnp.float32

    ref = jax.block_until_ready(reference(x, params))
    assert bool(jnp.all(jnp.isfinite(out)))
    # bf16 w3 stream + bf16 cached features, f32 accumulation: loose tolerance.
    assert bool(jnp.allclose(out, ref, rtol=5e-2, atol=5e-2)), (out, ref)

    print("KERNEL_OK")
</pallas_src>

<mosaic_0001>
module attributes {stable_mosaic.version = 11 : i64} {
  func.func @fused_kernel(%arg0: i32, %arg1: i32, %arg2: memref<392x16xf32, #tpu.memory_space<vmem>>, %arg3: memref<4x16x64xf32, #tpu.memory_space<vmem>>, %arg4: memref<1x64xf32, #tpu.memory_space<vmem>>, %arg5: memref<1x64xf32, #tpu.memory_space<vmem>>, %arg6: memref<1x64xf32, #tpu.memory_space<vmem>>, %arg7: memref<64x128xf32, #tpu.memory_space<vmem>>, %arg8: memref<1x128xf32, #tpu.memory_space<vmem>>, %arg9: memref<1x6272x256xbf16, #tpu.memory_space<vmem>>, %arg10: memref<1x256xf32, #tpu.memory_space<vmem>>, %arg11: memref<256x2xf32, #tpu.memory_space<vmem>>, %arg12: memref<1x2xf32, #tpu.memory_space<vmem>>, %arg13: memref<1x8x2xf32, #tpu.memory_space<vmem>>, %arg14: memref<8x6272xbf16, #tpu.memory_space<vmem>>) attributes {dimension_semantics = [#tpu.dimension_semantics<parallel>, #tpu.dimension_semantics<arbitrary>], iteration_bounds = array<i64: 2, 2>, scalar_prefetch = 0 : i64, scratch_operands = 1 : i64, tpu.core_type = #tpu.core_type<tc>, window_params = [{pipeline_mode = #tpu.pipeline_mode<synchronous>, transform_indices = @transform_0, window_bounds = array<i64: 392, 16>}, {pipeline_mode = #tpu.pipeline_mode<synchronous>, transform_indices = @transform_1, window_bounds = array<i64: 4, 16, 64>}, {pipeline_mode = #tpu.pipeline_mode<synchronous>, transform_indices = @transform_2, window_bounds = array<i64: 1, 64>}, {pipeline_mode = #tpu.pipeline_mode<synchronous>, transform_indices = @transform_3, window_bounds = array<i64: 1, 64>}, {pipeline_mode = #tpu.pipeline_mode<synchronous>, transform_indices = @transform_4, window_bounds = array<i64: 1, 64>}, {pipeline_mode = #tpu.pipeline_mode<synchronous>, transform_indices = @transform_5, window_bounds = array<i64: 64, 128>}, {pipeline_mode = #tpu.pipeline_mode<synchronous>, transform_indices = @transform_6, window_bounds = array<i64: 1, 128>}, {transform_indices = @transform_7, window_bounds = array<i64: 1, 6272, 256>}, {transform_indices = @transform_8, window_bounds = array<i64: 1, 256>}, {transform_indices = @transform_9, window_bounds = array<i64: 256, 2>}, {pipeline_mode = #tpu.pipeline_mode<synchronous>, transform_indices = @transform_10, window_bounds = array<i64: 1, 2>}, {transform_indices = @transform_11, window_bounds = array<i64: 1, 8, 2>}]} {
    %c0_i32 = arith.constant 0 : i32
    %0 = arith.cmpi eq, %arg1, %c0_i32 : i32
    %1 = arith.extui %0 : i1 to i32
    %c0_i32_0 = arith.constant 0 : i32
    %2 = arith.cmpi ne, %1, %c0_i32_0 : i32
    scf.if %2 {
      %c0_18 = arith.constant 0 : index
      %c0_19 = arith.constant 0 : index
      %23 = vector.load %arg2[%c0_18, %c0_19] : memref<392x16xf32, #tpu.memory_space<vmem>>, vector<392x16xf32>
      %c0_20 = arith.constant 0 : index
      %c0_21 = arith.constant 0 : index
      %c0_22 = arith.constant 0 : index
      %24 = vector.load %arg3[%c0_20, %c0_21, %c0_22] : memref<4x16x64xf32, #tpu.memory_space<vmem>>, vector<1x16x64xf32>
      %25 = vector.shape_cast %24 : vector<1x16x64xf32> to vector<16x64xf32>
      %cst_23 = arith.constant dense<0.000000e+00> : vector<392x64xf32>
      %26 = tpu.matmul %23, %25, %cst_23 {dimension_numbers = #tpu.dot_dimension_numbers<[1], [0], [0], [1], [0, 0, 1, 1], [], []>} : vector<392x16xf32>, vector<16x64xf32>, vector<392x64xf32> -> vector<392x64xf32>
      %c0_24 = arith.constant 0 : index
      %c0_25 = arith.constant 0 : index
      %27 = vector.load %arg4[%c0_24, %c0_25] : memref<1x64xf32, #tpu.memory_space<vmem>>, vector<1x64xf32>
      %28 = vector.broadcast %27 : vector<1x64xf32> to vector<392x64xf32>
      %29 = arith.addf %26, %28 : vector<392x64xf32>
      %c0_26 = arith.constant 0 : index
      %c0_27 = arith.constant 0 : index
      %30 = vector.load %arg5[%c0_26, %c0_27] : memref<1x64xf32, #tpu.memory_space<vmem>>, vector<1x64xf32>
      %31 = vector.broadcast %30 : vector<1x64xf32> to vector<392x64xf32>
      %32 = arith.mulf %29, %31 : vector<392x64xf32>
      %c0_28 = arith.constant 0 : index
      %c0_29 = arith.constant 0 : index
      %33 = vector.load %arg6[%c0_28, %c0_29] : memref<1x64xf32, #tpu.memory_space<vmem>>, vector<1x64xf32>
      %34 = vector.broadcast %33 : vector<1x64xf32> to vector<392x64xf32>
      %35 = arith.addf %32, %34 : vector<392x64xf32>
      %cst_30 = arith.constant 0.000000e+00 : f32
      %36 = vector.broadcast %cst_30 : f32 to vector<392x64xf32>
      %37 = arith.cmpf oge, %35, %36 : vector<392x64xf32>
      %cst_31 = arith.constant 0.00999999977 : f32
      %38 = vector.broadcast %cst_31 : f32 to vector<392x64xf32>
      %39 = arith.mulf %38, %35 : vector<392x64xf32>
      %40 = arith.select %37, %35, %39 : vector<392x64xi1>, vector<392x64xf32>
      %c0_32 = arith.constant 0 : index
      %c0_33 = arith.constant 0 : index
      %41 = vector.load %arg7[%c0_32, %c0_33] : memref<64x128xf32, #tpu.memory_space<vmem>>, vector<64x128xf32>
      %cst_34 = arith.constant dense<0.000000e+00> : vector<392x128xf32>
      %42 = tpu.matmul %40, %41, %cst_34 {dimension_numbers = #tpu.dot_dimension_numbers<[1], [0], [0], [1], [0, 0, 1, 1], [], []>} : vector<392x64xf32>, vector<64x128xf32>, vector<392x128xf32> -> vector<392x128xf32>
      %c0_35 = arith.constant 0 : index
      %c0_36 = arith.constant 0 : index
      %43 = vector.load %arg8[%c0_35, %c0_36] : memref<1x128xf32, #tpu.memory_space<vmem>>, vector<1x128xf32>
      %44 = vector.broadcast %43 : vector<1x128xf32> to vector<392x128xf32>
      %45 = arith.addf %42, %44 : vector<392x128xf32>
      %c1 = arith.constant 1 : index
      %c0_37 = arith.constant 0 : index
      %c0_38 = arith.constant 0 : index
      %46 = vector.load %arg3[%c1, %c0_37, %c0_38] : memref<4x16x64xf32, #tpu.memory_space<vmem>>, vector<1x16x64xf32>
      %47 = vector.shape_cast %46 : vector<1x16x64xf32> to vector<16x64xf32>
      %cst_39 = arith.constant dense<0.000000e+00> : vector<392x64xf32>
      %48 = tpu.matmul %23, %47, %cst_39 {dimension_numbers = #tpu.dot_dimension_numbers<[1], [0], [0], [1], [0, 0, 1, 1], [], []>} : vector<392x16xf32>, vector<16x64xf32>, vector<392x64xf32> -> vector<392x64xf32>
      %c0_40 = arith.constant 0 : index
      %c0_41 = arith.constant 0 : index
      %49 = vector.load %arg4[%c0_40, %c0_41] : memref<1x64xf32, #tpu.memory_space<vmem>>, vector<1x64xf32>
      %50 = vector.broadcast %49 : vector<1x64xf32> to vector<392x64xf32>
      %51 = arith.addf %48, %50 : vector<392x64xf32>
      %c0_42 = arith.constant 0 : index
      %c0_43 = arith.constant 0 : index
      %52 = vector.load %arg5[%c0_42, %c0_43] : memref<1x64xf32, #tpu.memory_space<vmem>>, vector<1x64xf32>
      %53 = vector.broadcast %52 : vector<1x64xf32> to vector<392x64xf32>
      %54 = arith.mulf %51, %53 : vector<392x64xf32>
      %c0_44 = arith.constant 0 : index
      %c0_45 = arith.constant 0 : index
      %55 = vector.load %arg6[%c0_44, %c0_45] : memref<1x64xf32, #tpu.memory_space<vmem>>, vector<1x64xf32>
      %56 = vector.broadcast %55 : vector<1x64xf32> to vector<392x64xf32>
      %57 = arith.addf %54, %56 : vector<392x64xf32>
      %cst_46 = arith.constant 0.000000e+00 : f32
      %58 = vector.broadcast %cst_46 : f32 to vector<392x64xf32>
      %59 = arith.cmpf oge, %57, %58 : vector<392x64xf32>
      %cst_47 = arith.constant 0.00999999977 : f32
      %60 = vector.broadcast %cst_47 : f32 to vector<392x64xf32>
      %61 = arith.mulf %60, %57 : vector<392x64xf32>
      %62 = arith.select %59, %57, %61 : vector<392x64xi1>, vector<392x64xf32>
      %c0_48 = arith.constant 0 : index
      %c0_49 = arith.constant 0 : index
      %63 = vector.load %arg7[%c0_48, %c0_49] : memref<64x128xf32, #tpu.memory_space<vmem>>, vector<64x128xf32>
      %cst_50 = arith.constant dense<0.000000e+00> : vector<392x128xf32>
      %64 = tpu.matmul %62, %63, %cst_50 {dimension_numbers = #tpu.dot_dimension_numbers<[1], [0], [0], [1], [0, 0, 1, 1], [], []>} : vector<392x64xf32>, vector<64x128xf32>, vector<392x128xf32> -> vector<392x128xf32>
      %c0_51 = arith.constant 0 : index
      %c0_52 = arith.constant 0 : index
      %65 = vector.load %arg8[%c0_51, %c0_52] : memref<1x128xf32, #tpu.memory_space<vmem>>, vector<1x128xf32>
      %66 = vector.broadcast %65 : vector<1x128xf32> to vector<392x128xf32>
      %67 = arith.addf %64, %66 : vector<392x128xf32>
      %68 = arith.maximumf %45, %67 : vector<392x128xf32>
      %c2 = arith.constant 2 : index
      %c0_53 = arith.constant 0 : index
      %c0_54 = arith.constant 0 : index
      %69 = vector.load %arg3[%c2, %c0_53, %c0_54] : memref<4x16x64xf32, #tpu.memory_space<vmem>>, vector<1x16x64xf32>
      %70 = vector.shape_cast %69 : vector<1x16x64xf32> to vector<16x64xf32>
      %cst_55 = arith.constant dense<0.000000e+00> : vector<392x64xf32>
      %71 = tpu.matmul %23, %70, %cst_55 {dimension_numbers = #tpu.dot_dimension_numbers<[1], [0], [0], [1], [0, 0, 1, 1], [], []>} : vector<392x16xf32>, vector<16x64xf32>, vector<392x64xf32> -> vector<392x64xf32>
      %c0_56 = arith.constant 0 : index
      %c0_57 = arith.constant 0 : index
      %72 = vector.load %arg4[%c0_56, %c0_57] : memref<1x64xf32, #tpu.memory_space<vmem>>, vector<1x64xf32>
      %73 = vector.broadcast %72 : vector<1x64xf32> to vector<392x64xf32>
      %74 = arith.addf %71, %73 : vector<392x64xf32>
      %c0_58 = arith.constant 0 : index
      %c0_59 = arith.constant 0 : index
      %75 = vector.load %arg5[%c0_58, %c0_59] : memref<1x64xf32, #tpu.memory_space<vmem>>, vector<1x64xf32>
      %76 = vector.broadcast %75 : vector<1x64xf32> to vector<392x64xf32>
      %77 = arith.mulf %74, %76 : vector<392x64xf32>
      %c0_60 = arith.constant 0 : index
      %c0_61 = arith.constant 0 : index
      %78 = vector.load %arg6[%c0_60, %c0_61] : memref<1x64xf32, #tpu.memory_space<vmem>>, vector<1x64xf32>
      %79 = vector.broadcast %78 : vector<1x64xf32> to vector<392x64xf32>
      %80 = arith.addf %77, %79 : vector<392x64xf32>
      %cst_62 = arith.constant 0.000000e+00 : f32
      %81 = vector.broadcast %cst_62 : f32 to vector<392x64xf32>
      %82 = arith.cmpf oge, %80, %81 : vector<392x64xf32>
      %cst_63 = arith.constant 0.00999999977 : f32
      %83 = vector.broadcast %cst_63 : f32 to vector<392x64xf32>
      %84 = arith.mulf %83, %80 : vector<392x64xf32>
      %85 = arith.select %82, %80, %84 : vector<392x64xi1>, vector<392x64xf32>
      %c0_64 = arith.constant 0 : index
      %c0_65 = arith.constant 0 : index
      %86 = vector.load %arg7[%c0_64, %c0_65] : memref<64x128xf32, #tpu.memory_space<vmem>>, vector<64x128xf32>
      %cst_66 = arith.constant dense<0.000000e+00> : vector<392x128xf32>
      %87 = tpu.matmul %85, %86, %cst_66 {dimension_numbers = #tpu.dot_dimension_numbers<[1], [0], [0], [1], [0, 0, 1, 1], [], []>} : vector<392x64xf32>, vector<64x128xf32>, vector<392x128xf32> -> vector<392x128xf32>
      %c0_67 = arith.constant 0 : index
      %c0_68 = arith.constant 0 : index
      %88 = vector.load %arg8[%c0_67, %c0_68] : memref<1x128xf32, #tpu.memory_space<vmem>>, vector<1x128xf32>
      %89 = vector.broadcast %88 : vector<1x128xf32> to vector<392x128xf32>
      %90 = arith.addf %87, %89 : vector<392x128xf32>
      %91 = arith.maximumf %68, %90 : vector<392x128xf32>
      %c3 = arith.constant 3 : index
      %c0_69 = arith.constant 0 : index
      %c0_70 = arith.constant 0 : index
      %92 = vector.load %arg3[%c3, %c0_69, %c0_70] : memref<4x16x64xf32, #tpu.memory_space<vmem>>, vector<1x16x64xf32>
      %93 = vector.shape_cast %92 : vector<1x16x64xf32> to vector<16x64xf32>
      %cst_71 = arith.constant dense<0.000000e+00> : vector<392x64xf32>
      %94 = tpu.matmul %23, %93, %cst_71 {dimension_numbers = #tpu.dot_dimension_numbers<[1], [0], [0], [1], [0, 0, 1, 1], [], []>} : vector<392x16xf32>, vector<16x64xf32>, vector<392x64xf32> -> vector<392x64xf32>
      %c0_72 = arith.constant 0 : index
      %c0_73 = arith.constant 0 : index
      %95 = vector.load %arg4[%c0_72, %c0_73] : memref<1x64xf32, #tpu.memory_space<vmem>>, vector<1x64xf32>
      %96 = vector.broadcast %95 : vector<1x64xf32> to vector<392x64xf32>
      %97 = arith.addf %94, %96 : vector<392x64xf32>
      %c0_74 = arith.constant 0 : index
      %c0_75 = arith.constant 0 : index
      %98 = vector.load %arg5[%c0_74, %c0_75] : memref<1x64xf32, #tpu.memory_space<vmem>>, vector<1x64xf32>
      %99 = vector.broadcast %98 : vector<1x64xf32> to vector<392x64xf32>
      %100 = arith.mulf %97, %99 : vector<392x64xf32>
      %c0_76 = arith.constant 0 : index
      %c0_77 = arith.constant 0 : index
      %101 = vector.load %arg6[%c0_76, %c0_77] : memref<1x64xf32, #tpu.memory_space<vmem>>, vector<1x64xf32>
      %102 = vector.broadcast %101 : vector<1x64xf32> to vector<392x64xf32>
      %103 = arith.addf %100, %102 : vector<392x64xf32>
      %cst_78 = arith.constant 0.000000e+00 : f32
      %104 = vector.broadcast %cst_78 : f32 to vector<392x64xf32>
      %105 = arith.cmpf oge, %103, %104 : vector<392x64xf32>
      %cst_79 = arith.constant 0.00999999977 : f32
      %106 = vector.broadcast %cst_79 : f32 to vector<392x64xf32>
      %107 = arith.mulf %106, %103 : vector<392x64xf32>
      %108 = arith.select %105, %103, %107 : vector<392x64xi1>, vector<392x64xf32>
      %c0_80 = arith.constant 0 : index
      %c0_81 = arith.constant 0 : index
      %109 = vector.load %arg7[%c0_80, %c0_81] : memref<64x128xf32, #tpu.memory_space<vmem>>, vector<64x128xf32>
      %cst_82 = arith.constant dense<0.000000e+00> : vector<392x128xf32>
      %110 = tpu.matmul %108, %109, %cst_82 {dimension_numbers = #tpu.dot_dimension_numbers<[1], [0], [0], [1], [0, 0, 1, 1], [], []>} : vector<392x64xf32>, vector<64x128xf32>, vector<392x128xf32> -> vector<392x128xf32>
      %c0_83 = arith.constant 0 : index
      %c0_84 = arith.constant 0 : index
      %111 = vector.load %arg8[%c0_83, %c0_84] : memref<1x128xf32, #tpu.memory_space<vmem>>, vector<1x128xf32>
      %112 = vector.broadcast %111 : vector<1x128xf32> to vector<392x128xf32>
      %113 = arith.addf %110, %112 : vector<392x128xf32>
      %114 = arith.maximumf %91, %113 : vector<392x128xf32>
      %cst_85 = arith.constant 0.000000e+00 : f32
      %115 = vector.broadcast %cst_85 : f32 to vector<392x128xf32>
      %116 = arith.cmpf oge, %114, %115 : vector<392x128xf32>
      %cst_86 = arith.constant 0.00999999977 : f32
      %117 = vector.broadcast %cst_86 : f32 to vector<392x128xf32>
      %118 = arith.mulf %117, %114 : vector<392x128xf32>
      %119 = arith.select %116, %114, %118 : vector<392x128xi1>, vector<392x128xf32>
      %120 = vector.extract_strided_slice %119 {offsets = [0, 0], sizes = [8, 128], strides = [1, 1]} : vector<392x128xf32> to vector<8x128xf32>
      %121 = arith.truncf %120 : vector<8x128xf32> to vector<8x128xbf16>
      %c0_87 = arith.constant 0 : index
      %c0_88 = arith.constant 0 : index
      %122 = vector.load %arg14[%c0_87, %c0_88] : memref<8x6272xbf16, #tpu.memory_space<vmem>>, vector<8x128xbf16>
      tpu.vector_store %arg14[%c0_87, %c0_88], %121 {strides = array<i32>} : memref<8x6272xbf16, #tpu.memory_space<vmem>>, vector<8x128xbf16>,
      %123 = vector.extract_strided_slice %119 {offsets = [8, 0], sizes = [8, 128], strides = [1, 1]} : vector<392x128xf32> to vector<8x128xf32>
      %124 = arith.truncf %123 : vector<8x128xf32> to vector<8x128xbf16>
      %c0_89 = arith.constant 0 : index
      %c128 = arith.constant 128 : index
      %125 = vector.load %arg14[%c0_89, %c128] : memref<8x6272xbf16, #tpu.memory_space<vmem>>, vector<8x128xbf16>
      tpu.vector_store %arg14[%c0_89, %c128], %124 {strides = array<i32>} : memref<8x6272xbf16, #tpu.memory_space<vmem>>, vector<8x128xbf16>,
      %126 = vector.extract_strided_slice %119 {offsets = [16, 0], sizes = [8, 128], strides = [1, 1]} : vector<392x128xf32> to vector<8x128xf32>
      %127 = arith.truncf %126 : vector<8x128xf32> to vector<8x128xbf16>
      %c0_90 = arith.constant 0 : index
      %c256 = arith.constant 256 : index
      %128 = vector.load %arg14[%c0_90, %c256] : memref<8x6272xbf16, #tpu.memory_space<vmem>>, vector<8x128xbf16>
      tpu.vector_store %arg14[%c0_90, %c256], %127 {strides = array<i32>} : memref<8x6272xbf16, #tpu.memory_space<vmem>>, vector<8x128xbf16>,
      %129 = vector.extract_strided_slice %119 {offsets = [24, 0], sizes = [8, 128], strides = [1, 1]} : vector<392x128xf32> to vector<8x128xf32>
      %130 = arith.truncf %129 : vector<8x128xf32> to vector<8x128xbf16>
      %c0_91 = arith.constant 0 : index
      %c384 = arith.constant 384 : index
      %131 = vector.load %arg14[%c0_91, %c384] : memref<8x6272xbf16, #tpu.memory_space<vmem>>, vector<8x128xbf16>
      tpu.vector_store %arg14[%c0_91, %c384], %130 {strides = array<i32>} : memref<8x6272xbf16, #tpu.memory_space<vmem>>, vector<8x128xbf16>,
      %132 = vector.extract_strided_slice %119 {offsets = [32, 0], sizes = [8, 128], strides = [1, 1]} : vector<392x128xf32> to vector<8x128xf32>
      %133 = arith.truncf %132 : vector<8x128xf32> to vector<8x128xbf16>
      %c0_92 = arith.constant 0 : index
      %c512 = arith.constant 512 : index
      %134 = vector.load %arg14[%c0_92, %c512] : memref<8x6272xbf16, #tpu.memory_space<vmem>>, vector<8x128xbf16>
      tpu.vector_store %arg14[%c0_92, %c512], %133 {strides = array<i32>} : memref<8x6272xbf16, #tpu.memory_space<vmem>>, vector<8x128xbf16>,
      %135 = vector.extract_strided_slice %119 {offsets = [40, 0], sizes = [8, 128], strides = [1, 1]} : vector<392x128xf32> to vector<8x128xf32>
      %136 = arith.truncf %135 : vector<8x128xf32> to vector<8x128xbf16>
      %c0_93 = arith.constant 0 : index
      %c640 = arith.constant 640 : index
      %137 = vector.load %arg14[%c0_93, %c640] : memref<8x6272xbf16, #tpu.memory_space<vmem>>, vector<8x128xbf16>
      tpu.vector_store %arg14[%c0_93, %c640], %136 {strides = array<i32>} : memref<8x6272xbf16, #tpu.memory_space<vmem>>, vector<8x128xbf16>,
      %138 = vector.extract_strided_slice %119 {offsets = [48, 0], sizes = [8, 128], strides = [1, 1]} : vector<392x128xf32> to vector<8x128xf32>
      %139 = arith.truncf %138 : vector<8x128xf32> to vector<8x128xbf16>
      %c0_94 = arith.constant 0 : index
      %c768 = arith.constant 768 : index
      %140 = vector.load %arg14[%c0_94, %c768] : memref<8x6272xbf16, #tpu.memory_space<vmem>>, vector<8x128xbf16>
      tpu.vector_store %arg14[%c0_94, %c768], %139 {strides = array<i32>} : memref<8x6272xbf16, #tpu.memory_space<vmem>>, vector<8x128xbf16>,
      %141 = vector.extract_strided_slice %119 {offsets = [56, 0], sizes = [8, 128], strides = [1, 1]} : vector<392x128xf32> to vector<8x128xf32>
      %142 = arith.truncf %141 : vector<8x128xf32> to vector<8x128xbf16>
      %c0_95 = arith.constant 0 : index
      %c896 = arith.constant 896 : index
      %143 = vector.load %arg14[%c0_95, %c896] : memref<8x6272xbf16, #tpu.memory_space<vmem>>, vector<8x128xbf16>
      tpu.vector_store %arg14[%c0_95, %c896], %142 {strides = array<i32>} : memref<8x6272xbf16, #tpu.memory_space<vmem>>, vector<8x128xbf16>,
      %144 = vector.extract_strided_slice %119 {offsets = [64, 0], sizes = [8, 128], strides = [1, 1]} : vector<392x128xf32> to vector<8x128xf32>
      %145 = arith.truncf %144 : vector<8x128xf32> to vector<8x128xbf16>
      %c0_96 = arith.constant 0 : index
      %c1024 = arith.constant 1024 : index
      %146 = vector.load %arg14[%c0_96, %c1024] : memref<8x6272xbf16, #tpu.memory_space<vmem>>, vector<8x128xbf16>
      tpu.vector_store %arg14[%c0_96, %c1024], %145 {strides = array<i32>} : memref<8x6272xbf16, #tpu.memory_space<vmem>>, vector<8x128xbf16>,
      %147 = vector.extract_strided_slice %119 {offsets = [72, 0], sizes = [8, 128], strides = [1, 1]} : vector<392x128xf32> to vector<8x128xf32>
      %148 = arith.truncf %147 : vector<8x128xf32> to vector<8x128xbf16>
      %c0_97 = arith.constant 0 : index
      %c1152 = arith.constant 1152 : index
      %149 = vector.load %arg14[%c0_97, %c1152] : memref<8x6272xbf16, #tpu.memory_space<vmem>>, vector<8x128xbf16>
      tpu.vector_store %arg14[%c0_97, %c1152], %148 {strides = array<i32>} : memref<8x6272xbf16, #tpu.memory_space<vmem>>, vector<8x128xbf16>,
      %150 = vector.extract_strided_slice %119 {offsets = [80, 0], sizes = [8, 128], strides = [1, 1]} : vector<392x128xf32> to vector<8x128xf32>
      %151 = arith.truncf %150 : vector<8x128xf32> to vector<8x128xbf16>
      %c0_98 = arith.constant 0 : index
      %c1280 = arith.constant 1280 : index
      %152 = vector.load %arg14[%c0_98, %c1280] : memref<8x6272xbf16, #tpu.memory_space<vmem>>, vector<8x128xbf16>
      tpu.vector_store %arg14[%c0_98, %c1280], %151 {strides = array<i32>} : memref<8x6272xbf16, #tpu.memory_space<vmem>>, vector<8x128xbf16>,
      %153 = vector.extract_strided_slice %119 {offsets = [88, 0], sizes = [8, 128], strides = [1, 1]} : vector<392x128xf32> to vector<8x128xf32>
      %154 = arith.truncf %153 : vector<8x128xf32> to vector<8x128xbf16>
      %c0_99 = arith.constant 0 : index
      %c1408 = arith.constant 1408 : index
      %155 = vector.load %arg14[%c0_99, %c1408] : memref<8x6272xbf16, #tpu.memory_space<vmem>>, vector<8x128xbf16>
      tpu.vector_store %arg14[%c0_99, %c1408], %154 {strides = array<i32>} : memref<8x6272xbf16, #tpu.memory_space<vmem>>, vector<8x128xbf16>,
      %156 = vector.extract_strided_slice %119 {offsets = [96, 0], sizes = [8, 128], strides = [1, 1]} : vector<392x128xf32> to vector<8x128xf32>
      %157 = arith.truncf %156 : vector<8x128xf32> to vector<8x128xbf16>
      %c0_100 = arith.constant 0 : index
      %c1536 = arith.constant 1536 : index
      %158 = vector.load %arg14[%c0_100, %c1536] : memref<8x6272xbf16, #tpu.memory_space<vmem>>, vector<8x128xbf16>
      tpu.vector_store %arg14[%c0_100, %c1536], %157 {strides = array<i32>} : memref<8x6272xbf16, #tpu.memory_space<vmem>>, vector<8x128xbf16>,
      %159 = vector.extract_strided_slice %119 {offsets = [104, 0], sizes = [8, 128], strides = [1, 1]} : vector<392x128xf32> to vector<8x128xf32>
      %160 = arith.truncf %159 : vector<8x128xf32> to vector<8x128xbf16>
      %c0_101 = arith.constant 0 : index
      %c1664 = arith.constant 1664 : index
      %161 = vector.load %arg14[%c0_101, %c1664] : memref<8x6272xbf16, #tpu.memory_space<vmem>>, vector<8x128xbf16>
      tpu.vector_store %arg14[%c0_101, %c1664], %160 {strides = array<i32>} : memref<8x6272xbf16, #tpu.memory_space<vmem>>, vector<8x128xbf16>,
      %162 = vector.extract_strided_slice %119 {offsets = [112, 0], sizes = [8, 128], strides = [1, 1]} : vector<392x128xf32> to vector<8x128xf32>
      %163 = arith.truncf %162 : vector<8x128xf32> to vector<8x128xbf16>
      %c0_102 = arith.constant 0 : index
      %c1792 = arith.constant 1792 : index
      %164 = vector.load %arg14[%c0_102, %c1792] : memref<8x6272xbf16, #tpu.memory_space<vmem>>, vector<8x128xbf16>
      tpu.vector_store %arg14[%c0_102, %c1792], %163 {strides = array<i32>} : memref<8x6272xbf16, #tpu.memory_space<vmem>>, vector<8x128xbf16>,
      %165 = vector.extract_strided_slice %119 {offsets = [120, 0], sizes = [8, 128], strides = [1, 1]} : vector<392x128xf32> to vector<8x128xf32>
      %166 = arith.truncf %165 : vector<8x128xf32> to vector<8x128xbf16>
      %c0_103 = arith.constant 0 : index
      %c1920 = arith.constant 1920 : index
      %167 = vector.load %arg14[%c0_103, %c1920] : memref<8x6272xbf16, #tpu.memory_space<vmem>>, vector<8x128xbf16>
      tpu.vector_store %arg14[%c0_103, %c1920], %166 {strides = array<i32>} : memref<8x6272xbf16, #tpu.memory_space<vmem>>, vector<8x128xbf16>,
      %168 = vector.extract_strided_slice %119 {offsets = [128, 0], sizes = [8, 128], strides = [1, 1]} : vector<392x128xf32> to vector<8x128xf32>
      %169 = arith.truncf %168 : vector<8x128xf32> to vector<8x128xbf16>
      %c0_104 = arith.constant 0 : index
      %c2048 = arith.constant 2048 : index
      %170 = vector.load %arg14[%c0_104, %c2048] : memref<8x6272xbf16, #tpu.memory_space<vmem>>, vector<8x128xbf16>
      tpu.vector_store %arg14[%c0_104, %c2048], %169 {strides = array<i32>} : memref<8x6272xbf16, #tpu.memory_space<vmem>>, vector<8x128xbf16>,
      %171 = vector.extract_strided_slice %119 {offsets = [136, 0], sizes = [8, 128], strides = [1, 1]} : vector<392x128xf32> to vector<8x128xf32>
      %172 = arith.truncf %171 : vector<8x128xf32> to vector<8x128xbf16>
      %c0_105 = arith.constant 0 : index
      %c2176 = arith.constant 2176 : index
      %173 = vector.load %arg14[%c0_105, %c2176] : memref<8x6272xbf16, #tpu.memory_space<vmem>>, vector<8x128xbf16>
      tpu.vector_store %arg14[%c0_105, %c2176], %172 {strides = array<i32>} : memref<8x6272xbf16, #tpu.memory_space<vmem>>, vector<8x128xbf16>,
      %174 = vector.extract_strided_slice %119 {offsets = [144, 0], sizes = [8, 128], strides = [1, 1]} : vector<392x128xf32> to vector<8x128xf32>
      %175 = arith.truncf %174 : vector<8x128xf32> to vector<8x128xbf16>
      %c0_106 = arith.constant 0 : index
      %c2304 = arith.constant 2304 : index
      %176 = vector.load %arg14[%c0_106, %c2304] : memref<8x6272xbf16, #tpu.memory_space<vmem>>, vector<8x128xbf16>
      tpu.vector_store %arg14[%c0_106, %c2304], %175 {strides = array<i32>} : memref<8x6272xbf16, #tpu.memory_space<vmem>>, vector<8x128xbf16>,
      %177 = vector.extract_strided_slice %119 {offsets = [152, 0], sizes = [8, 128], strides = [1, 1]} : vector<392x128xf32> to vector<8x128xf32>
      %178 = arith.truncf %177 : vector<8x128xf32> to vector<8x128xbf16>
      %c0_107 = arith.constant 0 : index
      %c2432 = arith.constant 2432 : index
      %179 = vector.load %arg14[%c0_107, %c2432] : memref<8x6272xbf16, #tpu.memory_space<vmem>>, vector<8x128xbf16>
      tpu.vector_store %arg14[%c0_107, %c2432], %178 {strides = array<i32>} : memref<8x6272xbf16, #tpu.memory_space<vmem>>, vector<8x128xbf16>,
      %180 = vector.extract_strided_slice %119 {offsets = [160, 0], sizes = [8, 128], strides = [1, 1]} : vector<392x128xf32> to vector<8x128xf32>
      %181 = arith.truncf %180 : vector<8x128xf32> to vector<8x128xbf16>
      %c0_108 = arith.constant 0 : index
      %c2560 = arith.constant 2560 : index
      %182 = vector.load %arg14[%c0_108, %c2560] : memref<8x6272xbf16, #tpu.memory_space<vmem>>, vector<8x128xbf16>
      tpu.vector_store %arg14[%c0_108, %c2560], %181 {strides = array<i32>} : memref<8x6272xbf16, #tpu.memory_space<vmem>>, vector<8x128xbf16>,
      %183 = vector.extract_strided_slice %119 {offsets = [168, 0], sizes = [8, 128], strides = [1, 1]} : vector<392x128xf32> to vector<8x128xf32>
      %184 = arith.truncf %183 : vector<8x128xf32> to vector<8x128xbf16>
      %c0_109 = arith.constant 0 : index
      %c2688 = arith.constant 2688 : index
      %185 = vector.load %arg14[%c0_109, %c2688] : memref<8x6272xbf16, #tpu.memory_space<vmem>>, vector<8x128xbf16>
      tpu.vector_store %arg14[%c0_109, %c2688], %184 {strides = array<i32>} : memref<8x6272xbf16, #tpu.memory_space<vmem>>, vector<8x128xbf16>,
      %186 = vector.extract_strided_slice %119 {offsets = [176, 0], sizes = [8, 128], strides = [1, 1]} : vector<392x128xf32> to vector<8x128xf32>
      %187 = arith.truncf %186 : vector<8x128xf32> to vector<8x128xbf16>
      %c0_110 = arith.constant 0 : index
      %c2816 = arith.constant 2816 : index
      %188 = vector.load %arg14[%c0_110, %c2816] : memref<8x6272xbf16, #tpu.memory_space<vmem>>, vector<8x128xbf16>
      tpu.vector_store %arg14[%c0_110, %c2816], %187 {strides = array<i32>} : memref<8x6272xbf16, #tpu.memory_space<vmem>>, vector<8x128xbf16>,
      %189 = vector.extract_strided_slice %119 {offsets = [184, 0], sizes = [8, 128], strides = [1, 1]} : vector<392x128xf32> to vector<8x128xf32>
      %190 = arith.truncf %189 : vector<8x128xf32> to vector<8x128xbf16>
      %c0_111 = arith.constant 0 : index
      %c2944 = arith.constant 2944 : index
      %191 = vector.load %arg14[%c0_111, %c2944] : memref<8x6272xbf16, #tpu.memory_space<vmem>>, vector<8x128xbf16>
      tpu.vector_store %arg14[%c0_111, %c2944], %190 {strides = array<i32>} : memref<8x6272xbf16, #tpu.memory_space<vmem>>, vector<8x128xbf16>,
      %192 = vector.extract_strided_slice %119 {offsets = [192, 0], sizes = [8, 128], strides = [1, 1]} : vector<392x128xf32> to vector<8x128xf32>
      %193 = arith.truncf %192 : vector<8x128xf32> to vector<8x128xbf16>
      %c0_112 = arith.constant 0 : index
      %c3072 = arith.constant 3072 : index
      %194 = vector.load %arg14[%c0_112, %c3072] : memref<8x6272xbf16, #tpu.memory_space<vmem>>, vector<8x128xbf16>
      tpu.vector_store %arg14[%c0_112, %c3072], %193 {strides = array<i32>} : memref<8x6272xbf16, #tpu.memory_space<vmem>>, vector<8x128xbf16>,
      %195 = vector.extract_strided_slice %119 {offsets = [200, 0], sizes = [8, 128], strides = [1, 1]} : vector<392x128xf32> to vector<8x128xf32>
      %196 = arith.truncf %195 : vector<8x128xf32> to vector<8x128xbf16>
      %c0_113 = arith.constant 0 : index
      %c3200 = arith.constant 3200 : index
      %197 = vector.load %arg14[%c0_113, %c3200] : memref<8x6272xbf16, #tpu.memory_space<vmem>>, vector<8x128xbf16>
      tpu.vector_store %arg14[%c0_113, %c3200], %196 {strides = array<i32>} : memref<8x6272xbf16, #tpu.memory_space<vmem>>, vector<8x128xbf16>,
      %198 = vector.extract_strided_slice %119 {offsets = [208, 0], sizes = [8, 128], strides = [1, 1]} : vector<392x128xf32> to vector<8x128xf32>
      %199 = arith.truncf %198 : vector<8x128xf32> to vector<8x128xbf16>
      %c0_114 = arith.constant 0 : index
      %c3328 = arith.constant 3328 : index
      %200 = vector.load %arg14[%c0_114, %c3328] : memref<8x6272xbf16, #tpu.memory_space<vmem>>, vector<8x128xbf16>
      tpu.vector_store %arg14[%c0_114, %c3328], %199 {strides = array<i32>} : memref<8x6272xbf16, #tpu.memory_space<vmem>>, vector<8x128xbf16>,
      %201 = vector.extract_strided_slice %119 {offsets = [216, 0], sizes = [8, 128], strides = [1, 1]} : vector<392x128xf32> to vector<8x128xf32>
      %202 = arith.truncf %201 : vector<8x128xf32> to vector<8x128xbf16>
      %c0_115 = arith.constant 0 : index
      %c3456 = arith.constant 3456 : index
      %203 = vector.load %arg14[%c0_115, %c3456] : memref<8x6272xbf16, #tpu.memory_space<vmem>>, vector<8x128xbf16>
      tpu.vector_store %arg14[%c0_115, %c3456], %202 {strides = array<i32>} : memref<8x6272xbf16, #tpu.memory_space<vmem>>, vector<8x128xbf16>,
      %204 = vector.extract_strided_slice %119 {offsets = [224, 0], sizes = [8, 128], strides = [1, 1]} : vector<392x128xf32> to vector<8x128xf32>
      %205 = arith.truncf %204 : vector<8x128xf32> to vector<8x128xbf16>
      %c0_116 = arith.constant 0 : index
      %c3584 = arith.constant 3584 : index
      %206 = vector.load %arg14[%c0_116, %c3584] : memref<8x6272xbf16, #tpu.memory_space<vmem>>, vector<8x128xbf16>
      tpu.vector_store %arg14[%c0_116, %c3584], %205 {strides = array<i32>} : memref<8x6272xbf16, #tpu.memory_space<vmem>>, vector<8x128xbf16>,
      %207 = vector.extract_strided_slice %119 {offsets = [232, 0], sizes = [8, 128], strides = [1, 1]} : vector<392x128xf32> to vector<8x128xf32>
      %208 = arith.truncf %207 : vector<8x128xf32> to vector<8x128xbf16>
      %c0_117 = arith.constant 0 : index
      %c3712 = arith.constant 3712 : index
      %209 = vector.load %arg14[%c0_117, %c3712] : memref<8x6272xbf16, #tpu.memory_space<vmem>>, vector<8x128xbf16>
      tpu.vector_store %arg14[%c0_117, %c3712], %208 {strides = array<i32>} : memref<8x6272xbf16, #tpu.memory_space<vmem>>, vector<8x128xbf16>,
      %210 = vector.extract_strided_slice %119 {offsets = [240, 0], sizes = [8, 128], strides = [1, 1]} : vector<392x128xf32> to vector<8x128xf32>
      %211 = arith.truncf %210 : vector<8x128xf32> to vector<8x128xbf16>
      %c0_118 = arith.constant 0 : index
      %c3840 = arith.constant 3840 : index
      %212 = vector.load %arg14[%c0_118, %c3840] : memref<8x6272xbf16, #tpu.memory_space<vmem>>, vector<8x128xbf16>
      tpu.vector_store %arg14[%c0_118, %c3840], %211 {strides = array<i32>} : memref<8x6272xbf16, #tpu.memory_space<vmem>>, vector<8x128xbf16>,
      %213 = vector.extract_strided_slice %119 {offsets = [248, 0], sizes = [8, 128], strides = [1, 1]} : vector<392x128xf32> to vector<8x128xf32>
      %214 = arith.truncf %213 : vector<8x128xf32> to vector<8x128xbf16>
      %c0_119 = arith.constant 0 : index
      %c3968 = arith.constant 3968 : index
      %215 = vector.load %arg14[%c0_119, %c3968] : memref<8x6272xbf16, #tpu.memory_space<vmem>>, vector<8x128xbf16>
      tpu.vector_store %arg14[%c0_119, %c3968], %214 {strides = array<i32>} : memref<8x6272xbf16, #tpu.memory_space<vmem>>, vector<8x128xbf16>,
      %216 = vector.extract_strided_slice %119 {offsets = [256, 0], sizes = [8, 128], strides = [1, 1]} : vector<392x128xf32> to vector<8x128xf32>
      %217 = arith.truncf %216 : vector<8x128xf32> to vector<8x128xbf16>
      %c0_120 = arith.constant 0 : index
      %c4096 = arith.constant 4096 : index
      %218 = vector.load %arg14[%c0_120, %c4096] : memref<8x6272xbf16, #tpu.memory_space<vmem>>, vector<8x128xbf16>
      tpu.vector_store %arg14[%c0_120, %c4096], %217 {strides = array<i32>} : memref<8x6272xbf16, #tpu.memory_space<vmem>>, vector<8x128xbf16>,
      %219 = vector.extract_strided_slice %119 {offsets = [264, 0], sizes = [8, 128], strides = [1, 1]} : vector<392x128xf32> to vector<8x128xf32>
      %220 = arith.truncf %219 : vector<8x128xf32> to vector<8x128xbf16>
      %c0_121 = arith.constant 0 : index
      %c4224 = arith.constant 4224 : index
      %221 = vector.load %arg14[%c0_121, %c4224] : memref<8x6272xbf16, #tpu.memory_space<vmem>>, vector<8x128xbf16>
      tpu.vector_store %arg14[%c0_121, %c4224], %220 {strides = array<i32>} : memref<8x6272xbf16, #tpu.memory_space<vmem>>, vector<8x128xbf16>,
      %222 = vector.extract_strided_slice %119 {offsets = [272, 0], sizes = [8, 128], strides = [1, 1]} : vector<392x128xf32> to vector<8x128xf32>
      %223 = arith.truncf %222 : vector<8x128xf32> to vector<8x128xbf16>
      %c0_122 = arith.constant 0 : index
      %c4352 = arith.constant 4352 : index
      %224 = vector.load %arg14[%c0_122, %c4352] : memref<8x6272xbf16, #tpu.memory_space<vmem>>, vector<8x128xbf16>
      tpu.vector_store %arg14[%c0_122, %c4352], %223 {strides = array<i32>} : memref<8x6272xbf16, #tpu.memory_space<vmem>>, vector<8x128xbf16>,
      %225 = vector.extract_strided_slice %119 {offsets = [280, 0], sizes = [8, 128], strides = [1, 1]} : vector<392x128xf32> to vector<8x128xf32>
      %226 = arith.truncf %225 : vector<8x128xf32> to vector<8x128xbf16>
      %c0_123 = arith.constant 0 : index
      %c4480 = arith.constant 4480 : index
      %227 = vector.load %arg14[%c0_123, %c4480] : memref<8x6272xbf16, #tpu.memory_space<vmem>>, vector<8x128xbf16>
      tpu.vector_store %arg14[%c0_123, %c4480], %226 {strides = array<i32>} : memref<8x6272xbf16, #tpu.memory_space<vmem>>, vector<8x128xbf16>,
      %228 = vector.extract_strided_slice %119 {offsets = [288, 0], sizes = [8, 128], strides = [1, 1]} : vector<392x128xf32> to vector<8x128xf32>
      %229 = arith.truncf %228 : vector<8x128xf32> to vector<8x128xbf16>
      %c0_124 = arith.constant 0 : index
      %c4608 = arith.constant 4608 : index
      %230 = vector.load %arg14[%c0_124, %c4608] : memref<8x6272xbf16, #tpu.memory_space<vmem>>, vector<8x128xbf16>
      tpu.vector_store %arg14[%c0_124, %c4608], %229 {strides = array<i32>} : memref<8x6272xbf16, #tpu.memory_space<vmem>>, vector<8x128xbf16>,
      %231 = vector.extract_strided_slice %119 {offsets = [296, 0], sizes = [8, 128], strides = [1, 1]} : vector<392x128xf32> to vector<8x128xf32>
      %232 = arith.truncf %231 : vector<8x128xf32> to vector<8x128xbf16>
      %c0_125 = arith.constant 0 : index
      %c4736 = arith.constant 4736 : index
      %233 = vector.load %arg14[%c0_125, %c4736] : memref<8x6272xbf16, #tpu.memory_space<vmem>>, vector<8x128xbf16>
      tpu.vector_store %arg14[%c0_125, %c4736], %232 {strides = array<i32>} : memref<8x6272xbf16, #tpu.memory_space<vmem>>, vector<8x128xbf16>,
      %234 = vector.extract_strided_slice %119 {offsets = [304, 0], sizes = [8, 128], strides = [1, 1]} : vector<392x128xf32> to vector<8x128xf32>
      %235 = arith.truncf %234 : vector<8x128xf32> to vector<8x128xbf16>
      %c0_126 = arith.constant 0 : index
      %c4864 = arith.constant 4864 : index
      %236 = vector.load %arg14[%c0_126, %c4864] : memref<8x6272xbf16, #tpu.memory_space<vmem>>, vector<8x128xbf16>
      tpu.vector_store %arg14[%c0_126, %c4864], %235 {strides = array<i32>} : memref<8x6272xbf16, #tpu.memory_space<vmem>>, vector<8x128xbf16>,
      %237 = vector.extract_strided_slice %119 {offsets = [312, 0], sizes = [8, 128], strides = [1, 1]} : vector<392x128xf32> to vector<8x128xf32>
      %238 = arith.truncf %237 : vector<8x128xf32> to vector<8x128xbf16>
      %c0_127 = arith.constant 0 : index
      %c4992 = arith.constant 4992 : index
      %239 = vector.load %arg14[%c0_127, %c4992] : memref<8x6272xbf16, #tpu.memory_space<vmem>>, vector<8x128xbf16>
      tpu.vector_store %arg14[%c0_127, %c4992], %238 {strides = array<i32>} : memref<8x6272xbf16, #tpu.memory_space<vmem>>, vector<8x128xbf16>,
      %240 = vector.extract_strided_slice %119 {offsets = [320, 0], sizes = [8, 128], strides = [1, 1]} : vector<392x128xf32> to vector<8x128xf32>
      %241 = arith.truncf %240 : vector<8x128xf32> to vector<8x128xbf16>
      %c0_128 = arith.constant 0 : index
      %c5120 = arith.constant 5120 : index
      %242 = vector.load %arg14[%c0_128, %c5120] : memref<8x6272xbf16, #tpu.memory_space<vmem>>, vector<8x128xbf16>
      tpu.vector_store %arg14[%c0_128, %c5120], %241 {strides = array<i32>} : memref<8x6272xbf16, #tpu.memory_space<vmem>>, vector<8x128xbf16>,
      %243 = vector.extract_strided_slice %119 {offsets = [328, 0], sizes = [8, 128], strides = [1, 1]} : vector<392x128xf32> to vector<8x128xf32>
      %244 = arith.truncf %243 : vector<8x128xf32> to vector<8x128xbf16>
      %c0_129 = arith.constant 0 : index
      %c5248 = arith.constant 5248 : index
      %245 = vector.load %arg14[%c0_129, %c5248] : memref<8x6272xbf16, #tpu.memory_space<vmem>>, vector<8x128xbf16>
      tpu.vector_store %arg14[%c0_129, %c5248], %244 {strides = array<i32>} : memref<8x6272xbf16, #tpu.memory_space<vmem>>, vector<8x128xbf16>,
      %246 = vector.extract_strided_slice %119 {offsets = [336, 0], sizes = [8, 128], strides = [1, 1]} : vector<392x128xf32> to vector<8x128xf32>
      %247 = arith.truncf %246 : vector<8x128xf32> to vector<8x128xbf16>
      %c0_130 = arith.constant 0 : index
      %c5376 = arith.constant 5376 : index
      %248 = vector.load %arg14[%c0_130, %c5376] : memref<8x6272xbf16, #tpu.memory_space<vmem>>, vector<8x128xbf16>
      tpu.vector_store %arg14[%c0_130, %c5376], %247 {strides = array<i32>} : memref<8x6272xbf16, #tpu.memory_space<vmem>>, vector<8x128xbf16>,
      %249 = vector.extract_strided_slice %119 {offsets = [344, 0], sizes = [8, 128], strides = [1, 1]} : vector<392x128xf32> to vector<8x128xf32>
      %250 = arith.truncf %249 : vector<8x128xf32> to vector<8x128xbf16>
      %c0_131 = arith.constant 0 : index
      %c5504 = arith.constant 5504 : index
      %251 = vector.load %arg14[%c0_131, %c5504] : memref<8x6272xbf16, #tpu.memory_space<vmem>>, vector<8x128xbf16>
      tpu.vector_store %arg14[%c0_131, %c5504], %250 {strides = array<i32>} : memref<8x6272xbf16, #tpu.memory_space<vmem>>, vector<8x128xbf16>,
      %252 = vector.extract_strided_slice %119 {offsets = [352, 0], sizes = [8, 128], strides = [1, 1]} : vector<392x128xf32> to vector<8x128xf32>
      %253 = arith.truncf %252 : vector<8x128xf32> to vector<8x128xbf16>
      %c0_132 = arith.constant 0 : index
      %c5632 = arith.constant 5632 : index
      %254 = vector.load %arg14[%c0_132, %c5632] : memref<8x6272xbf16, #tpu.memory_space<vmem>>, vector<8x128xbf16>
      tpu.vector_store %arg14[%c0_132, %c5632], %253 {strides = array<i32>} : memref<8x6272xbf16, #tpu.memory_space<vmem>>, vector<8x128xbf16>,
      %255 = vector.extract_strided_slice %119 {offsets = [360, 0], sizes = [8, 128], strides = [1, 1]} : vector<392x128xf32> to vector<8x128xf32>
      %256 = arith.truncf %255 : vector<8x128xf32> to vector<8x128xbf16>
      %c0_133 = arith.constant 0 : index
      %c5760 = arith.constant 5760 : index
      %257 = vector.load %arg14[%c0_133, %c5760] : memref<8x6272xbf16, #tpu.memory_space<vmem>>, vector<8x128xbf16>
      tpu.vector_store %arg14[%c0_133, %c5760], %256 {strides = array<i32>} : memref<8x6272xbf16, #tpu.memory_space<vmem>>, vector<8x128xbf16>,
      %258 = vector.extract_strided_slice %119 {offsets = [368, 0], sizes = [8, 128], strides = [1, 1]} : vector<392x128xf32> to vector<8x128xf32>
      %259 = arith.truncf %258 : vector<8x128xf32> to vector<8x128xbf16>
      %c0_134 = arith.constant 0 : index
      %c5888 = arith.constant 5888 : index
      %260 = vector.load %arg14[%c0_134, %c5888] : memref<8x6272xbf16, #tpu.memory_space<vmem>>, vector<8x128xbf16>
      tpu.vector_store %arg14[%c0_134, %c5888], %259 {strides = array<i32>} : memref<8x6272xbf16, #tpu.memory_space<vmem>>, vector<8x128xbf16>,
      %261 = vector.extract_strided_slice %119 {offsets = [376, 0], sizes = [8, 128], strides = [1, 1]} : vector<392x128xf32> to vector<8x128xf32>
      %262 = arith.truncf %261 : vector<8x128xf32> to vector<8x128xbf16>
      %c0_135 = arith.constant 0 : index
      %c6016 = arith.constant 6016 : index
      %263 = vector.load %arg14[%c0_135, %c6016] : memref<8x6272xbf16, #tpu.memory_space<vmem>>, vector<8x128xbf16>
      tpu.vector_store %arg14[%c0_135, %c6016], %262 {strides = array<i32>} : memref<8x6272xbf16, #tpu.memory_space<vmem>>, vector<8x128xbf16>,
      %264 = vector.extract_strided_slice %119 {offsets = [384, 0], sizes = [8, 128], strides = [1, 1]} : vector<392x128xf32> to vector<8x128xf32>
      %265 = arith.truncf %264 : vector<8x128xf32> to vector<8x128xbf16>
      %c0_136 = arith.constant 0 : index
      %c6144 = arith.constant 6144 : index
      %266 = vector.load %arg14[%c0_136, %c6144] : memref<8x6272xbf16, #tpu.memory_space<vmem>>, vector<8x128xbf16>
      tpu.vector_store %arg14[%c0_136, %c6144], %265 {strides = array<i32>} : memref<8x6272xbf16, #tpu.memory_space<vmem>>, vector<8x128xbf16>,
      %cst_137 = arith.constant 0.000000e+00 : f32
      %267 = vector.broadcast %cst_137 : f32 to vector<8x2xf32>
      %c0_138 = arith.constant 0 : index
      %c0_139 = arith.constant 0 : index
      %c0_140 = arith.constant 0 : index
      %268 = vector.load %arg13[%c0_138, %c0_139, %c0_140] : memref<1x8x2xf32, #tpu.memory_space<vmem>>, vector<1x8x2xf32>
      %269 = vector.shape_cast %268 : vector<1x8x2xf32> to vector<8x2xf32>
      %270 = vector.shape_cast %267 : vector<8x2xf32> to vector<1x8x2xf32>
      tpu.vector_store %arg13[%c0_138, %c0_139, %c0_140], %270 {strides = array<i32>} : memref<1x8x2xf32, #tpu.memory_space<vmem>>, vector<1x8x2xf32>,
    } else {
    }
    %c0 = arith.constant 0 : index
    %c0_1 = arith.constant 0 : index
    %3 = vector.load %arg14[%c0, %c0_1] : memref<8x6272xbf16, #tpu.memory_space<vmem>>, vector<8x6272xbf16>
    %c0_2 = arith.constant 0 : index
    %c0_3 = arith.constant 0 : index
    %c0_4 = arith.constant 0 : index
    %4 = vector.load %arg9[%c0_2, %c0_3, %c0_4] : memref<1x6272x256xbf16, #tpu.memory_space<vmem>>, vector<1x6272x256xbf16>
    %5 = vector.shape_cast %4 : vector<1x6272x256xbf16> to vector<6272x256xbf16>
    %cst = arith.constant dense<0.000000e+00> : vector<8x256xf32>
    %6 = tpu.matmul %3, %5, %cst {dimension_numbers = #tpu.dot_dimension_numbers<[1], [0], [0], [1], [0, 0, 1, 1], [], []>} : vector<8x6272xbf16>, vector<6272x256xbf16>, vector<8x256xf32> -> vector<8x256xf32>
    %c0_5 = arith.constant 0 : index
    %c0_6 = arith.constant 0 : index
    %7 = vector.load %arg10[%c0_5, %c0_6] : memref<1x256xf32, #tpu.memory_space<vmem>>, vector<1x256xf32>
    %8 = vector.broadcast %7 : vector<1x256xf32> to vector<8x256xf32>
    %9 = arith.addf %6, %8 : vector<8x256xf32>
    %c0_7 = arith.constant 0 : index
    %c0_8 = arith.constant 0 : index
    %c0_9 = arith.constant 0 : index
    %10 = vector.load %arg13[%c0_7, %c0_8, %c0_9] : memref<1x8x2xf32, #tpu.memory_space<vmem>>, vector<1x8x2xf32>
    %11 = vector.shape_cast %10 : vector<1x8x2xf32> to vector<8x2xf32>
    %c0_10 = arith.constant 0 : index
    %c0_11 = arith.constant 0 : index
    %12 = vector.load %arg11[%c0_10, %c0_11] : memref<256x2xf32, #tpu.memory_space<vmem>>, vector<256x2xf32>
    %cst_12 = arith.constant dense<0.000000e+00> : vector<8x2xf32>
    %13 = tpu.matmul %9, %12, %cst_12 {dimension_numbers = #tpu.dot_dimension_numbers<[1], [0], [0], [1], [0, 0, 1, 1], [], []>} : vector<8x256xf32>, vector<256x2xf32>, vector<8x2xf32> -> vector<8x2xf32>
    %14 = arith.addf %11, %13 : vector<8x2xf32>
    %c0_13 = arith.constant 0 : index
    %c0_14 = arith.constant 0 : index
    %c0_15 = arith.constant 0 : index
    %15 = vector.load %arg13[%c0_13, %c0_14, %c0_15] : memref<1x8x2xf32, #tpu.memory_space<vmem>>, vector<1x8x2xf32>
    %16 = vector.shape_cast %15 : vector<1x8x2xf32> to vector<8x2xf32>
    %17 = vector.shape_cast %14 : vector<8x2xf32> to vector<1x8x2xf32>
    tpu.vector_store %arg13[%c0_13, %c0_14, %c0_15], %17 {strides = array<i32>} : memref<1x8x2xf32, #tpu.memory_space<vmem>>, vector<1x8x2xf32>,
    %c1_i32 = arith.constant 1 : i32
    %18 = arith.cmpi eq, %arg1, %c1_i32 : i32
    %c0_i32_16 = arith.constant 0 : i32
    %19 = arith.cmpi eq, %arg0, %c0_i32_16 : i32
    %20 = arith.andi %18, %19 : i1
    %21 = arith.extui %20 : i1 to i32
    %c0_i32_17 = arith.constant 0 : i32
    %22 = arith.cmpi ne, %21, %c0_i32_17 : i32
    scf.if %22 {
      %c0_18 = arith.constant 0 : index
      %c0_19 = arith.constant 0 : index
      %c0_20 = arith.constant 0 : index
      %23 = vector.load %arg13[%c0_18, %c0_19, %c0_20] : memref<1x8x2xf32, #tpu.memory_space<vmem>>, vector<1x8x2xf32>
      %24 = vector.shape_cast %23 : vector<1x8x2xf32> to vector<8x2xf32>
      %c0_21 = arith.constant 0 : index
      %c0_22 = arith.constant 0 : index
      %25 = vector.load %arg12[%c0_21, %c0_22] : memref<1x2xf32, #tpu.memory_space<vmem>>, vector<1x2xf32>
      %26 = vector.broadcast %25 : vector<1x2xf32> to vector<8x2xf32>
      %27 = arith.addf %24, %26 : vector<8x2xf32>
      %c0_23 = arith.constant 0 : index
      %c0_24 = arith.constant 0 : index
      %c0_25 = arith.constant 0 : index
      %28 = vector.load %arg13[%c0_23, %c0_24, %c0_25] : memref<1x8x2xf32, #tpu.memory_space<vmem>>, vector<1x8x2xf32>
      %29 = vector.shape_cast %28 : vector<1x8x2xf32> to vector<8x2xf32>
      %30 = vector.shape_cast %27 : vector<8x2xf32> to vector<1x8x2xf32>
      tpu.vector_store %arg13[%c0_23, %c0_24, %c0_25], %30 {strides = array<i32>} : memref<1x8x2xf32, #tpu.memory_space<vmem>>, vector<1x8x2xf32>,
    } else {
    }
    return
  }
  func.func @transform_0(%arg0: i32, %arg1: i32) -> (i32, i32) {
    %c0_i32 = arith.constant 0 : i32
    %c0_i32_0 = arith.constant 0 : i32
    %c0_i32_1 = arith.constant 0 : i32
    return %c0_i32, %c0_i32_0 : i32, i32
  }
  func.func @transform_1(%arg0: i32, %arg1: i32) -> (i32, i32, i32) {
    %c0_i32 = arith.constant 0 : i32
    %c0_i32_0 = arith.constant 0 : i32
    %c0_i32_1 = arith.constant 0 : i32
    %c0_i32_2 = arith.constant 0 : i32
    return %c0_i32, %c0_i32_0, %c0_i32_1 : i32, i32, i32
  }
  func.func @transform_2(%arg0: i32, %arg1: i32) -> (i32, i32) {
    %c0_i32 = arith.constant 0 : i32
    %c0_i32_0 = arith.constant 0 : i32
    %c0_i32_1 = arith.constant 0 : i32
    return %c0_i32, %c0_i32_0 : i32, i32
  }
  func.func @transform_3(%arg0: i32, %arg1: i32) -> (i32, i32) {
    %c0_i32 = arith.constant 0 : i32
    %c0_i32_0 = arith.constant 0 : i32
    %c0_i32_1 = arith.constant 0 : i32
    return %c0_i32, %c0_i32_0 : i32, i32
  }
  func.func @transform_4(%arg0: i32, %arg1: i32) -> (i32, i32) {
    %c0_i32 = arith.constant 0 : i32
    %c0_i32_0 = arith.constant 0 : i32
    %c0_i32_1 = arith.constant 0 : i32
    return %c0_i32, %c0_i32_0 : i32, i32
  }
  func.func @transform_5(%arg0: i32, %arg1: i32) -> (i32, i32) {
    %c0_i32 = arith.constant 0 : i32
    %c0_i32_0 = arith.constant 0 : i32
    %c0_i32_1 = arith.constant 0 : i32
    return %c0_i32, %c0_i32_0 : i32, i32
  }
  func.func @transform_6(%arg0: i32, %arg1: i32) -> (i32, i32) {
    %c0_i32 = arith.constant 0 : i32
    %c0_i32_0 = arith.constant 0 : i32
    %c0_i32_1 = arith.constant 0 : i32
    return %c0_i32, %c0_i32_0 : i32, i32
  }
  func.func @transform_7(%arg0: i32, %arg1: i32) -> (i32, i32, i32) {
    %c2_i32 = arith.constant 2 : i32
    %0 = arith.muli %arg0, %c2_i32 : i32
    %1 = arith.addi %0, %arg1 : i32
    %c0_i32 = arith.constant 0 : i32
    %c0_i32_0 = arith.constant 0 : i32
    %c0_i32_1 = arith.constant 0 : i32
    return %1, %c0_i32, %c0_i32_0 : i32, i32, i32
  }
  func.func @transform_8(%arg0: i32, %arg1: i32) -> (i32, i32) {
    %c2_i32 = arith.constant 2 : i32
    %0 = arith.muli %arg0, %c2_i32 : i32
    %1 = arith.addi %0, %arg1 : i32
    %c0_i32 = arith.constant 0 : i32
    %c0_i32_0 = arith.constant 0 : i32
    return %c0_i32, %1 : i32, i32
  }
  func.func @transform_9(%arg0: i32, %arg1: i32) -> (i32, i32) {
    %c2_i32 = arith.constant 2 : i32
    %0 = arith.muli %arg0, %c2_i32 : i32
    %1 = arith.addi %0, %arg1 : i32
    %c0_i32 = arith.constant 0 : i32
    %c0_i32_0 = arith.constant 0 : i32
    return %1, %c0_i32 : i32, i32
  }
  func.func @transform_10(%arg0: i32, %arg1: i32) -> (i32, i32) {
    %c0_i32 = arith.constant 0 : i32
    %c0_i32_0 = arith.constant 0 : i32
    %c0_i32_1 = arith.constant 0 : i32
    return %c0_i32, %c0_i32_0 : i32, i32
  }
  func.func @transform_11(%arg0: i32, %arg1: i32) -> (i32, i32, i32) {
    %c0_i32 = arith.constant 0 : i32
    %c0_i32_0 = arith.constant 0 : i32
    %c0_i32_1 = arith.constant 0 : i32
    return %arg0, %c0_i32, %c0_i32_0 : i32, i32, i32
  }
}

</mosaic_0001>

<bundles_post_ra>
// kernel: net_forward.1
= control target key start
LH: loop header
LB: loop body
LE: loop exit
PB: predicated region body
PF: predicated region fallthrough
CT: control target
= control target key end

     0   :  { %s21561_s0 = inlined_call_operand.vmem [shape: f32[392,16], index: 0, kind: input, shape index: {}]   ;;  %s21562_s1 = inlined_call_operand.hbm [shape: f32[4,16,64], index: 1, kind: input, shape index: {}]   ;;  %s21563_s2 = inlined_call_operand.hbm [shape: f32[1,64], index: 2, kind: input, shape index: {}]   ;;  %s21564_s3 = inlined_call_operand.hbm [shape: f32[1,64], index: 3, kind: input, shape index: {}]   ;;  %s21565_s4 = inlined_call_operand.hbm [shape: f32[1,64], index: 4, kind: input, shape index: {}]   ;;  %s21566_s5 = inlined_call_operand.hbm [shape: f32[64,128], index: 5, kind: input, shape index: {}]   ;;  %s21567_s6 = inlined_call_operand.hbm [shape: f32[1,128], index: 6, kind: input, shape index: {}]   ;;  %s21568_s7 = inlined_call_operand.hbm [shape: bf16[4,6272,256], index: 7, kind: input, shape index: {}]   ;;  %s21569_s8 = inlined_call_operand.hbm [shape: f32[1,1024], index: 8, kind: input, shape index: {}]   ;;  %s21570_s9 = inlined_call_operand.vmem [shape: f32[1024,2], index: 9, kind: input, shape index: {}]   ;;  %s21571_s10 = inlined_call_operand.hbm [shape: f32[1,2], index: 10, kind: input, shape index: {}]   ;;  %s21572_s11 = inlined_call_operand.vmem [shape: f32[2,8,2], index: 11, kind: output, shape index: {}]  }
   0x1   :  { %21653 = sst [smem:[#allocation81_spill]] %s21561_s0 }
   0x2   :  { %21654 = sst [smem:[#allocation82_spill]] %s21562_s1 }
   0x3   :  { %21655 = sst [smem:[#allocation83_spill]] %s21563_s2 }
   0x4   :  { %21656 = sst [smem:[#allocation84_spill]] %s21564_s3 }
   0x5   :  { %21657 = sst [smem:[#allocation85_spill]] %s21565_s4 }
   0x6   :  { %21658 = sst [smem:[#allocation86_spill]] %s21568_s7 }
   0x7   :  { %21659 = sst [smem:[#allocation87_spill]] %s21569_s8 }
   0x8   :  { %21660 = sst [smem:[#allocation88_spill]] %s21570_s9 }
   0x9   :  { %21661 = sst [smem:[#allocation89_spill]] %s21572_s11 }
   0xa   :  { %16 = vsyncpa [#allocation4], 0 }
   0xb   :  { %17 = vsyncpa [#allocation6], 0 }
   0xc   :  { %18 = vsyncpa [#allocation9], 0 }
   0xd   :  { %19 = vsyncpa [#allocation12], 0  ;;  %s16785_s17 = smov 0   ;;  %s16787_s18 = smov 0  }
   0xe   :  { %s16789_s19 = smov 0   ;;  %s16791_s20 = smov 0  }
   0xf   :  { %s16793_s21 = smov 0   ;;  %s16795_s22 = smov 0  }
  0x10   :  { %s16797_s23 = smov 0   ;;  %s16799_s24 = smov 0  }
  0x11 LB: > { %21662 = sst [smem:[#allocation22_spill]] %s16692_s20  ;;  %s21573_s25 = sadd.s32 4294967295, %s16708_s24   ;;  %s16708_s24 = sphi %s16799_s24, %s25_s24   ;;  %s16704_s23 = sphi %s16797_s23, %s21882_s23   ;;  %s16700_s22 = sphi %s16795_s22, %s21881_s22   ;;  %s16696_s21 = sphi %s16793_s21, %s21880_s21   ;;  %s16692_s20 = sphi %s16791_s20, %s21879_s20   ;;  %s16688_s19 = sphi %s16789_s19, %s21878_s19   ;;  %s16684_s18 = sphi %s16787_s18, %s21877_s18   ;;  %s16680_s17 = sphi %s16785_s17, %s21876_s17  }
  0x12   : > { %21663 = sst [smem:[#allocation23_spill]] %s16696_s21  ;;  %p11532_p0 = scmp.ge.s32.totalorder %s16708_s24, 1 }
  0x13   : > { %p16829_p1 = scmp.eq.s32.totalorder %s21573_s25, 0  ;;  %p326_p2 = scmp.lt.s32.totalorder %s16708_s24, 5 }
  0x14   : > { %s16710_s28 = smov [#allocation3]   ;;  %s16711_s12 = smov [#allocation5]  }
  0x15   : > { %s21664_s26 = scalar_select %p16829_p1, 1, 0 }
  0x16   : > { %p16834_p3 = pnand %p11532_p0, %p326_p2  ;;  %s341_s29 = sshll.u32 %s16710_s28, 4  ;;  %s16838_s29 = int_to_ptr.vmem [resolvable:$true] %s341_s29 }
  0x17   : > { %s355_s13 = sshll.u32 %s16711_s12, 4  ;;  %s16712_s14 = smov [#allocation7]   ;;  %s16848_s13 = int_to_ptr.vmem [resolvable:$true] %s355_s13 }
  0x18   : > { %s21665_s27 = scalar_select %p16834_p3, 1, 0 }
  0x19   : > { %p14891_p4 = pneg %p16834_p3  ;;  %s16850_s15 = sshll.u32 %s16712_s14, 4  ;;  %s367_s15 = int_to_ptr.vmem [resolvable:$true] %s16850_s15 }
  0x1a   : > { %21666 = sst [smem:[#allocation24_spill]] %s21665_s27  ;;  %s21668_s1 = sld [smem:[#allocation82_spill]] }
  0x1b   : > { %p16844_p5 = pnand %p14891_p4, %p16829_p1 }
  0x1d   : > { %s21667_s30 = scalar_select %p16844_p5, 1, 0 }
  0x1e   : > { %p16860_p7 = pneg %p16844_p5 }
  0x20   : > { %s16366_s28 = scalar_lea.hbm %s21668_s1, 1024 }
  0x21   : > { %p16367_p6 = scmp.ne.s32.totalorder %s21668_s1, %s16366_s28  ;;  %p16373_p10 = scmp.lt.u32.totalorder %s16366_s28, %s21668_s1 }
  0x23   : > { %p16369_p8 = pnand %p16860_p7, %p16367_p6 }
  0x25   : > { %p16370_p9 = pneg %p16369_p8 }
  0x27   : > { %p16375_p11 = pnand %p16373_p10, %p16370_p9 }
  0x29   : > { %16378 = shalt.err (!%p16375_p11)
}
  0x2a   : > { %s16379_s0 = scalar_lea.vmem %s16838_s29, 1024  ;;  %p16387_p2 = scmp.lt.s32.totalorder %s16838_s29, %s16838_s29 }
  0x2b   : > { %p16380_p12 = scmp.ne.s32.totalorder %s16838_s29, %s16379_s0  ;;  %p16388_p4 = scmp.lt.s32.totalorder %s16379_s0, %s16379_s0 }
  0x2d   : > { %p16382_p13 = pnand %p16380_p12, %p16860_p7  ;;  %p16389_p6 = por %p16388_p4, %p16387_p2 }
  0x2f   : > { %p16383_p0 = pneg %p16382_p13 }
  0x31   : > { %p16390_p8 = pnand %p16389_p6, %p16383_p0 }
  0x33   : > { %16393 = shalt.err (!%p16390_p8)
}
  0x34   : > { %s21582_s9 = smov 128   ;;  %s21584_s25 = smov 8  }
  0x35   : > { %14894 = dma.hbm_to_vmem [thread:$0]  (!%p16844_p5), %s21668_s1, 1024, %s16838_s29, [#allocation4], %s21582_s9, %s21582_s9, %s21584_s25  }
  0x36   : > { %s21670_s2 = sld [smem:[#allocation83_spill]] }
  0x3c   : > { %s16394_s0 = scalar_lea.hbm %s21670_s2, 16 }
  0x3d   : > { %p16395_p9 = scmp.ne.s32.totalorder %s21670_s2, %s16394_s0  ;;  %p16401_p12 = scmp.lt.u32.totalorder %s16394_s0, %s21670_s2 }
  0x3f   : > { %p16397_p10 = pnand %p16395_p9, %p16860_p7 }
  0x41   : > { %p16398_p11 = pneg %p16397_p10 }
  0x43   : > { %p16403_p13 = pnand %p16401_p12, %p16398_p11 }
  0x45   : > { %16406 = shalt.err (!%p16403_p13)
}
  0x46   : > { %s16407_s29 = scalar_lea.vmem %s16848_s13, 16  ;;  %s16414_s20 = scalar_lea.vmem %s16848_s13, 32 }
  0x47   : > { %p16408_p0 = scmp.ne.s32.totalorder %s16848_s13, %s16407_s29  ;;  %p16415_p6 = scmp.lt.s32.totalorder %s16848_s13, %s16848_s13 }
  0x48   : > { %p16416_p8 = scmp.lt.s32.totalorder %s16414_s20, %s16407_s29 }
  0x49   : > { %p16410_p2 = pnand %p16408_p0, %p16860_p7 }
  0x4a   : > { %p16417_p9 = por %p16416_p8, %p16415_p6 }
  0x4b   : > { %p16411_p4 = pneg %p16410_p2 }
  0x4d   : > { %p16418_p10 = pnand %p16417_p9, %p16411_p4 }
  0x4f   : > { %16421 = shalt.err (!%p16418_p10)
}
  0x50   : > { %14897 = dma.hbm_to_vmem [thread:$0]  (!%p16844_p5), %s21670_s2, 16, %s16848_s13, [#allocation6]  }
  0x51   : > { %s21671_s3 = sld [smem:[#allocation84_spill]] }
  0x57   : > { %s16422_s28 = scalar_lea.hbm %s21671_s3, 16 }
  0x58   : > { %p16423_p11 = scmp.ne.s32.totalorder %s21671_s3, %s16422_s28  ;;  %p16429_p0 = scmp.lt.u32.totalorder %s16422_s28, %s21671_s3 }
  0x5a   : > { %p16425_p12 = pnand %p16423_p11, %p16860_p7 }
  0x5c   : > { %p16426_p13 = pneg %p16425_p12 }
  0x5e   : > { %p16431_p2 = pnand %p16429_p0, %p16426_p13 }
  0x60   : > { %16434 = shalt.err (!%p16431_p2)
}
  0x61   : > { %s16435_s20 = scalar_lea.vmem %s367_s15, 16  ;;  %s16442_s13 = scalar_lea.vmem %s367_s15, 32 }
  0x62   : > { %p16436_p4 = scmp.ne.s32.totalorder %s367_s15, %s16435_s20  ;;  %p16443_p9 = scmp.lt.s32.totalorder %s367_s15, %s367_s15 }
  0x63   : > { %p16444_p10 = scmp.lt.s32.totalorder %s16442_s13, %s16435_s20 }
  0x64   : > { %p16438_p6 = pnand %p16436_p4, %p16860_p7 }
  0x65   : > { %p16445_p3 = por %p16444_p10, %p16443_p9 }
  0x66   : > { %p16439_p8 = pneg %p16438_p6 }
  0x68   : > { %p16446_p1 = pnand %p16445_p3, %p16439_p8 }
  0x6a   : > { %16449 = shalt.err (!%p16446_p1)
}
  0x6b   : > { %14900 = dma.hbm_to_vmem [thread:$0]  (!%p16844_p5), %s21671_s3, 16, %s367_s15, [#allocation6]  }
  0x6c   : > { %s16715_s27 = smov [#allocation8]   ;;  %s21672_s4 = sld [smem:[#allocation85_spill]] }
  0x6d   : > { %s377_s16 = sshll.u32 %s16715_s27, 4  ;;  %s378_s16 = int_to_ptr.vmem [resolvable:$true] %s377_s16 }
  0x72   : > { %s16450_s14 = scalar_lea.hbm %s21672_s4, 16 }
  0x73   : > { %p16451_p11 = scmp.ne.s32.totalorder %s21672_s4, %s16450_s14  ;;  %p16457_p12 = scmp.lt.u32.totalorder %s16450_s14, %s21672_s4 }
  0x75   : > { %p16453_p1 = pnand %p16451_p11, %p16860_p7 }
  0x77   : > { %p16454_p3 = pneg %p16453_p1 }
  0x79   : > { %p16459_p13 = pnand %p16457_p12, %p16454_p3 }
  0x7b   : > { %16462 = shalt.err (!%p16459_p13)
}
  0x7c   : > { %s16463_s15 = scalar_lea.vmem %s378_s16, 16  ;;  %s16470_s8 = scalar_lea.vmem %s378_s16, 32 }
  0x7d   : > { %p16464_p0 = scmp.ne.s32.totalorder %s378_s16, %s16463_s15  ;;  %p16471_p6 = scmp.lt.s32.totalorder %s378_s16, %s378_s16 }
  0x7e   : > { %p16472_p8 = scmp.lt.s32.totalorder %s16470_s8, %s16463_s15 }
  0x7f   : > { %p16466_p2 = pnand %p16464_p0, %p16860_p7 }
  0x80   : > { %p16473_p9 = por %p16472_p8, %p16471_p6 }
  0x81   : > { %p16467_p4 = pneg %p16466_p2 }
  0x83   : > { %p16474_p10 = pnand %p16473_p9, %p16467_p4 }
  0x85   : > { %16477 = shalt.err (!%p16474_p10)
}
  0x86   : > { %14903 = dma.hbm_to_vmem [thread:$0]  (!%p16844_p5), %s21672_s4, 16, %s378_s16, [#allocation9]  }
  0x87   : > { %s34_s28 = sadd.s32 1, %s16700_s22  ;;  %s37_s12 = sadd.s32 1, %s16704_s23 }
  0x88   : > { %p35_p11 = scmp.ge.s32.totalorder %s34_s28, 2  ;;  %s11526_s14 = sshll.u32 %s16704_s23, 1 }
  0x89   : > { %s16949_s0 = sadd.s32 %s16700_s22, %s11526_s14  ;;  %s195_s29 = sadd.s32 1, %s16688_s19 }
  0x8a   : > { %s21884_s28 = smov (%p35_p11, %s34_s28), 0  ;;  %s21886_s12 = smov (!%p35_p11, %s37_s12), %s16704_s23 }
  0x8b   : > { %p202_p1 = scmp.ne.s32.totalorder %s16688_s19, %s16684_s18  ;;  %p203_p3 = scmp.eq.s32.totalorder %s16708_s24, 0 }
  0x8c   : > { %p39_p12 = scmp.ge.s32.totalorder %s21886_s12, 2  ;;  %p208_p13 = scmp.ne.s32.totalorder %s16684_s18, %s16680_s17 }
  0x8d   : > { %p204_p0 = por %p203_p3, %p202_p1  ;;  %p14927_p2 = scmp.lt.s32.totalorder %s16708_s24, 4 }
  0x8e   : > { %s21888_s12 = smov (%p39_p12, %s21886_s12), 0  ;;  %p21674_p4 = scmp.ne.s32.totalorder %s21664_s26, 0 }
  0x8f   : > { %21673 = sst [smem:[#allocation25_spill]] %s21888_s12  ;;  %s423_s20 = sand.u32 1, %s16708_s24  }
  0x90   : > { %p16965_p6 = por %p21674_p4, %p208_p13  ;;  %s11527_s13 = sshll.u32 %s21888_s12, 1 }
  0x91   : > { %s191_s15 = sadd.s32 %s11527_s13, %s21884_s28  ;;  %s21586_s8 = sand.u32 1, %s16688_s19  }
  0x92   : > { %s21675_s16 = scalar_select %p16965_p6, 1, 0 }
  0x93   : > { %s192_s21 = ssub.s32 %s16949_s0, %s191_s15  ;;  %s14856_s27 = smul.u32 6272, %s21586_s8 }
  0x94   : > { %p193_p8 = scmp.eq.s32.totalorder %s192_s21, 0  ;;  %s14857_s14 = smul.u32 100352, %s16949_s0 }
  0x95   : > { %p16977_p9 = pnand %p14927_p2, %p204_p0  ;;  %s21677_s7 = sld [smem:[#allocation86_spill]] }
  0x96   : > { %s16982_s9 = scalar_select %p193_p8, %s16688_s19, %s195_s29  }
  0x97   : > { %s21676_s17 = scalar_select %p16977_p9, 1, 0 }
  0x98   : > { %s427_s13 = scalar_lea.vmem [#allocation13], %s14856_s27  ;;  %s16991_s21 = scalar_lea.sflag [#allocation4], %s423_s20 }
  0x99   : > { %s436_s15 = sshll.u32 %s427_s13, 4  ;;  %p21591_p11 = pneg %p16977_p9  ;;  %s16989_s15 = int_to_ptr.vmem [resolvable:$true] %s436_s15 }
  0x9b   : > { %s16987_s2 = scalar_lea.hbm %s21677_s7, %s14857_s14  ;;  %s16483_s29 = scalar_lea.hbm %s21677_s7, 401408 }
  0x9c   : > { %s16478_s8 = scalar_lea.hbm %s16987_s2, 100352  ;;  %p16484_p12 = scmp.lt.u32.totalorder %s16987_s2, %s21677_s7 }
  0x9d   : > { %p16479_p10 = scmp.ne.s32.totalorder %s16987_s2, %s16478_s8  ;;  %p16485_p13 = scmp.lt.u32.totalorder %s16483_s29, %s16478_s8 }
  0x9e   : > { %p16487_p2 = scmp.lt.u32.totalorder %s16478_s8, %s16987_s2 }
  0x9f   : > { %p16481_p1 = pnand %p21591_p11, %p16479_p10  ;;  %p16486_p0 = por %p16485_p13, %p16484_p12 }
  0xa1   : > { %p16482_p3 = pneg %p16481_p1  ;;  %p16488_p4 = por %p16487_p2, %p16486_p0 }
  0xa3   : > { %p16489_p8 = pnand %p16488_p4, %p16482_p3 }
  0xa5   : > { %16492 = shalt.err (!%p16489_p8)
}
  0xa6   : > { %s16493_s20 = scalar_lea.vmem %s16989_s15, 100352  ;;  %s16716_s27 = smov [#allocation13]  }
  0xa7   : > { %p16494_p10 = scmp.ne.s32.totalorder %s16989_s15, %s16493_s20  ;;  %s16498_s13 = sshll.u32 %s16716_s27, 4  ;;  %s16499_s13 = int_to_ptr.vmem [resolvable:$false] %s16498_s13 }
  0xa8   : > { %s16500_s3 = scalar_lea.vmem %s16499_s13, 200704  ;;  %p16501_p5 = scmp.lt.s32.totalorder %s16989_s15, %s16499_s13 }
  0xa9   : > { %p16496_p1 = pnand %p16494_p10, %p21591_p11  ;;  %p16502_p12 = scmp.lt.s32.totalorder %s16500_s3, %s16493_s20 }
  0xab   : > { %p16497_p6 = pneg %p16496_p1  ;;  %p16503_p13 = por %p16502_p12, %p16501_p5 }
  0xad   : > { %p16504_p0 = pnand %p16503_p13, %p16497_p6 }
  0xaf   : > { %16507 = shalt.err (!%p16504_p0)
}
  0xb0   : > { %s21678_s8 = smov 8   ;;  %s21679_s1 = smov 128  }
  0xb1   : > { %14916 = dma.hbm_to_vmem [thread:$0]  (!%p16977_p9), %s16987_s2, 100352, %s16989_s15, %s16991_s21, %s21679_s1, %s21679_s1, %s21678_s8  }
  0xb2   : > { %s16717_s25 = smov [#allocation10]   ;;  %s16718_s14 = smov [#allocation11]  }
  0xb3   : > { %s387_s29 = sshll.u32 %s16717_s25, 4  ;;  %s401_s27 = sshll.u32 %s16718_s14, 4  ;;  %s388_s29 = int_to_ptr.vmem [resolvable:$true] %s387_s29  ;;  %s17022_s27 = int_to_ptr.vmem [resolvable:$true] %s401_s27 }
  0xb4   : > { %s16508_s3 = scalar_lea.hbm %s21566_s5, 1024 }
  0xb5   : > { %p16509_p5 = scmp.ne.s32.totalorder %s21566_s5, %s16508_s3  ;;  %p16515_p2 = scmp.lt.u32.totalorder %s16508_s3, %s21566_s5 }
  0xb7   : > { %p16511_p6 = pnand %p16509_p5, %p16860_p7 }
  0xb9   : > { %p16512_p3 = pneg %p16511_p6 }
  0xbb   : > { %p16517_p4 = pnand %p16515_p2, %p16512_p3 }
  0xbd   : > { %16520 = shalt.err (!%p16517_p4)
}
  0xbe   : > { %s16521_s15 = scalar_lea.vmem %s388_s29, 1024  ;;  %p16529_p12 = scmp.lt.s32.totalorder %s388_s29, %s388_s29 }
  0xbf   : > { %p16522_p8 = scmp.ne.s32.totalorder %s388_s29, %s16521_s15  ;;  %p16530_p13 = scmp.lt.s32.totalorder %s16521_s15, %s16521_s15 }
  0xc1   : > { %p16524_p10 = pnand %p16522_p8, %p16860_p7  ;;  %p16531_p0 = por %p16530_p13, %p16529_p12 }
  0xc3   : > { %p16525_p1 = pneg %p16524_p10 }
  0xc5   : > { %p16532_p11 = pnand %p16531_p0, %p16525_p1 }
  0xc7   : > { %16535 = shalt.err (!%p16532_p11)
}
  0xc8   : > { %p21680_p5 = scmp.ne.s32.totalorder %s21667_s30, 0  ;;  %s16536_s14 = scalar_lea.hbm %s21567_s6, 16 }
  0xc9   : > { %p16537_p6 = scmp.ne.s32.totalorder %s21567_s6, %s16536_s14  ;;  %p16543_p2 = scmp.lt.u32.totalorder %s16536_s14, %s21567_s6 }
  0xca   : > { %14906 = dma.hbm_to_vmem [thread:$0]  (!%p21680_p5), %s21566_s5, 1024, %s388_s29, [#allocation9], %s21679_s1, %s21679_s1, %s21678_s8  }
  0xcb   : > { %p16539_p11 = pnand %p16537_p6, %p16860_p7 }
  0xcd   : > { %p16540_p3 = pneg %p16539_p11 }
  0xcf   : > { %p16545_p4 = pnand %p16543_p2, %p16540_p3 }
  0xd1   : > { %16548 = shalt.err (!%p16545_p4)
}
  0xd2   : > { %s16549_s8 = scalar_lea.vmem %s17022_s27, 16  ;;  %s16556_s1 = scalar_lea.vmem %s17022_s27, 32 }
  0xd3   : > { %p16550_p8 = scmp.ne.s32.totalorder %s17022_s27, %s16549_s8  ;;  %p16557_p12 = scmp.lt.s32.totalorder %s17022_s27, %s17022_s27 }
  0xd4   : > { %p16558_p13 = scmp.lt.s32.totalorder %s16556_s1, %s16549_s8 }
  0xd5   : > { %p16552_p10 = pnand %p16550_p8, %p16860_p7 }
  0xd6   : > { %p16559_p0 = por %p16558_p13, %p16557_p12 }
  0xd7   : > { %p16553_p1 = pneg %p16552_p10 }
  0xd9   : > { %p16560_p6 = pnand %p16559_p0, %p16553_p1 }
  0xdb   : > { %16563 = shalt.err (!%p16560_p6)
}
  0xdc   : > { %14909 = dma.hbm_to_vmem [thread:$0]  (!%p21680_p5), %s21567_s6, 16, %s17022_s27, [#allocation12]  }
  0xdd   : > { %s21681_s4 = sand.u32 1, %s16688_s19   ;;  %s16719_s12 = smov [#allocation15]  }
  0xde   : > { %s11543_s7 = sshll.u32 %s21681_s4, 1  ;;  %s412_s25 = sshll.u32 %s16719_s12, 4  ;;  %s413_s25 = int_to_ptr.vmem [resolvable:$true] %s412_s25 }
  0xdf   : > { %s12793_s14 = sshll.u32 %s16949_s0, 5  ;;  %s16564_s3 = scalar_lea.hbm %s21571_s10, 16 }
  0xe0   : > { %p16565_p11 = scmp.ne.s32.totalorder %s21571_s10, %s16564_s3  ;;  %p16571_p4 = scmp.lt.u32.totalorder %s16564_s3, %s21571_s10 }
  0xe2   : > { %p16567_p3 = pnand %p16565_p11, %p16860_p7 }
  0xe4   : > { %p16568_p2 = pneg %p16567_p3 }
  0xe6   : > { %p16573_p8 = pnand %p16571_p4, %p16568_p2 }
  0xe8   : > { %16576 = shalt.err (!%p16573_p8)
}
  0xe9   : > { %s16577_s27 = scalar_lea.vmem %s413_s25, 16  ;;  %s16584_s0 = scalar_lea.vmem %s413_s25, 32 }
  0xea   : > { %p16578_p10 = scmp.ne.s32.totalorder %s413_s25, %s16577_s27  ;;  %p16585_p13 = scmp.lt.s32.totalorder %s413_s25, %s413_s25 }
  0xeb   : > { %p16586_p0 = scmp.lt.s32.totalorder %s16584_s0, %s16577_s27 }
  0xec   : > { %p16580_p1 = pnand %p16578_p10, %p16860_p7 }
  0xed   : > { %p16587_p6 = por %p16586_p0, %p16585_p13 }
  0xee   : > { %p16581_p12 = pneg %p16580_p1 }
  0xf0   : > { %p16588_p9 = pnand %p16587_p6, %p16581_p12 }
  0xf2   : > { %16591 = shalt.err (!%p16588_p9)
}
  0xf3   : > { %14912 = dma.hbm_to_vmem [thread:$0]  (!%p21680_p5), %s21571_s10, 16, %s413_s25, [#allocation6]  }
  0xf4   : > { %s21682_s13 = sld [smem:[#allocation87_spill]]  ;;  %s450_s11 = scalar_lea.vmem [#allocation14], %s11543_s7 }
  0xf5   : > { %s460_s2 = sshll.u32 %s450_s11, 4  ;;  %p21683_p9 = scmp.ne.s32.totalorder %s21676_s17, 0  ;;  %s461_s2 = int_to_ptr.vmem [resolvable:$true] %s460_s2 }
  0xf7   : > { %p21684_p11 = pneg %p21683_p9 }
  0xfa   : > { %s17093_s3 = scalar_lea.hbm %s21682_s13, %s12793_s14  ;;  %s16597_s1 = scalar_lea.hbm %s21682_s13, 128 }
  0xfb   : > { %s16592_s8 = scalar_lea.hbm %s17093_s3, 32  ;;  %p16598_p5 = scmp.lt.u32.totalorder %s17093_s3, %s21682_s13 }
  0xfc   : > { %p16593_p7 = scmp.ne.s32.totalorder %s17093_s3, %s16592_s8  ;;  %p16599_p4 = scmp.lt.u32.totalorder %s16597_s1, %s16592_s8 }
  0xfd   : > { %p16601_p10 = scmp.lt.u32.totalorder %s16592_s8, %s17093_s3 }
  0xfe   : > { %p16595_p3 = pnand %p16593_p7, %p21684_p11  ;;  %p16600_p8 = por %p16599_p4, %p16598_p5 }
 0x100   : > { %p16596_p2 = pneg %p16595_p3  ;;  %p16602_p1 = por %p16601_p10, %p16600_p8 }
 0x102   : > { %p16603_p12 = pnand %p16602_p1, %p16596_p2 }
 0x104   : > { %16606 = shalt.err (!%p16603_p12)
}
 0x105   : > { %s16607_s7 = scalar_lea.vmem %s461_s2, 32  ;;  %p21685_p0 = pmov %p21684_p11 }
 0x106   : > { %p16608_p13 = scmp.ne.s32.totalorder %s461_s2, %s16607_s7  ;;  %s16720_s27 = smov [#allocation14]  }
 0x107   : > { %s16612_s0 = sshll.u32 %s16720_s27, 4  ;;  %s16613_s0 = int_to_ptr.vmem [resolvable:$false] %s16612_s0 }
 0x108   : > { %p16610_p6 = pnand %p16608_p13, %p21685_p0  ;;  %s16614_s15 = scalar_lea.vmem %s16613_s0, 64 }
 0x109   : > { %p16615_p11 = scmp.lt.s32.totalorder %s461_s2, %s16613_s0  ;;  %p16616_p3 = scmp.lt.s32.totalorder %s16614_s15, %s16607_s7 }
 0x10a   : > { %p16611_p7 = pneg %p16610_p6 }
 0x10b   : > { %p16617_p4 = por %p16616_p3, %p16615_p11 }
 0x10d   : > { %p16618_p5 = pnand %p16617_p4, %p16611_p7 }
 0x10f   : > { %16621 = shalt.err (!%p16618_p5)
}
 0x110   : > { %14919 = dma.hbm_to_vmem [thread:$0]  (!%p21683_p9), %s17093_s3, 32, %s461_s2, %s16991_s21  }
 0x111   : > { %s21686_s4 = sld [smem:[#allocation24_spill]] }
 0x117   : > { %p21687_p2 = scmp.ne.s32.totalorder %s21686_s4, 0 }
 0x118   : > { %p21688_p8 = scmp.ne.s32.totalorder (!%p21687_p2), %s21664_s26, 0 }
 0x119   : > { %482 = sbr.rel (%p21687_p2) target bundleno = 2825 (0xb09), region = 64 }
 0x120   : > { %16655 = dma.done.wait (%p21688_p8), [#allocation4], 1024  }
 0x121   : > { %16657 = vsyncadd (%p21688_p8), [#allocation4], 4294966272 }
 0x122   : > { %16659 = dma.done.wait (%p21688_p8), [#allocation6], 32  }
 0x123   : > { %16661 = vsyncadd (%p21688_p8), [#allocation6], 4294967264 }
 0x124   : > { %16663 = dma.done.wait (%p21688_p8), [#allocation9], 1040  }
 0x125   : > { %16665 = vsyncadd (%p21688_p8), [#allocation9], 4294966256 }
 0x126   : > { %16667 = dma.done.wait (%p21688_p8), [#allocation12], 16  }
 0x127   : > { %16669 = vsyncadd (%p21688_p8), [#allocation12], 4294967280  ;;  %s21689_s17 = sadd.s32 4294967295, %s16708_s24   ;;  %s510_s12 = sand.u32 1, %s16684_s18  }
 0x128   : > { %s508_s21 = sand.u32 1, %s21689_s17   ;;  %s14858_s20 = smul.u32 6272, %s510_s12 }
 0x129   : > { %s509_s3 = scalar_lea.sflag [#allocation4], %s508_s21  ;;  %p21690_p9 = scmp.ne.s32.totalorder %s21675_s16, 0 }
 0x12a   : > { %s17136_s11 = scalar_lea.vmem [#allocation13], %s14858_s20 }
 0x12b   : > { %16671 = dma.done.wait (%p21690_p9), %s509_s3, 100384  }
 0x12c   : > { %16673 = vsyncadd (%p21690_p9), %s509_s3, 4294866912  ;;  %s17142_s2 = sshll.u32 %s510_s12, 1 }
 0x12d   : > { %s521_s8 = scalar_lea.vmem [#allocation14], %s17142_s2 }
 0x12e   : > { %16675 = dma.done.wait (%p21688_p8), [#allocation6], 16  }
 0x12f   : > { %16677 = vsyncadd (%p21688_p8), [#allocation6], 4294967280  ;;  %s21691_s30 = sld [smem:[#allocation23_spill]]  ;;  %s21692_s25 = sld [smem:[#allocation22_spill]] }
 0x130   : > { %s21693_s15 = sld [smem:[#allocation89_spill]]  ;;  %s21694_s21 = sld [smem:[#allocation88_spill]] }
 0x135   : > { %s11556_s1 = sshll.u32 %s21691_s30, 1  ;;  %p590_p10 = scmp.lt.s32.totalorder %s21691_s30, 1 }
 0x136   : > { %s581_s29 = sadd.s32 %s21692_s25, %s11556_s1  ;;  %p11560_p12 = scmp.ne.s32.totalorder %s21692_s25, 0 }
 0x137   : > { %s11557_s14 = sshll.u32 %s581_s29, 5  ;;  %s21890_s30 = smov (!%p590_p10, %s21691_s30), 1 }
 0x138   : > { %p583_p1 = scmp.lt.s32.totalorder %s11557_s14, 127  ;;  %s11559_s16 = sshll.u32 %s21890_s30, 3 }
 0x139   : > { %s17156_s4 = scalar_lea.vmem %s21693_s15, %s11559_s16  ;;  %598 = sbr.rel (%p11560_p12) target bundleno = 1579 (0x62b), region = 104 }
 0x13a   : > { %s21892_s14 = smov (!%p583_p1, %s11557_s14), 127 }
 0x13b   : > { %s11558_s7 = sshll.u32 %s21892_s14, 3 }
 0x13c   : > { %s17161_s12 = scalar_lea.vmem %s21694_s21, %s11558_s7 }
 0x140   : > { %v648_v0 = vld [vmem:[#allocation3] sm:$0xff]  ;;  %v649_v1 = vld [vmem:[#allocation3 + $0x8] sm:$0xff]  ;;  %v21594_v2 = vmov 0.0|0.0   ;;  %vm16722_vm0 = vmmov 0   ;;  %v21596_v4 = vmov 0.0   ;;  %s21695_s30 = sld [smem:[#allocation81_spill]] }
 0x141   : > { %14660 = vmatprep.subr.bf16.mxu0 %v21594_v2  ;;  %v14661_v3 = vpack.c.bf16 %v649_v1, %v648_v0  ;;  %13408 = vmatprep.mubr.msk.f32.mxu0 %vm16722_vm0, %v21596_v4  ;;  %v1374_v5 = vld [vmem:[#allocation10] sm:$0xff]  ;;  %v1375_v6 = vld [vmem:[#allocation10 + $0x8] sm:$0xff]  ;;  %vm657_vm1 = vcmask 130048   ;;  %v1376_v9 = vld [vmem:[#allocation10 + $0x10] sm:$0xff]  ;;  %vm1389_vm2 = vcmask 523264  }
 0x142   : > { %v17167_v7 = vpack.c.bf16 %v1375_v6, %v1374_v5  ;;  %14752 = vmatprep.subr.bf16.mxu1 %v21594_v2  ;;  %13574 = vmatprep.mubr.msk.f32.mxu1 %vm16722_vm0, %v21596_v4  ;;  %v1377_v10 = vld [vmem:[#allocation10 + $0x18] sm:$0xff]  ;;  %v1378_v13 = vld [vmem:[#allocation10 + $0x20] sm:$0xff]  ;;  %v1379_v15 = vld [vmem:[#allocation10 + $0x28] sm:$0xff] }
 0x143   : > { %14662 = vmatpush3.bf16.msra.mxu0 %v14661_v3  ;;  %v17190_v12 = vpack.c.bf16 %v1377_v10, %v1376_v9  ;;  %v17206_v16 = vpack.c.bf16 %v1379_v15, %v1378_v13  ;;  %v1380_v20 = vld [vmem:[#allocation10 + $0x30] sm:$0xff]  ;;  %v1381_v21 = vld [vmem:[#allocation10 + $0x38] sm:$0xff] }
 0x144   : > { %14663 = vmatprep.subr.bf16.mxu0 %v21594_v2  ;;  %14756 = vmatpush3.bf16.msra.mxu1 %v17167_v7  ;;  %v17248_v23 = vpack.c.bf16 %v1381_v21, %v1380_v20  ;;  %v17597_v3 = vld [vmem:[#allocation5] ss:$0 sm:$0xff]  ;;  %v17599_v6 = vld [vmem:[#allocation7] ss:$0 sm:$0xff]  ;;  %v17602_v13 = vld [vmem:[#allocation8] ss:$0 sm:$0xff] }
 0x145   : > { %14753 = vmatprep.subr.bf16.mxu1 %v21594_v2  ;;  %v1848_v20 = vld [vmem:[#allocation3 + $0x10] sm:$0xff]  ;;  %v1849_v21 = vld [vmem:[#allocation3 + $0x18] sm:$0xff] }
 0x146   : > { %v17175_v8 = vld [vmem:[%s21695_s30] sm:$0xff]  ;;  %v17188_v11 = vld [vmem:[%s21695_s30 + $0x8] sm:$0xff]  ;;  %v17202_v14 = vld [vmem:[%s21695_s30 + $0x10] sm:$0xff] }
 0x147   : > { %13409 = vmatmul.mubr.msk.f32.vlgmr.msra.gmra.mrb[0].mxu0 %vm657_vm1, %v17175_v8  ;;  %v17216_v17 = vld [vmem:[%s21695_s30 + $0x18] sm:$0xff]  ;;  %v17228_v18 = vld [vmem:[%s21695_s30 + $0x20] sm:$0xff]  ;;  %v17237_v19 = vld [vmem:[%s21695_s30 + $0x28] sm:$0xff] }
 0x148   : > { %13411 = vmatprep.mubr.msk.f32.mxu0 %vm16722_vm0, %v21596_v4  ;;  %14665 = vmatpush3.bf16.msra.mxu0 %v17167_v7  ;;  %v17246_v22 = vld [vmem:[%s21695_s30 + $0x30] sm:$0xff]  ;;  %v17260_v24 = vld [vmem:[%s21695_s30 + $0x38] sm:$0xff]  ;;  %v17270_v25 = vld [vmem:[%s21695_s30 + $0x40] sm:$0xff] }
 0x149   : > { %14666 = vmatprep.subr.bf16.mxu0 %v21594_v2  ;;  %14757 = vmatpush3.bf16.msra.mxu1 %v17190_v12  ;;  %v17279_v26 = vld [vmem:[%s21695_s30 + $0x48] sm:$0xff]  ;;  %v17288_v27 = vld [vmem:[%s21695_s30 + $0x50] sm:$0xff]  ;;  %v17297_v28 = vld [vmem:[%s21695_s30 + $0x58] sm:$0xff] }
 0x14a   : > { %14754 = vmatprep.subr.bf16.mxu1 %v21594_v2  ;;  %v17306_v29 = vld [vmem:[%s21695_s30 + $0x60] sm:$0xff]  ;;  %v17315_v30 = vld [vmem:[%s21695_s30 + $0x68] sm:$0xff]  ;;  %v17324_v31 = vld [vmem:[%s21695_s30 + $0x70] sm:$0xff] }
 0x14b   : > { %13412 = vmatmul.mubr.msk.f32.gmra.mrb[2].mxu0 %vm657_vm1, %v17188_v11  ;;  %v17333_v32 = vld [vmem:[%s21695_s30 + $0x78] sm:$0xff]  ;;  %v17342_v33 = vld [vmem:[%s21695_s30 + $0x80] sm:$0xff]  ;;  %v17351_v34 = vld [vmem:[%s21695_s30 + $0x88] sm:$0xff] }
 0x14c   : > { %13414 = vmatprep.mubr.msk.f32.mxu0 %vm16722_vm0, %v21596_v4  ;;  %14668 = vmatpush3.bf16.msra.mxu0 %v17190_v12  ;;  %v17360_v35 = vld [vmem:[%s21695_s30 + $0x90] sm:$0xff]  ;;  %v17369_v36 = vld [vmem:[%s21695_s30 + $0x98] sm:$0xff]  ;;  %v17378_v37 = vld [vmem:[%s21695_s30 + $0xa0] sm:$0xff] }
 0x14d   : > { %14669 = vmatprep.subr.bf16.mxu0 %v21594_v2  ;;  %14758 = vmatpush3.bf16.msra.mxu1 %v17206_v16  ;;  %v17387_v38 = vld [vmem:[%s21695_s30 + $0xa8] sm:$0xff]  ;;  %v17396_v39 = vld [vmem:[%s21695_s30 + $0xb0] sm:$0xff]  ;;  %v17405_v40 = vld [vmem:[%s21695_s30 + $0xb8] sm:$0xff] }
 0x14e   : > { %14755 = vmatprep.subr.bf16.mxu1 %v21594_v2  ;;  %v17414_v41 = vld [vmem:[%s21695_s30 + $0xc0] sm:$0xff]  ;;  %v17423_v42 = vld [vmem:[%s21695_s30 + $0xc8] sm:$0xff]  ;;  %v17432_v43 = vld [vmem:[%s21695_s30 + $0xd0] sm:$0xff] }
 0x14f   : > { %13415 = vmatmul.mubr.msk.f32.gmra.mrb[4].mxu0 %vm657_vm1, %v17202_v14  ;;  %v17441_v44 = vld [vmem:[%s21695_s30 + $0xd8] sm:$0xff]  ;;  %v17450_v45 = vld [vmem:[%s21695_s30 + $0xe0] sm:$0xff]  ;;  %v17459_v46 = vld [vmem:[%s21695_s30 + $0xe8] sm:$0xff] }
 0x150   : > { %13417 = vmatprep.mubr.msk.f32.mxu0 %vm16722_vm0, %v21596_v4  ;;  %14671 = vmatpush3.bf16.msra.mxu0 %v17206_v16  ;;  %v17468_v47 = vld [vmem:[%s21695_s30 + $0xf0] sm:$0xff]  ;;  %v17477_v48 = vld [vmem:[%s21695_s30 + $0xf8] sm:$0xff]  ;;  %v17486_v49 = vld [vmem:[%s21695_s30 + $0x100] sm:$0xff] }
 0x151   : > { %14672 = vmatprep.subr.bf16.mxu0 %v21594_v2  ;;  %14759 = vmatpush3.bf16.msra.mxu1 %v17248_v23  ;;  %v17495_v50 = vld [vmem:[%s21695_s30 + $0x108] sm:$0xff]  ;;  %v17504_v51 = vld [vmem:[%s21695_s30 + $0x110] sm:$0xff]  ;;  %v17513_v52 = vld [vmem:[%s21695_s30 + $0x118] sm:$0xff] }
 0x152   : > { %14678 = vmatprep.subr.bf16.mxu1 %v21594_v2  ;;  %v635_v53 = vld [vmem:[%s21695_s30 + $0x120] sm:$0xff]  ;;  %v636_v54 = vld [vmem:[%s21695_s30 + $0x128] sm:$0xff]  ;;  %v637_v55 = vld [vmem:[%s21695_s30 + $0x130] sm:$0xff] }
 0x153   : > { %13418 = vmatmul.mubr.msk.f32.gmra.mrb[6].mxu0 %vm657_vm1, %v17216_v17  ;;  %v638_v56 = vld [vmem:[%s21695_s30 + $0x138] sm:$0xff]  ;;  %v639_v57 = vld [vmem:[%s21695_s30 + $0x140] sm:$0xff]  ;;  %v640_v58 = vld [vmem:[%s21695_s30 + $0x148] sm:$0xff] }
 0x154   : > { %13420 = vmatprep.mubr.msk.f32.mxu0 %vm16722_vm0, %v21596_v4  ;;  %14674 = vmatpush3.bf16.msra.mxu0 %v17248_v23  ;;  %v641_v59 = vld [vmem:[%s21695_s30 + $0x150] sm:$0xff]  ;;  %v642_v60 = vld [vmem:[%s21695_s30 + $0x158] sm:$0xff]  ;;  %v643_v61 = vld [vmem:[%s21695_s30 + $0x160] sm:$0xff] }
 0x155   : > { %14675 = vmatprep.subr.bf16.mxu0 %v21594_v2  ;;  %v644_v62 = vld [vmem:[%s21695_s30 + $0x168] sm:$0xff]  ;;  %v645_v63 = vld [vmem:[%s21695_s30 + $0x170] sm:$0xff]  ;;  %v646_v0 = vld [vmem:[%s21695_s30 + $0x178] sm:$0xff] }
 0x156   : > { %v647_v1 = vld [vmem:[%s21695_s30 + $0x180] sm:$0xff] }
 0x157   : > { %13421 = vmatmul.mubr.msk.f32.gmra.mrb[8].mxu0 %vm657_vm1, %v17228_v18 }
 0x158   : > { %13423 = vmatprep.mubr.msk.f32.mxu0 %vm16722_vm0, %v21596_v4 }
 0x15b   : > { %13424 = vmatmul.mubr.msk.f32.gmra.mrb[10].mxu0 %vm657_vm1, %v17237_v19 }
 0x15c   : > { %13426 = vmatprep.mubr.msk.f32.mxu0 %vm16722_vm0, %v21596_v4 }
 0x15f   : > { %13427 = vmatmul.mubr.msk.f32.gmra.mrb[12].mxu0 %vm657_vm1, %v17246_v22 }
 0x160   : > { %13429 = vmatprep.mubr.msk.f32.mxu0 %vm16722_vm0, %v21596_v4 }
 0x163   : > { %13430 = vmatmul.mubr.msk.f32.gmra.mrb[14].mxu0 %vm657_vm1, %v17260_v24 }
 0x164   : > { %13432 = vmatprep.mubr.msk.f32.mxu0 %vm16722_vm0, %v21596_v4 }
 0x167   : > { %13433 = vmatmul.mubr.msk.f32.gmra.mrb[16].mxu0 %vm657_vm1, %v17270_v25 }
 0x168   : > { %13435 = vmatprep.mubr.msk.f32.mxu0 %vm16722_vm0, %v21596_v4 }
 0x16b   : > { %13436 = vmatmul.mubr.msk.f32.gmra.mrb[18].mxu0 %vm657_vm1, %v17279_v26 }
 0x16c   : > { %13438 = vmatprep.mubr.msk.f32.mxu0 %vm16722_vm0, %v21596_v4 }
 0x16f   : > { %13439 = vmatmul.mubr.msk.f32.gmra.mrb[20].mxu0 %vm657_vm1, %v17288_v27 }
 0x170   : > { %13441 = vmatprep.mubr.msk.f32.mxu0 %vm16722_vm0, %v21596_v4 }
 0x173   : > { %13442 = vmatmul.mubr.msk.f32.gmra.mrb[22].mxu0 %vm657_vm1, %v17297_v28 }
 0x174   : > { %13444 = vmatprep.mubr.msk.f32.mxu0 %vm16722_vm0, %v21596_v4 }
 0x177   : > { %13445 = vmatmul.mubr.msk.f32.gmra.mrb[24].mxu0 %vm657_vm1, %v17306_v29 }
 0x178   : > { %13447 = vmatprep.mubr.msk.f32.mxu0 %vm16722_vm0, %v21596_v4 }
 0x17b   : > { %13448 = vmatmul.mubr.msk.f32.gmra.mrb[26].mxu0 %vm657_vm1, %v17315_v30 }
 0x17c   : > { %13450 = vmatprep.mubr.msk.f32.mxu0 %vm16722_vm0, %v21596_v4 }
 0x17f   : > { %13451 = vmatmul.mubr.msk.f32.gmra.mrb[28].mxu0 %vm657_vm1, %v17324_v31 }
 0x180   : > { %13453 = vmatprep.mubr.msk.f32.mxu0 %vm16722_vm0, %v21596_v4 }
 0x183   : > { %13454 = vmatmul.mubr.msk.f32.gmra.mrb[30].mxu0 %vm657_vm1, %v17333_v32 }
 0x184   : > { %13456 = vmatprep.mubr.msk.f32.mxu0 %vm16722_vm0, %v21596_v4 }
 0x187   : > { %13457 = vmatmul.mubr.msk.f32.gmra.mrb[32].mxu0 %vm657_vm1, %v17342_v33 }
 0x188   : > { %13459 = vmatprep.mubr.msk.f32.mxu0 %vm16722_vm0, %v21596_v4 }
 0x18b   : > { %13460 = vmatmul.mubr.msk.f32.gmra.mrb[34].mxu0 %vm657_vm1, %v17351_v34 }
 0x18c   : > { %13462 = vmatprep.mubr.msk.f32.mxu0 %vm16722_vm0, %v21596_v4 }
 0x18f   : > { %13463 = vmatmul.mubr.msk.f32.gmra.mrb[36].mxu0 %vm657_vm1, %v17360_v35 }
 0x190   : > { %13465 = vmatprep.mubr.msk.f32.mxu0 %vm16722_vm0, %v21596_v4 }
 0x193   : > { %13466 = vmatmul.mubr.msk.f32.gmra.mrb[38].mxu0 %vm657_vm1, %v17369_v36 }
 0x194   : > { %13468 = vmatprep.mubr.msk.f32.mxu0 %vm16722_vm0, %v21596_v4 }
 0x197   : > { %13469 = vmatmul.mubr.msk.f32.gmra.mrb[40].mxu0 %vm657_vm1, %v17378_v37 }
 0x198   : > { %13471 = vmatprep.mubr.msk.f32.mxu0 %vm16722_vm0, %v21596_v4 }
 0x19b   : > { %13472 = vmatmul.mubr.msk.f32.gmra.mrb[42].mxu0 %vm657_vm1, %v17387_v38 }
 0x19c   : > { %13474 = vmatprep.mubr.msk.f32.mxu0 %vm16722_vm0, %v21596_v4 }
 0x19f   : > { %13475 = vmatmul.mubr.msk.f32.gmra.mrb[44].mxu0 %vm657_vm1, %v17396_v39 }
 0x1a0   : > { %13477 = vmatprep.mubr.msk.f32.mxu0 %vm16722_vm0, %v21596_v4 }
 0x1a3   : > { %13478 = vmatmul.mubr.msk.f32.gmra.mrb[46].mxu0 %vm657_vm1, %v17405_v40 }
 0x1a4   : > { %13480 = vmatprep.mubr.msk.f32.mxu0 %vm16722_vm0, %v21596_v4 }
 0x1a7   : > { %13481 = vmatmul.mubr.msk.f32.gmra.mrb[48].mxu0 %vm657_vm1, %v17414_v41 }
 0x1a8   : > { %13483 = vmatprep.mubr.msk.f32.mxu0 %vm16722_vm0, %v21596_v4 }
 0x1ab   : > { %13484 = vmatmul.mubr.msk.f32.gmra.mrb[50].mxu0 %vm657_vm1, %v17423_v42 }
 0x1ac   : > { %13486 = vmatprep.mubr.msk.f32.mxu0 %vm16722_vm0, %v21596_v4 }
 0x1af   : > { %13487 = vmatmul.mubr.msk.f32.gmra.mrb[52].mxu0 %vm657_vm1, %v17432_v43 }
 0x1b0   : > { %13489 = vmatprep.mubr.msk.f32.mxu0 %vm16722_vm0, %v21596_v4 }
 0x1b3   : > { %13490 = vmatmul.mubr.msk.f32.gmra.mrb[54].mxu0 %vm657_vm1, %v17441_v44 }
 0x1b4   : > { %13492 = vmatprep.mubr.msk.f32.mxu0 %vm16722_vm0, %v21596_v4 }
 0x1b7   : > { %13493 = vmatmul.mubr.msk.f32.gmra.mrb[56].mxu0 %vm657_vm1, %v17450_v45 }
 0x1b8   : > { %13495 = vmatprep.mubr.msk.f32.mxu0 %vm16722_vm0, %v21596_v4 }
 0x1bb   : > { %13496 = vmatmul.mubr.msk.f32.gmra.mrb[58].mxu0 %vm657_vm1, %v17459_v46 }
 0x1bc   : > { %13498 = vmatprep.mubr.msk.f32.mxu0 %vm16722_vm0, %v21596_v4 }
 0x1bf   : > { %13499 = vmatmul.mubr.msk.f32.gmra.mrb[60].mxu0 %vm657_vm1, %v17468_v47 }
 0x1c0   : > { %13501 = vmatprep.mubr.msk.f32.mxu0 %vm16722_vm0, %v21596_v4 }
 0x1c3   : > { %13502 = vmatmul.mubr.msk.f32.gmra.mrb[62].mxu0 %vm657_vm1, %v17477_v48 }
 0x1c4   : > { %13504 = vmatprep.mubr.msk.f32.mxu0 %vm16722_vm0, %v21596_v4 }
 0x1c7   : > { %13505 = vmatmul.mubr.msk.f32.gmra.mrb[64].mxu0 %vm657_vm1, %v17486_v49 }
 0x1c8   : > { %13507 = vmatprep.mubr.msk.f32.mxu0 %vm16722_vm0, %v21596_v4 }
 0x1cb   : > { %13508 = vmatmul.mubr.msk.f32.gmra.mrb[66].mxu0 %vm657_vm1, %v17495_v50 }
 0x1cc   : > { %13510 = vmatprep.mubr.msk.f32.mxu0 %vm16722_vm0, %v21596_v4 }
 0x1cf   : > { %13511 = vmatmul.mubr.msk.f32.gmra.mrb[68].mxu0 %vm657_vm1, %v17504_v51 }
 0x1d0   : > { %13513 = vmatprep.mubr.msk.f32.mxu0 %vm16722_vm0, %v21596_v4 }
 0x1d3   : > { %13514 = vmatmul.mubr.msk.f32.gmra.mrb[70].mxu0 %vm657_vm1, %v17513_v52 }
 0x1d4   : > { %13516 = vmatprep.mubr.msk.f32.mxu0 %vm16722_vm0, %v21596_v4 }
 0x1d7   : > { %13517 = vmatmul.mubr.msk.f32.gmra.mrb[72].mxu0 %vm657_vm1, %v635_v53 }
 0x1d8   : > { %13519 = vmatprep.mubr.msk.f32.mxu0 %vm16722_vm0, %v21596_v4 }
 0x1db   : > { %13520 = vmatmul.mubr.msk.f32.gmra.mrb[74].mxu0 %vm657_vm1, %v636_v54 }
 0x1dc   : > { %13522 = vmatprep.mubr.msk.f32.mxu0 %vm16722_vm0, %v21596_v4 }
 0x1df   : > { %13523 = vmatmul.mubr.msk.f32.gmra.mrb[76].mxu0 %vm657_vm1, %v637_v55 }
 0x1e0   : > { %13525 = vmatprep.mubr.msk.f32.mxu0 %vm16722_vm0, %v21596_v4 }
 0x1e3   : > { %13526 = vmatmul.mubr.msk.f32.gmra.mrb[78].mxu0 %vm657_vm1, %v638_v56 }
 0x1e4   : > { %13528 = vmatprep.mubr.msk.f32.mxu0 %vm16722_vm0, %v21596_v4 }
 0x1e7   : > { %13529 = vmatmul.mubr.msk.f32.gmra.mrb[80].mxu0 %vm657_vm1, %v639_v57 }
 0x1e8   : > { %13531 = vmatprep.mubr.msk.f32.mxu0 %vm16722_vm0, %v21596_v4 }
 0x1eb   : > { %13532 = vmatmul.mubr.msk.f32.gmra.mrb[82].mxu0 %vm657_vm1, %v640_v58  ;;  %v14676_v58 = vpack.c.bf16 %v1849_v21, %v1848_v20 }
 0x1ec   : > { %13534 = vmatprep.mubr.msk.f32.mxu0 %vm16722_vm0, %v21596_v4 }
 0x1ef   : > { %13535 = vmatmul.mubr.msk.f32.gmra.mrb[84].mxu0 %vm657_vm1, %v641_v59 }
 0x1f0   : > { %13537 = vmatprep.mubr.msk.f32.mxu0 %vm16722_vm0, %v21596_v4 }
 0x1f3   : > { %13538 = vmatmul.mubr.msk.f32.gmra.mrb[86].mxu0 %vm657_vm1, %v642_v60  ;;  %v2912_v60 = vld [vmem:[#allocation3 + $0x20] sm:$0xff] }
 0x1f4   : > { %13540 = vmatprep.mubr.msk.f32.mxu0 %vm16722_vm0, %v21596_v4 }
 0x1f7   : > { %13541 = vmatmul.mubr.msk.f32.gmra.mrb[88].mxu0 %vm657_vm1, %v643_v61  ;;  %v2913_v61 = vld [vmem:[#allocation3 + $0x28] sm:$0xff] }
 0x1f8   : > { %13543 = vmatprep.mubr.msk.f32.mxu0 %vm16722_vm0, %v21596_v4 }
 0x1fb   : > { %13544 = vmatmul.mubr.msk.f32.gmra.mrb[90].mxu0 %vm657_vm1, %v644_v62 }
 0x1fc   : > { %13546 = vmatprep.mubr.msk.f32.mxu0 %vm16722_vm0, %v21596_v4 }
 0x1ff   : > { %13547 = vmatmul.mubr.msk.f32.gmra.mrb[92].mxu0 %vm657_vm1, %v645_v63 }
 0x200   : > { %13549 = vmatprep.mubr.msk.f32.mxu0 %vm16722_vm0, %v21596_v4 }
 0x203   : > { %13550 = vmatmul.mubr.msk.f32.gmra.mrb[94].mxu0 %vm657_vm1, %v646_v0 }
 0x204   : > { %13552 = vmatprep.mubr.msk.f32.mxu0 %vm16722_vm0, %v21596_v4 }
 0x207   : > { %13553 = vmatmul.mubr.msk.f32.gmra.mrb[96].mxu0 %vm657_vm1, %v647_v1 }
 0x208   : > { %13571 = vmatprep.mubr.msk.f32.mxu0 %vm16722_vm0, %v21596_v4 }
 0x21a   : > { %v871_v5 = vpop.f32.mrb[0].mxu0 }
 0x21b   : > { %v872_v9 = vadd.f32 %v17597_v3, %v871_v5  ;;  %v13410_v10 = vpop.f32.mrb[1].mxu0 }
 0x21d   : > { %v1122_v15 = vmul.f32 %v17599_v6, %v872_v9  ;;  %v14691_v9 = vpack.c.bf16 %v2913_v61, %v2912_v60 }
 0x21e   : > { %v876_v53 = vpop.f32.mrb[2].mxu0 }
 0x21f   : > { %v1178_v54 = vadd.f32 %v17602_v13, %v1122_v15  ;;  %v877_v55 = vadd.f32 %v17597_v3, %v876_v53  ;;  %v13413_v56 = vpop.f32.mrb[3].mxu0 }
 0x221   : > { %v1276_v57 = vmul.f32 0.01, %v1178_v54  ;;  %vm1227_vm3 = vcmp.ge.f32.partialorder %v1178_v54, 0.0  ;;  %v1123_v59 = vmul.f32 %v17599_v6, %v877_v55 }
 0x222   : > { %v881_v62 = vpop.f32.mrb[4].mxu0 }
 0x223   : > { %v1325_v63 = vsel %vm1227_vm3, %v1178_v54, %v1276_v57  ;;  %v1179_v0 = vadd.f32 %v17602_v13, %v1123_v59  ;;  %v882_v1 = vadd.f32 %v17597_v3, %v881_v62  ;;  %v13416_v5 = vpop.f32.mrb[5].mxu0 }
 0x224   : > { %13572 = vmatmul.mubr.msk.f32.vlgmr.msra.gmra.mrb[98].mxu0 %vm1389_vm2, %v1325_v63 }
 0x225   : > { %14677 = vmatpush3.bf16.msra.mxu0 %v14676_v58  ;;  %13722 = vmatprep.mubr.msk.f32.mxu0 %vm16722_vm0, %v21596_v4  ;;  %v1124_v10 = vmul.f32 %v17599_v6, %v882_v1  ;;  %vm1228_vm4 = vcmp.ge.f32.partialorder %v1179_v0, 0.0  ;;  %v1277_v15 = vmul.f32 0.01, %v1179_v0 }
 0x226   : > { %14690 = vmatprep.subr.bf16.mxu0 %v21594_v2  ;;  %v886_v20 = vpop.f32.mrb[6].mxu0 }
 0x227   : > { %v1180_v21 = vadd.f32 %v17602_v13, %v1124_v10  ;;  %v887_v53 = vadd.f32 %v17597_v3, %v886_v20  ;;  %v1326_v54 = vsel %vm1228_vm4, %v1179_v0, %v1277_v15  ;;  %v13419_v55 = vpop.f32.mrb[7].mxu0 }
 0x228   : > { %13723 = vmatmul.mubr.msk.f32.vlgmr.msra.gmra.mrb[100].mxu0 %vm657_vm1, %v17175_v8  ;;  %13575 = vmatmul.mubr.msk.f32.vlgmr.msra.gmra.mrb[0].mxu1 %vm1389_vm2, %v1326_v54 }
 0x229   : > { %14692 = vmatpush3.bf16.msra.mxu0 %v14691_v9  ;;  %13725 = vmatprep.mubr.msk.f32.mxu0 %vm16722_vm0, %v21596_v4  ;;  %v1125_v56 = vmul.f32 %v17599_v6, %v887_v53  ;;  %vm1229_vm5 = vcmp.ge.f32.partialorder %v1180_v21, 0.0  ;;  %v1278_v57 = vmul.f32 0.01, %v1180_v21 }
 0x22a   : > { %v891_v58 = vpop.f32.mrb[8].mxu0  ;;  %13577 = vmatprep.mubr.msk.f32.mxu1 %vm16722_vm0, %v21596_v4  ;;  %14680 = vmatpush3.bf16.msra.mxu1 %v17167_v7 }
 0x22b   : > { %v1181_v59 = vadd.f32 %v17602_v13, %v1125_v56  ;;  %v892_v8 = vadd.f32 %v17597_v3, %v891_v58  ;;  %v1327_v60 = vsel %vm1229_vm5, %v1180_v21, %v1278_v57  ;;  %v13422_v61 = vpop.f32.mrb[9].mxu0  ;;  %14681 = vmatprep.subr.bf16.mxu1 %v21594_v2  ;;  %14705 = vmatprep.subr.bf16.mxu0 %v21594_v2 }
 0x22c   : > { %13726 = vmatmul.mubr.msk.f32.gmra.mrb[102].mxu0 %vm657_vm1, %v17188_v11  ;;  %13578 = vmatmul.mubr.msk.f32.gmra.mrb[2].mxu1 %vm1389_vm2, %v1327_v60 }
 0x22d   : > { %13728 = vmatprep.mubr.msk.f32.mxu0 %vm16722_vm0, %v21596_v4  ;;  %v1126_v62 = vmul.f32 %v17599_v6, %v892_v8  ;;  %13580 = vmatprep.mubr.msk.f32.mxu1 %vm16722_vm0, %v21596_v4  ;;  %vm1230_vm6 = vcmp.ge.f32.partialorder %v1181_v59, 0.0  ;;  %v1279_v63 = vmul.f32 0.01, %v1181_v59 }
 0x22e   : > { %v896_v0 = vpop.f32.mrb[10].mxu0  ;;  %14683 = vmatpush3.bf16.msra.mxu1 %v17190_v12 }
 0x22f   : > { %v1182_v1 = vadd.f32 %v17602_v13, %v1126_v62  ;;  %v897_v5 = vadd.f32 %v17597_v3, %v896_v0  ;;  %v1328_v11 = vsel %vm1230_vm6, %v1181_v59, %v1279_v63  ;;  %v13425_v9 = vpop.f32.mrb[11].mxu0  ;;  %14684 = vmatprep.subr.bf16.mxu1 %v21594_v2 }
 0x230   : > { %13729 = vmatmul.mubr.msk.f32.gmra.mrb[104].mxu0 %vm657_vm1, %v17202_v14  ;;  %13581 = vmatmul.mubr.msk.f32.gmra.mrb[4].mxu1 %vm1389_vm2, %v1328_v11 }
 0x231   : > { %13731 = vmatprep.mubr.msk.f32.mxu0 %vm16722_vm0, %v21596_v4  ;;  %v1127_v10 = vmul.f32 %v17599_v6, %v897_v5  ;;  %13583 = vmatprep.mubr.msk.f32.mxu1 %vm16722_vm0, %v21596_v4  ;;  %vm1231_vm7 = vcmp.ge.f32.partialorder %v1182_v1, 0.0  ;;  %v1280_v15 = vmul.f32 0.01, %v1182_v1 }
 0x232   : > { %v901_v20 = vpop.f32.mrb[12].mxu0  ;;  %14686 = vmatpush3.bf16.msra.mxu1 %v17206_v16 }
 0x233   : > { %v1183_v21 = vadd.f32 %v17602_v13, %v1127_v10  ;;  %v902_v53 = vadd.f32 %v17597_v3, %v901_v20  ;;  %v1329_v14 = vsel %vm1231_vm7, %v1182_v1, %v1280_v15  ;;  %v13428_v54 = vpop.f32.mrb[13].mxu0  ;;  %14687 = vmatprep.subr.bf16.mxu1 %v21594_v2 }
 0x234   : > { %13732 = vmatmul.mubr.msk.f32.gmra.mrb[106].mxu0 %vm657_vm1, %v17216_v17  ;;  %13584 = vmatmul.mubr.msk.f32.gmra.mrb[6].mxu1 %vm1389_vm2, %v1329_v14 }
 0x235   : > { %13734 = vmatprep.mubr.msk.f32.mxu0 %vm16722_vm0, %v21596_v4  ;;  %v1128_v55 = vmul.f32 %v17599_v6, %v902_v53  ;;  %13586 = vmatprep.mubr.msk.f32.mxu1 %vm16722_vm0, %v21596_v4  ;;  %vm1232_vm8 = vcmp.ge.f32.partialorder %v1183_v21, 0.0  ;;  %v1281_v56 = vmul.f32 0.01, %v1183_v21 }
 0x236   : > { %v906_v57 = vpop.f32.mrb[14].mxu0  ;;  %14689 = vmatpush3.bf16.msra.mxu1 %v17248_v23 }
 0x237   : > { %v1184_v58 = vadd.f32 %v17602_v13, %v1128_v55  ;;  %v907_v59 = vadd.f32 %v17597_v3, %v906_v57  ;;  %v1330_v17 = vsel %vm1232_vm8, %v1183_v21, %v1281_v56  ;;  %v13431_v8 = vpop.f32.mrb[15].mxu0  ;;  %14693 = vmatprep.subr.bf16.mxu1 %v21594_v2 }
 0x238   : > { %13735 = vmatmul.mubr.msk.f32.gmra.mrb[108].mxu0 %vm657_vm1, %v17228_v18  ;;  %13587 = vmatmul.mubr.msk.f32.gmra.mrb[8].mxu1 %vm1389_vm2, %v1330_v17 }
 0x239   : > { %13737 = vmatprep.mubr.msk.f32.mxu0 %vm16722_vm0, %v21596_v4  ;;  %v1129_v60 = vmul.f32 %v17599_v6, %v907_v59  ;;  %13589 = vmatprep.mubr.msk.f32.mxu1 %vm16722_vm0, %v21596_v4  ;;  %vm1233_vm9 = vcmp.ge.f32.partialorder %v1184_v58, 0.0  ;;  %v1282_v61 = vmul.f32 0.01, %v1184_v58 }
 0x23a   : > { %v911_v62 = vpop.f32.mrb[16].mxu0 }
 0x23b   : > { %v1185_v63 = vadd.f32 %v17602_v13, %v1129_v60  ;;  %v912_v0 = vadd.f32 %v17597_v3, %v911_v62  ;;  %v1331_v1 = vsel %vm1233_vm9, %v1184_v58, %v1282_v61  ;;  %v13434_v5 = vpop.f32.mrb[17].mxu0 }
 0x23c   : > { %13738 = vmatmul.mubr.msk.f32.gmra.mrb[110].mxu0 %vm657_vm1, %v17237_v19  ;;  %13590 = vmatmul.mubr.msk.f32.gmra.mrb[10].mxu1 %vm1389_vm2, %v1331_v1 }
 0x23d   : > { %13740 = vmatprep.mubr.msk.f32.mxu0 %vm16722_vm0, %v21596_v4  ;;  %v1130_v18 = vmul.f32 %v17599_v6, %v912_v0  ;;  %13592 = vmatprep.mubr.msk.f32.mxu1 %vm16722_vm0, %v21596_v4  ;;  %vm1234_vm10 = vcmp.ge.f32.partialorder %v1185_v63, 0.0  ;;  %v1283_v11 = vmul.f32 0.01, %v1185_v63 }
 0x23e   : > { %v916_v9 = vpop.f32.mrb[18].mxu0 }
 0x23f   : > { %v1186_v10 = vadd.f32 %v17602_v13, %v1130_v18  ;;  %v917_v15 = vadd.f32 %v17597_v3, %v916_v9  ;;  %v1332_v20 = vsel %vm1234_vm10, %v1185_v63, %v1283_v11  ;;  %v13437_v21 = vpop.f32.mrb[19].mxu0 }
 0x240   : > { %13741 = vmatmul.mubr.msk.f32.gmra.mrb[112].mxu0 %vm657_vm1, %v17246_v22  ;;  %13593 = vmatmul.mubr.msk.f32.gmra.mrb[12].mxu1 %vm1389_vm2, %v1332_v20 }
 0x241   : > { %13743 = vmatprep.mubr.msk.f32.mxu0 %vm16722_vm0, %v21596_v4  ;;  %v1131_v19 = vmul.f32 %v17599_v6, %v917_v15  ;;  %13595 = vmatprep.mubr.msk.f32.mxu1 %vm16722_vm0, %v21596_v4  ;;  %vm1235_vm11 = vcmp.ge.f32.partialorder %v1186_v10, 0.0  ;;  %v1284_v53 = vmul.f32 0.01, %v1186_v10 }
 0x242   : > { %v921_v14 = vpop.f32.mrb[20].mxu0 }
 0x243   : > { %v1187_v54 = vadd.f32 %v17602_v13, %v1131_v19  ;;  %v922_v55 = vadd.f32 %v17597_v3, %v921_v14  ;;  %v1333_v56 = vsel %vm1235_vm11, %v1186_v10, %v1284_v53  ;;  %v13440_v57 = vpop.f32.mrb[21].mxu0 }
 0x244   : > { %13744 = vmatmul.mubr.msk.f32.gmra.mrb[114].mxu0 %vm657_vm1, %v17260_v24  ;;  %13596 = vmatmul.mubr.msk.f32.gmra.mrb[14].mxu1 %vm1389_vm2, %v1333_v56 }
 0x245   : > { %13746 = vmatprep.mubr.msk.f32.mxu0 %vm16722_vm0, %v21596_v4  ;;  %v1132_v22 = vmul.f32 %v17599_v6, %v922_v55  ;;  %13598 = vmatprep.mubr.msk.f32.mxu1 %vm16722_vm0, %v21596_v4  ;;  %vm1236_vm12 = vcmp.ge.f32.partialorder %v1187_v54, 0.0  ;;  %v1285_v58 = vmul.f32 0.01, %v1187_v54 }
 0x246   : > { %v926_v59 = vpop.f32.mrb[22].mxu0 }
 0x247   : > { %v1188_v17 = vadd.f32 %v17602_v13, %v1132_v22  ;;  %v927_v8 = vadd.f32 %v17597_v3, %v926_v59  ;;  %v1334_v60 = vsel %vm1236_vm12, %v1187_v54, %v1285_v58  ;;  %v13443_v61 = vpop.f32.mrb[23].mxu0 }
 0x248   : > { %13747 = vmatmul.mubr.msk.f32.gmra.mrb[116].mxu0 %vm657_vm1, %v17270_v25  ;;  %13599 = vmatmul.mubr.msk.f32.gmra.mrb[16].mxu1 %vm1389_vm2, %v1334_v60 }
 0x249   : > { %13749 = vmatprep.mubr.msk.f32.mxu0 %vm16722_vm0, %v21596_v4  ;;  %v1133_v24 = vmul.f32 %v17599_v6, %v927_v8  ;;  %13601 = vmatprep.mubr.msk.f32.mxu1 %vm16722_vm0, %v21596_v4  ;;  %vm1237_vm13 = vcmp.ge.f32.partialorder %v1188_v17, 0.0  ;;  %v1286_v62 = vmul.f32 0.01, %v1188_v17 }
 0x24a   : > { %v931_v63 = vpop.f32.mrb[24].mxu0 }
 0x24b   : > { %v1189_v0 = vadd.f32 %v17602_v13, %v1133_v24  ;;  %v932_v1 = vadd.f32 %v17597_v3, %v931_v63  ;;  %v1335_v5 = vsel %vm1237_vm13, %v1188_v17, %v1286_v62  ;;  %v13446_v18 = vpop.f32.mrb[25].mxu0 }
 0x24c   : > { %13750 = vmatmul.mubr.msk.f32.gmra.mrb[118].mxu0 %vm657_vm1, %v17279_v26  ;;  %13602 = vmatmul.mubr.msk.f32.gmra.mrb[18].mxu1 %vm1389_vm2, %v1335_v5 }
 0x24d   : > { %13752 = vmatprep.mubr.msk.f32.mxu0 %vm16722_vm0, %v21596_v4  ;;  %v1134_v25 = vmul.f32 %v17599_v6, %v932_v1  ;;  %13604 = vmatprep.mubr.msk.f32.mxu1 %vm16722_vm0, %v21596_v4  ;;  %vm1238_vm14 = vcmp.ge.f32.partialorder %v1189_v0, 0.0  ;;  %v1287_v11 = vmul.f32 0.01, %v1189_v0 }
 0x24e   : > { %v936_v9 = vpop.f32.mrb[26].mxu0 }
 0x24f   : > { %v1190_v10 = vadd.f32 %v17602_v13, %v1134_v25  ;;  %v937_v15 = vadd.f32 %v17597_v3, %v936_v9  ;;  %v1336_v20 = vsel %vm1238_vm14, %v1189_v0, %v1287_v11  ;;  %v13449_v21 = vpop.f32.mrb[27].mxu0 }
 0x250   : > { %13753 = vmatmul.mubr.msk.f32.gmra.mrb[120].mxu0 %vm657_vm1, %v17288_v27  ;;  %13605 = vmatmul.mubr.msk.f32.gmra.mrb[20].mxu1 %vm1389_vm2, %v1336_v20 }
 0x251   : > { %13755 = vmatprep.mubr.msk.f32.mxu0 %vm16722_vm0, %v21596_v4  ;;  %v1135_v26 = vmul.f32 %v17599_v6, %v937_v15  ;;  %13607 = vmatprep.mubr.msk.f32.mxu1 %vm16722_vm0, %v21596_v4  ;;  %vm1239_vm15 = vcmp.ge.f32.partialorder %v1190_v10, 0.0  ;;  %v1288_v19 = vmul.f32 0.01, %v1190_v10 }
 0x252   : > { %v941_v53 = vpop.f32.mrb[28].mxu0 }
 0x253   : > { %v1191_v14 = vadd.f32 %v17602_v13, %v1135_v26  ;;  %v942_v54 = vadd.f32 %v17597_v3, %v941_v53  ;;  %v1337_v55 = vsel %vm1239_vm15, %v1190_v10, %v1288_v19  ;;  %v13452_v56 = vpop.f32.mrb[29].mxu0 }
 0x254   : > { %13756 = vmatmul.mubr.msk.f32.gmra.mrb[122].mxu0 %vm657_vm1, %v17297_v28  ;;  %13608 = vmatmul.mubr.msk.f32.gmra.mrb[22].mxu1 %vm1389_vm2, %v1337_v55 }
 0x255   : > { %13758 = vmatprep.mubr.msk.f32.mxu0 %vm16722_vm0, %v21596_v4  ;;  %v1136_v27 = vmul.f32 %v17599_v6, %v942_v54  ;;  %13610 = vmatprep.mubr.msk.f32.mxu1 %vm16722_vm0, %v21596_v4  ;;  %vm1240_vm3 = vcmp.ge.f32.partialorder %v1191_v14, 0.0  ;;  %v1289_v57 = vmul.f32 0.01, %v1191_v14 }
 0x256   : > { %v946_v22 = vpop.f32.mrb[30].mxu0 }
 0x257   : > { %v1192_v58 = vadd.f32 %v17602_v13, %v1136_v27  ;;  %v947_v59 = vadd.f32 %v17597_v3, %v946_v22  ;;  %v1338_v17 = vsel %vm1240_vm3, %v1191_v14, %v1289_v57  ;;  %v13455_v8 = vpop.f32.mrb[31].mxu0 }
 0x258   : > { %13759 = vmatmul.mubr.msk.f32.gmra.mrb[124].mxu0 %vm657_vm1, %v17306_v29  ;;  %13611 = vmatmul.mubr.msk.f32.gmra.mrb[24].mxu1 %vm1389_vm2, %v1338_v17 }
 0x259   : > { %13761 = vmatprep.mubr.msk.f32.mxu0 %vm16722_vm0, %v21596_v4  ;;  %v1137_v28 = vmul.f32 %v17599_v6, %v947_v59  ;;  %13613 = vmatprep.mubr.msk.f32.mxu1 %vm16722_vm0, %v21596_v4  ;;  %vm1241_vm4 = vcmp.ge.f32.partialorder %v1192_v58, 0.0  ;;  %v1290_v60 = vmul.f32 0.01, %v1192_v58 }
 0x25a   : > { %v951_v61 = vpop.f32.mrb[32].mxu0 }
 0x25b   : > { %v1193_v24 = vadd.f32 %v17602_v13, %v1137_v28  ;;  %v952_v62 = vadd.f32 %v17597_v3, %v951_v61  ;;  %v1339_v63 = vsel %vm1241_vm4, %v1192_v58, %v1290_v60  ;;  %v13458_v0 = vpop.f32.mrb[33].mxu0 }
 0x25c   : > { %13762 = vmatmul.mubr.msk.f32.gmra.mrb[126].mxu0 %vm657_vm1, %v17315_v30  ;;  %13614 = vmatmul.mubr.msk.f32.gmra.mrb[26].mxu1 %vm1389_vm2, %v1339_v63 }
 0x25d   : > { %13764 = vmatprep.mubr.msk.f32.mxu0 %vm16722_vm0, %v21596_v4  ;;  %v1138_v29 = vmul.f32 %v17599_v6, %v952_v62  ;;  %13616 = vmatprep.mubr.msk.f32.mxu1 %vm16722_vm0, %v21596_v4  ;;  %vm1242_vm5 = vcmp.ge.f32.partialorder %v1193_v24, 0.0  ;;  %v1291_v1 = vmul.f32 0.01, %v1193_v24 }
 0x25e   : > { %v956_v5 = vpop.f32.mrb[34].mxu0 }
 0x25f   : > { %v1194_v18 = vadd.f32 %v17602_v13, %v1138_v29  ;;  %v957_v25 = vadd.f32 %v17597_v3, %v956_v5  ;;  %v1340_v11 = vsel %vm1242_vm5, %v1193_v24, %v1291_v1  ;;  %v13461_v9 = vpop.f32.mrb[35].mxu0 }
 0x260   : > { %13765 = vmatmul.mubr.msk.f32.gmra.mrb[128].mxu0 %vm657_vm1, %v17324_v31  ;;  %13617 = vmatmul.mubr.msk.f32.gmra.mrb[28].mxu1 %vm1389_vm2, %v1340_v11 }
 0x261   : > { %13767 = vmatprep.mubr.msk.f32.mxu0 %vm16722_vm0, %v21596_v4  ;;  %v1139_v30 = vmul.f32 %v17599_v6, %v957_v25  ;;  %13619 = vmatprep.mubr.msk.f32.mxu1 %vm16722_vm0, %v21596_v4  ;;  %vm1243_vm6 = vcmp.ge.f32.partialorder %v1194_v18, 0.0  ;;  %v1292_v10 = vmul.f32 0.01, %v1194_v18 }
 0x262   : > { %v961_v15 = vpop.f32.mrb[36].mxu0 }
 0x263   : > { %v1195_v20 = vadd.f32 %v17602_v13, %v1139_v30  ;;  %v962_v21 = vadd.f32 %v17597_v3, %v961_v15  ;;  %v1341_v26 = vsel %vm1243_vm6, %v1194_v18, %v1292_v10  ;;  %v13464_v19 = vpop.f32.mrb[37].mxu0 }
 0x264   : > { %13768 = vmatmul.mubr.msk.f32.gmra.mrb[130].mxu0 %vm657_vm1, %v17333_v32  ;;  %13620 = vmatmul.mubr.msk.f32.gmra.mrb[30].mxu1 %vm1389_vm2, %v1341_v26 }
 0x265   : > { %13770 = vmatprep.mubr.msk.f32.mxu0 %vm16722_vm0, %v21596_v4  ;;  %v1140_v31 = vmul.f32 %v17599_v6, %v962_v21  ;;  %13622 = vmatprep.mubr.msk.f32.mxu1 %vm16722_vm0, %v21596_v4  ;;  %vm1244_vm7 = vcmp.ge.f32.partialorder %v1195_v20, 0.0  ;;  %v1293_v53 = vmul.f32 0.01, %v1195_v20 }
 0x266   : > { %v966_v14 = vpop.f32.mrb[38].mxu0 }
 0x267   : > { %v1196_v54 = vadd.f32 %v17602_v13, %v1140_v31  ;;  %v967_v55 = vadd.f32 %v17597_v3, %v966_v14  ;;  %v1342_v56 = vsel %vm1244_vm7, %v1195_v20, %v1293_v53  ;;  %v13467_v27 = vpop.f32.mrb[39].mxu0 }
 0x268   : > { %13771 = vmatmul.mubr.msk.f32.gmra.mrb[132].mxu0 %vm657_vm1, %v17342_v33  ;;  %13623 = vmatmul.mubr.msk.f32.gmra.mrb[32].mxu1 %vm1389_vm2, %v1342_v56 }
 0x269   : > { %13773 = vmatprep.mubr.msk.f32.mxu0 %vm16722_vm0, %v21596_v4  ;;  %v1141_v32 = vmul.f32 %v17599_v6, %v967_v55  ;;  %13625 = vmatprep.mubr.msk.f32.mxu1 %vm16722_vm0, %v21596_v4  ;;  %vm1245_vm8 = vcmp.ge.f32.partialorder %v1196_v54, 0.0  ;;  %v1294_v57 = vmul.f32 0.01, %v1196_v54 }
 0x26a   : > { %v971_v22 = vpop.f32.mrb[40].mxu0 }
 0x26b   : > { %v1197_v58 = vadd.f32 %v17602_v13, %v1141_v32  ;;  %v972_v59 = vadd.f32 %v17597_v3, %v971_v22  ;;  %v1343_v17 = vsel %vm1245_vm8, %v1196_v54, %v1294_v57  ;;  %v13470_v8 = vpop.f32.mrb[41].mxu0 }
 0x26c   : > { %13774 = vmatmul.mubr.msk.f32.gmra.mrb[134].mxu0 %vm657_vm1, %v17351_v34  ;;  %13626 = vmatmul.mubr.msk.f32.gmra.mrb[34].mxu1 %vm1389_vm2, %v1343_v17 }
 0x26d   : > { %13776 = vmatprep.mubr.msk.f32.mxu0 %vm16722_vm0, %v21596_v4  ;;  %v1142_v33 = vmul.f32 %v17599_v6, %v972_v59  ;;  %13628 = vmatprep.mubr.msk.f32.mxu1 %vm16722_vm0, %v21596_v4  ;;  %vm1246_vm9 = vcmp.ge.f32.partialorder %v1197_v58, 0.0  ;;  %v1295_v28 = vmul.f32 0.01, %v1197_v58 }
 0x26e   : > { %v976_v60 = vpop.f32.mrb[42].mxu0 }
 0x26f   : > { %v1198_v61 = vadd.f32 %v17602_v13, %v1142_v33  ;;  %v977_v24 = vadd.f32 %v17597_v3, %v976_v60  ;;  %v1344_v62 = vsel %vm1246_vm9, %v1197_v58, %v1295_v28  ;;  %v13473_v63 = vpop.f32.mrb[43].mxu0 }
 0x270   : > { %13777 = vmatmul.mubr.msk.f32.gmra.mrb[136].mxu0 %vm657_vm1, %v17360_v35  ;;  %13629 = vmatmul.mubr.msk.f32.gmra.mrb[36].mxu1 %vm1389_vm2, %v1344_v62 }
 0x271   : > { %13779 = vmatprep.mubr.msk.f32.mxu0 %vm16722_vm0, %v21596_v4  ;;  %v1143_v34 = vmul.f32 %v17599_v6, %v977_v24  ;;  %13631 = vmatprep.mubr.msk.f32.mxu1 %vm16722_vm0, %v21596_v4  ;;  %vm1247_vm10 = vcmp.ge.f32.partialorder %v1198_v61, 0.0  ;;  %v1296_v0 = vmul.f32 0.01, %v1198_v61 }
 0x272   : > { %v981_v29 = vpop.f32.mrb[44].mxu0 }
 0x273   : > { %v1199_v1 = vadd.f32 %v17602_v13, %v1143_v34  ;;  %v982_v5 = vadd.f32 %v17597_v3, %v981_v29  ;;  %v1345_v18 = vsel %vm1247_vm10, %v1198_v61, %v1296_v0  ;;  %v13476_v25 = vpop.f32.mrb[45].mxu0 }
 0x274   : > { %13780 = vmatmul.mubr.msk.f32.gmra.mrb[138].mxu0 %vm657_vm1, %v17369_v36  ;;  %13632 = vmatmul.mubr.msk.f32.gmra.mrb[38].mxu1 %vm1389_vm2, %v1345_v18 }
 0x275   : > { %13782 = vmatprep.mubr.msk.f32.mxu0 %vm16722_vm0, %v21596_v4  ;;  %v1144_v35 = vmul.f32 %v17599_v6, %v982_v5  ;;  %13634 = vmatprep.mubr.msk.f32.mxu1 %vm16722_vm0, %v21596_v4  ;;  %vm1248_vm11 = vcmp.ge.f32.partialorder %v1199_v1, 0.0  ;;  %v1297_v11 = vmul.f32 0.01, %v1199_v1 }
 0x276   : > { %v986_v9 = vpop.f32.mrb[46].mxu0 }
 0x277   : > { %v1200_v30 = vadd.f32 %v17602_v13, %v1144_v35  ;;  %v987_v10 = vadd.f32 %v17597_v3, %v986_v9  ;;  %v1346_v15 = vsel %vm1248_vm11, %v1199_v1, %v1297_v11  ;;  %v13479_v20 = vpop.f32.mrb[47].mxu0 }
 0x278   : > { %13783 = vmatmul.mubr.msk.f32.gmra.mrb[140].mxu0 %vm657_vm1, %v17378_v37  ;;  %13635 = vmatmul.mubr.msk.f32.gmra.mrb[40].mxu1 %vm1389_vm2, %v1346_v15 }
 0x279   : > { %13785 = vmatprep.mubr.msk.f32.mxu0 %vm16722_vm0, %v21596_v4  ;;  %v1145_v36 = vmul.f32 %v17599_v6, %v987_v10  ;;  %13637 = vmatprep.mubr.msk.f32.mxu1 %vm16722_vm0, %v21596_v4  ;;  %vm1249_vm12 = vcmp.ge.f32.partialorder %v1200_v30, 0.0  ;;  %v1298_v21 = vmul.f32 0.01, %v1200_v30 }
 0x27a   : > { %v991_v26 = vpop.f32.mrb[48].mxu0 }
 0x27b   : > { %v1201_v19 = vadd.f32 %v17602_v13, %v1145_v36  ;;  %v992_v31 = vadd.f32 %v17597_v3, %v991_v26  ;;  %v1347_v53 = vsel %vm1249_vm12, %v1200_v30, %v1298_v21  ;;  %v13482_v14 = vpop.f32.mrb[49].mxu0 }
 0x27c   : > { %13786 = vmatmul.mubr.msk.f32.gmra.mrb[142].mxu0 %vm657_vm1, %v17387_v38  ;;  %13638 = vmatmul.mubr.msk.f32.gmra.mrb[42].mxu1 %vm1389_vm2, %v1347_v53 }
 0x27d   : > { %13788 = vmatprep.mubr.msk.f32.mxu0 %vm16722_vm0, %v21596_v4  ;;  %v1146_v37 = vmul.f32 %v17599_v6, %v992_v31  ;;  %13640 = vmatprep.mubr.msk.f32.mxu1 %vm16722_vm0, %v21596_v4  ;;  %vm1250_vm13 = vcmp.ge.f32.partialorder %v1201_v19, 0.0  ;;  %v1299_v54 = vmul.f32 0.01, %v1201_v19 }
 0x27e   : > { %v996_v55 = vpop.f32.mrb[50].mxu0 }
 0x27f   : > { %v1202_v56 = vadd.f32 %v17602_v13, %v1146_v37  ;;  %v997_v27 = vadd.f32 %v17597_v3, %v996_v55  ;;  %v1348_v32 = vsel %vm1250_vm13, %v1201_v19, %v1299_v54  ;;  %v13485_v57 = vpop.f32.mrb[51].mxu0 }
 0x280   : > { %13789 = vmatmul.mubr.msk.f32.gmra.mrb[144].mxu0 %vm657_vm1, %v17396_v39  ;;  %13641 = vmatmul.mubr.msk.f32.gmra.mrb[44].mxu1 %vm1389_vm2, %v1348_v32 }
 0x281   : > { %13791 = vmatprep.mubr.msk.f32.mxu0 %vm16722_vm0, %v21596_v4  ;;  %v1147_v38 = vmul.f32 %v17599_v6, %v997_v27  ;;  %13643 = vmatprep.mubr.msk.f32.mxu1 %vm16722_vm0, %v21596_v4  ;;  %vm1251_vm14 = vcmp.ge.f32.partialorder %v1202_v56, 0.0  ;;  %v1300_v22 = vmul.f32 0.01, %v1202_v56 }
 0x282   : > { %v1001_v58 = vpop.f32.mrb[52].mxu0 }
 0x283   : > { %v1203_v59 = vadd.f32 %v17602_v13, %v1147_v38  ;;  %v1002_v17 = vadd.f32 %v17597_v3, %v1001_v58  ;;  %v1349_v8 = vsel %vm1251_vm14, %v1202_v56, %v1300_v22  ;;  %v13488_v33 = vpop.f32.mrb[53].mxu0 }
 0x284   : > { %13792 = vmatmul.mubr.msk.f32.gmra.mrb[146].mxu0 %vm657_vm1, %v17405_v40  ;;  %13644 = vmatmul.mubr.msk.f32.gmra.mrb[46].mxu1 %vm1389_vm2, %v1349_v8 }
 0x285   : > { %13794 = vmatprep.mubr.msk.f32.mxu0 %vm16722_vm0, %v21596_v4  ;;  %v1148_v39 = vmul.f32 %v17599_v6, %v1002_v17  ;;  %13646 = vmatprep.mubr.msk.f32.mxu1 %vm16722_vm0, %v21596_v4  ;;  %vm1252_vm15 = vcmp.ge.f32.partialorder %v1203_v59, 0.0  ;;  %v1301_v28 = vmul.f32 0.01, %v1203_v59 }
 0x286   : > { %v1006_v60 = vpop.f32.mrb[54].mxu0 }
 0x287   : > { %v1204_v61 = vadd.f32 %v17602_v13, %v1148_v39  ;;  %v1007_v24 = vadd.f32 %v17597_v3, %v1006_v60  ;;  %v1350_v62 = vsel %vm1252_vm15, %v1203_v59, %v1301_v28  ;;  %v13491_v63 = vpop.f32.mrb[55].mxu0 }
 0x288   : > { %13795 = vmatmul.mubr.msk.f32.gmra.mrb[148].mxu0 %vm657_vm1, %v17414_v41  ;;  %13647 = vmatmul.mubr.msk.f32.gmra.mrb[48].mxu1 %vm1389_vm2, %v1350_v62 }
 0x289   : > { %13797 = vmatprep.mubr.msk.f32.mxu0 %vm16722_vm0, %v21596_v4  ;;  %v1149_v40 = vmul.f32 %v17599_v6, %v1007_v24  ;;  %13649 = vmatprep.mubr.msk.f32.mxu1 %vm16722_vm0, %v21596_v4  ;;  %vm1253_vm3 = vcmp.ge.f32.partialorder %v1204_v61, 0.0  ;;  %v1302_v34 = vmul.f32 0.01, %v1204_v61 }
 0x28a   : > { %v1011_v0 = vpop.f32.mrb[56].mxu0 }
 0x28b   : > { %v1205_v29 = vadd.f32 %v17602_v13, %v1149_v40  ;;  %v1012_v1 = vadd.f32 %v17597_v3, %v1011_v0  ;;  %v1351_v5 = vsel %vm1253_vm3, %v1204_v61, %v1302_v34  ;;  %v13494_v18 = vpop.f32.mrb[57].mxu0 }
 0x28c   : > { %13798 = vmatmul.mubr.msk.f32.gmra.mrb[150].mxu0 %vm657_vm1, %v17423_v42  ;;  %13650 = vmatmul.mubr.msk.f32.gmra.mrb[50].mxu1 %vm1389_vm2, %v1351_v5 }
 0x28d   : > { %13800 = vmatprep.mubr.msk.f32.mxu0 %vm16722_vm0, %v21596_v4  ;;  %v1150_v41 = vmul.f32 %v17599_v6, %v1012_v1  ;;  %13652 = vmatprep.mubr.msk.f32.mxu1 %vm16722_vm0, %v21596_v4  ;;  %vm1254_vm4 = vcmp.ge.f32.partialorder %v1205_v29, 0.0  ;;  %v1303_v25 = vmul.f32 0.01, %v1205_v29 }
 0x28e   : > { %v1016_v35 = vpop.f32.mrb[58].mxu0 }
 0x28f   : > { %v1206_v11 = vadd.f32 %v17602_v13, %v1150_v41  ;;  %v1017_v9 = vadd.f32 %v17597_v3, %v1016_v35  ;;  %v1352_v30 = vsel %vm1254_vm4, %v1205_v29, %v1303_v25  ;;  %v13497_v10 = vpop.f32.mrb[59].mxu0 }
 0x290   : > { %13801 = vmatmul.mubr.msk.f32.gmra.mrb[152].mxu0 %vm657_vm1, %v17432_v43  ;;  %13653 = vmatmul.mubr.msk.f32.gmra.mrb[52].mxu1 %vm1389_vm2, %v1352_v30 }
 0x291   : > { %13803 = vmatprep.mubr.msk.f32.mxu0 %vm16722_vm0, %v21596_v4  ;;  %v1151_v42 = vmul.f32 %v17599_v6, %v1017_v9  ;;  %13655 = vmatprep.mubr.msk.f32.mxu1 %vm16722_vm0, %v21596_v4  ;;  %vm1255_vm5 = vcmp.ge.f32.partialorder %v1206_v11, 0.0  ;;  %v1304_v15 = vmul.f32 0.01, %v1206_v11 }
 0x292   : > { %v1021_v20 = vpop.f32.mrb[60].mxu0 }
 0x293   : > { %v1207_v36 = vadd.f32 %v17602_v13, %v1151_v42  ;;  %v1022_v21 = vadd.f32 %v17597_v3, %v1021_v20  ;;  %v1353_v26 = vsel %vm1255_vm5, %v1206_v11, %v1304_v15  ;;  %v13500_v19 = vpop.f32.mrb[61].mxu0 }
 0x294   : > { %13804 = vmatmul.mubr.msk.f32.gmra.mrb[154].mxu0 %vm657_vm1, %v17441_v44  ;;  %13656 = vmatmul.mubr.msk.f32.gmra.mrb[54].mxu1 %vm1389_vm2, %v1353_v26 }
 0x295   : > { %13806 = vmatprep.mubr.msk.f32.mxu0 %vm16722_vm0, %v21596_v4  ;;  %v1152_v43 = vmul.f32 %v17599_v6, %v1022_v21  ;;  %13658 = vmatprep.mubr.msk.f32.mxu1 %vm16722_vm0, %v21596_v4  ;;  %vm1256_vm6 = vcmp.ge.f32.partialorder %v1207_v36, 0.0  ;;  %v1305_v31 = vmul.f32 0.01, %v1207_v36 }
 0x296   : > { %v1026_v53 = vpop.f32.mrb[62].mxu0 }
 0x297   : > { %v1208_v14 = vadd.f32 %v17602_v13, %v1152_v43  ;;  %v1027_v37 = vadd.f32 %v17597_v3, %v1026_v53  ;;  %v1354_v54 = vsel %vm1256_vm6, %v1207_v36, %v1305_v31  ;;  %v13503_v55 = vpop.f32.mrb[63].mxu0 }
 0x298   : > { %13807 = vmatmul.mubr.msk.f32.gmra.mrb[156].mxu0 %vm657_vm1, %v17450_v45  ;;  %13659 = vmatmul.mubr.msk.f32.gmra.mrb[56].mxu1 %vm1389_vm2, %v1354_v54 }
 0x299   : > { %13809 = vmatprep.mubr.msk.f32.mxu0 %vm16722_vm0, %v21596_v4  ;;  %v1153_v44 = vmul.f32 %v17599_v6, %v1027_v37  ;;  %13661 = vmatprep.mubr.msk.f32.mxu1 %vm16722_vm0, %v21596_v4  ;;  %vm1257_vm7 = vcmp.ge.f32.partialorder %v1208_v14, 0.0  ;;  %v1306_v56 = vmul.f32 0.01, %v1208_v14 }
 0x29a   : > { %v1031_v27 = vpop.f32.mrb[64].mxu0 }
 0x29b   : > { %v1209_v32 = vadd.f32 %v17602_v13, %v1153_v44  ;;  %v1032_v57 = vadd.f32 %v17597_v3, %v1031_v27  ;;  %v1355_v38 = vsel %vm1257_vm7, %v1208_v14, %v1306_v56  ;;  %v13506_v22 = vpop.f32.mrb[65].mxu0 }
 0x29c   : > { %13810 = vmatmul.mubr.msk.f32.gmra.mrb[158].mxu0 %vm657_vm1, %v17459_v46  ;;  %13662 = vmatmul.mubr.msk.f32.gmra.mrb[58].mxu1 %vm1389_vm2, %v1355_v38 }
 0x29d   : > { %13812 = vmatprep.mubr.msk.f32.mxu0 %vm16722_vm0, %v21596_v4  ;;  %v1154_v45 = vmul.f32 %v17599_v6, %v1032_v57  ;;  %13664 = vmatprep.mubr.msk.f32.mxu1 %vm16722_vm0, %v21596_v4  ;;  %vm1258_vm8 = vcmp.ge.f32.partialorder %v1209_v32, 0.0  ;;  %v1307_v58 = vmul.f32 0.01, %v1209_v32 }
 0x29e   : > { %v1036_v59 = vpop.f32.mrb[66].mxu0 }
 0x29f   : > { %v1210_v17 = vadd.f32 %v17602_v13, %v1154_v45  ;;  %v1037_v8 = vadd.f32 %v17597_v3, %v1036_v59  ;;  %v1356_v33 = vsel %vm1258_vm8, %v1209_v32, %v1307_v58  ;;  %v13509_v39 = vpop.f32.mrb[67].mxu0  ;;  %v15013_v59 = vld [vmem:[%s21695_s30 + $0x128] sm:$0xff] }
 0x2a0   : > { %13813 = vmatmul.mubr.msk.f32.gmra.mrb[160].mxu0 %vm657_vm1, %v17468_v47  ;;  %13665 = vmatmul.mubr.msk.f32.gmra.mrb[60].mxu1 %vm1389_vm2, %v1356_v33 }
 0x2a1   : > { %13815 = vmatprep.mubr.msk.f32.mxu0 %vm16722_vm0, %v21596_v4  ;;  %v1155_v46 = vmul.f32 %v17599_v6, %v1037_v8  ;;  %13667 = vmatprep.mubr.msk.f32.mxu1 %vm16722_vm0, %v21596_v4  ;;  %vm1259_vm9 = vcmp.ge.f32.partialorder %v1210_v17, 0.0  ;;  %v1308_v28 = vmul.f32 0.01, %v1210_v17 }
 0x2a2   : > { %v1041_v60 = vpop.f32.mrb[68].mxu0 }
 0x2a3   : > { %v1211_v61 = vadd.f32 %v17602_v13, %v1155_v46  ;;  %v1042_v24 = vadd.f32 %v17597_v3, %v1041_v60  ;;  %v1357_v62 = vsel %vm1259_vm9, %v1210_v17, %v1308_v28  ;;  %v13512_v63 = vpop.f32.mrb[69].mxu0 }
 0x2a4   : > { %13816 = vmatmul.mubr.msk.f32.gmra.mrb[162].mxu0 %vm657_vm1, %v17477_v48  ;;  %13668 = vmatmul.mubr.msk.f32.gmra.mrb[62].mxu1 %vm1389_vm2, %v1357_v62 }
 0x2a5   : > { %13818 = vmatprep.mubr.msk.f32.mxu0 %vm16722_vm0, %v21596_v4  ;;  %v1156_v47 = vmul.f32 %v17599_v6, %v1042_v24  ;;  %13670 = vmatprep.mubr.msk.f32.mxu1 %vm16722_vm0, %v21596_v4  ;;  %vm1260_vm10 = vcmp.ge.f32.partialorder %v1211_v61, 0.0  ;;  %v1309_v40 = vmul.f32 0.01, %v1211_v61 }
 0x2a6   : > { %v1046_v34 = vpop.f32.mrb[70].mxu0 }
 0x2a7   : > { %v1212_v0 = vadd.f32 %v17602_v13, %v1156_v47  ;;  %v1047_v29 = vadd.f32 %v17597_v3, %v1046_v34  ;;  %v1358_v1 = vsel %vm1260_vm10, %v1211_v61, %v1309_v40  ;;  %v13515_v5 = vpop.f32.mrb[71].mxu0  ;;  %v15014_v61 = vld [vmem:[%s21695_s30 + $0x130] sm:$0xff]  ;;  %v18021_v47 = vld [vmem:[#allocation5] ss:$0 sm:$0xff] }
 0x2a8   : > { %13819 = vmatmul.mubr.msk.f32.gmra.mrb[164].mxu0 %vm657_vm1, %v17486_v49  ;;  %13671 = vmatmul.mubr.msk.f32.gmra.mrb[64].mxu1 %vm1389_vm2, %v1358_v1 }
 0x2a9   : > { %13821 = vmatprep.mubr.msk.f32.mxu0 %vm16722_vm0, %v21596_v4  ;;  %v1157_v48 = vmul.f32 %v17599_v6, %v1047_v29  ;;  %13673 = vmatprep.mubr.msk.f32.mxu1 %vm16722_vm0, %v21596_v4  ;;  %vm1261_vm11 = vcmp.ge.f32.partialorder %v1212_v0, 0.0  ;;  %v1310_v18 = vmul.f32 0.01, %v1212_v0  ;;  %v15016_v29 = vld [vmem:[%s21695_s30 + $0x138] sm:$0xff] }
 0x2aa   : > { %v1051_v41 = vpop.f32.mrb[72].mxu0 }
 0x2ab   : > { %v1213_v25 = vadd.f32 %v17602_v13, %v1157_v48  ;;  %v1052_v35 = vadd.f32 %v17597_v3, %v1051_v41  ;;  %v1359_v11 = vsel %vm1261_vm11, %v1212_v0, %v1310_v18  ;;  %v13518_v9 = vpop.f32.mrb[73].mxu0  ;;  %v18036_v48 = vld [vmem:[#allocation8] ss:$0 sm:$0xff] }
 0x2ac   : > { %13822 = vmatmul.mubr.msk.f32.gmra.mrb[166].mxu0 %vm657_vm1, %v17495_v50  ;;  %13674 = vmatmul.mubr.msk.f32.gmra.mrb[66].mxu1 %vm1389_vm2, %v1359_v11  ;;  %v15019_v11 = vld [vmem:[%s21695_s30 + $0x140] sm:$0xff] }
 0x2ad   : > { %13824 = vmatprep.mubr.msk.f32.mxu0 %vm16722_vm0, %v21596_v4  ;;  %v1158_v49 = vmul.f32 %v17599_v6, %v1052_v35  ;;  %13676 = vmatprep.mubr.msk.f32.mxu1 %vm16722_vm0, %v21596_v4  ;;  %vm1262_vm12 = vcmp.ge.f32.partialorder %v1213_v25, 0.0  ;;  %v1311_v30 = vmul.f32 0.01, %v1213_v25 }
 0x2ae   : > { %v1056_v10 = vpop.f32.mrb[74].mxu0 }
 0x2af   : > { %v1214_v42 = vadd.f32 %v17602_v13, %v1158_v49  ;;  %v1057_v15 = vadd.f32 %v17597_v3, %v1056_v10  ;;  %v1360_v20 = vsel %vm1262_vm12, %v1213_v25, %v1311_v30  ;;  %v13521_v36 = vpop.f32.mrb[75].mxu0 }
 0x2b0   : > { %13825 = vmatmul.mubr.msk.f32.gmra.mrb[168].mxu0 %vm657_vm1, %v17504_v51  ;;  %13677 = vmatmul.mubr.msk.f32.gmra.mrb[68].mxu1 %vm1389_vm2, %v1360_v20  ;;  %v15020_v36 = vld [vmem:[%s21695_s30 + $0x148] sm:$0xff] }
 0x2b1   : > { %13827 = vmatprep.mubr.msk.f32.mxu0 %vm16722_vm0, %v21596_v4  ;;  %v1159_v50 = vmul.f32 %v17599_v6, %v1057_v15  ;;  %13679 = vmatprep.mubr.msk.f32.mxu1 %vm16722_vm0, %v21596_v4  ;;  %vm1263_vm13 = vcmp.ge.f32.partialorder %v1214_v42, 0.0  ;;  %v1312_v21 = vmul.f32 0.01, %v1214_v42 }
 0x2b2   : > { %v1061_v26 = vpop.f32.mrb[76].mxu0 }
 0x2b3   : > { %v1215_v19 = vadd.f32 %v17602_v13, %v1159_v50  ;;  %v1062_v43 = vadd.f32 %v17597_v3, %v1061_v26  ;;  %v1361_v31 = vsel %vm1263_vm13, %v1214_v42, %v1312_v21  ;;  %v13524_v53 = vpop.f32.mrb[77].mxu0 }
 0x2b4   : > { %13828 = vmatmul.mubr.msk.f32.gmra.mrb[170].mxu0 %vm657_vm1, %v17513_v52  ;;  %13680 = vmatmul.mubr.msk.f32.gmra.mrb[70].mxu1 %vm1389_vm2, %v1361_v31  ;;  %v15012_v52 = vld [vmem:[%s21695_s30 + $0x120] sm:$0xff] }
 0x2b5   : > { %13830 = vmatprep.mubr.msk.f32.mxu0 %vm16722_vm0, %v21596_v4  ;;  %v1160_v51 = vmul.f32 %v17599_v6, %v1062_v43  ;;  %13682 = vmatprep.mubr.msk.f32.mxu1 %vm16722_vm0, %v21596_v4  ;;  %vm1264_vm14 = vcmp.ge.f32.partialorder %v1215_v19, 0.0  ;;  %v1313_v14 = vmul.f32 0.01, %v1215_v19 }
 0x2b6   : > { %v1066_v37 = vpop.f32.mrb[78].mxu0 }
 0x2b7   : > { %v1216_v54 = vadd.f32 %v17602_v13, %v1160_v51  ;;  %v1067_v55 = vadd.f32 %v17597_v3, %v1066_v37  ;;  %v1362_v44 = vsel %vm1264_vm14, %v1215_v19, %v1313_v14  ;;  %v13527_v56 = vpop.f32.mrb[79].mxu0  ;;  %v15021_v51 = vld [vmem:[%s21695_s30 + $0x150] sm:$0xff] }
 0x2b8   : > { %13831 = vmatmul.mubr.msk.f32.gmra.mrb[172].mxu0 %vm657_vm1, %v15012_v52  ;;  %13683 = vmatmul.mubr.msk.f32.gmra.mrb[72].mxu1 %vm1389_vm2, %v1362_v44 }
 0x2b9   : > { %13833 = vmatprep.mubr.msk.f32.mxu0 %vm16722_vm0, %v21596_v4  ;;  %v1161_v27 = vmul.f32 %v17599_v6, %v1067_v55  ;;  %13685 = vmatprep.mubr.msk.f32.mxu1 %vm16722_vm0, %v21596_v4  ;;  %vm1265_vm15 = vcmp.ge.f32.partialorder %v1216_v54, 0.0  ;;  %v1314_v32 = vmul.f32 0.01, %v1216_v54 }
 0x2ba   : > { %v1071_v57 = vpop.f32.mrb[80].mxu0 }
 0x2bb   : > { %v1217_v38 = vadd.f32 %v17602_v13, %v1161_v27  ;;  %v1072_v22 = vadd.f32 %v17597_v3, %v1071_v57  ;;  %v1363_v45 = vsel %vm1265_vm15, %v1216_v54, %v1314_v32  ;;  %v13530_v58 = vpop.f32.mrb[81].mxu0  ;;  %v15022_v27 = vld [vmem:[%s21695_s30 + $0x158] sm:$0xff] }
 0x2bc   : > { %13834 = vmatmul.mubr.msk.f32.gmra.mrb[174].mxu0 %vm657_vm1, %v15013_v59  ;;  %13686 = vmatmul.mubr.msk.f32.gmra.mrb[74].mxu1 %vm1389_vm2, %v1363_v45 }
 0x2bd   : > { %13836 = vmatprep.mubr.msk.f32.mxu0 %vm16722_vm0, %v21596_v4  ;;  %v1162_v17 = vmul.f32 %v17599_v6, %v1072_v22  ;;  %13688 = vmatprep.mubr.msk.f32.mxu1 %vm16722_vm0, %v21596_v4  ;;  %vm1266_vm3 = vcmp.ge.f32.partialorder %v1217_v38, 0.0  ;;  %v1315_v8 = vmul.f32 0.01, %v1217_v38 }
 0x2be   : > { %v1076_v33 = vpop.f32.mrb[82].mxu0 }
 0x2bf   : > { %v1218_v39 = vadd.f32 %v17602_v13, %v1162_v17  ;;  %v1077_v46 = vadd.f32 %v17597_v3, %v1076_v33  ;;  %v1364_v28 = vsel %vm1266_vm3, %v1217_v38, %v1315_v8  ;;  %v13533_v60 = vpop.f32.mrb[83].mxu0  ;;  %v15023_v17 = vld [vmem:[%s21695_s30 + $0x160] sm:$0xff] }
 0x2c0   : > { %13837 = vmatmul.mubr.msk.f32.gmra.mrb[176].mxu0 %vm657_vm1, %v15014_v61  ;;  %13689 = vmatmul.mubr.msk.f32.gmra.mrb[76].mxu1 %vm1389_vm2, %v1364_v28 }
 0x2c1   : > { %13839 = vmatprep.mubr.msk.f32.mxu0 %vm16722_vm0, %v21596_v4  ;;  %v1163_v24 = vmul.f32 %v17599_v6, %v1077_v46  ;;  %13691 = vmatprep.mubr.msk.f32.mxu1 %vm16722_vm0, %v21596_v4  ;;  %vm1267_vm4 = vcmp.ge.f32.partialorder %v1218_v39, 0.0  ;;  %v1316_v3 = vmul.f32 0.01, %v1218_v39  ;;  %v18031_v6 = vld [vmem:[#allocation7] ss:$0 sm:$0xff] }
 0x2c2   : > { %v1081_v62 = vpop.f32.mrb[84].mxu0 }
 0x2c3   : > { %v1219_v63 = vadd.f32 %v17602_v13, %v1163_v24  ;;  %v1082_v40 = vadd.f32 %v18021_v47, %v1081_v62  ;;  %v1365_v34 = vsel %vm1267_vm4, %v1218_v39, %v1316_v3  ;;  %v13536_v0 = vpop.f32.mrb[85].mxu0  ;;  %v15024_v24 = vld [vmem:[%s21695_s30 + $0x168] sm:$0xff] }
 0x2c4   : > { %13840 = vmatmul.mubr.msk.f32.gmra.mrb[178].mxu0 %vm657_vm1, %v15016_v29  ;;  %13692 = vmatmul.mubr.msk.f32.gmra.mrb[78].mxu1 %vm1389_vm2, %v1365_v34  ;;  %v15025_v34 = vld [vmem:[%s21695_s30 + $0x170] sm:$0xff] }
 0x2c5   : > { %13842 = vmatprep.mubr.msk.f32.mxu0 %vm16722_vm0, %v21596_v4  ;;  %v1164_v13 = vmul.f32 %v18031_v6, %v1082_v40  ;;  %13694 = vmatprep.mubr.msk.f32.mxu1 %vm16722_vm0, %v21596_v4  ;;  %vm1268_vm5 = vcmp.ge.f32.partialorder %v1219_v63, 0.0  ;;  %v1317_v1 = vmul.f32 0.01, %v1219_v63 }
 0x2c6   : > { %v1086_v5 = vpop.f32.mrb[86].mxu0 }
 0x2c7   : > { %v1220_v18 = vadd.f32 %v18036_v48, %v1164_v13  ;;  %v1087_v41 = vadd.f32 %v18021_v47, %v1086_v5  ;;  %v1366_v25 = vsel %vm1268_vm5, %v1219_v63, %v1317_v1  ;;  %v13539_v35 = vpop.f32.mrb[87].mxu0  ;;  %v15026_v13 = vld [vmem:[%s21695_s30 + $0x178] sm:$0xff] }
 0x2c8   : > { %13843 = vmatmul.mubr.msk.f32.gmra.mrb[180].mxu0 %vm657_vm1, %v15019_v11  ;;  %13695 = vmatmul.mubr.msk.f32.gmra.mrb[80].mxu1 %vm1389_vm2, %v1366_v25  ;;  %v3976_v1 = vld [vmem:[#allocation3 + $0x30] sm:$0xff]  ;;  %v3977_v5 = vld [vmem:[#allocation3 + $0x38] sm:$0xff]  ;;  %v15029_v35 = vld [vmem:[%s21695_s30 + $0x8] sm:$0xff] }
 0x2c9   : > { %13845 = vmatprep.mubr.msk.f32.mxu0 %vm16722_vm0, %v21596_v4  ;;  %v1165_v9 = vmul.f32 %v18031_v6, %v1087_v41  ;;  %13697 = vmatprep.mubr.msk.f32.mxu1 %vm16722_vm0, %v21596_v4  ;;  %vm1269_vm6 = vcmp.ge.f32.partialorder %v1220_v18, 0.0  ;;  %v1318_v49 = vmul.f32 0.01, %v1220_v18  ;;  %v14706_v41 = vpack.c.bf16 %v3977_v5, %v3976_v1  ;;  %v15028_v25 = vld [vmem:[%s21695_s30] sm:$0xff]  ;;  %v15030_v11 = vld [vmem:[%s21695_s30 + $0x10] sm:$0xff] }
 0x2ca   : > { %v1091_v30 = vpop.f32.mrb[88].mxu0 }
 0x2cb   : > { %v1221_v10 = vadd.f32 %v18036_v48, %v1165_v9  ;;  %v1092_v42 = vadd.f32 %v18021_v47, %v1091_v30  ;;  %v1367_v15 = vsel %vm1269_vm6, %v1220_v18, %v1318_v49  ;;  %v13542_v20 = vpop.f32.mrb[89].mxu0  ;;  %v15027_v18 = vld [vmem:[%s21695_s30 + $0x180] sm:$0xff]  ;;  %v15031_v30 = vld [vmem:[%s21695_s30 + $0x18] sm:$0xff] }
 0x2cc   : > { %13846 = vmatmul.mubr.msk.f32.gmra.mrb[182].mxu0 %vm657_vm1, %v15020_v36  ;;  %13698 = vmatmul.mubr.msk.f32.gmra.mrb[82].mxu1 %vm1389_vm2, %v1367_v15  ;;  %v15032_v36 = vld [vmem:[%s21695_s30 + $0x20] sm:$0xff] }
 0x2cd   : > { %13848 = vmatprep.mubr.msk.f32.mxu0 %vm16722_vm0, %v21596_v4  ;;  %v1166_v50 = vmul.f32 %v18031_v6, %v1092_v42  ;;  %13700 = vmatprep.mubr.msk.f32.mxu1 %vm16722_vm0, %v21596_v4  ;;  %vm1270_vm7 = vcmp.ge.f32.partialorder %v1221_v10, 0.0  ;;  %v1319_v21 = vmul.f32 0.01, %v1221_v10 }
 0x2ce   : > { %v1096_v26 = vpop.f32.mrb[90].mxu0 }
 0x2cf   : > { %v1222_v19 = vadd.f32 %v18036_v48, %v1166_v50  ;;  %v1097_v43 = vadd.f32 %v18021_v47, %v1096_v26  ;;  %v1368_v31 = vsel %vm1270_vm7, %v1221_v10, %v1319_v21  ;;  %v13545_v53 = vpop.f32.mrb[91].mxu0 }
 0x2d0   : > { %13849 = vmatmul.mubr.msk.f32.gmra.mrb[184].mxu0 %vm657_vm1, %v15021_v51  ;;  %13701 = vmatmul.mubr.msk.f32.gmra.mrb[84].mxu1 %vm1389_vm2, %v1368_v31  ;;  %v15033_v51 = vld [vmem:[%s21695_s30 + $0x28] sm:$0xff] }
 0x2d1   : > { %13851 = vmatprep.mubr.msk.f32.mxu0 %vm16722_vm0, %v21596_v4  ;;  %v1167_v14 = vmul.f32 %v18031_v6, %v1097_v43  ;;  %13703 = vmatprep.mubr.msk.f32.mxu1 %vm16722_vm0, %v21596_v4  ;;  %vm1271_vm8 = vcmp.ge.f32.partialorder %v1222_v19, 0.0  ;;  %v1320_v37 = vmul.f32 0.01, %v1222_v19 }
 0x2d2   : > { %v1101_v54 = vpop.f32.mrb[92].mxu0 }
 0x2d3   : > { %v1223_v55 = vadd.f32 %v18036_v48, %v1167_v14  ;;  %v1102_v44 = vadd.f32 %v18021_v47, %v1101_v54  ;;  %v1369_v56 = vsel %vm1271_vm8, %v1222_v19, %v1320_v37  ;;  %v13548_v52 = vpop.f32.mrb[93].mxu0 }
 0x2d4   : > { %13852 = vmatmul.mubr.msk.f32.gmra.mrb[186].mxu0 %vm657_vm1, %v15022_v27  ;;  %13704 = vmatmul.mubr.msk.f32.gmra.mrb[86].mxu1 %vm1389_vm2, %v1369_v56 }
 0x2d5   : > { %13854 = vmatprep.mubr.msk.f32.mxu0 %vm16722_vm0, %v21596_v4  ;;  %v1168_v32 = vmul.f32 %v18031_v6, %v1102_v44  ;;  %13706 = vmatprep.mubr.msk.f32.mxu1 %vm16722_vm0, %v21596_v4  ;;  %vm1272_vm9 = vcmp.ge.f32.partialorder %v1223_v55, 0.0  ;;  %v1321_v57 = vmul.f32 0.01, %v1223_v55 }
 0x2d6   : > { %v1106_v38 = vpop.f32.mrb[94].mxu0 }
 0x2d7   : > { %v1224_v22 = vadd.f32 %v18036_v48, %v1168_v32  ;;  %v1107_v45 = vadd.f32 %v18021_v47, %v1106_v38  ;;  %v1370_v58 = vsel %vm1272_vm9, %v1223_v55, %v1321_v57  ;;  %v13551_v59 = vpop.f32.mrb[95].mxu0  ;;  %v15034_v32 = vld [vmem:[%s21695_s30 + $0x30] sm:$0xff] }
 0x2d8   : > { %13855 = vmatmul.mubr.msk.f32.gmra.mrb[188].mxu0 %vm657_vm1, %v15023_v17  ;;  %13707 = vmatmul.mubr.msk.f32.gmra.mrb[88].mxu1 %vm1389_vm2, %v1370_v58 }
 0x2d9   : > { %13857 = vmatprep.mubr.msk.f32.mxu0 %vm16722_vm0, %v21596_v4  ;;  %v1169_v8 = vmul.f32 %v18031_v6, %v1107_v45  ;;  %13709 = vmatprep.mubr.msk.f32.mxu1 %vm16722_vm0, %v21596_v4  ;;  %vm1273_vm10 = vcmp.ge.f32.partialorder %v1224_v22, 0.0  ;;  %v1322_v33 = vmul.f32 0.01, %v1224_v22 }
 0x2da   : > { %v1111_v39 = vpop.f32.mrb[96].mxu0 }
 0x2db   : > { %v1225_v46 = vadd.f32 %v18036_v48, %v1169_v8  ;;  %v1112_v28 = vadd.f32 %v18021_v47, %v1111_v39  ;;  %v1371_v60 = vsel %vm1273_vm10, %v1224_v22, %v1322_v33  ;;  %v13554_v61 = vpop.f32.mrb[97].mxu0  ;;  %v15035_v39 = vld [vmem:[%s21695_s30 + $0x38] sm:$0xff] }
 0x2dc   : > { %13858 = vmatmul.mubr.msk.f32.gmra.mrb[190].mxu0 %vm657_vm1, %v15024_v24  ;;  %13710 = vmatmul.mubr.msk.f32.gmra.mrb[90].mxu1 %vm1389_vm2, %v1371_v60 }
 0x2dd   : > { %13860 = vmatprep.mubr.msk.f32.mxu0 %vm16722_vm0, %v21596_v4  ;;  %v1170_v3 = vmul.f32 %v18031_v6, %v1112_v28  ;;  %13712 = vmatprep.mubr.msk.f32.mxu1 %vm16722_vm0, %v21596_v4  ;;  %vm1274_vm11 = vcmp.ge.f32.partialorder %v1225_v46, 0.0  ;;  %v1323_v62 = vmul.f32 0.01, %v1225_v46 }
 0x2df   : > { %v1226_v63 = vadd.f32 %v18036_v48, %v1170_v3  ;;  %v1372_v40 = vsel %vm1274_vm11, %v1225_v46, %v1323_v62 }
 0x2e0   : > { %13861 = vmatmul.mubr.msk.f32.gmra.mrb[192].mxu0 %vm657_vm1, %v15025_v34  ;;  %13713 = vmatmul.mubr.msk.f32.gmra.mrb[92].mxu1 %vm1389_vm2, %v1372_v40  ;;  %v15036_v34 = vld [vmem:[%s21695_s30 + $0x40] sm:$0xff] }
 0x2e1   : > { %13863 = vmatprep.mubr.msk.f32.mxu0 %vm16722_vm0, %v21596_v4  ;;  %13715 = vmatprep.mubr.msk.f32.mxu1 %vm16722_vm0, %v21596_v4  ;;  %vm1275_vm12 = vcmp.ge.f32.partialorder %v1226_v63, 0.0  ;;  %v1324_v0 = vmul.f32 0.01, %v1226_v63 }
 0x2e3   : > { %v1373_v29 = vsel %vm1275_vm12, %v1226_v63, %v1324_v0 }
 0x2e4   : > { %13864 = vmatmul.mubr.msk.f32.gmra.mrb[194].mxu0 %vm657_vm1, %v15026_v13  ;;  %13716 = vmatmul.mubr.msk.f32.gmra.mrb[94].mxu1 %vm1389_vm2, %v1373_v29 }
 0x2e5   : > { %13866 = vmatprep.mubr.msk.f32.mxu0 %vm16722_vm0, %v21596_v4  ;;  %13885 = vmatprep.mubr.msk.f32.mxu1 %vm16722_vm0, %v21596_v4 }
 0x2e8   : > { %13867 = vmatmul.mubr.msk.f32.gmra.mrb[196].mxu0 %vm657_vm1, %v15027_v18 }
 0x2e9   : > { %14036 = vmatprep.mubr.msk.f32.mxu0 %vm16722_vm0, %v21596_v4 }
 0x2ec   : > { %14037 = vmatmul.mubr.msk.f32.vlgmr.msra.gmra.mrb[198].mxu0 %vm657_vm1, %v15028_v25 }
 0x2ed   : > { %14707 = vmatpush3.bf16.msra.mxu0 %v14706_v41  ;;  %14039 = vmatprep.mubr.msk.f32.mxu0 %vm16722_vm0, %v21596_v4 }
 0x2f0   : > { %14040 = vmatmul.mubr.msk.f32.gmra.mrb[200].mxu0 %vm657_vm1, %v15029_v35 }
 0x2f1   : > { %14042 = vmatprep.mubr.msk.f32.mxu0 %vm16722_vm0, %v21596_v4 }
 0x2f4   : > { %14043 = vmatmul.mubr.msk.f32.gmra.mrb[202].mxu0 %vm657_vm1, %v15030_v11  ;;  %v15037_v11 = vld [vmem:[%s21695_s30 + $0x48] sm:$0xff] }
 0x2f5   : > { %14045 = vmatprep.mubr.msk.f32.mxu0 %vm16722_vm0, %v21596_v4 }
 0x2f7   : > { %v18153_v9 = vpop.f32.mrb[98].mxu0 }
 0x2f8   : > { %v13573_v49 = vpop.f32.mrb[99].mxu0  ;;  %14046 = vmatmul.mubr.msk.f32.gmra.mrb[204].mxu0 %vm657_vm1, %v15031_v30 }
 0x2f9   : > { %14048 = vmatprep.mubr.msk.f32.mxu0 %vm16722_vm0, %v21596_v4 }
 0x2fb   : > { %v1916_v10 = vpop.f32.mrb[100].mxu0  ;;  %v18161_v42 = vpop.f32.mrb[0].mxu1 }
 0x2fc   : > { %v1917_v15 = vadd.f32 %v18021_v47, %v1916_v10  ;;  %v13724_v20 = vpop.f32.mrb[101].mxu0  ;;  %14049 = vmatmul.mubr.msk.f32.gmra.mrb[206].mxu0 %vm657_vm1, %v15032_v36  ;;  %v13576_v50 = vpop.f32.mrb[1].mxu1 }
 0x2fd   : > { %14051 = vmatprep.mubr.msk.f32.mxu0 %vm16722_vm0, %v21596_v4 }
 0x2fe   : > { %v2160_v21 = vmul.f32 %v18031_v6, %v1917_v15 }
 0x2ff   : > { %v1921_v26 = vpop.f32.mrb[102].mxu0  ;;  %v18171_v19 = vpop.f32.mrb[2].mxu1 }
 0x300   : > { %v2209_v43 = vadd.f32 %v18036_v48, %v2160_v21  ;;  %v1922_v31 = vadd.f32 %v18021_v47, %v1921_v26  ;;  %v13727_v53 = vpop.f32.mrb[103].mxu0  ;;  %14052 = vmatmul.mubr.msk.f32.gmra.mrb[208].mxu0 %vm657_vm1, %v15033_v51  ;;  %v13579_v14 = vpop.f32.mrb[3].mxu1 }
 0x301   : > { %14054 = vmatprep.mubr.msk.f32.mxu0 %vm16722_vm0, %v21596_v4 }
 0x302   : > { %v2307_v37 = vmul.f32 0.01, %v2209_v43  ;;  %v2161_v54 = vmul.f32 %v18031_v6, %v1922_v31  ;;  %vm2258_vm13 = vcmp.ge.f32.partialorder %v2209_v43, 0.0 }
 0x303   : > { %v1926_v55 = vpop.f32.mrb[104].mxu0  ;;  %v18182_v44 = vpop.f32.mrb[4].mxu1 }
 0x304   : > { %v2210_v56 = vadd.f32 %v18036_v48, %v2161_v54  ;;  %v1927_v52 = vadd.f32 %v18021_v47, %v1926_v55  ;;  %v13730_v27 = vpop.f32.mrb[105].mxu0  ;;  %14055 = vmatmul.mubr.msk.f32.gmra.mrb[210].mxu0 %vm657_vm1, %v15034_v32  ;;  %v2356_v57 = vsel %vm2258_vm13, %v2209_v43, %v2307_v37  ;;  %v13582_v38 = vpop.f32.mrb[5].mxu1  ;;  %v15038_v43 = vld [vmem:[%s21695_s30 + $0x50] sm:$0xff] }
 0x305   : > { %13886 = vmatmul.mubr.msk.f32.vlgmr.msra.gmra.mrb[96].mxu1 %vm1389_vm2, %v2356_v57  ;;  %14057 = vmatprep.mubr.msk.f32.mxu0 %vm16722_vm0, %v21596_v4  ;;  %v15039_v27 = vld [vmem:[%s21695_s30 + $0x58] sm:$0xff] }
 0x306   : > { %v2162_v22 = vmul.f32 %v18031_v6, %v1927_v52  ;;  %14695 = vmatpush3.bf16.msra.mxu1 %v17167_v7  ;;  %13888 = vmatprep.mubr.msk.f32.mxu1 %vm16722_vm0, %v21596_v4  ;;  %vm2259_vm14 = vcmp.ge.f32.partialorder %v2210_v56, 0.0  ;;  %v2308_v45 = vmul.f32 0.01, %v2210_v56 }
 0x307   : > { %v1931_v58 = vpop.f32.mrb[106].mxu0  ;;  %v18197_v59 = vpop.f32.mrb[6].mxu1  ;;  %14696 = vmatprep.subr.bf16.mxu1 %v21594_v2 }
 0x308   : > { %v2211_v17 = vadd.f32 %v18036_v48, %v2162_v22  ;;  %v1932_v8 = vadd.f32 %v18021_v47, %v1931_v58  ;;  %v13733_v33 = vpop.f32.mrb[107].mxu0  ;;  %14058 = vmatmul.mubr.msk.f32.gmra.mrb[212].mxu0 %vm657_vm1, %v15035_v39  ;;  %v2357_v46 = vsel %vm2259_vm14, %v2210_v56, %v2308_v45  ;;  %v13585_v28 = vpop.f32.mrb[7].mxu1  ;;  %v15040_v39 = vld [vmem:[%s21695_s30 + $0x60] sm:$0xff] }
 0x309   : > { %13889 = vmatmul.mubr.msk.f32.gmra.mrb[98].mxu1 %vm1389_vm2, %v2357_v46  ;;  %14060 = vmatprep.mubr.msk.f32.mxu0 %vm16722_vm0, %v21596_v4 }
 0x30a   : > { %v2163_v60 = vmul.f32 %v18031_v6, %v1932_v8  ;;  %13891 = vmatprep.mubr.msk.f32.mxu1 %vm16722_vm0, %v21596_v4  ;;  %vm2260_vm15 = vcmp.ge.f32.partialorder %v2211_v17, 0.0  ;;  %v2309_v61 = vmul.f32 0.01, %v2211_v17  ;;  %14698 = vmatpush3.bf16.msra.mxu1 %v17190_v12 }
 0x30b   : > { %v1936_v24 = vpop.f32.mrb[108].mxu0  ;;  %v18213_v3 = vpop.f32.mrb[8].mxu1  ;;  %14699 = vmatprep.subr.bf16.mxu1 %v21594_v2 }
 0x30c   : > { %v2212_v62 = vadd.f32 %v18036_v48, %v2163_v60  ;;  %v1937_v63 = vadd.f32 %v18021_v47, %v1936_v24  ;;  %v13736_v40 = vpop.f32.mrb[109].mxu0  ;;  %14061 = vmatmul.mubr.msk.f32.gmra.mrb[214].mxu0 %vm657_vm1, %v15036_v34  ;;  %v2358_v0 = vsel %vm2260_vm15, %v2211_v17, %v2309_v61  ;;  %v13588_v29 = vpop.f32.mrb[9].mxu1 }
 0x30d   : > { %13892 = vmatmul.mubr.msk.f32.gmra.mrb[100].mxu1 %vm1389_vm2, %v2358_v0  ;;  %14063 = vmatprep.mubr.msk.f32.mxu0 %vm16722_vm0, %v21596_v4  ;;  %v15041_v0 = vld [vmem:[%s21695_s30 + $0x68] sm:$0xff] }
 0x30e   : > { %v2164_v13 = vmul.f32 %v18031_v6, %v1937_v63  ;;  %13894 = vmatprep.mubr.msk.f32.mxu1 %vm16722_vm0, %v21596_v4  ;;  %vm2261_vm3 = vcmp.ge.f32.partialorder %v2212_v62, 0.0  ;;  %v2310_v1 = vmul.f32 0.01, %v2212_v62  ;;  %14701 = vmatpush3.bf16.msra.mxu1 %v17206_v16 }
 0x30f   : > { %v1941_v5 = vpop.f32.mrb[110].mxu0  ;;  %v18229_v18 = vpop.f32.mrb[10].mxu1  ;;  %14702 = vmatprep.subr.bf16.mxu1 %v21594_v2 }
 0x310   : > { %v2213_v41 = vadd.f32 %v18036_v48, %v2164_v13  ;;  %v1942_v25 = vadd.f32 %v18021_v47, %v1941_v5  ;;  %v13739_v35 = vpop.f32.mrb[111].mxu0  ;;  %14064 = vmatmul.mubr.msk.f32.gmra.mrb[216].mxu0 %vm657_vm1, %v15037_v11  ;;  %v2359_v49 = vsel %vm2261_vm3, %v2212_v62, %v2310_v1  ;;  %v13591_v30 = vpop.f32.mrb[11].mxu1 }
 0x311   : > { %13895 = vmatmul.mubr.msk.f32.gmra.mrb[102].mxu1 %vm1389_vm2, %v2359_v49  ;;  %14066 = vmatprep.mubr.msk.f32.mxu0 %vm16722_vm0, %v21596_v4  ;;  %v15042_v30 = vld [vmem:[%s21695_s30 + $0x70] sm:$0xff] }
 0x312   : > { %v2165_v10 = vmul.f32 %v18031_v6, %v1942_v25  ;;  %13897 = vmatprep.mubr.msk.f32.mxu1 %vm16722_vm0, %v21596_v4  ;;  %vm2262_vm4 = vcmp.ge.f32.partialorder %v2213_v41, 0.0  ;;  %v2311_v15 = vmul.f32 0.01, %v2213_v41  ;;  %14704 = vmatpush3.bf16.msra.mxu1 %v17248_v23 }
 0x313   : > { %v1946_v20 = vpop.f32.mrb[112].mxu0  ;;  %v18245_v36 = vpop.f32.mrb[12].mxu1  ;;  %14708 = vmatprep.subr.bf16.mxu1 %v21594_v2 }
 0x314   : > { %v2214_v50 = vadd.f32 %v18036_v48, %v2165_v10  ;;  %v1947_v21 = vadd.f32 %v18021_v47, %v1946_v20  ;;  %v13742_v26 = vpop.f32.mrb[113].mxu0  ;;  %14067 = vmatmul.mubr.msk.f32.gmra.mrb[218].mxu0 %vm657_vm1, %v15038_v43  ;;  %v2360_v31 = vsel %vm2262_vm4, %v2213_v41, %v2311_v15  ;;  %v13594_v53 = vpop.f32.mrb[13].mxu1 }
 0x315   : > { %13898 = vmatmul.mubr.msk.f32.gmra.mrb[104].mxu1 %vm1389_vm2, %v2360_v31  ;;  %14069 = vmatprep.mubr.msk.f32.mxu0 %vm16722_vm0, %v21596_v4 }
 0x316   : > { %v2166_v51 = vmul.f32 %v18031_v6, %v1947_v21  ;;  %13900 = vmatprep.mubr.msk.f32.mxu1 %vm16722_vm0, %v21596_v4  ;;  %vm2263_vm5 = vcmp.ge.f32.partialorder %v2214_v50, 0.0  ;;  %v2312_v14 = vmul.f32 0.01, %v2214_v50 }
 0x317   : > { %v1951_v37 = vpop.f32.mrb[114].mxu0  ;;  %v18260_v54 = vpop.f32.mrb[14].mxu1 }
 0x318   : > { %v2215_v55 = vadd.f32 %v18036_v48, %v2166_v51  ;;  %v1952_v56 = vadd.f32 %v18021_v47, %v1951_v37  ;;  %v13745_v52 = vpop.f32.mrb[115].mxu0  ;;  %14070 = vmatmul.mubr.msk.f32.gmra.mrb[220].mxu0 %vm657_vm1, %v15039_v27  ;;  %v2361_v32 = vsel %vm2263_vm5, %v2214_v50, %v2312_v14  ;;  %v13597_v57 = vpop.f32.mrb[15].mxu1  ;;  %v15043_v51 = vld [vmem:[%s21695_s30 + $0x78] sm:$0xff] }
 0x319   : > { %13901 = vmatmul.mubr.msk.f32.gmra.mrb[106].mxu1 %vm1389_vm2, %v2361_v32  ;;  %14072 = vmatprep.mubr.msk.f32.mxu0 %vm16722_vm0, %v21596_v4 }
 0x31a   : > { %v2167_v38 = vmul.f32 %v18031_v6, %v1952_v56  ;;  %13903 = vmatprep.mubr.msk.f32.mxu1 %vm16722_vm0, %v21596_v4  ;;  %vm2264_vm6 = vcmp.ge.f32.partialorder %v2215_v55, 0.0  ;;  %v2313_v22 = vmul.f32 0.01, %v2215_v55 }
 0x31b   : > { %v1956_v45 = vpop.f32.mrb[116].mxu0  ;;  %v18274_v58 = vpop.f32.mrb[16].mxu1 }
 0x31c   : > { %v2216_v17 = vadd.f32 %v18036_v48, %v2167_v38  ;;  %v1957_v8 = vadd.f32 %v18021_v47, %v1956_v45  ;;  %v13748_v33 = vpop.f32.mrb[117].mxu0  ;;  %14073 = vmatmul.mubr.msk.f32.gmra.mrb[222].mxu0 %vm657_vm1, %v15040_v39  ;;  %v2362_v46 = vsel %vm2264_vm6, %v2215_v55, %v2313_v22  ;;  %v13600_v28 = vpop.f32.mrb[17].mxu1  ;;  %v15044_v22 = vld [vmem:[%s21695_s30 + $0x80] sm:$0xff] }
 0x31d   : > { %13904 = vmatmul.mubr.msk.f32.gmra.mrb[108].mxu1 %vm1389_vm2, %v2362_v46  ;;  %14075 = vmatprep.mubr.msk.f32.mxu0 %vm16722_vm0, %v21596_v4 }
 0x31e   : > { %v2168_v60 = vmul.f32 %v18031_v6, %v1957_v8  ;;  %13906 = vmatprep.mubr.msk.f32.mxu1 %vm16722_vm0, %v21596_v4  ;;  %vm2265_vm7 = vcmp.ge.f32.partialorder %v2216_v17, 0.0  ;;  %v2314_v61 = vmul.f32 0.01, %v2216_v17 }
 0x31f   : > { %v1961_v24 = vpop.f32.mrb[118].mxu0  ;;  %v18288_v62 = vpop.f32.mrb[18].mxu1 }
 0x320   : > { %v2217_v63 = vadd.f32 %v18036_v48, %v2168_v60  ;;  %v1962_v40 = vadd.f32 %v18021_v47, %v1961_v24  ;;  %v13751_v34 = vpop.f32.mrb[119].mxu0  ;;  %14076 = vmatmul.mubr.msk.f32.gmra.mrb[224].mxu0 %vm657_vm1, %v15041_v0  ;;  %v2363_v29 = vsel %vm2265_vm7, %v2216_v17, %v2314_v61  ;;  %v13603_v13 = vpop.f32.mrb[19].mxu1  ;;  %v15045_v24 = vld [vmem:[%s21695_s30 + $0x88] sm:$0xff] }
 0x321   : > { %13907 = vmatmul.mubr.msk.f32.gmra.mrb[110].mxu1 %vm1389_vm2, %v2363_v29  ;;  %14078 = vmatprep.mubr.msk.f32.mxu0 %vm16722_vm0, %v21596_v4 }
 0x322   : > { %v2169_v1 = vmul.f32 %v18031_v6, %v1962_v40  ;;  %13909 = vmatprep.mubr.msk.f32.mxu1 %vm16722_vm0, %v21596_v4  ;;  %vm2266_vm8 = vcmp.ge.f32.partialorder %v2217_v63, 0.0  ;;  %v2315_v5 = vmul.f32 0.01, %v2217_v63 }
 0x323   : > { %v1966_v41 = vpop.f32.mrb[120].mxu0  ;;  %v18302_v25 = vpop.f32.mrb[20].mxu1 }
 0x324   : > { %v2218_v35 = vadd.f32 %v18036_v48, %v2169_v1  ;;  %v1967_v11 = vadd.f32 %v18021_v47, %v1966_v41  ;;  %v13754_v49 = vpop.f32.mrb[121].mxu0  ;;  %14079 = vmatmul.mubr.msk.f32.gmra.mrb[226].mxu0 %vm657_vm1, %v15042_v30  ;;  %v2364_v10 = vsel %vm2266_vm8, %v2217_v63, %v2315_v5  ;;  %v13606_v15 = vpop.f32.mrb[21].mxu1 }
 0x325   : > { %13910 = vmatmul.mubr.msk.f32.gmra.mrb[112].mxu1 %vm1389_vm2, %v2364_v10  ;;  %14081 = vmatprep.mubr.msk.f32.mxu0 %vm16722_vm0, %v21596_v4 }
 0x326   : > { %v2170_v20 = vmul.f32 %v18031_v6, %v1967_v11  ;;  %13912 = vmatprep.mubr.msk.f32.mxu1 %vm16722_vm0, %v21596_v4  ;;  %vm2267_vm9 = vcmp.ge.f32.partialorder %v2218_v35, 0.0  ;;  %v2316_v50 = vmul.f32 0.01, %v2218_v35 }
 0x327   : > { %v1971_v21 = vpop.f32.mrb[122].mxu0  ;;  %v18316_v26 = vpop.f32.mrb[22].mxu1 }
 0x328   : > { %v2219_v43 = vadd.f32 %v18036_v48, %v2170_v20  ;;  %v1972_v31 = vadd.f32 %v18021_v47, %v1971_v21  ;;  %v13757_v53 = vpop.f32.mrb[123].mxu0  ;;  %14082 = vmatmul.mubr.msk.f32.gmra.mrb[228].mxu0 %vm657_vm1, %v15043_v51  ;;  %v2365_v14 = vsel %vm2267_vm9, %v2218_v35, %v2316_v50  ;;  %v13609_v37 = vpop.f32.mrb[23].mxu1  ;;  %v15046_v35 = vld [vmem:[%s21695_s30 + $0x90] sm:$0xff] }
 0x329   : > { %13913 = vmatmul.mubr.msk.f32.gmra.mrb[114].mxu1 %vm1389_vm2, %v2365_v14  ;;  %14084 = vmatprep.mubr.msk.f32.mxu0 %vm16722_vm0, %v21596_v4 }
 0x32a   : > { %v2171_v55 = vmul.f32 %v18031_v6, %v1972_v31  ;;  %13915 = vmatprep.mubr.msk.f32.mxu1 %vm16722_vm0, %v21596_v4  ;;  %vm2268_vm10 = vcmp.ge.f32.partialorder %v2219_v43, 0.0  ;;  %v2317_v56 = vmul.f32 0.01, %v2219_v43  ;;  %v15047_v31 = vld [vmem:[%s21695_s30 + $0x98] sm:$0xff] }
 0x32b   : > { %v1976_v52 = vpop.f32.mrb[124].mxu0  ;;  %v18330_v27 = vpop.f32.mrb[24].mxu1 }
 0x32c   : > { %v2220_v32 = vadd.f32 %v18036_v48, %v2171_v55  ;;  %v1977_v57 = vadd.f32 %v18021_v47, %v1976_v52  ;;  %v13760_v38 = vpop.f32.mrb[125].mxu0  ;;  %14085 = vmatmul.mubr.msk.f32.gmra.mrb[230].mxu0 %vm657_vm1, %v15044_v22  ;;  %v2366_v45 = vsel %vm2268_vm10, %v2219_v43, %v2317_v56  ;;  %v13612_v17 = vpop.f32.mrb[25].mxu1 }
 0x32d   : > { %13916 = vmatmul.mubr.msk.f32.gmra.mrb[116].mxu1 %vm1389_vm2, %v2366_v45  ;;  %14087 = vmatprep.mubr.msk.f32.mxu0 %vm16722_vm0, %v21596_v4  ;;  %v15048_v38 = vld [vmem:[%s21695_s30 + $0xa0] sm:$0xff] }
 0x32e   : > { %v2172_v8 = vmul.f32 %v18031_v6, %v1977_v57  ;;  %13918 = vmatprep.mubr.msk.f32.mxu1 %vm16722_vm0, %v21596_v4  ;;  %vm2269_vm11 = vcmp.ge.f32.partialorder %v2220_v32, 0.0  ;;  %v2318_v33 = vmul.f32 0.01, %v2220_v32 }
 0x32f   : > { %v1981_v39 = vpop.f32.mrb[126].mxu0  ;;  %v18344_v46 = vpop.f32.mrb[26].mxu1 }
 0x330   : > { %v2221_v28 = vadd.f32 %v18036_v48, %v2172_v8  ;;  %v1982_v60 = vadd.f32 %v18021_v47, %v1981_v39  ;;  %v13763_v61 = vpop.f32.mrb[127].mxu0  ;;  %14088 = vmatmul.mubr.msk.f32.gmra.mrb[232].mxu0 %vm657_vm1, %v15045_v24  ;;  %v2367_v63 = vsel %vm2269_vm11, %v2220_v32, %v2318_v33  ;;  %v13615_v40 = vpop.f32.mrb[27].mxu1  ;;  %v15049_v24 = vld [vmem:[%s21695_s30 + $0xa8] sm:$0xff] }
 0x331   : > { %13919 = vmatmul.mubr.msk.f32.gmra.mrb[118].mxu1 %vm1389_vm2, %v2367_v63  ;;  %14090 = vmatprep.mubr.msk.f32.mxu0 %vm16722_vm0, %v21596_v4 }
 0x332   : > { %v2173_v34 = vmul.f32 %v18031_v6, %v1982_v60  ;;  %13921 = vmatprep.mubr.msk.f32.mxu1 %vm16722_vm0, %v21596_v4  ;;  %vm2270_vm12 = vcmp.ge.f32.partialorder %v2221_v28, 0.0  ;;  %v2319_v0 = vmul.f32 0.01, %v2221_v28 }
 0x333   : > { %v1986_v29 = vpop.f32.mrb[128].mxu0  ;;  %v18358_v13 = vpop.f32.mrb[28].mxu1 }
 0x334   : > { %v2222_v1 = vadd.f32 %v18036_v48, %v2173_v34  ;;  %v1987_v5 = vadd.f32 %v18021_v47, %v1986_v29  ;;  %v13766_v41 = vpop.f32.mrb[129].mxu0  ;;  %14091 = vmatmul.mubr.msk.f32.gmra.mrb[234].mxu0 %vm657_vm1, %v15046_v35  ;;  %v2368_v11 = vsel %vm2270_vm12, %v2221_v28, %v2319_v0  ;;  %v13618_v49 = vpop.f32.mrb[29].mxu1 }
 0x335   : > { %13922 = vmatmul.mubr.msk.f32.gmra.mrb[120].mxu1 %vm1389_vm2, %v2368_v11  ;;  %14093 = vmatprep.mubr.msk.f32.mxu0 %vm16722_vm0, %v21596_v4  ;;  %v15050_v11 = vld [vmem:[%s21695_s30 + $0xb0] sm:$0xff] }
 0x336   : > { %v2174_v30 = vmul.f32 %v18031_v6, %v1987_v5  ;;  %13924 = vmatprep.mubr.msk.f32.mxu1 %vm16722_vm0, %v21596_v4  ;;  %vm2271_vm13 = vcmp.ge.f32.partialorder %v2222_v1, 0.0  ;;  %v2320_v10 = vmul.f32 0.01, %v2222_v1 }
 0x337   : > { %v1991_v15 = vpop.f32.mrb[130].mxu0  ;;  %v18372_v20 = vpop.f32.mrb[30].mxu1 }
 0x338   : > { %v2223_v50 = vadd.f32 %v18036_v48, %v2174_v30  ;;  %v1992_v21 = vadd.f32 %v18021_v47, %v1991_v15  ;;  %v13769_v43 = vpop.f32.mrb[131].mxu0  ;;  %14094 = vmatmul.mubr.msk.f32.gmra.mrb[236].mxu0 %vm657_vm1, %v15047_v31  ;;  %v2369_v53 = vsel %vm2271_vm13, %v2222_v1, %v2320_v10  ;;  %v13621_v51 = vpop.f32.mrb[31].mxu1 }
 0x339   : > { %13925 = vmatmul.mubr.msk.f32.gmra.mrb[122].mxu1 %vm1389_vm2, %v2369_v53  ;;  %14096 = vmatprep.mubr.msk.f32.mxu0 %vm16722_vm0, %v21596_v4  ;;  %v15051_v51 = vld [vmem:[%s21695_s30 + $0xb8] sm:$0xff] }
 0x33a   : > { %v2175_v14 = vmul.f32 %v18031_v6, %v1992_v21  ;;  %13927 = vmatprep.mubr.msk.f32.mxu1 %vm16722_vm0, %v21596_v4  ;;  %vm2272_vm14 = vcmp.ge.f32.partialorder %v2223_v50, 0.0  ;;  %v2321_v37 = vmul.f32 0.01, %v2223_v50 }
 0x33b   : > { %v1996_v55 = vpop.f32.mrb[132].mxu0  ;;  %v18386_v56 = vpop.f32.mrb[32].mxu1 }
 0x33c   : > { %v2224_v52 = vadd.f32 %v18036_v48, %v2175_v14  ;;  %v1997_v32 = vadd.f32 %v18021_v47, %v1996_v55  ;;  %v13772_v57 = vpop.f32.mrb[133].mxu0  ;;  %14097 = vmatmul.mubr.msk.f32.gmra.mrb[238].mxu0 %vm657_vm1, %v15048_v38  ;;  %v2370_v22 = vsel %vm2272_vm14, %v2223_v50, %v2321_v37  ;;  %v13624_v45 = vpop.f32.mrb[33].mxu1 }
 0x33d   : > { %13928 = vmatmul.mubr.msk.f32.gmra.mrb[124].mxu1 %vm1389_vm2, %v2370_v22  ;;  %14099 = vmatprep.mubr.msk.f32.mxu0 %vm16722_vm0, %v21596_v4 }
 0x33e   : > { %v2176_v17 = vmul.f32 %v18031_v6, %v1997_v32  ;;  %13930 = vmatprep.mubr.msk.f32.mxu1 %vm16722_vm0, %v21596_v4  ;;  %vm2273_vm15 = vcmp.ge.f32.partialorder %v2224_v52, 0.0  ;;  %v2322_v8 = vmul.f32 0.01, %v2224_v52 }
 0x33f   : > { %v2001_v33 = vpop.f32.mrb[134].mxu0  ;;  %v18400_v39 = vpop.f32.mrb[34].mxu1 }
 0x340   : > { %v2225_v28 = vadd.f32 %v18036_v48, %v2176_v17  ;;  %v2002_v60 = vadd.f32 %v18021_v47, %v2001_v33  ;;  %v13775_v61 = vpop.f32.mrb[135].mxu0  ;;  %14100 = vmatmul.mubr.msk.f32.gmra.mrb[240].mxu0 %vm657_vm1, %v15049_v24  ;;  %v2371_v63 = vsel %vm2273_vm15, %v2224_v52, %v2322_v8  ;;  %v13627_v40 = vpop.f32.mrb[35].mxu1  ;;  %v15052_v17 = vld [vmem:[%s21695_s30 + $0xc0] sm:$0xff] }
 0x341   : > { %13931 = vmatmul.mubr.msk.f32.gmra.mrb[126].mxu1 %vm1389_vm2, %v2371_v63  ;;  %14102 = vmatprep.mubr.msk.f32.mxu0 %vm16722_vm0, %v21596_v4 }
 0x342   : > { %v2177_v34 = vmul.f32 %v18031_v6, %v2002_v60  ;;  %13933 = vmatprep.mubr.msk.f32.mxu1 %vm16722_vm0, %v21596_v4  ;;  %vm2274_vm3 = vcmp.ge.f32.partialorder %v2225_v28, 0.0  ;;  %v2323_v0 = vmul.f32 0.01, %v2225_v28 }
 0x343   : > { %v2006_v29 = vpop.f32.mrb[136].mxu0  ;;  %v18414_v1 = vpop.f32.mrb[36].mxu1 }
 0x344   : > { %v2226_v5 = vadd.f32 %v18036_v48, %v2177_v34  ;;  %v2007_v41 = vadd.f32 %v18021_v47, %v2006_v29  ;;  %v13778_v35 = vpop.f32.mrb[137].mxu0  ;;  %14103 = vmatmul.mubr.msk.f32.gmra.mrb[242].mxu0 %vm657_vm1, %v15050_v11  ;;  %v2372_v49 = vsel %vm2274_vm3, %v2225_v28, %v2323_v0  ;;  %v13630_v30 = vpop.f32.mrb[37].mxu1  ;;  %v15053_v0 = vld [vmem:[%s21695_s30 + $0xc8] sm:$0xff] }
 0x345   : > { %13934 = vmatmul.mubr.msk.f32.gmra.mrb[128].mxu1 %vm1389_vm2, %v2372_v49  ;;  %14105 = vmatprep.mubr.msk.f32.mxu0 %vm16722_vm0, %v21596_v4 }
 0x346   : > { %v2178_v10 = vmul.f32 %v18031_v6, %v2007_v41  ;;  %13936 = vmatprep.mubr.msk.f32.mxu1 %vm16722_vm0, %v21596_v4  ;;  %vm2275_vm4 = vcmp.ge.f32.partialorder %v2226_v5, 0.0  ;;  %v2324_v15 = vmul.f32 0.01, %v2226_v5 }
 0x347   : > { %v2011_v50 = vpop.f32.mrb[138].mxu0  ;;  %v18428_v21 = vpop.f32.mrb[38].mxu1 }
 0x348   : > { %v2227_v43 = vadd.f32 %v18036_v48, %v2178_v10  ;;  %v2012_v31 = vadd.f32 %v18021_v47, %v2011_v50  ;;  %v13781_v53 = vpop.f32.mrb[139].mxu0  ;;  %14106 = vmatmul.mubr.msk.f32.gmra.mrb[244].mxu0 %vm657_vm1, %v15051_v51  ;;  %v2373_v14 = vsel %vm2275_vm4, %v2226_v5, %v2324_v15  ;;  %v13633_v37 = vpop.f32.mrb[39].mxu1  ;;  %v15054_v50 = vld [vmem:[%s21695_s30 + $0xd0] sm:$0xff] }
 0x349   : > { %13937 = vmatmul.mubr.msk.f32.gmra.mrb[130].mxu1 %vm1389_vm2, %v2373_v14  ;;  %14108 = vmatprep.mubr.msk.f32.mxu0 %vm16722_vm0, %v21596_v4 }
 0x34a   : > { %v2179_v55 = vmul.f32 %v18031_v6, %v2012_v31  ;;  %13939 = vmatprep.mubr.msk.f32.mxu1 %vm16722_vm0, %v21596_v4  ;;  %vm2276_vm5 = vcmp.ge.f32.partialorder %v2227_v43, 0.0  ;;  %v2325_v52 = vmul.f32 0.01, %v2227_v43 }
 0x34b   : > { %v2016_v32 = vpop.f32.mrb[140].mxu0  ;;  %v18442_v57 = vpop.f32.mrb[40].mxu1 }
 0x34c   : > { %v2228_v38 = vadd.f32 %v18036_v48, %v2179_v55  ;;  %v2017_v22 = vadd.f32 %v18021_v47, %v2016_v32  ;;  %v13784_v45 = vpop.f32.mrb[141].mxu0  ;;  %14109 = vmatmul.mubr.msk.f32.gmra.mrb[246].mxu0 %vm657_vm1, %v15052_v17  ;;  %v2374_v8 = vsel %vm2276_vm5, %v2227_v43, %v2325_v52  ;;  %v13636_v33 = vpop.f32.mrb[41].mxu1 }
 0x34d   : > { %13940 = vmatmul.mubr.msk.f32.gmra.mrb[132].mxu1 %vm1389_vm2, %v2374_v8  ;;  %14111 = vmatprep.mubr.msk.f32.mxu0 %vm16722_vm0, %v21596_v4 }
 0x34e   : > { %v2180_v28 = vmul.f32 %v18031_v6, %v2017_v22  ;;  %13942 = vmatprep.mubr.msk.f32.mxu1 %vm16722_vm0, %v21596_v4  ;;  %vm2277_vm6 = vcmp.ge.f32.partialorder %v2228_v38, 0.0  ;;  %v2326_v60 = vmul.f32 0.01, %v2228_v38 }
 0x34f   : > { %v2021_v61 = vpop.f32.mrb[142].mxu0  ;;  %v18456_v24 = vpop.f32.mrb[42].mxu1 }
 0x350   : > { %v2229_v63 = vadd.f32 %v18036_v48, %v2180_v28  ;;  %v2022_v40 = vadd.f32 %v18021_v47, %v2021_v61  ;;  %v13787_v34 = vpop.f32.mrb[143].mxu0  ;;  %14112 = vmatmul.mubr.msk.f32.gmra.mrb[248].mxu0 %vm657_vm1, %v15053_v0  ;;  %v2375_v29 = vsel %vm2277_vm6, %v2228_v38, %v2326_v60  ;;  %v13639_v5 = vpop.f32.mrb[43].mxu1  ;;  %v15055_v38 = vld [vmem:[%s21695_s30 + $0xd8] sm:$0xff] }
 0x351   : > { %13943 = vmatmul.mubr.msk.f32.gmra.mrb[134].mxu1 %vm1389_vm2, %v2375_v29  ;;  %14114 = vmatprep.mubr.msk.f32.mxu0 %vm16722_vm0, %v21596_v4 }
 0x352   : > { %v2181_v41 = vmul.f32 %v18031_v6, %v2022_v40  ;;  %13945 = vmatprep.mubr.msk.f32.mxu1 %vm16722_vm0, %v21596_v4  ;;  %vm2278_vm7 = vcmp.ge.f32.partialorder %v2229_v63, 0.0  ;;  %v2327_v35 = vmul.f32 0.01, %v2229_v63  ;;  %v15056_v40 = vld [vmem:[%s21695_s30 + $0xe0] sm:$0xff] }
 0x353   : > { %v2026_v11 = vpop.f32.mrb[144].mxu0  ;;  %v18470_v49 = vpop.f32.mrb[44].mxu1 }
 0x354   : > { %v2230_v30 = vadd.f32 %v18036_v48, %v2181_v41  ;;  %v2027_v10 = vadd.f32 %v18021_v47, %v2026_v11  ;;  %v13790_v15 = vpop.f32.mrb[145].mxu0  ;;  %14115 = vmatmul.mubr.msk.f32.gmra.mrb[250].mxu0 %vm657_vm1, %v15054_v50  ;;  %v2376_v43 = vsel %vm2278_vm7, %v2229_v63, %v2327_v35  ;;  %v13642_v31 = vpop.f32.mrb[45].mxu1 }
 0x355   : > { %13946 = vmatmul.mubr.msk.f32.gmra.mrb[136].mxu1 %vm1389_vm2, %v2376_v43  ;;  %14117 = vmatprep.mubr.msk.f32.mxu0 %vm16722_vm0, %v21596_v4  ;;  %v15057_v15 = vld [vmem:[%s21695_s30 + $0xe8] sm:$0xff] }
 0x356   : > { %v2182_v53 = vmul.f32 %v18031_v6, %v2027_v10  ;;  %13948 = vmatprep.mubr.msk.f32.mxu1 %vm16722_vm0, %v21596_v4  ;;  %vm2279_vm8 = vcmp.ge.f32.partialorder %v2230_v30, 0.0  ;;  %v2328_v51 = vmul.f32 0.01, %v2230_v30 }
 0x357   : > { %v2031_v14 = vpop.f32.mrb[146].mxu0  ;;  %v18484_v37 = vpop.f32.mrb[46].mxu1 }
 0x358   : > { %v2231_v55 = vadd.f32 %v18036_v48, %v2182_v53  ;;  %v2032_v52 = vadd.f32 %v18021_v47, %v2031_v14  ;;  %v13793_v32 = vpop.f32.mrb[147].mxu0  ;;  %14118 = vmatmul.mubr.msk.f32.gmra.mrb[252].mxu0 %vm657_vm1, %v15055_v38  ;;  %v2377_v22 = vsel %vm2279_vm8, %v2230_v30, %v2328_v51  ;;  %v13645_v45 = vpop.f32.mrb[47].mxu1  ;;  %v15058_v38 = vld [vmem:[%s21695_s30 + $0xf0] sm:$0xff] }
 0x359   : > { %13949 = vmatmul.mubr.msk.f32.gmra.mrb[138].mxu1 %vm1389_vm2, %v2377_v22  ;;  %14120 = vmatprep.mubr.msk.f32.mxu0 %vm16722_vm0, %v21596_v4 }
 0x35a   : > { %v2183_v17 = vmul.f32 %v18031_v6, %v2032_v52  ;;  %13951 = vmatprep.mubr.msk.f32.mxu1 %vm16722_vm0, %v21596_v4  ;;  %vm2280_vm9 = vcmp.ge.f32.partialorder %v2231_v55, 0.0  ;;  %v2329_v8 = vmul.f32 0.01, %v2231_v55 }
 0x35b   : > { %v2036_v33 = vpop.f32.mrb[148].mxu0  ;;  %v18498_v28 = vpop.f32.mrb[48].mxu1 }
 0x35c   : > { %v2232_v60 = vadd.f32 %v18036_v48, %v2183_v17  ;;  %v2037_v61 = vadd.f32 %v18021_v47, %v2036_v33  ;;  %v13796_v63 = vpop.f32.mrb[149].mxu0  ;;  %14121 = vmatmul.mubr.msk.f32.gmra.mrb[254].mxu0 %vm657_vm1, %v15056_v40  ;;  %v2378_v34 = vsel %vm2280_vm9, %v2231_v55, %v2329_v8  ;;  %v13648_v0 = vpop.f32.mrb[49].mxu1 }
 0x35d   : > { %13952 = vmatmul.mubr.msk.f32.gmra.mrb[140].mxu1 %vm1389_vm2, %v2378_v34  ;;  %14123 = vmatprep.mubr.msk.f32.mxu0 %vm16722_vm0, %v21596_v4  ;;  %v15059_v34 = vld [vmem:[%s21695_s30 + $0xf8] sm:$0xff] }
 0x35e   : > { %v2184_v29 = vmul.f32 %v18031_v6, %v2037_v61  ;;  %13954 = vmatprep.mubr.msk.f32.mxu1 %vm16722_vm0, %v21596_v4  ;;  %vm2281_vm10 = vcmp.ge.f32.partialorder %v2232_v60, 0.0  ;;  %v2330_v5 = vmul.f32 0.01, %v2232_v60 }
 0x35f   : > { %v2041_v41 = vpop.f32.mrb[150].mxu0  ;;  %v18512_v35 = vpop.f32.mrb[50].mxu1 }
 0x360   : > { %v2233_v11 = vadd.f32 %v18036_v48, %v2184_v29  ;;  %v2042_v30 = vadd.f32 %v18021_v47, %v2041_v41  ;;  %v13799_v10 = vpop.f32.mrb[151].mxu0  ;;  %14124 = vmatmul.mubr.msk.f32.gmra.mrb[0].mxu0 %vm657_vm1, %v15057_v15  ;;  %v2379_v50 = vsel %vm2281_vm10, %v2232_v60, %v2330_v5  ;;  %v13651_v43 = vpop.f32.mrb[51].mxu1 }
 0x361   : > { %13955 = vmatmul.mubr.msk.f32.gmra.mrb[142].mxu1 %vm1389_vm2, %v2379_v50  ;;  %14126 = vmatprep.mubr.msk.f32.mxu0 %vm16722_vm0, %v21596_v4  ;;  %v15060_v43 = vld [vmem:[%s21695_s30 + $0x100] sm:$0xff] }
 0x362   : > { %v2185_v31 = vmul.f32 %v18031_v6, %v2042_v30  ;;  %13957 = vmatprep.mubr.msk.f32.mxu1 %vm16722_vm0, %v21596_v4  ;;  %vm2282_vm11 = vcmp.ge.f32.partialorder %v2233_v11, 0.0  ;;  %v2331_v53 = vmul.f32 0.01, %v2233_v11 }
 0x363   : > { %v2046_v51 = vpop.f32.mrb[152].mxu0  ;;  %v18526_v14 = vpop.f32.mrb[52].mxu1 }
 0x364   : > { %v2234_v55 = vadd.f32 %v18036_v48, %v2185_v31  ;;  %v2047_v52 = vadd.f32 %v18021_v47, %v2046_v51  ;;  %v13802_v32 = vpop.f32.mrb[153].mxu0  ;;  %14127 = vmatmul.mubr.msk.f32.gmra.mrb[2].mxu0 %vm657_vm1, %v15058_v38  ;;  %v2380_v22 = vsel %vm2282_vm11, %v2233_v11, %v2331_v53  ;;  %v13654_v45 = vpop.f32.mrb[53].mxu1  ;;  %v18571_v38 = vld [vmem:[#allocation5] ss:$0 sm:$0xff] }
 0x365   : > { %13958 = vmatmul.mubr.msk.f32.gmra.mrb[144].mxu1 %vm1389_vm2, %v2380_v22  ;;  %14129 = vmatprep.mubr.msk.f32.mxu0 %vm16722_vm0, %v21596_v4 }
 0x366   : > { %v2186_v17 = vmul.f32 %v18031_v6, %v2047_v52  ;;  %13960 = vmatprep.mubr.msk.f32.mxu1 %vm16722_vm0, %v21596_v4  ;;  %vm2283_vm12 = vcmp.ge.f32.partialorder %v2234_v55, 0.0  ;;  %v2332_v8 = vmul.f32 0.01, %v2234_v55 }
 0x367   : > { %v2051_v33 = vpop.f32.mrb[154].mxu0  ;;  %v18540_v60 = vpop.f32.mrb[54].mxu1 }
 0x368   : > { %v2235_v61 = vadd.f32 %v18036_v48, %v2186_v17  ;;  %v2052_v63 = vadd.f32 %v18021_v47, %v2051_v33  ;;  %v13805_v40 = vpop.f32.mrb[155].mxu0  ;;  %14130 = vmatmul.mubr.msk.f32.gmra.mrb[4].mxu0 %vm657_vm1, %v15059_v34  ;;  %v2381_v0 = vsel %vm2283_vm12, %v2234_v55, %v2332_v8  ;;  %v13657_v29 = vpop.f32.mrb[55].mxu1  ;;  %v15062_v17 = vld [vmem:[%s21695_s30 + $0x108] sm:$0xff]  ;;  %v18581_v33 = vld [vmem:[#allocation7] ss:$0 sm:$0xff] }
 0x369   : > { %13961 = vmatmul.mubr.msk.f32.gmra.mrb[146].mxu1 %vm1389_vm2, %v2381_v0  ;;  %14132 = vmatprep.mubr.msk.f32.mxu0 %vm16722_vm0, %v21596_v4  ;;  %v18588_v34 = vld [vmem:[#allocation8] ss:$0 sm:$0xff] }
 0x36a   : > { %v2187_v5 = vmul.f32 %v18031_v6, %v2052_v63  ;;  %13963 = vmatprep.mubr.msk.f32.mxu1 %vm16722_vm0, %v21596_v4  ;;  %vm2284_vm13 = vcmp.ge.f32.partialorder %v2235_v61, 0.0  ;;  %v2333_v41 = vmul.f32 0.01, %v2235_v61 }
 0x36b   : > { %v2056_v11 = vpop.f32.mrb[156].mxu0  ;;  %v18554_v30 = vpop.f32.mrb[56].mxu1 }
 0x36c   : > { %v2236_v10 = vadd.f32 %v18036_v48, %v2187_v5  ;;  %v2057_v15 = vadd.f32 %v18021_v47, %v2056_v11  ;;  %v13808_v50 = vpop.f32.mrb[157].mxu0  ;;  %14133 = vmatmul.mubr.msk.f32.gmra.mrb[6].mxu0 %vm657_vm1, %v15060_v43  ;;  %v2382_v31 = vsel %vm2284_vm13, %v2235_v61, %v2333_v41  ;;  %v13660_v53 = vpop.f32.mrb[57].mxu1  ;;  %v15065_v41 = vld [vmem:[%s21695_s30 + $0x110] sm:$0xff] }
 0x36d   : > { %13964 = vmatmul.mubr.msk.f32.gmra.mrb[148].mxu1 %vm1389_vm2, %v2382_v31  ;;  %14135 = vmatprep.mubr.msk.f32.mxu0 %vm16722_vm0, %v21596_v4 }
 0x36e   : > { %v2188_v51 = vmul.f32 %v18031_v6, %v2057_v15  ;;  %13966 = vmatprep.mubr.msk.f32.mxu1 %vm16722_vm0, %v21596_v4  ;;  %vm2285_vm14 = vcmp.ge.f32.partialorder %v2236_v10, 0.0  ;;  %v2334_v47 = vmul.f32 0.01, %v2236_v10 }
 0x36f   : > { %v2061_v55 = vpop.f32.mrb[158].mxu0  ;;  %v18568_v52 = vpop.f32.mrb[58].mxu1 }
 0x370   : > { %v2237_v32 = vadd.f32 %v18036_v48, %v2188_v51  ;;  %v2062_v22 = vadd.f32 %v18571_v38, %v2061_v55  ;;  %v13811_v45 = vpop.f32.mrb[159].mxu0  ;;  %14136 = vmatmul.mubr.msk.f32.gmra.mrb[8].mxu0 %vm657_vm1, %v15062_v17  ;;  %v2383_v6 = vsel %vm2285_vm14, %v2236_v10, %v2334_v47  ;;  %v13663_v8 = vpop.f32.mrb[59].mxu1  ;;  %v15066_v55 = vld [vmem:[%s21695_s30 + $0x118] sm:$0xff] }
 0x371   : > { %13967 = vmatmul.mubr.msk.f32.gmra.mrb[150].mxu1 %vm1389_vm2, %v2383_v6  ;;  %14138 = vmatprep.mubr.msk.f32.mxu0 %vm16722_vm0, %v21596_v4 }
 0x372   : > { %v2189_v48 = vmul.f32 %v18581_v33, %v2062_v22  ;;  %13969 = vmatprep.mubr.msk.f32.mxu1 %vm16722_vm0, %v21596_v4  ;;  %vm2286_vm15 = vcmp.ge.f32.partialorder %v2237_v32, 0.0  ;;  %v2335_v61 = vmul.f32 0.01, %v2237_v32 }
 0x373   : > { %v2066_v63 = vpop.f32.mrb[160].mxu0  ;;  %v18586_v40 = vpop.f32.mrb[60].mxu1 }
 0x374   : > { %v2238_v0 = vadd.f32 %v18588_v34, %v2189_v48  ;;  %v2067_v29 = vadd.f32 %v18571_v38, %v2066_v63  ;;  %v13814_v5 = vpop.f32.mrb[161].mxu0  ;;  %14139 = vmatmul.mubr.msk.f32.gmra.mrb[10].mxu0 %vm657_vm1, %v15065_v41  ;;  %v2384_v11 = vsel %vm2286_vm15, %v2237_v32, %v2335_v61  ;;  %v13666_v10 = vpop.f32.mrb[61].mxu1 }
 0x375   : > { %13970 = vmatmul.mubr.msk.f32.gmra.mrb[152].mxu1 %vm1389_vm2, %v2384_v11  ;;  %14141 = vmatprep.mubr.msk.f32.mxu0 %vm16722_vm0, %v21596_v4 }
 0x376   : > { %v2190_v15 = vmul.f32 %v18581_v33, %v2067_v29  ;;  %13972 = vmatprep.mubr.msk.f32.mxu1 %vm16722_vm0, %v21596_v4  ;;  %vm2287_vm3 = vcmp.ge.f32.partialorder %v2238_v0, 0.0  ;;  %v2336_v50 = vmul.f32 0.01, %v2238_v0 }
 0x377   : > { %v2071_v43 = vpop.f32.mrb[162].mxu0  ;;  %v18602_v31 = vpop.f32.mrb[62].mxu1 }
 0x378   : > { %v2239_v53 = vadd.f32 %v18588_v34, %v2190_v15  ;;  %v2072_v51 = vadd.f32 %v18571_v38, %v2071_v43  ;;  %v13817_v47 = vpop.f32.mrb[163].mxu0  ;;  %14142 = vmatmul.mubr.msk.f32.gmra.mrb[12].mxu0 %vm657_vm1, %v15066_v55  ;;  %v2385_v32 = vsel %vm2287_vm3, %v2238_v0, %v2336_v50  ;;  %v13669_v22 = vpop.f32.mrb[63].mxu1  ;;  %v15067_v0 = vld [vmem:[%s21695_s30 + $0x120] sm:$0xff] }
 0x379   : > { %13973 = vmatmul.mubr.msk.f32.gmra.mrb[154].mxu1 %vm1389_vm2, %v2385_v32  ;;  %14144 = vmatprep.mubr.msk.f32.mxu0 %vm16722_vm0, %v21596_v4 }
 0x37a   : > { %v2191_v45 = vmul.f32 %v18581_v33, %v2072_v51  ;;  %13975 = vmatprep.mubr.msk.f32.mxu1 %vm16722_vm0, %v21596_v4  ;;  %vm2288_vm4 = vcmp.ge.f32.partialorder %v2239_v53, 0.0  ;;  %v2337_v17 = vmul.f32 0.01, %v2239_v53  ;;  %v15068_v51 = vld [vmem:[%s21695_s30 + $0x128] sm:$0xff] }
 0x37b   : > { %v2076_v6 = vpop.f32.mrb[164].mxu0  ;;  %v18616_v8 = vpop.f32.mrb[64].mxu1 }
 0x37c   : > { %v2240_v48 = vadd.f32 %v18588_v34, %v2191_v45  ;;  %v2077_v61 = vadd.f32 %v18571_v38, %v2076_v6  ;;  %v13820_v63 = vpop.f32.mrb[165].mxu0  ;;  %14145 = vmatmul.mubr.msk.f32.gmra.mrb[14].mxu0 %vm657_vm1, %v15067_v0  ;;  %v2386_v29 = vsel %vm2288_vm4, %v2239_v53, %v2337_v17  ;;  %v13672_v5 = vpop.f32.mrb[65].mxu1 }
 0x37d   : > { %13976 = vmatmul.mubr.msk.f32.gmra.mrb[156].mxu1 %vm1389_vm2, %v2386_v29  ;;  %14147 = vmatprep.mubr.msk.f32.mxu0 %vm16722_vm0, %v21596_v4  ;;  %v15069_v63 = vld [vmem:[%s21695_s30 + $0x130] sm:$0xff] }
 0x37e   : > { %v2192_v41 = vmul.f32 %v18581_v33, %v2077_v61  ;;  %13978 = vmatprep.mubr.msk.f32.mxu1 %vm16722_vm0, %v21596_v4  ;;  %vm2289_vm5 = vcmp.ge.f32.partialorder %v2240_v48, 0.0  ;;  %v2338_v11 = vmul.f32 0.01, %v2240_v48 }
 0x37f   : > { %v2081_v10 = vpop.f32.mrb[166].mxu0  ;;  %v18630_v15 = vpop.f32.mrb[66].mxu1 }
 0x380   : > { %v2241_v50 = vadd.f32 %v18588_v34, %v2192_v41  ;;  %v2082_v43 = vadd.f32 %v18571_v38, %v2081_v10  ;;  %v13823_v53 = vpop.f32.mrb[167].mxu0  ;;  %14148 = vmatmul.mubr.msk.f32.gmra.mrb[16].mxu0 %vm657_vm1, %v15068_v51  ;;  %v2387_v47 = vsel %vm2289_vm5, %v2240_v48, %v2338_v11  ;;  %v13675_v55 = vpop.f32.mrb[67].mxu1  ;;  %v15070_v51 = vld [vmem:[%s21695_s30 + $0x138] sm:$0xff] }
 0x381   : > { %13979 = vmatmul.mubr.msk.f32.gmra.mrb[158].mxu1 %vm1389_vm2, %v2387_v47  ;;  %14150 = vmatprep.mubr.msk.f32.mxu0 %vm16722_vm0, %v21596_v4 }
 0x382   : > { %v2193_v32 = vmul.f32 %v18581_v33, %v2082_v43  ;;  %13981 = vmatprep.mubr.msk.f32.mxu1 %vm16722_vm0, %v21596_v4  ;;  %vm2290_vm6 = vcmp.ge.f32.partialorder %v2241_v50, 0.0  ;;  %v2339_v22 = vmul.f32 0.01, %v2241_v50 }
 0x383   : > { %v2086_v45 = vpop.f32.mrb[168].mxu0  ;;  %v18644_v17 = vpop.f32.mrb[68].mxu1 }
 0x384   : > { %v2242_v6 = vadd.f32 %v18588_v34, %v2193_v32  ;;  %v2087_v48 = vadd.f32 %v18571_v38, %v2086_v45  ;;  %v13826_v61 = vpop.f32.mrb[169].mxu0  ;;  %14151 = vmatmul.mubr.msk.f32.gmra.mrb[18].mxu0 %vm657_vm1, %v15069_v63  ;;  %v2388_v0 = vsel %vm2290_vm6, %v2241_v50, %v2339_v22  ;;  %v13678_v29 = vpop.f32.mrb[69].mxu1 }
 0x385   : > { %13982 = vmatmul.mubr.msk.f32.gmra.mrb[160].mxu1 %vm1389_vm2, %v2388_v0  ;;  %14153 = vmatprep.mubr.msk.f32.mxu0 %vm16722_vm0, %v21596_v4  ;;  %v15071_v0 = vld [vmem:[%s21695_s30 + $0x140] sm:$0xff] }
 0x386   : > { %v2194_v5 = vmul.f32 %v18581_v33, %v2087_v48  ;;  %13984 = vmatprep.mubr.msk.f32.mxu1 %vm16722_vm0, %v21596_v4  ;;  %vm2291_vm7 = vcmp.ge.f32.partialorder %v2242_v6, 0.0  ;;  %v2340_v41 = vmul.f32 0.01, %v2242_v6 }
 0x387   : > { %v2091_v11 = vpop.f32.mrb[170].mxu0  ;;  %v18658_v10 = vpop.f32.mrb[70].mxu1 }
 0x388   : > { %v2243_v43 = vadd.f32 %v18588_v34, %v2194_v5  ;;  %v2092_v50 = vadd.f32 %v18571_v38, %v2091_v11  ;;  %v13829_v53 = vpop.f32.mrb[171].mxu0  ;;  %14154 = vmatmul.mubr.msk.f32.gmra.mrb[20].mxu0 %vm657_vm1, %v15070_v51  ;;  %v2389_v47 = vsel %vm2291_vm7, %v2242_v6, %v2340_v41  ;;  %v13681_v55 = vpop.f32.mrb[71].mxu1 }
 0x389   : > { %13985 = vmatmul.mubr.msk.f32.gmra.mrb[162].mxu1 %vm1389_vm2, %v2389_v47  ;;  %14156 = vmatprep.mubr.msk.f32.mxu0 %vm16722_vm0, %v21596_v4  ;;  %v15072_v55 = vld [vmem:[%s21695_s30 + $0x148] sm:$0xff] }
 0x38a   : > { %v2195_v32 = vmul.f32 %v18581_v33, %v2092_v50  ;;  %13987 = vmatprep.mubr.msk.f32.mxu1 %vm16722_vm0, %v21596_v4  ;;  %vm2292_vm8 = vcmp.ge.f32.partialorder %v2243_v43, 0.0  ;;  %v2341_v22 = vmul.f32 0.01, %v2243_v43 }
 0x38b   : > { %v2096_v45 = vpop.f32.mrb[172].mxu0  ;;  %v18672_v48 = vpop.f32.mrb[72].mxu1 }
 0x38c   : > { %v2244_v61 = vadd.f32 %v18588_v34, %v2195_v32  ;;  %v2097_v6 = vadd.f32 %v18571_v38, %v2096_v45  ;;  %v13832_v63 = vpop.f32.mrb[173].mxu0  ;;  %14157 = vmatmul.mubr.msk.f32.gmra.mrb[22].mxu0 %vm657_vm1, %v15071_v0  ;;  %v2390_v29 = vsel %vm2292_vm8, %v2243_v43, %v2341_v22  ;;  %v13684_v5 = vpop.f32.mrb[73].mxu1 }
 0x38d   : > { %13988 = vmatmul.mubr.msk.f32.gmra.mrb[164].mxu1 %vm1389_vm2, %v2390_v29  ;;  %14159 = vmatprep.mubr.msk.f32.mxu0 %vm16722_vm0, %v21596_v4 }
 0x38e   : > { %v2196_v41 = vmul.f32 %v18581_v33, %v2097_v6  ;;  %13990 = vmatprep.mubr.msk.f32.mxu1 %vm16722_vm0, %v21596_v4  ;;  %vm2293_vm9 = vcmp.ge.f32.partialorder %v2244_v61, 0.0  ;;  %v2342_v11 = vmul.f32 0.01, %v2244_v61 }
 0x38f   : > { %v2101_v50 = vpop.f32.mrb[174].mxu0  ;;  %v18686_v53 = vpop.f32.mrb[74].mxu1 }
 0x390   : > { %v2245_v51 = vadd.f32 %v18588_v34, %v2196_v41  ;;  %v2102_v43 = vadd.f32 %v18571_v38, %v2101_v50  ;;  %v13835_v47 = vpop.f32.mrb[175].mxu0  ;;  %14160 = vmatmul.mubr.msk.f32.gmra.mrb[24].mxu0 %vm657_vm1, %v15072_v55  ;;  %v2391_v32 = vsel %vm2293_vm9, %v2244_v61, %v2342_v11  ;;  %v13687_v22 = vpop.f32.mrb[75].mxu1  ;;  %v15073_v41 = vld [vmem:[%s21695_s30 + $0x150] sm:$0xff] }
 0x391   : > { %13991 = vmatmul.mubr.msk.f32.gmra.mrb[166].mxu1 %vm1389_vm2, %v2391_v32  ;;  %14162 = vmatprep.mubr.msk.f32.mxu0 %vm16722_vm0, %v21596_v4 }
 0x392   : > { %v2197_v45 = vmul.f32 %v18581_v33, %v2102_v43  ;;  %13993 = vmatprep.mubr.msk.f32.mxu1 %vm16722_vm0, %v21596_v4  ;;  %vm2294_vm10 = vcmp.ge.f32.partialorder %v2245_v51, 0.0  ;;  %v2343_v6 = vmul.f32 0.01, %v2245_v51 }
 0x393   : > { %v2106_v63 = vpop.f32.mrb[176].mxu0  ;;  %v18700_v0 = vpop.f32.mrb[76].mxu1 }
 0x394   : > { %v2246_v29 = vadd.f32 %v18588_v34, %v2197_v45  ;;  %v2107_v61 = vadd.f32 %v18571_v38, %v2106_v63  ;;  %v13838_v5 = vpop.f32.mrb[177].mxu0  ;;  %14163 = vmatmul.mubr.msk.f32.gmra.mrb[26].mxu0 %vm657_vm1, %v15073_v41  ;;  %v2392_v11 = vsel %vm2294_vm10, %v2245_v51, %v2343_v6  ;;  %v13690_v50 = vpop.f32.mrb[77].mxu1  ;;  %v15074_v6 = vld [vmem:[%s21695_s30 + $0x158] sm:$0xff] }
 0x395   : > { %13994 = vmatmul.mubr.msk.f32.gmra.mrb[168].mxu1 %vm1389_vm2, %v2392_v11  ;;  %14165 = vmatprep.mubr.msk.f32.mxu0 %vm16722_vm0, %v21596_v4 }
 0x396   : > { %v2198_v43 = vmul.f32 %v18581_v33, %v2107_v61  ;;  %13996 = vmatprep.mubr.msk.f32.mxu1 %vm16722_vm0, %v21596_v4  ;;  %vm2295_vm11 = vcmp.ge.f32.partialorder %v2246_v29, 0.0  ;;  %v2344_v47 = vmul.f32 0.01, %v2246_v29 }
 0x397   : > { %v2111_v55 = vpop.f32.mrb[178].mxu0  ;;  %v18714_v32 = vpop.f32.mrb[78].mxu1 }
 0x398   : > { %v2247_v22 = vadd.f32 %v18588_v34, %v2198_v43  ;;  %v2112_v51 = vadd.f32 %v18571_v38, %v2111_v55  ;;  %v13841_v45 = vpop.f32.mrb[179].mxu0  ;;  %14166 = vmatmul.mubr.msk.f32.gmra.mrb[28].mxu0 %vm657_vm1, %v15074_v6  ;;  %v2393_v63 = vsel %vm2295_vm11, %v2246_v29, %v2344_v47  ;;  %v13693_v61 = vpop.f32.mrb[79].mxu1  ;;  %v15075_v55 = vld [vmem:[%s21695_s30 + $0x160] sm:$0xff] }
 0x399   : > { %13997 = vmatmul.mubr.msk.f32.gmra.mrb[170].mxu1 %vm1389_vm2, %v2393_v63  ;;  %14168 = vmatprep.mubr.msk.f32.mxu0 %vm16722_vm0, %v21596_v4 }
 0x39a   : > { %v2199_v5 = vmul.f32 %v18581_v33, %v2112_v51  ;;  %13999 = vmatprep.mubr.msk.f32.mxu1 %vm16722_vm0, %v21596_v4  ;;  %vm2296_vm12 = vcmp.ge.f32.partialorder %v2247_v22, 0.0  ;;  %v2345_v41 = vmul.f32 0.01, %v2247_v22 }
 0x39b   : > { %v2116_v11 = vpop.f32.mrb[180].mxu0  ;;  %v18728_v50 = vpop.f32.mrb[80].mxu1 }
 0x39c   : > { %v2248_v43 = vadd.f32 %v18588_v34, %v2199_v5  ;;  %v2117_v29 = vadd.f32 %v18571_v38, %v2116_v11  ;;  %v13844_v47 = vpop.f32.mrb[181].mxu0  ;;  %14169 = vmatmul.mubr.msk.f32.gmra.mrb[30].mxu0 %vm657_vm1, %v15075_v55  ;;  %v2394_v51 = vsel %vm2296_vm12, %v2247_v22, %v2345_v41  ;;  %v13696_v45 = vpop.f32.mrb[81].mxu1 }
 0x39d   : > { %14000 = vmatmul.mubr.msk.f32.gmra.mrb[172].mxu1 %vm1389_vm2, %v2394_v51  ;;  %14171 = vmatprep.mubr.msk.f32.mxu0 %vm16722_vm0, %v21596_v4  ;;  %v15076_v47 = vld [vmem:[%s21695_s30 + $0x168] sm:$0xff] }
 0x39e   : > { %v2200_v6 = vmul.f32 %v18581_v33, %v2117_v29  ;;  %14002 = vmatprep.mubr.msk.f32.mxu1 %vm16722_vm0, %v21596_v4  ;;  %vm2297_vm13 = vcmp.ge.f32.partialorder %v2248_v43, 0.0  ;;  %v2346_v63 = vmul.f32 0.01, %v2248_v43 }
 0x39f   : > { %v2121_v61 = vpop.f32.mrb[182].mxu0  ;;  %v18742_v5 = vpop.f32.mrb[82].mxu1 }
 0x3a0   : > { %v2249_v11 = vadd.f32 %v18588_v34, %v2200_v6  ;;  %v2122_v22 = vadd.f32 %v18571_v38, %v2121_v61  ;;  %v13847_v41 = vpop.f32.mrb[183].mxu0  ;;  %14172 = vmatmul.mubr.msk.f32.gmra.mrb[32].mxu0 %vm657_vm1, %v15076_v47  ;;  %v2395_v29 = vsel %vm2297_vm13, %v2248_v43, %v2346_v63  ;;  %v13699_v55 = vpop.f32.mrb[83].mxu1  ;;  %v15077_v47 = vld [vmem:[%s21695_s30 + $0x170] sm:$0xff] }
 0x3a1   : > { %14003 = vmatmul.mubr.msk.f32.gmra.mrb[174].mxu1 %vm1389_vm2, %v2395_v29  ;;  %14174 = vmatprep.mubr.msk.f32.mxu0 %vm16722_vm0, %v21596_v4 }
 0x3a2   : > { %v2201_v51 = vmul.f32 %v18581_v33, %v2122_v22  ;;  %14005 = vmatprep.mubr.msk.f32.mxu1 %vm16722_vm0, %v21596_v4  ;;  %vm2298_vm14 = vcmp.ge.f32.partialorder %v2249_v11, 0.0  ;;  %v2347_v45 = vmul.f32 0.01, %v2249_v11 }
 0x3a3   : > { %v2126_v6 = vpop.f32.mrb[184].mxu0  ;;  %v18756_v61 = vpop.f32.mrb[84].mxu1 }
 0x3a4   : > { %v2250_v41 = vadd.f32 %v18588_v34, %v2201_v51  ;;  %v2127_v43 = vadd.f32 %v18571_v38, %v2126_v6  ;;  %v13850_v63 = vpop.f32.mrb[185].mxu0  ;;  %14175 = vmatmul.mubr.msk.f32.gmra.mrb[34].mxu0 %vm657_vm1, %v15077_v47  ;;  %v2396_v22 = vsel %vm2298_vm14, %v2249_v11, %v2347_v45  ;;  %v13702_v29 = vpop.f32.mrb[85].mxu1  ;;  %v15078_v47 = vld [vmem:[%s21695_s30 + $0x178] sm:$0xff] }
 0x3a5   : > { %14006 = vmatmul.mubr.msk.f32.gmra.mrb[176].mxu1 %vm1389_vm2, %v2396_v22  ;;  %14177 = vmatprep.mubr.msk.f32.mxu0 %vm16722_vm0, %v21596_v4 }
 0x3a6   : > { %v2202_v55 = vmul.f32 %v18581_v33, %v2127_v43  ;;  %14008 = vmatprep.mubr.msk.f32.mxu1 %vm16722_vm0, %v21596_v4  ;;  %vm2299_vm15 = vcmp.ge.f32.partialorder %v2250_v41, 0.0  ;;  %v2348_v51 = vmul.f32 0.01, %v2250_v41 }
 0x3a7   : > { %v2131_v6 = vpop.f32.mrb[186].mxu0  ;;  %v18770_v63 = vpop.f32.mrb[86].mxu1 }
 0x3a8   : > { %21696 = vst [vmem:[#allocation26_spill] sm:$0xff] %v18770_v63  ;;  %v2251_v2 = vadd.f32 %v18588_v34, %v2202_v55  ;;  %v2132_v11 = vadd.f32 %v18571_v38, %v2131_v6  ;;  %v13853_v45 = vpop.f32.mrb[187].mxu0  ;;  %14178 = vmatmul.mubr.msk.f32.gmra.mrb[36].mxu0 %vm657_vm1, %v15078_v47  ;;  %v2397_v43 = vsel %vm2299_vm15, %v2250_v41, %v2348_v51  ;;  %v13705_v22 = vpop.f32.mrb[87].mxu1  ;;  %v15079_v47 = vld [vmem:[%s21695_s30 + $0x180] sm:$0xff] }
 0x3a9   : > { %14009 = vmatmul.mubr.msk.f32.gmra.mrb[178].mxu1 %vm1389_vm2, %v2397_v43  ;;  %14180 = vmatprep.mubr.msk.f32.mxu0 %vm16722_vm0, %v21596_v4 }
 0x3aa   : > { %v2203_v29 = vmul.f32 %v18581_v33, %v2132_v11  ;;  %14011 = vmatprep.mubr.msk.f32.mxu1 %vm16722_vm0, %v21596_v4  ;;  %vm2300_vm3 = vcmp.ge.f32.partialorder %v2251_v2, 0.0  ;;  %v2349_v55 = vmul.f32 0.01, %v2251_v2 }
 0x3ab   : > { %v2136_v6 = vpop.f32.mrb[188].mxu0  ;;  %v18784_v45 = vpop.f32.mrb[88].mxu1 }
 0x3ac   : > { %21697 = vst [vmem:[#allocation27_spill] sm:$0xff] %v18784_v45  ;;  %v2252_v63 = vadd.f32 %v18588_v34, %v2203_v29  ;;  %v2137_v41 = vadd.f32 %v18571_v38, %v2136_v6  ;;  %v13856_v51 = vpop.f32.mrb[189].mxu0  ;;  %14181 = vmatmul.mubr.msk.f32.gmra.mrb[38].mxu0 %vm657_vm1, %v15079_v47  ;;  %v2398_v11 = vsel %vm2300_vm3, %v2251_v2, %v2349_v55  ;;  %v13708_v43 = vpop.f32.mrb[89].mxu1  ;;  %v15080_v47 = vld [vmem:[%s21695_s30] sm:$0xff] }
 0x3ad   : > { %14012 = vmatmul.mubr.msk.f32.gmra.mrb[180].mxu1 %vm1389_vm2, %v2398_v11  ;;  %14350 = vmatprep.mubr.msk.f32.mxu0 %vm16722_vm0, %v21596_v4 }
 0x3ae   : > { %v2204_v22 = vmul.f32 %v18581_v33, %v2137_v41  ;;  %14014 = vmatprep.mubr.msk.f32.mxu1 %vm16722_vm0, %v21596_v4  ;;  %vm2301_vm4 = vcmp.ge.f32.partialorder %v2252_v63, 0.0  ;;  %v2350_v29 = vmul.f32 0.01, %v2252_v63 }
 0x3af   : > { %v2141_v6 = vpop.f32.mrb[190].mxu0  ;;  %v18798_v51 = vpop.f32.mrb[90].mxu1 }
 0x3b0   : > { %21698 = vst [vmem:[#allocation28_spill] sm:$0xff] %v18798_v51  ;;  %v2253_v45 = vadd.f32 %v18588_v34, %v2204_v22  ;;  %v2142_v2 = vadd.f32 %v18571_v38, %v2141_v6  ;;  %v13859_v55 = vpop.f32.mrb[191].mxu0  ;;  %14351 = vmatmul.mubr.msk.f32.vlgmr.msra.gmra.mrb[40].mxu0 %vm657_vm1, %v15080_v47  ;;  %v2399_v41 = vsel %vm2301_vm4, %v2252_v63, %v2350_v29  ;;  %v13711_v11 = vpop.f32.mrb[91].mxu1  ;;  %v15081_v47 = vld [vmem:[%s21695_s30 + $0x8] sm:$0xff] }
 0x3b1   : > { %14015 = vmatmul.mubr.msk.f32.gmra.mrb[182].mxu1 %vm1389_vm2, %v2399_v41  ;;  %14353 = vmatprep.mubr.msk.f32.mxu0 %vm16722_vm0, %v21596_v4 }
 0x3b2   : > { %v2205_v43 = vmul.f32 %v18581_v33, %v2142_v2  ;;  %14017 = vmatprep.mubr.msk.f32.mxu1 %vm16722_vm0, %v21596_v4  ;;  %vm2302_vm5 = vcmp.ge.f32.partialorder %v2253_v45, 0.0  ;;  %v2351_v22 = vmul.f32 0.01, %v2253_v45 }
 0x3b3   : > { %v2146_v6 = vpop.f32.mrb[192].mxu0  ;;  %v18812_v55 = vpop.f32.mrb[92].mxu1 }
 0x3b4   : > { %21699 = vst [vmem:[#allocation29_spill] sm:$0xff] %v18812_v55  ;;  %v2254_v51 = vadd.f32 %v18588_v34, %v2205_v43  ;;  %v2147_v63 = vadd.f32 %v18571_v38, %v2146_v6  ;;  %v13862_v29 = vpop.f32.mrb[193].mxu0  ;;  %14354 = vmatmul.mubr.msk.f32.gmra.mrb[42].mxu0 %vm657_vm1, %v15081_v47  ;;  %v2400_v2 = vsel %vm2302_vm5, %v2253_v45, %v2351_v22  ;;  %v13714_v41 = vpop.f32.mrb[93].mxu1  ;;  %v15082_v47 = vld [vmem:[%s21695_s30 + $0x10] sm:$0xff] }
 0x3b5   : > { %14018 = vmatmul.mubr.msk.f32.gmra.mrb[184].mxu1 %vm1389_vm2, %v2400_v2  ;;  %14356 = vmatprep.mubr.msk.f32.mxu0 %vm16722_vm0, %v21596_v4 }
 0x3b6   : > { %v2206_v11 = vmul.f32 %v18581_v33, %v2147_v63  ;;  %14020 = vmatprep.mubr.msk.f32.mxu1 %vm16722_vm0, %v21596_v4  ;;  %vm2303_vm6 = vcmp.ge.f32.partialorder %v2254_v51, 0.0  ;;  %v2352_v43 = vmul.f32 0.01, %v2254_v51 }
 0x3b7   : > { %v2151_v6 = vpop.f32.mrb[194].mxu0  ;;  %v18826_v29 = vpop.f32.mrb[94].mxu1 }
 0x3b8   : > { %21700 = vst [vmem:[#allocation30_spill] sm:$0xff] %v18826_v29  ;;  %v2255_v55 = vadd.f32 %v18588_v34, %v2206_v11  ;;  %v2152_v45 = vadd.f32 %v18571_v38, %v2151_v6  ;;  %v13865_v22 = vpop.f32.mrb[195].mxu0  ;;  %14357 = vmatmul.mubr.msk.f32.gmra.mrb[44].mxu0 %vm657_vm1, %v15082_v47  ;;  %v2401_v63 = vsel %vm2303_vm6, %v2254_v51, %v2352_v43  ;;  %v13717_v2 = vpop.f32.mrb[95].mxu1  ;;  %v15083_v51 = vld [vmem:[%s21695_s30 + $0x18] sm:$0xff] }
 0x3b9   : > { %14021 = vmatmul.mubr.msk.f32.gmra.mrb[186].mxu1 %vm1389_vm2, %v2401_v63  ;;  %14359 = vmatprep.mubr.msk.f32.mxu0 %vm16722_vm0, %v21596_v4 }
 0x3ba   : > { %v2207_v41 = vmul.f32 %v18581_v33, %v2152_v45  ;;  %14023 = vmatprep.mubr.msk.f32.mxu1 %vm16722_vm0, %v21596_v4  ;;  %vm2304_vm7 = vcmp.ge.f32.partialorder %v2255_v55, 0.0  ;;  %v2353_v11 = vmul.f32 0.01, %v2255_v55 }
 0x3bb   : > { %v2156_v6 = vpop.f32.mrb[196].mxu0 }
 0x3bc   : > { %v2256_v22 = vadd.f32 %v18588_v34, %v2207_v41  ;;  %v2157_v29 = vadd.f32 %v18571_v38, %v2156_v6  ;;  %v13868_v47 = vpop.f32.mrb[197].mxu0  ;;  %14360 = vmatmul.mubr.msk.f32.gmra.mrb[46].mxu0 %vm657_vm1, %v15083_v51  ;;  %v2402_v43 = vsel %vm2304_vm7, %v2255_v55, %v2353_v11  ;;  %v15084_v55 = vld [vmem:[%s21695_s30 + $0x20] sm:$0xff] }
 0x3bd   : > { %14024 = vmatmul.mubr.msk.f32.gmra.mrb[188].mxu1 %vm1389_vm2, %v2402_v43  ;;  %14362 = vmatprep.mubr.msk.f32.mxu0 %vm16722_vm0, %v21596_v4 }
 0x3be   : > { %v2208_v45 = vmul.f32 %v18581_v33, %v2157_v29  ;;  %14026 = vmatprep.mubr.msk.f32.mxu1 %vm16722_vm0, %v21596_v4  ;;  %vm2305_vm8 = vcmp.ge.f32.partialorder %v2256_v22, 0.0  ;;  %v2354_v63 = vmul.f32 0.01, %v2256_v22 }
 0x3bf   : > { %v2980_v2 = vpop.f32.mrb[198].mxu0 }
 0x3c0   : > { %v2257_v41 = vadd.f32 %v18588_v34, %v2208_v45  ;;  %v2981_v6 = vadd.f32 %v18571_v38, %v2980_v2  ;;  %v14038_v47 = vpop.f32.mrb[199].mxu0  ;;  %14363 = vmatmul.mubr.msk.f32.gmra.mrb[48].mxu0 %vm657_vm1, %v15084_v55  ;;  %v2403_v11 = vsel %vm2305_vm8, %v2256_v22, %v2354_v63  ;;  %v15085_v22 = vld [vmem:[%s21695_s30 + $0x28] sm:$0xff] }
 0x3c1   : > { %14027 = vmatmul.mubr.msk.f32.gmra.mrb[190].mxu1 %vm1389_vm2, %v2403_v11  ;;  %14365 = vmatprep.mubr.msk.f32.mxu0 %vm16722_vm0, %v21596_v4 }
 0x3c2   : > { %v3224_v29 = vmul.f32 %v18581_v33, %v2981_v6  ;;  %14029 = vmatprep.mubr.msk.f32.mxu1 %vm16722_vm0, %v21596_v4  ;;  %vm2306_vm9 = vcmp.ge.f32.partialorder %v2257_v41, 0.0  ;;  %v2355_v51 = vmul.f32 0.01, %v2257_v41 }
 0x3c3   : > { %v2985_v43 = vpop.f32.mrb[200].mxu0 }
 0x3c4   : > { %v3273_v45 = vadd.f32 %v18588_v34, %v3224_v29  ;;  %v2986_v2 = vadd.f32 %v18571_v38, %v2985_v43  ;;  %v14041_v47 = vpop.f32.mrb[201].mxu0  ;;  %14366 = vmatmul.mubr.msk.f32.gmra.mrb[50].mxu0 %vm657_vm1, %v15085_v22  ;;  %v2404_v63 = vsel %vm2306_vm9, %v2257_v41, %v2355_v51  ;;  %v15086_v41 = vld [vmem:[%s21695_s30 + $0x30] sm:$0xff] }
 0x3c5   : > { %14030 = vmatmul.mubr.msk.f32.gmra.mrb[192].mxu1 %vm1389_vm2, %v2404_v63  ;;  %14368 = vmatprep.mubr.msk.f32.mxu0 %vm16722_vm0, %v21596_v4 }
 0x3c6   : > { %vm3322_vm10 = vcmp.ge.f32.partialorder %v3273_v45, 0.0  ;;  %v3371_v6 = vmul.f32 0.01, %v3273_v45  ;;  %v3225_v55 = vmul.f32 %v18581_v33, %v2986_v2  ;;  %14199 = vmatprep.mubr.msk.f32.mxu1 %vm16722_vm0, %v21596_v4 }
 0x3c7   : > { %v2990_v11 = vpop.f32.mrb[202].mxu0 }
 0x3c8   : > { %v3274_v29 = vadd.f32 %v18588_v34, %v3225_v55  ;;  %v2991_v43 = vadd.f32 %v18571_v38, %v2990_v11  ;;  %v14044_v47 = vpop.f32.mrb[203].mxu0  ;;  %14369 = vmatmul.mubr.msk.f32.gmra.mrb[52].mxu0 %vm657_vm1, %v15086_v41  ;;  %v3420_v51 = vsel %vm3322_vm10, %v3273_v45, %v3371_v6  ;;  %v21701_v55 = vmov 0.0|0.0  }
 0x3c9   : > { %14200 = vmatmul.mubr.msk.f32.vlgmr.msra.gmra.mrb[194].mxu1 %vm1389_vm2, %v3420_v51  ;;  %14371 = vmatprep.mubr.msk.f32.mxu0 %vm16722_vm0, %v21596_v4  ;;  %v15087_v47 = vld [vmem:[%s21695_s30 + $0x38] sm:$0xff] }
 0x3ca   : > { %v3226_v2 = vmul.f32 %v18581_v33, %v2991_v43  ;;  %14710 = vmatpush3.bf16.msra.mxu1 %v17167_v7  ;;  %14202 = vmatprep.mubr.msk.f32.mxu1 %vm16722_vm0, %v21596_v4  ;;  %vm3323_vm11 = vcmp.ge.f32.partialorder %v3274_v29, 0.0  ;;  %v3372_v22 = vmul.f32 0.01, %v3274_v29 }
 0x3cb   : > { %v2995_v63 = vpop.f32.mrb[204].mxu0  ;;  %14711 = vmatprep.subr.bf16.mxu1 %v21701_v55 }
 0x3cc   : > { %v3275_v11 = vadd.f32 %v18588_v34, %v3226_v2  ;;  %v2996_v45 = vadd.f32 %v18571_v38, %v2995_v63  ;;  %v14047_v6 = vpop.f32.mrb[205].mxu0  ;;  %14372 = vmatmul.mubr.msk.f32.gmra.mrb[54].mxu0 %vm657_vm1, %v15087_v47  ;;  %v3421_v7 = vsel %vm3323_vm11, %v3274_v29, %v3372_v22  ;;  %v15088_v63 = vld [vmem:[%s21695_s30 + $0x40] sm:$0xff] }
 0x3cd   : > { %14203 = vmatmul.mubr.msk.f32.gmra.mrb[196].mxu1 %vm1389_vm2, %v3421_v7  ;;  %14374 = vmatprep.mubr.msk.f32.mxu0 %vm16722_vm0, %v21596_v4 }
 0x3ce   : > { %v3227_v43 = vmul.f32 %v18581_v33, %v2996_v45  ;;  %14205 = vmatprep.mubr.msk.f32.mxu1 %vm16722_vm0, %v21596_v4  ;;  %vm3324_vm12 = vcmp.ge.f32.partialorder %v3275_v11, 0.0  ;;  %v3373_v41 = vmul.f32 0.01, %v3275_v11  ;;  %14713 = vmatpush3.bf16.msra.mxu1 %v17190_v12 }
 0x3cf   : > { %v3000_v51 = vpop.f32.mrb[206].mxu0  ;;  %14714 = vmatprep.subr.bf16.mxu1 %v21701_v55 }
 0x3d0   : > { %v3276_v2 = vadd.f32 %v18588_v34, %v3227_v43  ;;  %v3001_v29 = vadd.f32 %v18571_v38, %v3000_v51  ;;  %v14050_v22 = vpop.f32.mrb[207].mxu0  ;;  %14375 = vmatmul.mubr.msk.f32.gmra.mrb[56].mxu0 %vm657_vm1, %v15088_v63  ;;  %v3422_v45 = vsel %vm3324_vm12, %v3275_v11, %v3373_v41  ;;  %v15089_v41 = vld [vmem:[%s21695_s30 + $0x48] sm:$0xff] }
 0x3d1   : > { %14206 = vmatmul.mubr.msk.f32.gmra.mrb[198].mxu1 %vm1389_vm2, %v3422_v45  ;;  %14377 = vmatprep.mubr.msk.f32.mxu0 %vm16722_vm0, %v21596_v4 }
 0x3d2   : > { %v3228_v12 = vmul.f32 %v18581_v33, %v3001_v29  ;;  %14208 = vmatprep.mubr.msk.f32.mxu1 %vm16722_vm0, %v21596_v4  ;;  %vm3325_vm13 = vcmp.ge.f32.partialorder %v3276_v2, 0.0  ;;  %v3374_v6 = vmul.f32 0.01, %v3276_v2  ;;  %14716 = vmatpush3.bf16.msra.mxu1 %v17206_v16  ;;  %v18927_v16 = vld [vmem:[#allocation11] ss:$0 sm:$0xff] }
 0x3d3   : > { %v3005_v47 = vpop.f32.mrb[208].mxu0  ;;  %14717 = vmatprep.subr.bf16.mxu1 %v21701_v55 }
 0x3d4   : > { %v3277_v7 = vadd.f32 %v18588_v34, %v3228_v12  ;;  %v3006_v11 = vadd.f32 %v18571_v38, %v3005_v47  ;;  %v14053_v43 = vpop.f32.mrb[209].mxu0  ;;  %14378 = vmatmul.mubr.msk.f32.gmra.mrb[58].mxu0 %vm657_vm1, %v15089_v41  ;;  %v3423_v51 = vsel %vm3325_vm13, %v3276_v2, %v3374_v6  ;;  %v15090_v6 = vld [vmem:[%s21695_s30 + $0x50] sm:$0xff] }
 0x3d5   : > { %14209 = vmatmul.mubr.msk.f32.gmra.mrb[200].mxu1 %vm1389_vm2, %v3423_v51  ;;  %14380 = vmatprep.mubr.msk.f32.mxu0 %vm16722_vm0, %v21596_v4 }
 0x3d6   : > { %v3229_v55 = vmul.f32 %v18581_v33, %v3006_v11  ;;  %14211 = vmatprep.mubr.msk.f32.mxu1 %vm16722_vm0, %v21596_v4  ;;  %vm3326_vm14 = vcmp.ge.f32.partialorder %v3277_v7, 0.0  ;;  %v3375_v29 = vmul.f32 0.01, %v3277_v7  ;;  %14719 = vmatpush3.bf16.msra.mxu1 %v17248_v23  ;;  %v18941_v11 = vadd.f32 %v18927_v16, %v18153_v9 }
 0x3d7   : > { %v3010_v22 = vpop.f32.mrb[210].mxu0 }
 0x3d8   : > { %v3278_v63 = vadd.f32 %v18588_v34, %v3229_v55  ;;  %v3011_v2 = vadd.f32 %v18571_v38, %v3010_v22  ;;  %v2618_v45 = vpop.f32.mrb[96].mxu1  ;;  %v14056_v12 = vpop.f32.mrb[211].mxu0  ;;  %14381 = vmatmul.mubr.msk.f32.gmra.mrb[60].mxu0 %vm657_vm1, %v15090_v6  ;;  %v3424_v47 = vsel %vm3326_vm14, %v3277_v7, %v3375_v29  ;;  %v18962_v6 = vadd.f32 %v18927_v16, %v18161_v42 }
 0x3d9   : > { %v18944_v23 = vadd.f32 %v18927_v16, %v2618_v45  ;;  %v13887_v43 = vpop.f32.mrb[97].mxu1  ;;  %14212 = vmatmul.mubr.msk.f32.gmra.mrb[202].mxu1 %vm1389_vm2, %v3424_v47  ;;  %14383 = vmatprep.mubr.msk.f32.mxu0 %vm16722_vm0, %v21596_v4  ;;  %v15091_v12 = vld [vmem:[%s21695_s30 + $0x58] sm:$0xff] }
 0x3da   : > { %v3230_v41 = vmul.f32 %v18581_v33, %v3011_v2  ;;  %14214 = vmatprep.mubr.msk.f32.mxu1 %vm16722_vm0, %v21596_v4  ;;  %vm3327_vm15 = vcmp.ge.f32.partialorder %v3278_v63, 0.0  ;;  %v3376_v7 = vmul.f32 0.01, %v3278_v63 }
 0x3db   : > { %v3015_v51 = vpop.f32.mrb[212].mxu0 }
 0x3dc   : > { %v3279_v55 = vadd.f32 %v18588_v34, %v3230_v41  ;;  %v3016_v29 = vadd.f32 %v18571_v38, %v3015_v51  ;;  %v2623_v22 = vpop.f32.mrb[98].mxu1  ;;  %v14059_v45 = vpop.f32.mrb[213].mxu0  ;;  %14384 = vmatmul.mubr.msk.f32.gmra.mrb[62].mxu0 %vm657_vm1, %v15091_v12  ;;  %v3425_v2 = vsel %vm3327_vm15, %v3278_v63, %v3376_v7 }
 0x3dd   : > { %v18965_v47 = vadd.f32 %v18927_v16, %v2623_v22  ;;  %v13890_v43 = vpop.f32.mrb[99].mxu1  ;;  %14215 = vmatmul.mubr.msk.f32.gmra.mrb[204].mxu1 %vm1389_vm2, %v3425_v2  ;;  %14386 = vmatprep.mubr.msk.f32.mxu0 %vm16722_vm0, %v21596_v4  ;;  %v15092_v2 = vld [vmem:[%s21695_s30 + $0x60] sm:$0xff] }
 0x3de   : > { %v3231_v41 = vmul.f32 %v18581_v33, %v3016_v29  ;;  %14217 = vmatprep.mubr.msk.f32.mxu1 %vm16722_vm0, %v21596_v4  ;;  %vm3328_vm3 = vcmp.ge.f32.partialorder %v3279_v55, 0.0  ;;  %v3377_v63 = vmul.f32 0.01, %v3279_v55  ;;  %v18983_v43 = vadd.f32 %v18927_v16, %v18171_v19 }
 0x3df   : > { %v3020_v7 = vpop.f32.mrb[214].mxu0 }
 0x3e0   : > { %v3280_v51 = vadd.f32 %v18588_v34, %v3231_v41  ;;  %v3021_v22 = vadd.f32 %v18571_v38, %v3020_v7  ;;  %v2628_v45 = vpop.f32.mrb[100].mxu1  ;;  %v14062_v12 = vpop.f32.mrb[215].mxu0  ;;  %14387 = vmatmul.mubr.msk.f32.gmra.mrb[64].mxu0 %vm657_vm1, %v15092_v2  ;;  %v3426_v29 = vsel %vm3328_vm3, %v3279_v55, %v3377_v63  ;;  %21702 = vst [vmem:[#allocation31_spill] sm:$0xff] %v18983_v43  ;;  %v15093_v2 = vld [vmem:[%s21695_s30 + $0x68] sm:$0xff] }
 0x3e1   : > { %v18986_v9 = vadd.f32 %v18927_v16, %v2628_v45  ;;  %v13893_v42 = vpop.f32.mrb[101].mxu1  ;;  %14218 = vmatmul.mubr.msk.f32.gmra.mrb[206].mxu1 %vm1389_vm2, %v3426_v29  ;;  %14389 = vmatprep.mubr.msk.f32.mxu0 %vm16722_vm0, %v21596_v4  ;;  %v19004_v29 = vadd.f32 %v18927_v16, %v18182_v44 }
 0x3e2   : > { %v3232_v41 = vmul.f32 %v18581_v33, %v3021_v22  ;;  %14220 = vmatprep.mubr.msk.f32.mxu1 %vm16722_vm0, %v21596_v4  ;;  %vm3329_vm4 = vcmp.ge.f32.partialorder %v3280_v51, 0.0  ;;  %v3378_v55 = vmul.f32 0.01, %v3280_v51 }
 0x3e3   : > { %21703 = vst [vmem:[#allocation32_spill] sm:$0xff] %v18986_v9  ;;  %v3025_v63 = vpop.f32.mrb[216].mxu0  ;;  %v19025_v9 = vadd.f32 %v18927_v16, %v18197_v59 }
 0x3e4   : > { %v3281_v7 = vadd.f32 %v18588_v34, %v3232_v41  ;;  %v3026_v42 = vadd.f32 %v18571_v38, %v3025_v63  ;;  %v2633_v45 = vpop.f32.mrb[102].mxu1  ;;  %v14065_v12 = vpop.f32.mrb[217].mxu0  ;;  %14390 = vmatmul.mubr.msk.f32.gmra.mrb[66].mxu0 %vm657_vm1, %v15093_v2  ;;  %v3427_v22 = vsel %vm3329_vm4, %v3280_v51, %v3378_v55  ;;  %v21705_v41 = vmov 0.0  }
 0x3e5   : > { %v19007_v4 = vadd.f32 %v18927_v16, %v2633_v45  ;;  %v13896_v19 = vpop.f32.mrb[103].mxu1  ;;  %14221 = vmatmul.mubr.msk.f32.gmra.mrb[208].mxu1 %vm1389_vm2, %v3427_v22  ;;  %14392 = vmatprep.mubr.msk.f32.mxu0 %vm16722_vm0, %v21705_v41  ;;  %v15094_v22 = vld [vmem:[%s21695_s30 + $0x70] sm:$0xff] }
 0x3e6   : > { %v3233_v63 = vmul.f32 %v18581_v33, %v3026_v42  ;;  %14223 = vmatprep.mubr.msk.f32.mxu1 %vm16722_vm0, %v21705_v41  ;;  %vm3330_vm5 = vcmp.ge.f32.partialorder %v3281_v7, 0.0  ;;  %v3379_v51 = vmul.f32 0.01, %v3281_v7 }
 0x3e7   : > { %21704 = vst [vmem:[#allocation33_spill] sm:$0xff] %v19007_v4  ;;  %v3030_v55 = vpop.f32.mrb[218].mxu0 }
 0x3e8   : > { %v3282_v45 = vadd.f32 %v18588_v34, %v3233_v63  ;;  %v3031_v19 = vadd.f32 %v18571_v38, %v3030_v55  ;;  %v2638_v12 = vpop.f32.mrb[104].mxu1  ;;  %v14068_v2 = vpop.f32.mrb[219].mxu0  ;;  %14393 = vmatmul.mubr.msk.f32.gmra.mrb[68].mxu0 %vm657_vm1, %v15094_v22  ;;  %v3428_v42 = vsel %vm3330_vm5, %v3281_v7, %v3379_v51  ;;  %v15095_v22 = vld [vmem:[%s21695_s30 + $0x78] sm:$0xff] }
 0x3e9   : > { %v19028_v43 = vadd.f32 %v18927_v16, %v2638_v12  ;;  %v13899_v44 = vpop.f32.mrb[105].mxu1  ;;  %14224 = vmatmul.mubr.msk.f32.gmra.mrb[210].mxu1 %vm1389_vm2, %v3428_v42  ;;  %14395 = vmatprep.mubr.msk.f32.mxu0 %vm16722_vm0, %v21705_v41  ;;  %v19046_v42 = vadd.f32 %v18927_v16, %v18213_v3 }
 0x3ea   : > { %v3234_v63 = vmul.f32 %v18581_v33, %v3031_v19  ;;  %14226 = vmatprep.mubr.msk.f32.mxu1 %vm16722_vm0, %v21705_v41  ;;  %vm3331_vm6 = vcmp.ge.f32.partialorder %v3282_v45, 0.0  ;;  %v3380_v7 = vmul.f32 0.01, %v3282_v45 }
 0x3eb   : > { %21706 = vst [vmem:[#allocation34_spill] sm:$0xff] %v19028_v43  ;;  %v3035_v51 = vpop.f32.mrb[220].mxu0 }
 0x3ec   : > { %v3283_v55 = vadd.f32 %v18588_v34, %v3234_v63  ;;  %v3036_v44 = vadd.f32 %v18571_v38, %v3035_v51  ;;  %v2643_v12 = vpop.f32.mrb[106].mxu1  ;;  %v14071_v2 = vpop.f32.mrb[221].mxu0  ;;  %14396 = vmatmul.mubr.msk.f32.gmra.mrb[70].mxu0 %vm657_vm1, %v15095_v22  ;;  %v3429_v19 = vsel %vm3331_vm6, %v3282_v45, %v3380_v7  ;;  %v15096_v22 = vld [vmem:[%s21695_s30 + $0x80] sm:$0xff] }
 0x3ed   : > { %v19049_v4 = vadd.f32 %v18927_v16, %v2643_v12  ;;  %v13902_v59 = vpop.f32.mrb[107].mxu1  ;;  %14227 = vmatmul.mubr.msk.f32.gmra.mrb[212].mxu1 %vm1389_vm2, %v3429_v19  ;;  %14398 = vmatprep.mubr.msk.f32.mxu0 %vm16722_vm0, %v21705_v41  ;;  %v19067_v19 = vadd.f32 %v18927_v16, %v18229_v18 }
 0x3ee   : > { %v3235_v63 = vmul.f32 %v18581_v33, %v3036_v44  ;;  %14229 = vmatprep.mubr.msk.f32.mxu1 %vm16722_vm0, %v21705_v41  ;;  %vm3332_vm7 = vcmp.ge.f32.partialorder %v3283_v55, 0.0  ;;  %v3381_v45 = vmul.f32 0.01, %v3283_v55 }
 0x3ef   : > { %21707 = vst [vmem:[#allocation35_spill] sm:$0xff] %v19049_v4  ;;  %v3040_v7 = vpop.f32.mrb[222].mxu0 }
 0x3f0   : > { %v3284_v51 = vadd.f32 %v18588_v34, %v3235_v63  ;;  %v3041_v59 = vadd.f32 %v18571_v38, %v3040_v7  ;;  %v2648_v12 = vpop.f32.mrb[108].mxu1  ;;  %v14074_v2 = vpop.f32.mrb[223].mxu0  ;;  %14399 = vmatmul.mubr.msk.f32.gmra.mrb[72].mxu0 %vm657_vm1, %v15096_v22  ;;  %v3430_v44 = vsel %vm3332_vm7, %v3283_v55, %v3381_v45  ;;  %v15097_v22 = vld [vmem:[%s21695_s30 + $0x88] sm:$0xff] }
 0x3f1   : > { %v19070_v43 = vadd.f32 %v18927_v16, %v2648_v12  ;;  %v13905_v3 = vpop.f32.mrb[109].mxu1  ;;  %14230 = vmatmul.mubr.msk.f32.gmra.mrb[214].mxu1 %vm1389_vm2, %v3430_v44  ;;  %14401 = vmatprep.mubr.msk.f32.mxu0 %vm16722_vm0, %v21705_v41  ;;  %v19088_v44 = vadd.f32 %v18927_v16, %v18245_v36 }
 0x3f2   : > { %v3236_v63 = vmul.f32 %v18581_v33, %v3041_v59  ;;  %14232 = vmatprep.mubr.msk.f32.mxu1 %vm16722_vm0, %v21705_v41  ;;  %vm3333_vm8 = vcmp.ge.f32.partialorder %v3284_v51, 0.0  ;;  %v3382_v55 = vmul.f32 0.01, %v3284_v51 }
 0x3f3   : > { %21708 = vst [vmem:[#allocation36_spill] sm:$0xff] %v19070_v43  ;;  %v3045_v45 = vpop.f32.mrb[224].mxu0 }
 0x3f4   : > { %v3285_v7 = vadd.f32 %v18588_v34, %v3236_v63  ;;  %v3046_v3 = vadd.f32 %v18571_v38, %v3045_v45  ;;  %v2653_v12 = vpop.f32.mrb[110].mxu1  ;;  %v14077_v2 = vpop.f32.mrb[225].mxu0  ;;  %14402 = vmatmul.mubr.msk.f32.gmra.mrb[74].mxu0 %vm657_vm1, %v15097_v22  ;;  %v3431_v59 = vsel %vm3333_vm8, %v3284_v51, %v3382_v55  ;;  %v15098_v22 = vld [vmem:[%s21695_s30 + $0x90] sm:$0xff] }
 0x3f5   : > { %v19091_v4 = vadd.f32 %v18927_v16, %v2653_v12  ;;  %v13908_v18 = vpop.f32.mrb[111].mxu1  ;;  %14233 = vmatmul.mubr.msk.f32.gmra.mrb[216].mxu1 %vm1389_vm2, %v3431_v59  ;;  %14404 = vmatprep.mubr.msk.f32.mxu0 %vm16722_vm0, %v21705_v41  ;;  %v19109_v59 = vadd.f32 %v18927_v16, %v18260_v54 }
 0x3f6   : > { %v3237_v63 = vmul.f32 %v18581_v33, %v3046_v3  ;;  %14235 = vmatprep.mubr.msk.f32.mxu1 %vm16722_vm0, %v21705_v41  ;;  %vm3334_vm9 = vcmp.ge.f32.partialorder %v3285_v7, 0.0  ;;  %v3383_v51 = vmul.f32 0.01, %v3285_v7 }
 0x3f7   : > { %v3050_v55 = vpop.f32.mrb[226].mxu0 }
 0x3f8   : > { %v3286_v45 = vadd.f32 %v18588_v34, %v3237_v63  ;;  %v3051_v18 = vadd.f32 %v18571_v38, %v3050_v55  ;;  %v2658_v12 = vpop.f32.mrb[112].mxu1  ;;  %v14080_v2 = vpop.f32.mrb[227].mxu0  ;;  %14405 = vmatmul.mubr.msk.f32.gmra.mrb[76].mxu0 %vm657_vm1, %v15098_v22  ;;  %v3432_v3 = vsel %vm3334_vm9, %v3285_v7, %v3383_v51  ;;  %v15099_v22 = vld [vmem:[%s21695_s30 + $0x98] sm:$0xff] }
 0x3f9   : > { %v19112_v43 = vadd.f32 %v18927_v16, %v2658_v12  ;;  %v13911_v36 = vpop.f32.mrb[113].mxu1  ;;  %14236 = vmatmul.mubr.msk.f32.gmra.mrb[218].mxu1 %vm1389_vm2, %v3432_v3  ;;  %14407 = vmatprep.mubr.msk.f32.mxu0 %vm16722_vm0, %v21705_v41 }
 0x3fa   : > { %v3238_v63 = vmul.f32 %v18581_v33, %v3051_v18  ;;  %14238 = vmatprep.mubr.msk.f32.mxu1 %vm16722_vm0, %v21705_v41  ;;  %vm3335_vm10 = vcmp.ge.f32.partialorder %v3286_v45, 0.0  ;;  %v3384_v7 = vmul.f32 0.01, %v3286_v45  ;;  %v19130_v18 = vadd.f32 %v18927_v16, %v18274_v58 }
 0x3fb   : > { %21709 = vst [vmem:[#allocation37_spill] sm:$0xff] %v19112_v43  ;;  %v3055_v51 = vpop.f32.mrb[228].mxu0 }
 0x3fc   : > { %v3287_v55 = vadd.f32 %v18588_v34, %v3238_v63  ;;  %v3056_v36 = vadd.f32 %v18571_v38, %v3055_v51  ;;  %v2663_v12 = vpop.f32.mrb[114].mxu1  ;;  %v14083_v2 = vpop.f32.mrb[229].mxu0  ;;  %14408 = vmatmul.mubr.msk.f32.gmra.mrb[78].mxu0 %vm657_vm1, %v15099_v22  ;;  %v3433_v33 = vsel %vm3335_vm10, %v3286_v45, %v3384_v7  ;;  %21710 = vst [vmem:[#allocation38_spill] sm:$0xff] %v19130_v18  ;;  %v19138_v38 = vld [vmem:[#allocation7] ss:$0 sm:$0xff] }
 0x3fd   : > { %v19133_v3 = vadd.f32 %v18927_v16, %v2663_v12  ;;  %v13914_v54 = vpop.f32.mrb[115].mxu1  ;;  %14239 = vmatmul.mubr.msk.f32.gmra.mrb[220].mxu1 %vm1389_vm2, %v3433_v33  ;;  %14410 = vmatprep.mubr.msk.f32.mxu0 %vm16722_vm0, %v21705_v41  ;;  %v19145_v7 = vld [vmem:[#allocation8] ss:$0 sm:$0xff]  ;;  %v19157_v63 = vadd.f32 %v18927_v16, %v18288_v62  ;;  %v19178_v18 = vadd.f32 %v18927_v16, %v18302_v25 }
 0x3fe   : > { %v3239_v34 = vmul.f32 %v19138_v38, %v3056_v36  ;;  %14241 = vmatprep.mubr.msk.f32.mxu1 %vm16722_vm0, %v21705_v41  ;;  %vm3336_vm11 = vcmp.ge.f32.partialorder %v3287_v55, 0.0  ;;  %v3385_v45 = vmul.f32 0.01, %v3287_v55  ;;  %v19148_v54 = vld [vmem:[#allocation5] ss:$0 sm:$0xff] }
 0x3ff   : > { %21711 = vst [vmem:[#allocation39_spill] sm:$0xff] %v19133_v3  ;;  %v3060_v58 = vpop.f32.mrb[230].mxu0  ;;  %v15103_v36 = vld [vmem:[%s21695_s30 + $0xa0] sm:$0xff] }
 0x400   : > { %v3288_v51 = vadd.f32 %v19145_v7, %v3239_v34  ;;  %v3061_v12 = vadd.f32 %v19148_v54, %v3060_v58  ;;  %v2668_v2 = vpop.f32.mrb[116].mxu1  ;;  %v14086_v22 = vpop.f32.mrb[231].mxu0  ;;  %14411 = vmatmul.mubr.msk.f32.gmra.mrb[80].mxu0 %vm657_vm1, %v15103_v36  ;;  %v3434_v33 = vsel %vm3336_vm11, %v3287_v55, %v3385_v45 }
 0x401   : > { %v19160_v3 = vadd.f32 %v18927_v16, %v2668_v2  ;;  %v13917_v34 = vpop.f32.mrb[117].mxu1  ;;  %14242 = vmatmul.mubr.msk.f32.gmra.mrb[222].mxu1 %vm1389_vm2, %v3434_v33  ;;  %14413 = vmatprep.mubr.msk.f32.mxu0 %vm16722_vm0, %v21705_v41 }
 0x402   : > { %v3240_v58 = vmul.f32 %v19138_v38, %v3061_v12  ;;  %14244 = vmatprep.mubr.msk.f32.mxu1 %vm16722_vm0, %v21705_v41  ;;  %vm3337_vm12 = vcmp.ge.f32.partialorder %v3288_v51, 0.0  ;;  %v3386_v55 = vmul.f32 0.01, %v3288_v51  ;;  %v15104_v34 = vld [vmem:[%s21695_s30 + $0xa8] sm:$0xff] }
 0x403   : > { %21712 = vst [vmem:[#allocation40_spill] sm:$0xff] %v19160_v3  ;;  %v3065_v45 = vpop.f32.mrb[232].mxu0 }
 0x404   : > { %v3289_v2 = vadd.f32 %v19145_v7, %v3240_v58  ;;  %v3066_v22 = vadd.f32 %v19148_v54, %v3065_v45  ;;  %v2673_v36 = vpop.f32.mrb[118].mxu1  ;;  %v14089_v33 = vpop.f32.mrb[233].mxu0  ;;  %14414 = vmatmul.mubr.msk.f32.gmra.mrb[82].mxu0 %vm657_vm1, %v15104_v34  ;;  %v3435_v12 = vsel %vm3337_vm12, %v3288_v51, %v3386_v55  ;;  %v15105_v34 = vld [vmem:[%s21695_s30 + $0xb0] sm:$0xff] }
 0x405   : > { %v19181_v43 = vadd.f32 %v18927_v16, %v2673_v36  ;;  %v13920_v62 = vpop.f32.mrb[119].mxu1  ;;  %14245 = vmatmul.mubr.msk.f32.gmra.mrb[224].mxu1 %vm1389_vm2, %v3435_v12  ;;  %14416 = vmatprep.mubr.msk.f32.mxu0 %vm16722_vm0, %v21705_v41  ;;  %v19199_v12 = vadd.f32 %v18927_v16, %v18316_v26 }
 0x406   : > { %v3241_v58 = vmul.f32 %v19138_v38, %v3066_v22  ;;  %14247 = vmatprep.mubr.msk.f32.mxu1 %vm16722_vm0, %v21705_v41  ;;  %vm3338_vm13 = vcmp.ge.f32.partialorder %v3289_v2, 0.0  ;;  %v3387_v51 = vmul.f32 0.01, %v3289_v2 }
 0x407   : > { %21713 = vst [vmem:[#allocation41_spill] sm:$0xff] %v19181_v43  ;;  %v3070_v55 = vpop.f32.mrb[234].mxu0 }
 0x408   : > { %v3290_v45 = vadd.f32 %v19145_v7, %v3241_v58  ;;  %v3071_v62 = vadd.f32 %v19148_v54, %v3070_v55  ;;  %v2678_v36 = vpop.f32.mrb[120].mxu1  ;;  %v14092_v33 = vpop.f32.mrb[235].mxu0  ;;  %14417 = vmatmul.mubr.msk.f32.gmra.mrb[84].mxu0 %vm657_vm1, %v15105_v34  ;;  %v3436_v22 = vsel %vm3338_vm13, %v3289_v2, %v3387_v51  ;;  %v15106_v34 = vld [vmem:[%s21695_s30 + $0xb8] sm:$0xff] }
 0x409   : > { %v19202_v3 = vadd.f32 %v18927_v16, %v2678_v36  ;;  %v13923_v25 = vpop.f32.mrb[121].mxu1  ;;  %14248 = vmatmul.mubr.msk.f32.gmra.mrb[226].mxu1 %vm1389_vm2, %v3436_v22  ;;  %14419 = vmatprep.mubr.msk.f32.mxu0 %vm16722_vm0, %v21705_v41  ;;  %v19220_v22 = vadd.f32 %v18927_v16, %v18330_v27 }
 0x40a   : > { %v3242_v58 = vmul.f32 %v19138_v38, %v3071_v62  ;;  %14250 = vmatprep.mubr.msk.f32.mxu1 %vm16722_vm0, %v21705_v41  ;;  %vm3339_vm14 = vcmp.ge.f32.partialorder %v3290_v45, 0.0  ;;  %v3388_v2 = vmul.f32 0.01, %v3290_v45 }
 0x40b   : > { %21714 = vst [vmem:[#allocation42_spill] sm:$0xff] %v19202_v3  ;;  %v3075_v51 = vpop.f32.mrb[236].mxu0 }
 0x40c   : > { %v3291_v55 = vadd.f32 %v19145_v7, %v3242_v58  ;;  %v3076_v25 = vadd.f32 %v19148_v54, %v3075_v51  ;;  %v2683_v36 = vpop.f32.mrb[122].mxu1  ;;  %v14095_v33 = vpop.f32.mrb[237].mxu0  ;;  %14420 = vmatmul.mubr.msk.f32.gmra.mrb[86].mxu0 %vm657_vm1, %v15106_v34  ;;  %v3437_v62 = vsel %vm3339_vm14, %v3290_v45, %v3388_v2  ;;  %v15107_v34 = vld [vmem:[%s21695_s30 + $0xc0] sm:$0xff] }
 0x40d   : > { %v19223_v43 = vadd.f32 %v18927_v16, %v2683_v36  ;;  %v13926_v26 = vpop.f32.mrb[123].mxu1  ;;  %14251 = vmatmul.mubr.msk.f32.gmra.mrb[228].mxu1 %vm1389_vm2, %v3437_v62  ;;  %14422 = vmatprep.mubr.msk.f32.mxu0 %vm16722_vm0, %v21705_v41  ;;  %v19241_v62 = vadd.f32 %v18927_v16, %v18344_v46 }
 0x40e   : > { %v3243_v58 = vmul.f32 %v19138_v38, %v3076_v25  ;;  %14253 = vmatprep.mubr.msk.f32.mxu1 %vm16722_vm0, %v21705_v41  ;;  %vm3340_vm15 = vcmp.ge.f32.partialorder %v3291_v55, 0.0  ;;  %v3389_v45 = vmul.f32 0.01, %v3291_v55 }
 0x40f   : > { %21715 = vst [vmem:[#allocation43_spill] sm:$0xff] %v19223_v43  ;;  %v3080_v2 = vpop.f32.mrb[238].mxu0 }
 0x410   : > { %v3292_v51 = vadd.f32 %v19145_v7, %v3243_v58  ;;  %v3081_v26 = vadd.f32 %v19148_v54, %v3080_v2  ;;  %v2688_v36 = vpop.f32.mrb[124].mxu1  ;;  %v14098_v33 = vpop.f32.mrb[239].mxu0  ;;  %14423 = vmatmul.mubr.msk.f32.gmra.mrb[88].mxu0 %vm657_vm1, %v15107_v34  ;;  %v3438_v25 = vsel %vm3340_vm15, %v3291_v55, %v3389_v45  ;;  %v15108_v34 = vld [vmem:[%s21695_s30 + $0xc8] sm:$0xff] }
 0x411   : > { %v19244_v3 = vadd.f32 %v18927_v16, %v2688_v36  ;;  %v13929_v27 = vpop.f32.mrb[125].mxu1  ;;  %14254 = vmatmul.mubr.msk.f32.gmra.mrb[230].mxu1 %vm1389_vm2, %v3438_v25  ;;  %14425 = vmatprep.mubr.msk.f32.mxu0 %vm16722_vm0, %v21705_v41  ;;  %v19262_v25 = vadd.f32 %v18927_v16, %v18358_v13 }
 0x412   : > { %v3244_v58 = vmul.f32 %v19138_v38, %v3081_v26  ;;  %14256 = vmatprep.mubr.msk.f32.mxu1 %vm16722_vm0, %v21705_v41  ;;  %vm3341_vm3 = vcmp.ge.f32.partialorder %v3292_v51, 0.0  ;;  %v3390_v55 = vmul.f32 0.01, %v3292_v51 }
 0x413   : > { %21716 = vst [vmem:[#allocation44_spill] sm:$0xff] %v19244_v3  ;;  %v3085_v45 = vpop.f32.mrb[240].mxu0 }
 0x414   : > { %v3293_v2 = vadd.f32 %v19145_v7, %v3244_v58  ;;  %v3086_v27 = vadd.f32 %v19148_v54, %v3085_v45  ;;  %v2693_v36 = vpop.f32.mrb[126].mxu1  ;;  %v14101_v33 = vpop.f32.mrb[241].mxu0  ;;  %14426 = vmatmul.mubr.msk.f32.gmra.mrb[90].mxu0 %vm657_vm1, %v15108_v34  ;;  %v3439_v26 = vsel %vm3341_vm3, %v3292_v51, %v3390_v55  ;;  %v15109_v34 = vld [vmem:[%s21695_s30 + $0xd0] sm:$0xff] }
 0x415   : > { %v19265_v43 = vadd.f32 %v18927_v16, %v2693_v36  ;;  %v13932_v46 = vpop.f32.mrb[127].mxu1  ;;  %14257 = vmatmul.mubr.msk.f32.gmra.mrb[232].mxu1 %vm1389_vm2, %v3439_v26  ;;  %14428 = vmatprep.mubr.msk.f32.mxu0 %vm16722_vm0, %v21705_v41  ;;  %v19283_v26 = vadd.f32 %v18927_v16, %v18372_v20 }
 0x416   : > { %v3245_v58 = vmul.f32 %v19138_v38, %v3086_v27  ;;  %14259 = vmatprep.mubr.msk.f32.mxu1 %vm16722_vm0, %v21705_v41  ;;  %vm3342_vm4 = vcmp.ge.f32.partialorder %v3293_v2, 0.0  ;;  %v3391_v51 = vmul.f32 0.01, %v3293_v2 }
 0x417   : > { %21717 = vst [vmem:[#allocation45_spill] sm:$0xff] %v19265_v43  ;;  %v3090_v55 = vpop.f32.mrb[242].mxu0 }
 0x418   : > { %v3294_v45 = vadd.f32 %v19145_v7, %v3245_v58  ;;  %v3091_v46 = vadd.f32 %v19148_v54, %v3090_v55  ;;  %v2698_v36 = vpop.f32.mrb[128].mxu1  ;;  %v14104_v33 = vpop.f32.mrb[243].mxu0  ;;  %14429 = vmatmul.mubr.msk.f32.gmra.mrb[92].mxu0 %vm657_vm1, %v15109_v34  ;;  %v3440_v27 = vsel %vm3342_vm4, %v3293_v2, %v3391_v51  ;;  %v15110_v34 = vld [vmem:[%s21695_s30 + $0xd8] sm:$0xff] }
 0x419   : > { %v19286_v3 = vadd.f32 %v18927_v16, %v2698_v36  ;;  %v13935_v13 = vpop.f32.mrb[129].mxu1  ;;  %14260 = vmatmul.mubr.msk.f32.gmra.mrb[234].mxu1 %vm1389_vm2, %v3440_v27  ;;  %14431 = vmatprep.mubr.msk.f32.mxu0 %vm16722_vm0, %v21705_v41  ;;  %v19304_v27 = vadd.f32 %v18927_v16, %v18386_v56 }
 0x41a   : > { %v3246_v58 = vmul.f32 %v19138_v38, %v3091_v46  ;;  %14262 = vmatprep.mubr.msk.f32.mxu1 %vm16722_vm0, %v21705_v41  ;;  %vm3343_vm5 = vcmp.ge.f32.partialorder %v3294_v45, 0.0  ;;  %v3392_v2 = vmul.f32 0.01, %v3294_v45 }
 0x41b   : > { %21718 = vst [vmem:[#allocation46_spill] sm:$0xff] %v19286_v3  ;;  %v3095_v51 = vpop.f32.mrb[244].mxu0 }
 0x41c   : > { %v3295_v55 = vadd.f32 %v19145_v7, %v3246_v58  ;;  %v3096_v13 = vadd.f32 %v19148_v54, %v3095_v51  ;;  %v2703_v36 = vpop.f32.mrb[130].mxu1  ;;  %v14107_v33 = vpop.f32.mrb[245].mxu0  ;;  %14432 = vmatmul.mubr.msk.f32.gmra.mrb[94].mxu0 %vm657_vm1, %v15110_v34  ;;  %v3441_v46 = vsel %vm3343_vm5, %v3294_v45, %v3392_v2  ;;  %v15111_v34 = vld [vmem:[%s21695_s30 + $0xe0] sm:$0xff] }
 0x41d   : > { %v19307_v43 = vadd.f32 %v18927_v16, %v2703_v36  ;;  %v13938_v20 = vpop.f32.mrb[131].mxu1  ;;  %14263 = vmatmul.mubr.msk.f32.gmra.mrb[236].mxu1 %vm1389_vm2, %v3441_v46  ;;  %14434 = vmatprep.mubr.msk.f32.mxu0 %vm16722_vm0, %v21705_v41  ;;  %v19325_v46 = vadd.f32 %v18927_v16, %v18400_v39 }
 0x41e   : > { %v3247_v58 = vmul.f32 %v19138_v38, %v3096_v13  ;;  %14265 = vmatprep.mubr.msk.f32.mxu1 %vm16722_vm0, %v21705_v41  ;;  %vm3344_vm6 = vcmp.ge.f32.partialorder %v3295_v55, 0.0  ;;  %v3393_v45 = vmul.f32 0.01, %v3295_v55 }
 0x41f   : > { %21719 = vst [vmem:[#allocation47_spill] sm:$0xff] %v19307_v43  ;;  %v3100_v2 = vpop.f32.mrb[246].mxu0 }
 0x420   : > { %v3296_v51 = vadd.f32 %v19145_v7, %v3247_v58  ;;  %v3101_v20 = vadd.f32 %v19148_v54, %v3100_v2  ;;  %v2708_v36 = vpop.f32.mrb[132].mxu1  ;;  %v14110_v33 = vpop.f32.mrb[247].mxu0  ;;  %14435 = vmatmul.mubr.msk.f32.gmra.mrb[96].mxu0 %vm657_vm1, %v15111_v34  ;;  %v3442_v13 = vsel %vm3344_vm6, %v3295_v55, %v3393_v45  ;;  %v15112_v34 = vld [vmem:[%s21695_s30 + $0xe8] sm:$0xff] }
 0x421   : > { %v19328_v3 = vadd.f32 %v18927_v16, %v2708_v36  ;;  %v13941_v56 = vpop.f32.mrb[133].mxu1  ;;  %14266 = vmatmul.mubr.msk.f32.gmra.mrb[238].mxu1 %vm1389_vm2, %v3442_v13  ;;  %14437 = vmatprep.mubr.msk.f32.mxu0 %vm16722_vm0, %v21705_v41  ;;  %v19346_v13 = vadd.f32 %v18927_v16, %v18414_v1 }
 0x422   : > { %v3248_v58 = vmul.f32 %v19138_v38, %v3101_v20  ;;  %14268 = vmatprep.mubr.msk.f32.mxu1 %vm16722_vm0, %v21705_v41  ;;  %vm3345_vm7 = vcmp.ge.f32.partialorder %v3296_v51, 0.0  ;;  %v3394_v55 = vmul.f32 0.01, %v3296_v51 }
 0x423   : > { %v3105_v45 = vpop.f32.mrb[248].mxu0 }
 0x424   : > { %v3297_v2 = vadd.f32 %v19145_v7, %v3248_v58  ;;  %v3106_v56 = vadd.f32 %v19148_v54, %v3105_v45  ;;  %v2713_v36 = vpop.f32.mrb[134].mxu1  ;;  %v14113_v33 = vpop.f32.mrb[249].mxu0  ;;  %14438 = vmatmul.mubr.msk.f32.gmra.mrb[98].mxu0 %vm657_vm1, %v15112_v34  ;;  %v3443_v20 = vsel %vm3345_vm7, %v3296_v51, %v3394_v55  ;;  %v15113_v34 = vld [vmem:[%s21695_s30 + $0xf0] sm:$0xff] }
 0x425   : > { %v19349_v43 = vadd.f32 %v18927_v16, %v2713_v36  ;;  %v13944_v39 = vpop.f32.mrb[135].mxu1  ;;  %14269 = vmatmul.mubr.msk.f32.gmra.mrb[240].mxu1 %vm1389_vm2, %v3443_v20  ;;  %14440 = vmatprep.mubr.msk.f32.mxu0 %vm16722_vm0, %v21705_v41  ;;  %v19367_v20 = vadd.f32 %v18927_v16, %v18428_v21 }
 0x426   : > { %v3249_v58 = vmul.f32 %v19138_v38, %v3106_v56  ;;  %14271 = vmatprep.mubr.msk.f32.mxu1 %vm16722_vm0, %v21705_v41  ;;  %vm3346_vm8 = vcmp.ge.f32.partialorder %v3297_v2, 0.0  ;;  %v3395_v51 = vmul.f32 0.01, %v3297_v2 }
 0x427   : > { %21720 = vst [vmem:[#allocation48_spill] sm:$0xff] %v19349_v43  ;;  %v3110_v55 = vpop.f32.mrb[250].mxu0 }
 0x428   : > { %v3298_v45 = vadd.f32 %v19145_v7, %v3249_v58  ;;  %v3111_v39 = vadd.f32 %v19148_v54, %v3110_v55  ;;  %v2718_v36 = vpop.f32.mrb[136].mxu1  ;;  %v14116_v33 = vpop.f32.mrb[251].mxu0  ;;  %14441 = vmatmul.mubr.msk.f32.gmra.mrb[100].mxu0 %vm657_vm1, %v15113_v34  ;;  %v3444_v56 = vsel %vm3346_vm8, %v3297_v2, %v3395_v51  ;;  %v15114_v34 = vld [vmem:[%s21695_s30 + $0xf8] sm:$0xff] }
 0x429   : > { %v19370_v1 = vadd.f32 %v18927_v16, %v2718_v36  ;;  %v13947_v43 = vpop.f32.mrb[137].mxu1  ;;  %14272 = vmatmul.mubr.msk.f32.gmra.mrb[242].mxu1 %vm1389_vm2, %v3444_v56  ;;  %14443 = vmatprep.mubr.msk.f32.mxu0 %vm16722_vm0, %v21705_v41  ;;  %v19388_v56 = vadd.f32 %v18927_v16, %v18442_v57 }
 0x42a   : > { %v3250_v58 = vmul.f32 %v19138_v38, %v3111_v39  ;;  %14274 = vmatprep.mubr.msk.f32.mxu1 %vm16722_vm0, %v21705_v41  ;;  %vm3347_vm9 = vcmp.ge.f32.partialorder %v3298_v45, 0.0  ;;  %v3396_v2 = vmul.f32 0.01, %v3298_v45 }
 0x42b   : > { %21721 = vst [vmem:[#allocation49_spill] sm:$0xff] %v19370_v1  ;;  %v3115_v51 = vpop.f32.mrb[252].mxu0 }
 0x42c   : > { %v3299_v55 = vadd.f32 %v19145_v7, %v3250_v58  ;;  %v3116_v43 = vadd.f32 %v19148_v54, %v3115_v51  ;;  %v2723_v36 = vpop.f32.mrb[138].mxu1  ;;  %v14119_v33 = vpop.f32.mrb[253].mxu0  ;;  %14444 = vmatmul.mubr.msk.f32.gmra.mrb[102].mxu0 %vm657_vm1, %v15114_v34  ;;  %v3445_v39 = vsel %vm3347_vm9, %v3298_v45, %v3396_v2  ;;  %v15115_v34 = vld [vmem:[%s21695_s30 + $0x100] sm:$0xff] }
 0x42d   : > { %v19391_v21 = vadd.f32 %v18927_v16, %v2723_v36  ;;  %v13950_v1 = vpop.f32.mrb[139].mxu1  ;;  %14275 = vmatmul.mubr.msk.f32.gmra.mrb[244].mxu1 %vm1389_vm2, %v3445_v39  ;;  %14446 = vmatprep.mubr.msk.f32.mxu0 %vm16722_vm0, %v21705_v41  ;;  %v19409_v39 = vadd.f32 %v18927_v16, %v18456_v24 }
 0x42e   : > { %v3251_v58 = vmul.f32 %v19138_v38, %v3116_v43  ;;  %14277 = vmatprep.mubr.msk.f32.mxu1 %vm16722_vm0, %v21705_v41  ;;  %vm3348_vm10 = vcmp.ge.f32.partialorder %v3299_v55, 0.0  ;;  %v3397_v45 = vmul.f32 0.01, %v3299_v55 }
 0x42f   : > { %21722 = vst [vmem:[#allocation50_spill] sm:$0xff] %v19391_v21  ;;  %v3120_v2 = vpop.f32.mrb[254].mxu0 }
 0x430   : > { %v3300_v51 = vadd.f32 %v19145_v7, %v3251_v58  ;;  %v3121_v1 = vadd.f32 %v19148_v54, %v3120_v2  ;;  %v2728_v36 = vpop.f32.mrb[140].mxu1  ;;  %v14122_v33 = vpop.f32.mrb[255].mxu0  ;;  %14447 = vmatmul.mubr.msk.f32.gmra.mrb[104].mxu0 %vm657_vm1, %v15115_v34  ;;  %v3446_v43 = vsel %vm3348_vm10, %v3299_v55, %v3397_v45  ;;  %v15116_v34 = vld [vmem:[%s21695_s30 + $0x108] sm:$0xff] }
 0x431   : > { %v19412_v57 = vadd.f32 %v18927_v16, %v2728_v36  ;;  %v13953_v21 = vpop.f32.mrb[141].mxu1  ;;  %14278 = vmatmul.mubr.msk.f32.gmra.mrb[246].mxu1 %vm1389_vm2, %v3446_v43  ;;  %14449 = vmatprep.mubr.msk.f32.mxu0 %vm16722_vm0, %v21705_v41  ;;  %v19430_v43 = vadd.f32 %v18927_v16, %v18470_v49 }
 0x432   : > { %v3252_v58 = vmul.f32 %v19138_v38, %v3121_v1  ;;  %14280 = vmatprep.mubr.msk.f32.mxu1 %vm16722_vm0, %v21705_v41  ;;  %vm3349_vm11 = vcmp.ge.f32.partialorder %v3300_v51, 0.0  ;;  %v3398_v55 = vmul.f32 0.01, %v3300_v51 }
 0x433   : > { %21723 = vst [vmem:[#allocation51_spill] sm:$0xff] %v19412_v57  ;;  %v3125_v45 = vpop.f32.mrb[0].mxu0 }
 0x434   : > { %v3301_v2 = vadd.f32 %v19145_v7, %v3252_v58  ;;  %v3126_v21 = vadd.f32 %v19148_v54, %v3125_v45  ;;  %v2733_v36 = vpop.f32.mrb[142].mxu1  ;;  %v14125_v33 = vpop.f32.mrb[1].mxu0  ;;  %14450 = vmatmul.mubr.msk.f32.gmra.mrb[106].mxu0 %vm657_vm1, %v15116_v34  ;;  %v3447_v1 = vsel %vm3349_vm11, %v3300_v51, %v3398_v55  ;;  %v15117_v34 = vld [vmem:[%s21695_s30 + $0x110] sm:$0xff] }
 0x435   : > { %v19433_v24 = vadd.f32 %v18927_v16, %v2733_v36  ;;  %v13956_v57 = vpop.f32.mrb[143].mxu1  ;;  %14281 = vmatmul.mubr.msk.f32.gmra.mrb[248].mxu1 %vm1389_vm2, %v3447_v1  ;;  %14452 = vmatprep.mubr.msk.f32.mxu0 %vm16722_vm0, %v21705_v41  ;;  %v19451_v1 = vadd.f32 %v18927_v16, %v18484_v37 }
 0x436   : > { %v3253_v58 = vmul.f32 %v19138_v38, %v3126_v21  ;;  %14283 = vmatprep.mubr.msk.f32.mxu1 %vm16722_vm0, %v21705_v41  ;;  %vm3350_vm12 = vcmp.ge.f32.partialorder %v3301_v2, 0.0  ;;  %v3399_v51 = vmul.f32 0.01, %v3301_v2 }
 0x437   : > { %21724 = vst [vmem:[#allocation52_spill] sm:$0xff] %v19433_v24  ;;  %v3130_v55 = vpop.f32.mrb[2].mxu0 }
 0x438   : > { %v3302_v45 = vadd.f32 %v19145_v7, %v3253_v58  ;;  %v3131_v57 = vadd.f32 %v19148_v54, %v3130_v55  ;;  %v2738_v36 = vpop.f32.mrb[144].mxu1  ;;  %v14128_v33 = vpop.f32.mrb[3].mxu0  ;;  %14453 = vmatmul.mubr.msk.f32.gmra.mrb[108].mxu0 %vm657_vm1, %v15117_v34  ;;  %v3448_v21 = vsel %vm3350_vm12, %v3301_v2, %v3399_v51  ;;  %v15118_v34 = vld [vmem:[%s21695_s30 + $0x118] sm:$0xff] }
 0x439   : > { %v19454_v49 = vadd.f32 %v18927_v16, %v2738_v36  ;;  %v13959_v24 = vpop.f32.mrb[145].mxu1  ;;  %14284 = vmatmul.mubr.msk.f32.gmra.mrb[250].mxu1 %vm1389_vm2, %v3448_v21  ;;  %14455 = vmatprep.mubr.msk.f32.mxu0 %vm16722_vm0, %v21705_v41  ;;  %v19472_v21 = vadd.f32 %v18927_v16, %v18498_v28 }
 0x43a   : > { %v3254_v58 = vmul.f32 %v19138_v38, %v3131_v57  ;;  %14286 = vmatprep.mubr.msk.f32.mxu1 %vm16722_vm0, %v21705_v41  ;;  %vm3351_vm13 = vcmp.ge.f32.partialorder %v3302_v45, 0.0  ;;  %v3400_v2 = vmul.f32 0.01, %v3302_v45 }
 0x43b   : > { %21725 = vst [vmem:[#allocation53_spill] sm:$0xff] %v19454_v49  ;;  %v3135_v51 = vpop.f32.mrb[4].mxu0 }
 0x43c   : > { %v3303_v55 = vadd.f32 %v19145_v7, %v3254_v58  ;;  %v3136_v24 = vadd.f32 %v19148_v54, %v3135_v51  ;;  %v2743_v36 = vpop.f32.mrb[146].mxu1  ;;  %v14131_v33 = vpop.f32.mrb[5].mxu0  ;;  %14456 = vmatmul.mubr.msk.f32.gmra.mrb[110].mxu0 %vm657_vm1, %v15118_v34  ;;  %v3449_v57 = vsel %vm3351_vm13, %v3302_v45, %v3400_v2  ;;  %v15119_v34 = vld [vmem:[%s21695_s30 + $0x120] sm:$0xff] }
 0x43d   : > { %v19475_v37 = vadd.f32 %v18927_v16, %v2743_v36  ;;  %v13962_v49 = vpop.f32.mrb[147].mxu1  ;;  %14287 = vmatmul.mubr.msk.f32.gmra.mrb[252].mxu1 %vm1389_vm2, %v3449_v57  ;;  %14458 = vmatprep.mubr.msk.f32.mxu0 %vm16722_vm0, %v21705_v41  ;;  %v19493_v57 = vadd.f32 %v18927_v16, %v18512_v35 }
 0x43e   : > { %v3255_v58 = vmul.f32 %v19138_v38, %v3136_v24  ;;  %14289 = vmatprep.mubr.msk.f32.mxu1 %vm16722_vm0, %v21705_v41  ;;  %vm3352_vm14 = vcmp.ge.f32.partialorder %v3303_v55, 0.0  ;;  %v3401_v45 = vmul.f32 0.01, %v3303_v55 }
 0x43f   : > { %21726 = vst [vmem:[#allocation54_spill] sm:$0xff] %v19475_v37  ;;  %v3140_v2 = vpop.f32.mrb[6].mxu0 }
 0x440   : > { %v3304_v51 = vadd.f32 %v19145_v7, %v3255_v58  ;;  %v3141_v49 = vadd.f32 %v19148_v54, %v3140_v2  ;;  %v2748_v36 = vpop.f32.mrb[148].mxu1  ;;  %v14134_v33 = vpop.f32.mrb[7].mxu0  ;;  %14459 = vmatmul.mubr.msk.f32.gmra.mrb[112].mxu0 %vm657_vm1, %v15119_v34  ;;  %v3450_v24 = vsel %vm3352_vm14, %v3303_v55, %v3401_v45  ;;  %v15120_v34 = vld [vmem:[%s21695_s30 + $0x128] sm:$0xff] }
 0x441   : > { %v19496_v28 = vadd.f32 %v18927_v16, %v2748_v36  ;;  %v13965_v37 = vpop.f32.mrb[149].mxu1  ;;  %14290 = vmatmul.mubr.msk.f32.gmra.mrb[254].mxu1 %vm1389_vm2, %v3450_v24  ;;  %14461 = vmatprep.mubr.msk.f32.mxu0 %vm16722_vm0, %v21705_v41  ;;  %v19514_v24 = vadd.f32 %v18927_v16, %v18526_v14 }
 0x442   : > { %vm3353_vm15 = vcmp.ge.f32.partialorder %v3304_v51, 0.0  ;;  %v3402_v58 = vmul.f32 0.01, %v3304_v51  ;;  %v3256_v2 = vmul.f32 %v19138_v38, %v3141_v49  ;;  %14292 = vmatprep.mubr.msk.f32.mxu1 %vm16722_vm0, %v21705_v41 }
 0x443   : > { %21727 = vst [vmem:[#allocation55_spill] sm:$0xff] %v19496_v28  ;;  %v3145_v55 = vpop.f32.mrb[8].mxu0 }
 0x444   : > { %v3305_v45 = vadd.f32 %v19145_v7, %v3256_v2  ;;  %v3146_v37 = vadd.f32 %v19148_v54, %v3145_v55  ;;  %v2753_v36 = vpop.f32.mrb[150].mxu1  ;;  %v14137_v33 = vpop.f32.mrb[9].mxu0  ;;  %14462 = vmatmul.mubr.msk.f32.gmra.mrb[114].mxu0 %vm657_vm1, %v15120_v34  ;;  %v3451_v49 = vsel %vm3353_vm15, %v3304_v51, %v3402_v58  ;;  %v15121_v34 = vld [vmem:[%s21695_s30 + $0x130] sm:$0xff] }
 0x445   : > { %v19517_v35 = vadd.f32 %v18927_v16, %v2753_v36  ;;  %v13968_v28 = vpop.f32.mrb[151].mxu1  ;;  %14293 = vmatmul.mubr.msk.f32.gmra.mrb[0].mxu1 %vm1389_vm2, %v3451_v49  ;;  %14464 = vmatprep.mubr.msk.f32.mxu0 %vm16722_vm0, %v21705_v41  ;;  %v19535_v49 = vadd.f32 %v18927_v16, %v18540_v60 }
 0x446   : > { %vm3354_vm3 = vcmp.ge.f32.partialorder %v3305_v45, 0.0  ;;  %v3403_v2 = vmul.f32 0.01, %v3305_v45  ;;  %v3257_v55 = vmul.f32 %v19138_v38, %v3146_v37  ;;  %14295 = vmatprep.mubr.msk.f32.mxu1 %vm16722_vm0, %v21705_v41 }
 0x447   : > { %21728 = vst [vmem:[#allocation56_spill] sm:$0xff] %v19517_v35  ;;  %v3150_v51 = vpop.f32.mrb[10].mxu0 }
 0x448   : > { %v3306_v58 = vadd.f32 %v19145_v7, %v3257_v55  ;;  %v3151_v28 = vadd.f32 %v19148_v54, %v3150_v51  ;;  %v2758_v36 = vpop.f32.mrb[152].mxu1  ;;  %v14140_v33 = vpop.f32.mrb[11].mxu0  ;;  %14465 = vmatmul.mubr.msk.f32.gmra.mrb[116].mxu0 %vm657_vm1, %v15121_v34  ;;  %v3452_v37 = vsel %vm3354_vm3, %v3305_v45, %v3403_v2  ;;  %v15122_v34 = vld [vmem:[%s21695_s30 + $0x138] sm:$0xff] }
 0x449   : > { %v19538_v14 = vadd.f32 %v18927_v16, %v2758_v36  ;;  %v13971_v35 = vpop.f32.mrb[153].mxu1  ;;  %14296 = vmatmul.mubr.msk.f32.gmra.mrb[2].mxu1 %vm1389_vm2, %v3452_v37  ;;  %14467 = vmatprep.mubr.msk.f32.mxu0 %vm16722_vm0, %v21705_v41  ;;  %v19556_v37 = vadd.f32 %v18927_v16, %v18554_v30 }
 0x44a   : > { %vm3355_vm4 = vcmp.ge.f32.partialorder %v3306_v58, 0.0  ;;  %v3404_v55 = vmul.f32 0.01, %v3306_v58  ;;  %v3258_v51 = vmul.f32 %v19138_v38, %v3151_v28  ;;  %14298 = vmatprep.mubr.msk.f32.mxu1 %vm16722_vm0, %v21705_v41 }
 0x44b   : > { %21729 = vst [vmem:[#allocation57_spill] sm:$0xff] %v19538_v14  ;;  %v3155_v45 = vpop.f32.mrb[12].mxu0 }
 0x44c   : > { %v3307_v2 = vadd.f32 %v19145_v7, %v3258_v51  ;;  %v3156_v35 = vadd.f32 %v19148_v54, %v3155_v45  ;;  %v2763_v36 = vpop.f32.mrb[154].mxu1  ;;  %v14143_v33 = vpop.f32.mrb[13].mxu0  ;;  %14468 = vmatmul.mubr.msk.f32.gmra.mrb[118].mxu0 %vm657_vm1, %v15122_v34  ;;  %v3453_v28 = vsel %vm3355_vm4, %v3306_v58, %v3404_v55  ;;  %v19575_v34 = vld [vmem:[#allocation11] ss:$0 sm:$0xff] }
 0x44d   : > { %v19559_v60 = vadd.f32 %v18927_v16, %v2763_v36  ;;  %v13974_v14 = vpop.f32.mrb[155].mxu1  ;;  %14299 = vmatmul.mubr.msk.f32.gmra.mrb[4].mxu1 %vm1389_vm2, %v3453_v28  ;;  %14470 = vmatprep.mubr.msk.f32.mxu0 %vm16722_vm0, %v21705_v41  ;;  %v15123_v33 = vld [vmem:[%s21695_s30 + $0x140] sm:$0xff]  ;;  %v19579_v28 = vadd.f32 %v19575_v34, %v18568_v52 }
 0x44e   : > { %vm3356_vm5 = vcmp.ge.f32.partialorder %v3307_v2, 0.0  ;;  %v3405_v51 = vmul.f32 0.01, %v3307_v2  ;;  %v3259_v45 = vmul.f32 %v19138_v38, %v3156_v35  ;;  %14301 = vmatprep.mubr.msk.f32.mxu1 %vm16722_vm0, %v21705_v41 }
 0x44f   : > { %21730 = vst [vmem:[#allocation58_spill] sm:$0xff] %v19559_v60  ;;  %v3160_v58 = vpop.f32.mrb[14].mxu0  ;;  %v19600_v60 = vadd.f32 %v19575_v34, %v18586_v40 }
 0x450   : > { %v3308_v16 = vadd.f32 %v19145_v7, %v3259_v45  ;;  %v3161_v14 = vadd.f32 %v19148_v54, %v3160_v58  ;;  %v2768_v55 = vpop.f32.mrb[156].mxu1  ;;  %v14146_v36 = vpop.f32.mrb[15].mxu0  ;;  %14471 = vmatmul.mubr.msk.f32.gmra.mrb[120].mxu0 %vm657_vm1, %v15123_v33  ;;  %v3454_v35 = vsel %vm3356_vm5, %v3307_v2, %v3405_v51 }
 0x451   : > { %v19582_v30 = vadd.f32 %v19575_v34, %v2768_v55  ;;  %v13977_v45 = vpop.f32.mrb[157].mxu1  ;;  %14302 = vmatmul.mubr.msk.f32.gmra.mrb[6].mxu1 %vm1389_vm2, %v3454_v35  ;;  %14473 = vmatprep.mubr.msk.f32.mxu0 %vm16722_vm0, %v21705_v41 }
 0x452   : > { %vm3357_vm6 = vcmp.ge.f32.partialorder %v3308_v16, 0.0  ;;  %v3406_v58 = vmul.f32 0.01, %v3308_v16  ;;  %v3260_v36 = vmul.f32 %v19138_v38, %v3161_v14  ;;  %14304 = vmatprep.mubr.msk.f32.mxu1 %vm16722_vm0, %v21705_v41  ;;  %v15125_v45 = vld [vmem:[%s21695_s30 + $0x148] sm:$0xff] }
 0x453   : > { %21731 = vst [vmem:[#allocation59_spill] sm:$0xff] %v19582_v30  ;;  %v3165_v2 = vpop.f32.mrb[16].mxu0 }
 0x454   : > { %v3309_v51 = vadd.f32 %v19145_v7, %v3260_v36  ;;  %v3166_v55 = vadd.f32 %v19148_v54, %v3165_v2  ;;  %v2773_v33 = vpop.f32.mrb[158].mxu1  ;;  %v14149_v35 = vpop.f32.mrb[17].mxu0  ;;  %14474 = vmatmul.mubr.msk.f32.gmra.mrb[122].mxu0 %vm657_vm1, %v15125_v45  ;;  %v3455_v14 = vsel %vm3357_vm6, %v3308_v16, %v3406_v58  ;;  %v15126_v45 = vld [vmem:[%s21695_s30 + $0x150] sm:$0xff] }
 0x455   : > { %v19603_v52 = vadd.f32 %v19575_v34, %v2773_v33  ;;  %v13980_v30 = vpop.f32.mrb[159].mxu1  ;;  %14305 = vmatmul.mubr.msk.f32.gmra.mrb[8].mxu1 %vm1389_vm2, %v3455_v14  ;;  %14476 = vmatprep.mubr.msk.f32.mxu0 %vm16722_vm0, %v21705_v41  ;;  %v19621_v14 = vadd.f32 %v19575_v34, %v18602_v31 }
 0x456   : > { %vm3358_vm7 = vcmp.ge.f32.partialorder %v3309_v51, 0.0  ;;  %v3407_v36 = vmul.f32 0.01, %v3309_v51  ;;  %v3261_v2 = vmul.f32 %v19138_v38, %v3166_v55  ;;  %14307 = vmatprep.mubr.msk.f32.mxu1 %vm16722_vm0, %v21705_v41 }
 0x457   : > { %21732 = vst [vmem:[#allocation60_spill] sm:$0xff] %v19603_v52  ;;  %v3170_v16 = vpop.f32.mrb[18].mxu0 }
 0x458   : > { %v3310_v58 = vadd.f32 %v19145_v7, %v3261_v2  ;;  %v3171_v30 = vadd.f32 %v19148_v54, %v3170_v16  ;;  %v2778_v33 = vpop.f32.mrb[160].mxu1  ;;  %v14152_v35 = vpop.f32.mrb[19].mxu0  ;;  %14477 = vmatmul.mubr.msk.f32.gmra.mrb[124].mxu0 %vm657_vm1, %v15126_v45  ;;  %v3456_v55 = vsel %vm3358_vm7, %v3309_v51, %v3407_v36  ;;  %v15127_v45 = vld [vmem:[%s21695_s30 + $0x158] sm:$0xff] }
 0x459   : > { %v19624_v40 = vadd.f32 %v19575_v34, %v2778_v33  ;;  %v13983_v52 = vpop.f32.mrb[161].mxu1  ;;  %14308 = vmatmul.mubr.msk.f32.gmra.mrb[10].mxu1 %vm1389_vm2, %v3456_v55  ;;  %14479 = vmatprep.mubr.msk.f32.mxu0 %vm16722_vm0, %v21705_v41  ;;  %v19642_v55 = vadd.f32 %v19575_v34, %v18616_v8 }
 0x45a   : > { %vm3359_vm8 = vcmp.ge.f32.partialorder %v3310_v58, 0.0  ;;  %v3408_v2 = vmul.f32 0.01, %v3310_v58  ;;  %v3262_v16 = vmul.f32 %v19138_v38, %v3171_v30  ;;  %14310 = vmatprep.mubr.msk.f32.mxu1 %vm16722_vm0, %v21705_v41 }
 0x45b   : > { %21733 = vst [vmem:[#allocation61_spill] sm:$0xff] %v19624_v40  ;;  %v3175_v51 = vpop.f32.mrb[20].mxu0 }
 0x45c   : > { %v3311_v36 = vadd.f32 %v19145_v7, %v3262_v16  ;;  %v3176_v52 = vadd.f32 %v19148_v54, %v3175_v51  ;;  %v2783_v33 = vpop.f32.mrb[162].mxu1  ;;  %v14155_v35 = vpop.f32.mrb[21].mxu0  ;;  %14480 = vmatmul.mubr.msk.f32.gmra.mrb[126].mxu0 %vm657_vm1, %v15127_v45  ;;  %v3457_v30 = vsel %vm3359_vm8, %v3310_v58, %v3408_v2  ;;  %v15128_v45 = vld [vmem:[%s21695_s30 + $0x160] sm:$0xff] }
 0x45d   : > { %v19645_v31 = vadd.f32 %v19575_v34, %v2783_v33  ;;  %v13986_v40 = vpop.f32.mrb[163].mxu1  ;;  %14311 = vmatmul.mubr.msk.f32.gmra.mrb[12].mxu1 %vm1389_vm2, %v3457_v30  ;;  %14482 = vmatprep.mubr.msk.f32.mxu0 %vm16722_vm0, %v21705_v41  ;;  %v19663_v30 = vadd.f32 %v19575_v34, %v18630_v15 }
 0x45e   : > { %vm3360_vm9 = vcmp.ge.f32.partialorder %v3311_v36, 0.0  ;;  %v3409_v16 = vmul.f32 0.01, %v3311_v36  ;;  %v3263_v51 = vmul.f32 %v19138_v38, %v3176_v52  ;;  %14313 = vmatprep.mubr.msk.f32.mxu1 %vm16722_vm0, %v21705_v41 }
 0x45f   : > { %21734 = vst [vmem:[#allocation62_spill] sm:$0xff] %v19645_v31  ;;  %v3180_v58 = vpop.f32.mrb[22].mxu0 }
 0x460   : > { %v3312_v2 = vadd.f32 %v19145_v7, %v3263_v51  ;;  %v3181_v40 = vadd.f32 %v19148_v54, %v3180_v58  ;;  %v2788_v33 = vpop.f32.mrb[164].mxu1  ;;  %v14158_v35 = vpop.f32.mrb[23].mxu0  ;;  %14483 = vmatmul.mubr.msk.f32.gmra.mrb[128].mxu0 %vm657_vm1, %v15128_v45  ;;  %v3458_v52 = vsel %vm3360_vm9, %v3311_v36, %v3409_v16  ;;  %v15129_v45 = vld [vmem:[%s21695_s30 + $0x168] sm:$0xff] }
 0x461   : > { %v19666_v8 = vadd.f32 %v19575_v34, %v2788_v33  ;;  %v13989_v31 = vpop.f32.mrb[165].mxu1  ;;  %14314 = vmatmul.mubr.msk.f32.gmra.mrb[14].mxu1 %vm1389_vm2, %v3458_v52  ;;  %14485 = vmatprep.mubr.msk.f32.mxu0 %vm16722_vm0, %v21705_v41  ;;  %v19684_v52 = vadd.f32 %v19575_v34, %v18644_v17 }
 0x462   : > { %vm3361_vm10 = vcmp.ge.f32.partialorder %v3312_v2, 0.0  ;;  %v3410_v51 = vmul.f32 0.01, %v3312_v2  ;;  %v3264_v58 = vmul.f32 %v19138_v38, %v3181_v40  ;;  %14316 = vmatprep.mubr.msk.f32.mxu1 %vm16722_vm0, %v21705_v41 }
 0x463   : > { %21735 = vst [vmem:[#allocation63_spill] sm:$0xff] %v19666_v8  ;;  %v3185_v36 = vpop.f32.mrb[24].mxu0 }
 0x464   : > { %v3313_v16 = vadd.f32 %v19145_v7, %v3264_v58  ;;  %v3186_v31 = vadd.f32 %v19148_v54, %v3185_v36  ;;  %v2793_v33 = vpop.f32.mrb[166].mxu1  ;;  %v14161_v35 = vpop.f32.mrb[25].mxu0  ;;  %14486 = vmatmul.mubr.msk.f32.gmra.mrb[130].mxu0 %vm657_vm1, %v15129_v45  ;;  %v3459_v40 = vsel %vm3361_vm10, %v3312_v2, %v3410_v51  ;;  %v15130_v45 = vld [vmem:[%s21695_s30 + $0x170] sm:$0xff] }
 0x465   : > { %v19687_v15 = vadd.f32 %v19575_v34, %v2793_v33  ;;  %v13992_v8 = vpop.f32.mrb[167].mxu1  ;;  %14317 = vmatmul.mubr.msk.f32.gmra.mrb[16].mxu1 %vm1389_vm2, %v3459_v40  ;;  %14488 = vmatprep.mubr.msk.f32.mxu0 %vm16722_vm0, %v21705_v41  ;;  %v19705_v40 = vadd.f32 %v19575_v34, %v18658_v10 }
 0x466   : > { %vm3362_vm11 = vcmp.ge.f32.partialorder %v3313_v16, 0.0  ;;  %v3411_v58 = vmul.f32 0.01, %v3313_v16  ;;  %v3265_v36 = vmul.f32 %v19138_v38, %v3186_v31  ;;  %14319 = vmatprep.mubr.msk.f32.mxu1 %vm16722_vm0, %v21705_v41 }
 0x467   : > { %21736 = vst [vmem:[#allocation64_spill] sm:$0xff] %v19687_v15  ;;  %v3190_v2 = vpop.f32.mrb[26].mxu0 }
 0x468   : > { %v3314_v51 = vadd.f32 %v19145_v7, %v3265_v36  ;;  %v3191_v8 = vadd.f32 %v19148_v54, %v3190_v2  ;;  %v2798_v33 = vpop.f32.mrb[168].mxu1  ;;  %v14164_v35 = vpop.f32.mrb[27].mxu0  ;;  %14489 = vmatmul.mubr.msk.f32.gmra.mrb[132].mxu0 %vm657_vm1, %v15130_v45  ;;  %v3460_v31 = vsel %vm3362_vm11, %v3313_v16, %v3411_v58  ;;  %v15131_v45 = vld [vmem:[%s21695_s30 + $0x178] sm:$0xff] }
 0x469   : > { %v19708_v17 = vadd.f32 %v19575_v34, %v2798_v33  ;;  %v13995_v15 = vpop.f32.mrb[169].mxu1  ;;  %14320 = vmatmul.mubr.msk.f32.gmra.mrb[18].mxu1 %vm1389_vm2, %v3460_v31  ;;  %14491 = vmatprep.mubr.msk.f32.mxu0 %vm16722_vm0, %v21705_v41  ;;  %v19726_v31 = vadd.f32 %v19575_v34, %v18672_v48 }
 0x46a   : > { %vm3363_vm12 = vcmp.ge.f32.partialorder %v3314_v51, 0.0  ;;  %v3412_v36 = vmul.f32 0.01, %v3314_v51  ;;  %v3266_v2 = vmul.f32 %v19138_v38, %v3191_v8  ;;  %14322 = vmatprep.mubr.msk.f32.mxu1 %vm16722_vm0, %v21705_v41 }
 0x46b   : > { %21737 = vst [vmem:[#allocation65_spill] sm:$0xff] %v19708_v17  ;;  %v3195_v16 = vpop.f32.mrb[28].mxu0  ;;  %21738 = vst [vmem:[#allocation66_spill] sm:$0xff] %v19726_v31 }
 0x46c   : > { %v3315_v58 = vadd.f32 %v19145_v7, %v3266_v2  ;;  %v3196_v15 = vadd.f32 %v19148_v54, %v3195_v16  ;;  %v2803_v33 = vpop.f32.mrb[170].mxu1  ;;  %v14167_v35 = vpop.f32.mrb[29].mxu0  ;;  %14492 = vmatmul.mubr.msk.f32.gmra.mrb[134].mxu0 %vm657_vm1, %v15131_v45  ;;  %v3461_v8 = vsel %vm3363_vm12, %v3314_v51, %v3412_v36  ;;  %v15132_v45 = vld [vmem:[%s21695_s30 + $0x180] sm:$0xff] }
 0x46d   : > { %v19729_v10 = vadd.f32 %v19575_v34, %v2803_v33  ;;  %v13998_v17 = vpop.f32.mrb[171].mxu1  ;;  %14323 = vmatmul.mubr.msk.f32.gmra.mrb[20].mxu1 %vm1389_vm2, %v3461_v8  ;;  %14494 = vmatprep.mubr.msk.f32.mxu0 %vm16722_vm0, %v21705_v41  ;;  %v19747_v8 = vadd.f32 %v19575_v34, %v18686_v53 }
 0x46e   : > { %vm3364_vm13 = vcmp.ge.f32.partialorder %v3315_v58, 0.0  ;;  %v3413_v2 = vmul.f32 0.01, %v3315_v58  ;;  %v3267_v16 = vmul.f32 %v19138_v38, %v3196_v15  ;;  %14325 = vmatprep.mubr.msk.f32.mxu1 %vm16722_vm0, %v21705_v41 }
 0x46f   : > { %21739 = vst [vmem:[#allocation67_spill] sm:$0xff] %v19729_v10  ;;  %v3200_v51 = vpop.f32.mrb[30].mxu0 }
 0x470   : > { %v3316_v36 = vadd.f32 %v19145_v7, %v3267_v16  ;;  %v3201_v17 = vadd.f32 %v19148_v54, %v3200_v51  ;;  %v2808_v33 = vpop.f32.mrb[172].mxu1  ;;  %v14170_v35 = vpop.f32.mrb[31].mxu0  ;;  %14495 = vmatmul.mubr.msk.f32.gmra.mrb[136].mxu0 %vm657_vm1, %v15132_v45  ;;  %v3462_v15 = vsel %vm3364_vm13, %v3315_v58, %v3413_v2 }
 0x471   : > { %v19750_v48 = vadd.f32 %v19575_v34, %v2808_v33  ;;  %v14001_v10 = vpop.f32.mrb[173].mxu1  ;;  %14326 = vmatmul.mubr.msk.f32.gmra.mrb[22].mxu1 %vm1389_vm2, %v3462_v15  ;;  %v19762_v15 = vadd.f32 %v19575_v34, %v18700_v0 }
 0x472   : > { %vm3365_vm14 = vcmp.ge.f32.partialorder %v3316_v36, 0.0  ;;  %v3414_v16 = vmul.f32 0.01, %v3316_v36  ;;  %v3268_v51 = vmul.f32 %v19138_v38, %v3201_v17  ;;  %14328 = vmatprep.mubr.msk.f32.mxu1 %vm16722_vm0, %v21705_v41 }
 0x473   : > { %21740 = vst [vmem:[#allocation68_spill] sm:$0xff] %v19750_v48  ;;  %v3205_v2 = vpop.f32.mrb[32].mxu0 }
 0x474   : > { %v3317_v53 = vadd.f32 %v19145_v7, %v3268_v51  ;;  %v3206_v35 = vadd.f32 %v19148_v54, %v3205_v2  ;;  %v2813_v33 = vpop.f32.mrb[174].mxu1  ;;  %v14173_v45 = vpop.f32.mrb[33].mxu0  ;;  %v3463_v10 = vsel %vm3365_vm14, %v3316_v36, %v3414_v16  ;;  %v19783_v36 = vld [vmem:[#allocation7] ss:$0 sm:$0xff] }
 0x475   : > { %v19765_v17 = vadd.f32 %v19575_v34, %v2813_v33  ;;  %v14004_v31 = vpop.f32.mrb[175].mxu1  ;;  %14329 = vmatmul.mubr.msk.f32.gmra.mrb[24].mxu1 %vm1389_vm2, %v3463_v10  ;;  %v19777_v45 = vadd.f32 %v19575_v34, %v18714_v32 }
 0x476   : > { %vm3366_vm1 = vcmp.ge.f32.partialorder %v3317_v53, 0.0  ;;  %v3415_v58 = vmul.f32 0.01, %v3317_v53  ;;  %v3269_v48 = vmul.f32 %v19138_v38, %v3206_v35  ;;  %14331 = vmatprep.mubr.msk.f32.mxu1 %vm16722_vm0, %v21705_v41 }
 0x477   : > { %v3210_v16 = vpop.f32.mrb[34].mxu0  ;;  %21741 = vst [vmem:[#allocation69_spill] sm:$0xff] %v19777_v45 }
 0x478   : > { %v3318_v0 = vadd.f32 %v19145_v7, %v3269_v48  ;;  %v3211_v51 = vadd.f32 %v19148_v54, %v3210_v16  ;;  %v2818_v2 = vpop.f32.mrb[176].mxu1  ;;  %v14176_v33 = vpop.f32.mrb[35].mxu0  ;;  %v3464_v31 = vsel %vm3366_vm1, %v3317_v53, %v3415_v58  ;;  %v19790_v48 = vld [vmem:[#allocation8] ss:$0 sm:$0xff]  ;;  %v19793_v53 = vld [vmem:[#allocation5] ss:$0 sm:$0xff] }
 0x479   : > { %v19780_v38 = vadd.f32 %v19575_v34, %v2818_v2  ;;  %v14007_v35 = vpop.f32.mrb[177].mxu1  ;;  %14332 = vmatmul.mubr.msk.f32.gmra.mrb[26].mxu1 %vm1389_vm2, %v3464_v31 }
 0x47a   : > { %vm3367_vm15 = vcmp.ge.f32.partialorder %v3318_v0, 0.0  ;;  %v3416_v10 = vmul.f32 0.01, %v3318_v0  ;;  %v3270_v7 = vmul.f32 %v19783_v36, %v3211_v51  ;;  %14334 = vmatprep.mubr.msk.f32.mxu1 %vm16722_vm0, %v21705_v41  ;;  %v19798_v51 = vadd.f32 %v19575_v34, %v18728_v50 }
 0x47b   : > { %21742 = vst [vmem:[#allocation70_spill] sm:$0xff] %v19780_v38  ;;  %v3215_v32 = vpop.f32.mrb[36].mxu0 }
 0x47c   : > { %v3319_v58 = vadd.f32 %v19790_v48, %v3270_v7  ;;  %v3216_v16 = vadd.f32 %v19793_v53, %v3215_v32  ;;  %v2823_v2 = vpop.f32.mrb[178].mxu1  ;;  %v14179_v33 = vpop.f32.mrb[37].mxu0  ;;  %v3465_v31 = vsel %vm3367_vm15, %v3318_v0, %v3416_v10 }
 0x47d   : > { %v19801_v35 = vadd.f32 %v19575_v34, %v2823_v2  ;;  %v14010_v54 = vpop.f32.mrb[179].mxu1  ;;  %14335 = vmatmul.mubr.msk.f32.gmra.mrb[28].mxu1 %vm1389_vm2, %v3465_v31  ;;  %v19813_v31 = vadd.f32 %v19575_v34, %v18742_v5 }
 0x47e   : > { %vm3368_vm3 = vcmp.ge.f32.partialorder %v3319_v58, 0.0  ;;  %v3417_v38 = vmul.f32 0.01, %v3319_v58  ;;  %v3271_v7 = vmul.f32 %v19783_v36, %v3216_v16  ;;  %14337 = vmatprep.mubr.msk.f32.mxu1 %vm16722_vm0, %v21705_v41 }
 0x47f   : > { %21743 = vst [vmem:[#allocation71_spill] sm:$0xff] %v19801_v35  ;;  %v3220_v10 = vpop.f32.mrb[38].mxu0  ;;  %21744 = vst [vmem:[#allocation72_spill] sm:$0xff] %v19813_v31 }
 0x480   : > { %v3320_v50 = vadd.f32 %v19790_v48, %v3271_v7  ;;  %v3221_v32 = vadd.f32 %v19793_v53, %v3220_v10  ;;  %v2828_v2 = vpop.f32.mrb[180].mxu1  ;;  %v14182_v33 = vpop.f32.mrb[39].mxu0  ;;  %v3466_v54 = vsel %vm3368_vm3, %v3319_v58, %v3417_v38 }
 0x481   : > { %v19816_v16 = vadd.f32 %v19575_v34, %v2828_v2  ;;  %v14013_v45 = vpop.f32.mrb[181].mxu1  ;;  %14338 = vmatmul.mubr.msk.f32.gmra.mrb[30].mxu1 %vm1389_vm2, %v3466_v54  ;;  %v19828_v33 = vadd.f32 %v19575_v34, %v18756_v61 }
 0x482   : > { %vm3369_vm4 = vcmp.ge.f32.partialorder %v3320_v50, 0.0  ;;  %v3418_v0 = vmul.f32 0.01, %v3320_v50  ;;  %v3272_v35 = vmul.f32 %v19783_v36, %v3221_v32  ;;  %14340 = vmatprep.mubr.msk.f32.mxu1 %vm16722_vm0, %v21705_v41 }
 0x483   : > { %21745 = vst [vmem:[#allocation73_spill] sm:$0xff] %v19816_v16  ;;  %v4044_v58 = vpop.f32.mrb[40].mxu0  ;;  %21746 = vst [vmem:[#allocation74_spill] sm:$0xff] %v19828_v33 }
 0x484   : > { %v3321_v5 = vadd.f32 %v19790_v48, %v3272_v35  ;;  %v4045_v7 = vadd.f32 %v19793_v53, %v4044_v58  ;;  %v2833_v10 = vpop.f32.mrb[182].mxu1  ;;  %v14352_v2 = vpop.f32.mrb[41].mxu0  ;;  %v3467_v45 = vsel %vm3369_vm4, %v3320_v50, %v3418_v0 }
 0x485   : > { %v19831_v32 = vadd.f32 %v19575_v34, %v2833_v10  ;;  %v14016_v54 = vpop.f32.mrb[183].mxu1  ;;  %14341 = vmatmul.mubr.msk.f32.gmra.mrb[32].mxu1 %vm1389_vm2, %v3467_v45 }
 0x486   : > { %vm3370_vm5 = vcmp.ge.f32.partialorder %v3321_v5, 0.0  ;;  %v3419_v38 = vmul.f32 0.01, %v3321_v5  ;;  %v4288_v16 = vmul.f32 %v19783_v36, %v4045_v7  ;;  %14343 = vmatprep.mubr.msk.f32.mxu1 %vm16722_vm0, %v21705_v41  ;;  %v21748_v54 = vld [vmem:[#allocation26_spill] sm:$0xff] }
 0x487   : > { %21747 = vst [vmem:[#allocation75_spill] sm:$0xff] %v19831_v32  ;;  %v4049_v0 = vpop.f32.mrb[42].mxu0  ;;  %v19843_v45 = vadd.f32 %v19575_v34, %v21748_v54  ;;  %v21751_v54 = vld [vmem:[#allocation27_spill] sm:$0xff] }
 0x488   : > { %v4337_v61 = vadd.f32 %v19790_v48, %v4288_v16  ;;  %v4050_v50 = vadd.f32 %v19793_v53, %v4049_v0  ;;  %v2838_v58 = vpop.f32.mrb[184].mxu1  ;;  %v14355_v10 = vpop.f32.mrb[43].mxu0  ;;  %v3468_v2 = vsel %vm3370_vm5, %v3321_v5, %v3419_v38 }
 0x489   : > { %21749 = vst [vmem:[#allocation26_spill] sm:$0xff] %v19843_v45  ;;  %v19846_v7 = vadd.f32 %v19575_v34, %v2838_v58  ;;  %v14019_v31 = vpop.f32.mrb[185].mxu1  ;;  %14344 = vmatmul.mubr.msk.f32.gmra.mrb[34].mxu1 %vm1389_vm2, %v3468_v2  ;;  %v19858_v2 = vadd.f32 %v19575_v34, %v21751_v54 }
 0x48a   : > { %vm4386_vm6 = vcmp.ge.f32.partialorder %v4337_v61, 0.0  ;;  %v4435_v35 = vmul.f32 0.01, %v4337_v61  ;;  %v4289_v32 = vmul.f32 %v19783_v36, %v4050_v50  ;;  %14513 = vmatprep.mubr.msk.f32.mxu1 %vm16722_vm0, %v21705_v41 }
 0x48b   : > { %21750 = vst [vmem:[#allocation76_spill] sm:$0xff] %v19846_v7  ;;  %v4054_v38 = vpop.f32.mrb[44].mxu0  ;;  %21752 = vst [vmem:[#allocation27_spill] sm:$0xff] %v19858_v2  ;;  %v21754_v7 = vld [vmem:[#allocation28_spill] sm:$0xff] }
 0x48c   : > { %v4484_v5 = vsel %vm4386_vm6, %v4337_v61, %v4435_v35  ;;  %v4338_v0 = vadd.f32 %v19790_v48, %v4289_v32  ;;  %v4055_v58 = vadd.f32 %v19793_v53, %v4054_v38  ;;  %v2843_v10 = vpop.f32.mrb[186].mxu1  ;;  %v14358_v31 = vpop.f32.mrb[45].mxu0 }
 0x48d   : > { %v19861_v50 = vadd.f32 %v19575_v34, %v2843_v10  ;;  %v14022_v33 = vpop.f32.mrb[187].mxu1  ;;  %14514 = vmatmul.mubr.msk.f32.vlgmr.msra.gmra.mrb[36].mxu1 %vm1389_vm2, %v4484_v5  ;;  %v19873_v5 = vadd.f32 %v19575_v34, %v21754_v7 }
 0x48e   : > { %vm4387_vm7 = vcmp.ge.f32.partialorder %v4338_v0, 0.0  ;;  %v4436_v16 = vmul.f32 0.01, %v4338_v0  ;;  %v4290_v35 = vmul.f32 %v19783_v36, %v4055_v58  ;;  %14516 = vmatprep.mubr.msk.f32.mxu1 %vm16722_vm0, %v21705_v41 }
 0x48f   : > { %21753 = vst [vmem:[#allocation77_spill] sm:$0xff] %v19861_v50  ;;  %v4059_v61 = vpop.f32.mrb[46].mxu0  ;;  %21755 = vst [vmem:[#allocation28_spill] sm:$0xff] %v19873_v5 }
 0x490   : > { %v4339_v38 = vadd.f32 %v19790_v48, %v4290_v35  ;;  %v4060_v31 = vadd.f32 %v19793_v53, %v4059_v61  ;;  %v2848_v10 = vpop.f32.mrb[188].mxu1  ;;  %v14361_v54 = vpop.f32.mrb[47].mxu0  ;;  %v4485_v33 = vsel %vm4387_vm7, %v4338_v0, %v4436_v16 }
 0x491   : > { %v19876_v58 = vadd.f32 %v19575_v34, %v2848_v10  ;;  %v14025_v45 = vpop.f32.mrb[189].mxu1  ;;  %14517 = vmatmul.mubr.msk.f32.gmra.mrb[38].mxu1 %vm1389_vm2, %v4485_v33  ;;  %v21757_v54 = vld [vmem:[#allocation29_spill] sm:$0xff] }
 0x492   : > { %vm4388_vm8 = vcmp.ge.f32.partialorder %v4339_v38, 0.0  ;;  %v4437_v32 = vmul.f32 0.01, %v4339_v38  ;;  %v4291_v50 = vmul.f32 %v19783_v36, %v4060_v31  ;;  %14519 = vmatprep.mubr.msk.f32.mxu1 %vm16722_vm0, %v21705_v41  ;;  %v19888_v33 = vadd.f32 %v19575_v34, %v21757_v54  ;;  %v21760_v54 = vld [vmem:[#allocation30_spill] sm:$0xff] }
 0x493   : > { %21756 = vst [vmem:[#allocation78_spill] sm:$0xff] %v19876_v58  ;;  %v4064_v0 = vpop.f32.mrb[48].mxu0 }
 0x494   : > { %v4340_v7 = vadd.f32 %v19790_v48, %v4291_v50  ;;  %v4065_v35 = vadd.f32 %v19793_v53, %v4064_v0  ;;  %v2853_v61 = vpop.f32.mrb[190].mxu1  ;;  %v14364_v10 = vpop.f32.mrb[49].mxu0  ;;  %v4486_v45 = vsel %vm4388_vm8, %v4339_v38, %v4437_v32  ;;  %21758 = vst [vmem:[#allocation29_spill] sm:$0xff] %v19888_v33 }
 0x495   : > { %v19891_v31 = vadd.f32 %v19575_v34, %v2853_v61  ;;  %v14028_v2 = vpop.f32.mrb[191].mxu1  ;;  %14520 = vmatmul.mubr.msk.f32.gmra.mrb[40].mxu1 %vm1389_vm2, %v4486_v45  ;;  %v19903_v45 = vadd.f32 %v19575_v34, %v21760_v54 }
 0x496   : > { %vm4389_vm9 = vcmp.ge.f32.partialorder %v4340_v7, 0.0  ;;  %v4438_v16 = vmul.f32 0.01, %v4340_v7  ;;  %v4292_v58 = vmul.f32 %v19783_v36, %v4065_v35  ;;  %14522 = vmatprep.mubr.msk.f32.mxu1 %vm16722_vm0, %v21705_v41 }
 0x497   : > { %21759 = vst [vmem:[#allocation79_spill] sm:$0xff] %v19891_v31  ;;  %v4069_v32 = vpop.f32.mrb[50].mxu0  ;;  %21761 = vst [vmem:[#allocation30_spill] sm:$0xff] %v19903_v45 }
 0x498   : > { %v4341_v38 = vadd.f32 %v19790_v48, %v4292_v58  ;;  %v4070_v0 = vadd.f32 %v19793_v53, %v4069_v32  ;;  %v2858_v61 = vpop.f32.mrb[192].mxu1  ;;  %v14367_v10 = vpop.f32.mrb[51].mxu0  ;;  %v4487_v2 = vsel %vm4389_vm9, %v4340_v7, %v4438_v16 }
 0x499   : > { %v19906_v35 = vadd.f32 %v19575_v34, %v2858_v61  ;;  %v14031_v5 = vpop.f32.mrb[193].mxu1  ;;  %14523 = vmatmul.mubr.msk.f32.gmra.mrb[42].mxu1 %vm1389_vm2, %v4487_v2 }
 0x49a   : > { %vm4390_vm10 = vcmp.ge.f32.partialorder %v4341_v38, 0.0  ;;  %v4439_v50 = vmul.f32 0.01, %v4341_v38  ;;  %v4293_v31 = vmul.f32 %v19783_v36, %v4070_v0  ;;  %14525 = vmatprep.mubr.msk.f32.mxu1 %vm16722_vm0, %v21705_v41 }
 0x49b   : > { %21762 = vst [vmem:[#allocation80_spill] sm:$0xff] %v19906_v35  ;;  %v4074_v16 = vpop.f32.mrb[52].mxu0 }
 0x49c   : > { %v4342_v7 = vadd.f32 %v19790_v48, %v4293_v31  ;;  %v4075_v32 = vadd.f32 %v19793_v53, %v4074_v16  ;;  %v3682_v61 = vpop.f32.mrb[194].mxu1  ;;  %v14370_v10 = vpop.f32.mrb[53].mxu0  ;;  %v4488_v5 = vsel %vm4390_vm10, %v4341_v38, %v4439_v50  ;;  %v21763_v31 = vmax.f32 %v18941_v11, %v18944_v23 }
 0x49d   : > { %v3683_v2 = vadd.f32 %v19575_v34, %v3682_v61  ;;  %v14201_v54 = vpop.f32.mrb[195].mxu1  ;;  %14526 = vmatmul.mubr.msk.f32.gmra.mrb[44].mxu1 %vm1389_vm2, %v4488_v5  ;;  %v21764_v11 = vmax.f32 %v18962_v6, %v18965_v47  ;;  %v21765_v6 = vld [vmem:[#allocation31_spill] sm:$0xff]  ;;  %v21766_v47 = vld [vmem:[#allocation32_spill] sm:$0xff] }
 0x49e   : > { %vm4391_vm11 = vcmp.ge.f32.partialorder %v4342_v7, 0.0  ;;  %v4440_v0 = vmul.f32 0.01, %v4342_v7  ;;  %v4294_v33 = vmul.f32 %v19783_v36, %v4075_v32  ;;  %14528 = vmatprep.mubr.msk.f32.mxu1 %vm16722_vm0, %v21705_v41 }
 0x49f   : > { %v19924_v58 = vmax.f32 %v21763_v31, %v3683_v2  ;;  %v4079_v16 = vpop.f32.mrb[54].mxu0 }
 0x4a0   : > { %v4343_v50 = vadd.f32 %v19790_v48, %v4294_v33  ;;  %v4080_v38 = vadd.f32 %v19793_v53, %v4079_v16  ;;  %v3687_v61 = vpop.f32.mrb[196].mxu1  ;;  %v14373_v10 = vpop.f32.mrb[55].mxu0  ;;  %v4489_v5 = vsel %vm4391_vm11, %v4342_v7, %v4440_v0 }
 0x4a1   : > { %v3688_v54 = vadd.f32 %v19575_v34, %v3687_v61  ;;  %v14204_v35 = vpop.f32.mrb[197].mxu1  ;;  %14529 = vmatmul.mubr.msk.f32.gmra.mrb[46].mxu1 %vm1389_vm2, %v4489_v5 }
 0x4a2   : > { %vm4392_vm12 = vcmp.ge.f32.partialorder %v4343_v50, 0.0  ;;  %v4441_v32 = vmul.f32 0.01, %v4343_v50  ;;  %v4295_v45 = vmul.f32 %v19783_v36, %v4080_v38  ;;  %14531 = vmatprep.mubr.msk.f32.mxu1 %vm16722_vm0, %v21705_v41 }
 0x4a3   : > { %v19936_v23 = vmax.f32 %v21764_v11, %v3688_v54  ;;  %v4084_v33 = vpop.f32.mrb[56].mxu0 }
 0x4a4   : > { %v4344_v7 = vadd.f32 %v19790_v48, %v4295_v45  ;;  %v4085_v2 = vadd.f32 %v19793_v53, %v4084_v33  ;;  %v3692_v35 = vpop.f32.mrb[198].mxu1  ;;  %v14376_v0 = vpop.f32.mrb[57].mxu0  ;;  %v4490_v31 = vsel %vm4392_vm12, %v4343_v50, %v4441_v32  ;;  %v21767_v45 = vmax.f32 %v21765_v6, %v21766_v47 }
 0x4a5   : > { %v3693_v16 = vadd.f32 %v19575_v34, %v3692_v35  ;;  %v14207_v61 = vpop.f32.mrb[199].mxu1  ;;  %14532 = vmatmul.mubr.msk.f32.gmra.mrb[48].mxu1 %vm1389_vm2, %v4490_v31 }
 0x4a6   : > { %vm4393_vm13 = vcmp.ge.f32.partialorder %v4344_v7, 0.0  ;;  %v4442_v38 = vmul.f32 0.01, %v4344_v7  ;;  %v4296_v10 = vmul.f32 %v19783_v36, %v4085_v2  ;;  %14534 = vmatprep.mubr.msk.f32.mxu1 %vm16722_vm0, %v21705_v41 }
 0x4a7   : > { %v19948_v5 = vmax.f32 %v21767_v45, %v3693_v16  ;;  %v4089_v54 = vpop.f32.mrb[58].mxu0  ;;  %v21768_v16 = vld [vmem:[#allocation33_spill] sm:$0xff] }
 0x4a8   : > { %v4345_v50 = vadd.f32 %v19790_v48, %v4296_v10  ;;  %v4090_v32 = vadd.f32 %v19793_v53, %v4089_v54  ;;  %v3697_v11 = vpop.f32.mrb[200].mxu1  ;;  %v14379_v33 = vpop.f32.mrb[59].mxu0  ;;  %v4491_v35 = vsel %vm4393_vm13, %v4344_v7, %v4442_v38  ;;  %v21769_v10 = vmax.f32 %v19004_v29, %v21768_v16  ;;  %v21770_v29 = vld [vmem:[#allocation34_spill] sm:$0xff] }
 0x4a9   : > { %v3698_v0 = vadd.f32 %v19575_v34, %v3697_v11  ;;  %v14210_v31 = vpop.f32.mrb[201].mxu1  ;;  %14535 = vmatmul.mubr.msk.f32.gmra.mrb[50].mxu1 %vm1389_vm2, %v4491_v35 }
 0x4aa   : > { %vm4394_vm14 = vcmp.ge.f32.partialorder %v4345_v50, 0.0  ;;  %v4443_v2 = vmul.f32 0.01, %v4345_v50  ;;  %v4297_v61 = vmul.f32 %v19783_v36, %v4090_v32  ;;  %14537 = vmatprep.mubr.msk.f32.mxu1 %vm16722_vm0, %v21705_v41 }
 0x4ab   : > { %v19960_v6 = vmax.f32 %v21769_v10, %v3698_v0  ;;  %v4094_v47 = vpop.f32.mrb[60].mxu0  ;;  %v21771_v0 = vmax.f32 %v19025_v9, %v21770_v29  ;;  %v21772_v9 = vld [vmem:[#allocation35_spill] sm:$0xff] }
 0x4ac   : > { %v4346_v7 = vadd.f32 %v19790_v48, %v4297_v61  ;;  %v4095_v38 = vadd.f32 %v19793_v53, %v4094_v47  ;;  %v3702_v45 = vpop.f32.mrb[202].mxu1  ;;  %v14382_v54 = vpop.f32.mrb[61].mxu0  ;;  %v4492_v11 = vsel %vm4394_vm14, %v4345_v50, %v4443_v2 }
 0x4ad   : > { %v3703_v33 = vadd.f32 %v19575_v34, %v3702_v45  ;;  %v14213_v35 = vpop.f32.mrb[203].mxu1  ;;  %14538 = vmatmul.mubr.msk.f32.gmra.mrb[52].mxu1 %vm1389_vm2, %v4492_v11 }
 0x4ae   : > { %vm4395_vm1 = vcmp.ge.f32.partialorder %v4346_v7, 0.0  ;;  %v4444_v32 = vmul.f32 0.01, %v4346_v7  ;;  %v4298_v31 = vmul.f32 %v19783_v36, %v4095_v38  ;;  %14540 = vmatprep.mubr.msk.f32.mxu1 %vm16722_vm0, %v21705_v41 }
 0x4af   : > { %v19972_v61 = vmax.f32 %v21771_v0, %v3703_v33  ;;  %v4099_v16 = vpop.f32.mrb[62].mxu0  ;;  %v21773_v33 = vmax.f32 %v19046_v42, %v21772_v9  ;;  %v21774_v42 = vld [vmem:[#allocation36_spill] sm:$0xff] }
 0x4b0   : > { %v4347_v50 = vadd.f32 %v19790_v48, %v4298_v31  ;;  %v4100_v2 = vadd.f32 %v19793_v53, %v4099_v16  ;;  %v3707_v10 = vpop.f32.mrb[204].mxu1  ;;  %v14385_v47 = vpop.f32.mrb[63].mxu0  ;;  %v4493_v45 = vsel %vm4395_vm1, %v4346_v7, %v4444_v32 }
 0x4b1   : > { %v3708_v54 = vadd.f32 %v19575_v34, %v3707_v10  ;;  %v14216_v11 = vpop.f32.mrb[205].mxu1  ;;  %14541 = vmatmul.mubr.msk.f32.gmra.mrb[54].mxu1 %vm1389_vm2, %v4493_v45 }
 0x4b2   : > { %vm4396_vm15 = vcmp.ge.f32.partialorder %v4347_v50, 0.0  ;;  %v4445_v38 = vmul.f32 0.01, %v4347_v50  ;;  %v4299_v35 = vmul.f32 %v19783_v36, %v4100_v2  ;;  %14543 = vmatprep.mubr.msk.f32.mxu1 %vm16722_vm0, %v21705_v41 }
 0x4b3   : > { %v19984_v31 = vmax.f32 %v21773_v33, %v3708_v54  ;;  %v4104_v29 = vpop.f32.mrb[64].mxu0  ;;  %v21775_v54 = vmax.f32 %v19067_v19, %v21774_v42  ;;  %v21776_v19 = vmax.f32 %v19088_v44, %v19091_v4  ;;  %v21777_v4 = vld [vmem:[#allocation37_spill] sm:$0xff] }
 0x4b4   : > { %v4348_v7 = vadd.f32 %v19790_v48, %v4299_v35  ;;  %v4105_v32 = vadd.f32 %v19793_v53, %v4104_v29  ;;  %v3712_v0 = vpop.f32.mrb[206].mxu1  ;;  %v14388_v16 = vpop.f32.mrb[65].mxu0  ;;  %v4494_v10 = vsel %vm4396_vm15, %v4347_v50, %v4445_v38  ;;  %v21778_v44 = vmax.f32 %v19109_v59, %v21777_v4  ;;  %v21779_v59 = vld [vmem:[#allocation38_spill] sm:$0xff] }
 0x4b5   : > { %v3713_v47 = vadd.f32 %v19575_v34, %v3712_v0  ;;  %v14219_v45 = vpop.f32.mrb[207].mxu1  ;;  %14544 = vmatmul.mubr.msk.f32.gmra.mrb[56].mxu1 %vm1389_vm2, %v4494_v10 }
 0x4b6   : > { %vm4397_vm3 = vcmp.ge.f32.partialorder %v4348_v7, 0.0  ;;  %v4446_v2 = vmul.f32 0.01, %v4348_v7  ;;  %v4300_v11 = vmul.f32 %v19783_v36, %v4105_v32  ;;  %14546 = vmatprep.mubr.msk.f32.mxu1 %vm16722_vm0, %v21705_v41 }
 0x4b7   : > { %v19996_v35 = vmax.f32 %v21775_v54, %v3713_v47  ;;  %v4109_v9 = vpop.f32.mrb[66].mxu0 }
 0x4b8   : > { %v4349_v50 = vadd.f32 %v19790_v48, %v4300_v11  ;;  %v4110_v38 = vadd.f32 %v19793_v53, %v4109_v9  ;;  %v3717_v33 = vpop.f32.mrb[208].mxu1  ;;  %v14391_v29 = vpop.f32.mrb[67].mxu0  ;;  %v4495_v0 = vsel %vm4397_vm3, %v4348_v7, %v4446_v2 }
 0x4b9   : > { %v3718_v16 = vadd.f32 %v19575_v34, %v3717_v33  ;;  %v14222_v10 = vpop.f32.mrb[209].mxu1  ;;  %14547 = vmatmul.mubr.msk.f32.gmra.mrb[58].mxu1 %vm1389_vm2, %v4495_v0 }
 0x4ba   : > { %vm4398_vm4 = vcmp.ge.f32.partialorder %v4349_v50, 0.0  ;;  %v4447_v32 = vmul.f32 0.01, %v4349_v50  ;;  %v4301_v45 = vmul.f32 %v19783_v36, %v4110_v38  ;;  %14549 = vmatprep.mubr.msk.f32.mxu1 %vm16722_vm0, %v21705_v41 }
 0x4bb   : > { %v20008_v47 = vmax.f32 %v21776_v19, %v3718_v16  ;;  %v4114_v11 = vpop.f32.mrb[68].mxu0 }
 0x4bc   : > { %v4350_v7 = vadd.f32 %v19790_v48, %v4301_v45  ;;  %v4115_v2 = vadd.f32 %v19793_v53, %v4114_v11  ;;  %v3722_v42 = vpop.f32.mrb[210].mxu1  ;;  %v14394_v54 = vpop.f32.mrb[69].mxu0  ;;  %v4496_v9 = vsel %vm4398_vm4, %v4349_v50, %v4447_v32 }
 0x4bd   : > { %v3723_v33 = vadd.f32 %v19575_v34, %v3722_v42  ;;  %v14225_v29 = vpop.f32.mrb[211].mxu1  ;;  %14550 = vmatmul.mubr.msk.f32.gmra.mrb[60].mxu1 %vm1389_vm2, %v4496_v9 }
 0x4be   : > { %vm4399_vm5 = vcmp.ge.f32.partialorder %v4350_v7, 0.0  ;;  %v4448_v38 = vmul.f32 0.01, %v4350_v7  ;;  %v4302_v0 = vmul.f32 %v19783_v36, %v4115_v2  ;;  %14552 = vmatprep.mubr.msk.f32.mxu1 %vm16722_vm0, %v21705_v41 }
 0x4bf   : > { %v20020_v16 = vmax.f32 %v21778_v44, %v3723_v33  ;;  %v4119_v10 = vpop.f32.mrb[70].mxu0  ;;  %v21780_v33 = vld [vmem:[#allocation39_spill] sm:$0xff] }
 0x4c0   : > { %v4351_v50 = vadd.f32 %v19790_v48, %v4302_v0  ;;  %v4120_v32 = vadd.f32 %v19793_v53, %v4119_v10  ;;  %v3727_v45 = vpop.f32.mrb[212].mxu1  ;;  %v14397_v19 = vpop.f32.mrb[71].mxu0  ;;  %v4497_v11 = vsel %vm4399_vm5, %v4350_v7, %v4448_v38  ;;  %v21781_v29 = vmax.f32 %v21779_v59, %v21780_v33 }
 0x4c1   : > { %v3728_v42 = vadd.f32 %v19575_v34, %v3727_v45  ;;  %v14228_v54 = vpop.f32.mrb[213].mxu1  ;;  %14553 = vmatmul.mubr.msk.f32.gmra.mrb[62].mxu1 %vm1389_vm2, %v4497_v11 }
 0x4c2   : > { %vm4400_vm6 = vcmp.ge.f32.partialorder %v4351_v50, 0.0  ;;  %v4449_v2 = vmul.f32 0.01, %v4351_v50  ;;  %v4303_v9 = vmul.f32 %v19783_v36, %v4120_v32  ;;  %14555 = vmatprep.mubr.msk.f32.mxu1 %vm16722_vm0, %v21705_v41 }
 0x4c3   : > { %v20032_v0 = vmax.f32 %v21781_v29, %v3728_v42  ;;  %v4124_v4 = vpop.f32.mrb[72].mxu0  ;;  %v21782_v42 = vld [vmem:[#allocation40_spill] sm:$0xff] }
 0x4c4   : > { %v4352_v7 = vadd.f32 %v19790_v48, %v4303_v9  ;;  %v4125_v38 = vadd.f32 %v19793_v53, %v4124_v4  ;;  %v3732_v44 = vpop.f32.mrb[214].mxu1  ;;  %v14400_v10 = vpop.f32.mrb[73].mxu0  ;;  %v4498_v45 = vsel %vm4400_vm6, %v4351_v50, %v4449_v2  ;;  %v21783_v9 = vmax.f32 %v19157_v63, %v21782_v42  ;;  %v21784_v63 = vld [vmem:[#allocation41_spill] sm:$0xff] }
 0x4c5   : > { %v3733_v19 = vadd.f32 %v19575_v34, %v3732_v44  ;;  %v14231_v11 = vpop.f32.mrb[215].mxu1  ;;  %14556 = vmatmul.mubr.msk.f32.gmra.mrb[64].mxu1 %vm1389_vm2, %v4498_v45 }
 0x4c6   : > { %vm4401_vm7 = vcmp.ge.f32.partialorder %v4352_v7, 0.0  ;;  %v4450_v32 = vmul.f32 0.01, %v4352_v7  ;;  %v4304_v54 = vmul.f32 %v19783_v36, %v4125_v38  ;;  %14558 = vmatprep.mubr.msk.f32.mxu1 %vm16722_vm0, %v21705_v41 }
 0x4c7   : > { %v20044_v59 = vmax.f32 %v21783_v9, %v3733_v19  ;;  %v4129_v33 = vpop.f32.mrb[74].mxu0  ;;  %v21785_v19 = vmax.f32 %v19178_v18, %v21784_v63  ;;  %v21786_v18 = vld [vmem:[#allocation42_spill] sm:$0xff] }
 0x4c8   : > { %v4353_v50 = vadd.f32 %v19790_v48, %v4304_v54  ;;  %v4130_v2 = vadd.f32 %v19793_v53, %v4129_v33  ;;  %v3737_v29 = vpop.f32.mrb[216].mxu1  ;;  %v14403_v4 = vpop.f32.mrb[75].mxu0  ;;  %v4499_v44 = vsel %vm4401_vm7, %v4352_v7, %v4450_v32 }
 0x4c9   : > { %v3738_v10 = vadd.f32 %v19575_v34, %v3737_v29  ;;  %v14234_v45 = vpop.f32.mrb[217].mxu1  ;;  %14559 = vmatmul.mubr.msk.f32.gmra.mrb[66].mxu1 %vm1389_vm2, %v4499_v44 }
 0x4ca   : > { %vm4402_vm8 = vcmp.ge.f32.partialorder %v4353_v50, 0.0  ;;  %v4451_v38 = vmul.f32 0.01, %v4353_v50  ;;  %v4305_v11 = vmul.f32 %v19783_v36, %v4130_v2  ;;  %14561 = vmatprep.mubr.msk.f32.mxu1 %vm16722_vm0, %v21705_v41 }
 0x4cb   : > { %v20056_v54 = vmax.f32 %v21785_v19, %v3738_v10  ;;  %v4134_v42 = vpop.f32.mrb[76].mxu0  ;;  %v21787_v10 = vmax.f32 %v19199_v12, %v21786_v18  ;;  %v21788_v12 = vld [vmem:[#allocation43_spill] sm:$0xff] }
 0x4cc   : > { %v4354_v7 = vadd.f32 %v19790_v48, %v4305_v11  ;;  %v4135_v32 = vadd.f32 %v19793_v53, %v4134_v42  ;;  %v3742_v9 = vpop.f32.mrb[218].mxu1  ;;  %v14406_v33 = vpop.f32.mrb[77].mxu0  ;;  %v4500_v29 = vsel %vm4402_vm8, %v4353_v50, %v4451_v38 }
 0x4cd   : > { %v3743_v4 = vadd.f32 %v19575_v34, %v3742_v9  ;;  %v14237_v44 = vpop.f32.mrb[219].mxu1  ;;  %14562 = vmatmul.mubr.msk.f32.gmra.mrb[68].mxu1 %vm1389_vm2, %v4500_v29 }
 0x4ce   : > { %vm4403_vm9 = vcmp.ge.f32.partialorder %v4354_v7, 0.0  ;;  %v4452_v2 = vmul.f32 0.01, %v4354_v7  ;;  %v4306_v45 = vmul.f32 %v19783_v36, %v4135_v32  ;;  %14564 = vmatprep.mubr.msk.f32.mxu1 %vm16722_vm0, %v21705_v41 }
 0x4cf   : > { %v20068_v11 = vmax.f32 %v21787_v10, %v3743_v4  ;;  %v4139_v63 = vpop.f32.mrb[78].mxu0  ;;  %v21789_v4 = vmax.f32 %v19220_v22, %v21788_v12  ;;  %v21790_v22 = vld [vmem:[#allocation44_spill] sm:$0xff] }
 0x4d0   : > { %v4355_v50 = vadd.f32 %v19790_v48, %v4306_v45  ;;  %v4140_v38 = vadd.f32 %v19793_v53, %v4139_v63  ;;  %v3747_v19 = vpop.f32.mrb[220].mxu1  ;;  %v14409_v42 = vpop.f32.mrb[79].mxu0  ;;  %v4501_v9 = vsel %vm4403_vm9, %v4354_v7, %v4452_v2 }
 0x4d1   : > { %v3748_v33 = vadd.f32 %v19575_v34, %v3747_v19  ;;  %v14240_v29 = vpop.f32.mrb[221].mxu1  ;;  %14565 = vmatmul.mubr.msk.f32.gmra.mrb[70].mxu1 %vm1389_vm2, %v4501_v9 }
 0x4d2   : > { %vm4404_vm10 = vcmp.ge.f32.partialorder %v4355_v50, 0.0  ;;  %v4453_v32 = vmul.f32 0.01, %v4355_v50  ;;  %v4307_v44 = vmul.f32 %v19783_v36, %v4140_v38  ;;  %14567 = vmatprep.mubr.msk.f32.mxu1 %vm16722_vm0, %v21705_v41 }
 0x4d3   : > { %v20080_v45 = vmax.f32 %v21789_v4, %v3748_v33  ;;  %v4144_v18 = vpop.f32.mrb[80].mxu0  ;;  %v21791_v33 = vmax.f32 %v19241_v62, %v21790_v22  ;;  %v21792_v62 = vld [vmem:[#allocation45_spill] sm:$0xff] }
 0x4d4   : > { %v4356_v7 = vadd.f32 %v19790_v48, %v4307_v44  ;;  %v4145_v2 = vadd.f32 %v19793_v53, %v4144_v18  ;;  %v3752_v10 = vpop.f32.mrb[222].mxu1  ;;  %v14412_v63 = vpop.f32.mrb[81].mxu0  ;;  %v4502_v19 = vsel %vm4404_vm10, %v4355_v50, %v4453_v32 }
 0x4d5   : > { %v3753_v42 = vadd.f32 %v19575_v34, %v3752_v10  ;;  %v14243_v9 = vpop.f32.mrb[223].mxu1  ;;  %14568 = vmatmul.mubr.msk.f32.gmra.mrb[72].mxu1 %vm1389_vm2, %v4502_v19 }
 0x4d6   : > { %vm4405_vm11 = vcmp.ge.f32.partialorder %v4356_v7, 0.0  ;;  %v4454_v38 = vmul.f32 0.01, %v4356_v7  ;;  %v4308_v29 = vmul.f32 %v19783_v36, %v4145_v2  ;;  %14570 = vmatprep.mubr.msk.f32.mxu1 %vm16722_vm0, %v21705_v41 }
 0x4d7   : > { %v20092_v44 = vmax.f32 %v21791_v33, %v3753_v42  ;;  %v4149_v12 = vpop.f32.mrb[82].mxu0  ;;  %v21793_v42 = vmax.f32 %v19262_v25, %v21792_v62 }
 0x4d8   : > { %v4357_v50 = vadd.f32 %v19790_v48, %v4308_v29  ;;  %v4150_v32 = vadd.f32 %v19793_v53, %v4149_v12  ;;  %v3757_v4 = vpop.f32.mrb[224].mxu1  ;;  %v14415_v18 = vpop.f32.mrb[83].mxu0  ;;  %v4503_v10 = vsel %vm4405_vm11, %v4356_v7, %v4454_v38 }
 0x4d9   : > { %v3758_v63 = vadd.f32 %v19575_v34, %v3757_v4  ;;  %v14246_v19 = vpop.f32.mrb[225].mxu1  ;;  %14571 = vmatmul.mubr.msk.f32.gmra.mrb[74].mxu1 %vm1389_vm2, %v4503_v10  ;;  %v20108_v4 = vld [vmem:[#allocation11] ss:$0 sm:$0xff] }
 0x4da   : > { %vm4406_vm12 = vcmp.ge.f32.partialorder %v4357_v50, 0.0  ;;  %v4455_v2 = vmul.f32 0.01, %v4357_v50  ;;  %v4309_v9 = vmul.f32 %v19783_v36, %v4150_v32  ;;  %14573 = vmatprep.mubr.msk.f32.mxu1 %vm16722_vm0, %v21705_v41 }
 0x4db   : > { %v20104_v29 = vmax.f32 %v21793_v42, %v3758_v63  ;;  %v4154_v22 = vpop.f32.mrb[84].mxu0  ;;  %v21794_v63 = vld [vmem:[#allocation46_spill] sm:$0xff] }
 0x4dc   : > { %v4358_v7 = vadd.f32 %v19790_v48, %v4309_v9  ;;  %v4155_v34 = vadd.f32 %v19793_v53, %v4154_v22  ;;  %v3762_v38 = vpop.f32.mrb[226].mxu1  ;;  %v14418_v33 = vpop.f32.mrb[85].mxu0  ;;  %v4504_v12 = vsel %vm4406_vm12, %v4357_v50, %v4455_v2  ;;  %v21795_v19 = vmax.f32 %v19283_v26, %v21794_v63  ;;  %v21796_v26 = vld [vmem:[#allocation47_spill] sm:$0xff] }
 0x4dd   : > { %v3763_v32 = vadd.f32 %v20108_v4, %v3762_v38  ;;  %v14249_v18 = vpop.f32.mrb[227].mxu1  ;;  %14574 = vmatmul.mubr.msk.f32.gmra.mrb[76].mxu1 %vm1389_vm2, %v4504_v12 }
 0x4de   : > { %vm4407_vm13 = vcmp.ge.f32.partialorder %v4358_v7, 0.0  ;;  %v4456_v10 = vmul.f32 0.01, %v4358_v7  ;;  %v4310_v25 = vmul.f32 %v19783_v36, %v4155_v34  ;;  %14576 = vmatprep.mubr.msk.f32.mxu1 %vm16722_vm0, %v21705_v41 }
 0x4df   : > { %v20118_v9 = vmax.f32 %v21795_v19, %v3763_v32  ;;  %v4159_v50 = vpop.f32.mrb[86].mxu0  ;;  %v21797_v32 = vmax.f32 %v19304_v27, %v21796_v26  ;;  %v21798_v27 = vmax.f32 %v19325_v46, %v19328_v3  ;;  %v21799_v3 = vld [vmem:[#allocation48_spill] sm:$0xff] }
 0x4e0   : > { %v4359_v2 = vadd.f32 %v19790_v48, %v4310_v25  ;;  %v4160_v62 = vadd.f32 %v19793_v53, %v4159_v50  ;;  %v3767_v42 = vpop.f32.mrb[228].mxu1  ;;  %v14421_v22 = vpop.f32.mrb[87].mxu0  ;;  %v4505_v38 = vsel %vm4407_vm13, %v4358_v7, %v4456_v10  ;;  %v21800_v46 = vmax.f32 %v19346_v13, %v21799_v3  ;;  %v21801_v13 = vld [vmem:[#allocation49_spill] sm:$0xff] }
 0x4e1   : > { %v3768_v33 = vadd.f32 %v20108_v4, %v3767_v42  ;;  %v14252_v12 = vpop.f32.mrb[229].mxu1  ;;  %14577 = vmatmul.mubr.msk.f32.gmra.mrb[78].mxu1 %vm1389_vm2, %v4505_v38 }
 0x4e2   : > { %vm4408_vm14 = vcmp.ge.f32.partialorder %v4359_v2, 0.0  ;;  %v4457_v34 = vmul.f32 0.01, %v4359_v2  ;;  %v4311_v18 = vmul.f32 %v19783_v36, %v4160_v62  ;;  %14579 = vmatprep.mubr.msk.f32.mxu1 %vm16722_vm0, %v21705_v41 }
 0x4e3   : > { %v20130_v25 = vmax.f32 %v21797_v32, %v3768_v33  ;;  %v4164_v63 = vpop.f32.mrb[88].mxu0 }
 0x4e4   : > { %v4360_v7 = vadd.f32 %v19790_v48, %v4311_v18  ;;  %v4165_v10 = vadd.f32 %v19793_v53, %v4164_v63  ;;  %v3772_v19 = vpop.f32.mrb[230].mxu1  ;;  %v14424_v50 = vpop.f32.mrb[89].mxu0  ;;  %v4506_v42 = vsel %vm4408_vm14, %v4359_v2, %v4457_v34 }
 0x4e5   : > { %v3773_v22 = vadd.f32 %v20108_v4, %v3772_v19  ;;  %v14255_v38 = vpop.f32.mrb[231].mxu1  ;;  %14580 = vmatmul.mubr.msk.f32.gmra.mrb[80].mxu1 %vm1389_vm2, %v4506_v42 }
 0x4e6   : > { %vm4409_vm1 = vcmp.ge.f32.partialorder %v4360_v7, 0.0  ;;  %v4458_v62 = vmul.f32 0.01, %v4360_v7  ;;  %v4312_v12 = vmul.f32 %v19783_v36, %v4165_v10  ;;  %14582 = vmatprep.mubr.msk.f32.mxu1 %vm16722_vm0, %v21705_v41 }
 0x4e7   : > { %v20142_v33 = vmax.f32 %v21798_v27, %v3773_v22  ;;  %v4169_v18 = vpop.f32.mrb[90].mxu0 }
 0x4e8   : > { %v4361_v2 = vadd.f32 %v19790_v48, %v4312_v12  ;;  %v4170_v34 = vadd.f32 %v19793_v53, %v4169_v18  ;;  %v3777_v26 = vpop.f32.mrb[232].mxu1  ;;  %v14427_v32 = vpop.f32.mrb[91].mxu0  ;;  %v4507_v63 = vsel %vm4409_vm1, %v4360_v7, %v4458_v62 }
 0x4e9   : > { %v3778_v19 = vadd.f32 %v20108_v4, %v3777_v26  ;;  %v14258_v50 = vpop.f32.mrb[233].mxu1  ;;  %14583 = vmatmul.mubr.msk.f32.gmra.mrb[82].mxu1 %vm1389_vm2, %v4507_v63 }
 0x4ea   : > { %vm4410_vm15 = vcmp.ge.f32.partialorder %v4361_v2, 0.0  ;;  %v4459_v10 = vmul.f32 0.01, %v4361_v2  ;;  %v4313_v42 = vmul.f32 %v19783_v36, %v4170_v34  ;;  %14585 = vmatprep.mubr.msk.f32.mxu1 %vm16722_vm0, %v21705_v41 }
 0x4eb   : > { %v20154_v22 = vmax.f32 %v21800_v46, %v3778_v19  ;;  %v4174_v38 = vpop.f32.mrb[92].mxu0  ;;  %v21802_v19 = vmax.f32 %v19367_v20, %v21801_v13  ;;  %v21803_v20 = vld [vmem:[#allocation50_spill] sm:$0xff] }
 0x4ec   : > { %v4362_v7 = vadd.f32 %v19790_v48, %v4313_v42  ;;  %v4175_v62 = vadd.f32 %v19793_v53, %v4174_v38  ;;  %v3782_v12 = vpop.f32.mrb[234].mxu1  ;;  %v14430_v27 = vpop.f32.mrb[93].mxu0  ;;  %v4508_v18 = vsel %vm4410_vm15, %v4361_v2, %v4459_v10 }
 0x4ed   : > { %v3783_v26 = vadd.f32 %v20108_v4, %v3782_v12  ;;  %v14261_v32 = vpop.f32.mrb[235].mxu1  ;;  %14586 = vmatmul.mubr.msk.f32.gmra.mrb[84].mxu1 %vm1389_vm2, %v4508_v18 }
 0x4ee   : > { %vm4411_vm3 = vcmp.ge.f32.partialorder %v4362_v7, 0.0  ;;  %v4460_v34 = vmul.f32 0.01, %v4362_v7  ;;  %v4314_v63 = vmul.f32 %v19783_v36, %v4175_v62  ;;  %14588 = vmatprep.mubr.msk.f32.mxu1 %vm16722_vm0, %v21705_v41 }
 0x4ef   : > { %v20166_v50 = vmax.f32 %v21802_v19, %v3783_v26  ;;  %v4179_v42 = vpop.f32.mrb[94].mxu0  ;;  %v21804_v26 = vmax.f32 %v19388_v56, %v21803_v20  ;;  %v21805_v56 = vld [vmem:[#allocation51_spill] sm:$0xff] }
 0x4f0   : > { %v4363_v2 = vadd.f32 %v19790_v48, %v4314_v63  ;;  %v4180_v10 = vadd.f32 %v19793_v53, %v4179_v42  ;;  %v3787_v3 = vpop.f32.mrb[236].mxu1  ;;  %v14433_v46 = vpop.f32.mrb[95].mxu0  ;;  %v4509_v38 = vsel %vm4411_vm3, %v4362_v7, %v4460_v34 }
 0x4f1   : > { %v3788_v12 = vadd.f32 %v20108_v4, %v3787_v3  ;;  %v14264_v27 = vpop.f32.mrb[237].mxu1  ;;  %14589 = vmatmul.mubr.msk.f32.gmra.mrb[86].mxu1 %vm1389_vm2, %v4509_v38 }
 0x4f2   : > { %vm4412_vm4 = vcmp.ge.f32.partialorder %v4363_v2, 0.0  ;;  %v4461_v62 = vmul.f32 0.01, %v4363_v2  ;;  %v4315_v18 = vmul.f32 %v19783_v36, %v4180_v10  ;;  %14591 = vmatprep.mubr.msk.f32.mxu1 %vm16722_vm0, %v21705_v41 }
 0x4f3   : > { %v20178_v32 = vmax.f32 %v21804_v26, %v3788_v12  ;;  %v4184_v63 = vpop.f32.mrb[96].mxu0  ;;  %v21806_v12 = vmax.f32 %v19409_v39, %v21805_v56  ;;  %v21807_v39 = vld [vmem:[#allocation52_spill] sm:$0xff] }
 0x4f4   : > { %v4364_v7 = vadd.f32 %v19790_v48, %v4315_v18  ;;  %v4185_v34 = vadd.f32 %v19793_v53, %v4184_v63  ;;  %v3792_v13 = vpop.f32.mrb[238].mxu1  ;;  %v14436_v19 = vpop.f32.mrb[97].mxu0  ;;  %v4510_v42 = vsel %vm4412_vm4, %v4363_v2, %v4461_v62 }
 0x4f5   : > { %v3793_v3 = vadd.f32 %v20108_v4, %v3792_v13  ;;  %v14267_v46 = vpop.f32.mrb[239].mxu1  ;;  %14592 = vmatmul.mubr.msk.f32.gmra.mrb[88].mxu1 %vm1389_vm2, %v4510_v42 }
 0x4f6   : > { %vm4413_vm5 = vcmp.ge.f32.partialorder %v4364_v7, 0.0  ;;  %v4462_v10 = vmul.f32 0.01, %v4364_v7  ;;  %v4316_v38 = vmul.f32 %v19783_v36, %v4185_v34  ;;  %14594 = vmatprep.mubr.msk.f32.mxu1 %vm16722_vm0, %v21705_v41 }
 0x4f7   : > { %v20190_v27 = vmax.f32 %v21806_v12, %v3793_v3  ;;  %v4189_v18 = vpop.f32.mrb[98].mxu0  ;;  %v21808_v3 = vmax.f32 %v19430_v43, %v21807_v39  ;;  %v21809_v43 = vld [vmem:[#allocation53_spill] sm:$0xff] }
 0x4f8   : > { %v4365_v2 = vadd.f32 %v19790_v48, %v4316_v38  ;;  %v4190_v62 = vadd.f32 %v19793_v53, %v4189_v18  ;;  %v3797_v20 = vpop.f32.mrb[240].mxu1  ;;  %v14439_v26 = vpop.f32.mrb[99].mxu0  ;;  %v4511_v63 = vsel %vm4413_vm5, %v4364_v7, %v4462_v10 }
 0x4f9   : > { %v3798_v13 = vadd.f32 %v20108_v4, %v3797_v20  ;;  %v14270_v19 = vpop.f32.mrb[241].mxu1  ;;  %14595 = vmatmul.mubr.msk.f32.gmra.mrb[90].mxu1 %vm1389_vm2, %v4511_v63 }
 0x4fa   : > { %vm4414_vm6 = vcmp.ge.f32.partialorder %v4365_v2, 0.0  ;;  %v4463_v34 = vmul.f32 0.01, %v4365_v2  ;;  %v4317_v42 = vmul.f32 %v19783_v36, %v4190_v62  ;;  %14597 = vmatprep.mubr.msk.f32.mxu1 %vm16722_vm0, %v21705_v41 }
 0x4fb   : > { %v20202_v46 = vmax.f32 %v21808_v3, %v3798_v13  ;;  %v4194_v38 = vpop.f32.mrb[100].mxu0  ;;  %v21810_v13 = vmax.f32 %v19451_v1, %v21809_v43  ;;  %v21811_v1 = vld [vmem:[#allocation54_spill] sm:$0xff] }
 0x4fc   : > { %v4366_v7 = vadd.f32 %v19790_v48, %v4317_v42  ;;  %v4195_v10 = vadd.f32 %v19793_v53, %v4194_v38  ;;  %v3802_v56 = vpop.f32.mrb[242].mxu1  ;;  %v14442_v12 = vpop.f32.mrb[101].mxu0  ;;  %v4512_v18 = vsel %vm4414_vm6, %v4365_v2, %v4463_v34 }
 0x4fd   : > { %v3803_v20 = vadd.f32 %v20108_v4, %v3802_v56  ;;  %v14273_v26 = vpop.f32.mrb[243].mxu1  ;;  %14598 = vmatmul.mubr.msk.f32.gmra.mrb[92].mxu1 %vm1389_vm2, %v4512_v18 }
 0x4fe   : > { %vm4415_vm7 = vcmp.ge.f32.partialorder %v4366_v7, 0.0  ;;  %v4464_v62 = vmul.f32 0.01, %v4366_v7  ;;  %v4318_v63 = vmul.f32 %v19783_v36, %v4195_v10  ;;  %14600 = vmatprep.mubr.msk.f32.mxu1 %vm16722_vm0, %v21705_v41 }
 0x4ff   : > { %v20214_v19 = vmax.f32 %v21810_v13, %v3803_v20  ;;  %v4199_v42 = vpop.f32.mrb[102].mxu0  ;;  %v21812_v20 = vmax.f32 %v19472_v21, %v21811_v1  ;;  %v21813_v21 = vld [vmem:[#allocation55_spill] sm:$0xff] }
 0x500   : > { %v4367_v2 = vadd.f32 %v19790_v48, %v4318_v63  ;;  %v4200_v34 = vadd.f32 %v19793_v53, %v4199_v42  ;;  %v3807_v39 = vpop.f32.mrb[244].mxu1  ;;  %v14445_v3 = vpop.f32.mrb[103].mxu0  ;;  %v4513_v38 = vsel %vm4415_vm7, %v4366_v7, %v4464_v62 }
 0x501   : > { %v3808_v56 = vadd.f32 %v20108_v4, %v3807_v39  ;;  %v14276_v12 = vpop.f32.mrb[245].mxu1  ;;  %14601 = vmatmul.mubr.msk.f32.gmra.mrb[94].mxu1 %vm1389_vm2, %v4513_v38 }
 0x502   : > { %vm4416_vm8 = vcmp.ge.f32.partialorder %v4367_v2, 0.0  ;;  %v4465_v10 = vmul.f32 0.01, %v4367_v2  ;;  %v4319_v18 = vmul.f32 %v19783_v36, %v4200_v34  ;;  %14603 = vmatprep.mubr.msk.f32.mxu1 %vm16722_vm0, %v21705_v41 }
 0x503   : > { %v20226_v26 = vmax.f32 %v21812_v20, %v3808_v56  ;;  %v4204_v63 = vpop.f32.mrb[104].mxu0  ;;  %v21814_v56 = vmax.f32 %v19493_v57, %v21813_v21 }
 0x504   : > { %v4368_v7 = vadd.f32 %v19790_v48, %v4319_v18  ;;  %v4205_v62 = vadd.f32 %v19793_v53, %v4204_v63  ;;  %v3812_v43 = vpop.f32.mrb[246].mxu1  ;;  %v14448_v13 = vpop.f32.mrb[105].mxu0  ;;  %v4514_v42 = vsel %vm4416_vm8, %v4367_v2, %v4465_v10 }
 0x505   : > { %v3813_v39 = vadd.f32 %v20108_v4, %v3812_v43  ;;  %v14279_v3 = vpop.f32.mrb[247].mxu1  ;;  %14604 = vmatmul.mubr.msk.f32.gmra.mrb[96].mxu1 %vm1389_vm2, %v4514_v42 }
 0x506   : > { %vm4417_vm9 = vcmp.ge.f32.partialorder %v4368_v7, 0.0  ;;  %v4466_v34 = vmul.f32 0.01, %v4368_v7  ;;  %v4320_v38 = vmul.f32 %v19783_v36, %v4205_v62  ;;  %14606 = vmatprep.mubr.msk.f32.mxu1 %vm16722_vm0, %v21705_v41  ;;  %v20244_v62 = vld [vmem:[#allocation7] ss:$0 sm:$0xff] }
 0x507   : > { %v20238_v12 = vmax.f32 %v21814_v56, %v3813_v39  ;;  %v4209_v18 = vpop.f32.mrb[106].mxu0  ;;  %v20254_v39 = vld [vmem:[#allocation8] ss:$0 sm:$0xff] }
 0x508   : > { %v4369_v2 = vadd.f32 %v19790_v48, %v4320_v38  ;;  %v4210_v10 = vadd.f32 %v19793_v53, %v4209_v18  ;;  %v3817_v1 = vpop.f32.mrb[248].mxu1  ;;  %v14451_v20 = vpop.f32.mrb[107].mxu0  ;;  %v4515_v63 = vsel %vm4417_vm9, %v4368_v7, %v4466_v34  ;;  %v21815_v48 = vld [vmem:[#allocation56_spill] sm:$0xff] }
 0x509   : > { %v3818_v43 = vadd.f32 %v20108_v4, %v3817_v1  ;;  %v14282_v13 = vpop.f32.mrb[249].mxu1  ;;  %14607 = vmatmul.mubr.msk.f32.gmra.mrb[98].mxu1 %vm1389_vm2, %v4515_v63  ;;  %v21816_v53 = vmax.f32 %v19514_v24, %v21815_v48  ;;  %v20257_v34 = vld [vmem:[#allocation5] ss:$0 sm:$0xff]  ;;  %v21817_v63 = vld [vmem:[#allocation57_spill] sm:$0xff] }
 0x50a   : > { %vm4418_vm10 = vcmp.ge.f32.partialorder %v4369_v2, 0.0  ;;  %v4467_v36 = vmul.f32 0.01, %v4369_v2  ;;  %v4321_v57 = vmul.f32 %v20244_v62, %v4210_v10  ;;  %14609 = vmatprep.mubr.msk.f32.mxu1 %vm16722_vm0, %v21705_v41 }
 0x50b   : > { %v20252_v42 = vmax.f32 %v21816_v53, %v3818_v43  ;;  %v4214_v7 = vpop.f32.mrb[108].mxu0  ;;  %v21818_v43 = vmax.f32 %v19535_v49, %v21817_v63  ;;  %v21819_v49 = vld [vmem:[#allocation58_spill] sm:$0xff] }
 0x50c   : > { %v4370_v3 = vadd.f32 %v20254_v39, %v4321_v57  ;;  %v4215_v38 = vadd.f32 %v20257_v34, %v4214_v7  ;;  %v3822_v21 = vpop.f32.mrb[250].mxu1  ;;  %v14454_v56 = vpop.f32.mrb[109].mxu0  ;;  %v4516_v18 = vsel %vm4418_vm10, %v4369_v2, %v4467_v36 }
 0x50d   : > { %v3823_v10 = vadd.f32 %v20108_v4, %v3822_v21  ;;  %v14285_v1 = vpop.f32.mrb[251].mxu1  ;;  %14610 = vmatmul.mubr.msk.f32.gmra.mrb[100].mxu1 %vm1389_vm2, %v4516_v18 }
 0x50e   : > { %vm4419_vm11 = vcmp.ge.f32.partialorder %v4370_v3, 0.0  ;;  %v4468_v24 = vmul.f32 0.01, %v4370_v3  ;;  %v4322_v20 = vmul.f32 %v20244_v62, %v4215_v38  ;;  %14612 = vmatprep.mubr.msk.f32.mxu1 %vm16722_vm0, %v21705_v41 }
 0x50f   : > { %v20268_v13 = vmax.f32 %v21818_v43, %v3823_v10  ;;  %v4219_v57 = vpop.f32.mrb[110].mxu0  ;;  %v21820_v10 = vmax.f32 %v19556_v37, %v21819_v49  ;;  %v21821_v37 = vld [vmem:[#allocation59_spill] sm:$0xff] }
 0x510   : > { %v4371_v2 = vadd.f32 %v20254_v39, %v4322_v20  ;;  %v4220_v36 = vadd.f32 %v20257_v34, %v4219_v57  ;;  %v3827_v48 = vpop.f32.mrb[252].mxu1  ;;  %v14457_v53 = vpop.f32.mrb[111].mxu0  ;;  %v4517_v7 = vsel %vm4419_vm11, %v4370_v3, %v4468_v24 }
 0x511   : > { %v3828_v21 = vadd.f32 %v20108_v4, %v3827_v48  ;;  %v14288_v56 = vpop.f32.mrb[253].mxu1  ;;  %14613 = vmatmul.mubr.msk.f32.gmra.mrb[102].mxu1 %vm1389_vm2, %v4517_v7 }
 0x512   : > { %vm4420_vm12 = vcmp.ge.f32.partialorder %v4371_v2, 0.0  ;;  %v4469_v38 = vmul.f32 0.01, %v4371_v2  ;;  %v4323_v18 = vmul.f32 %v20244_v62, %v4220_v36  ;;  %14615 = vmatprep.mubr.msk.f32.mxu1 %vm16722_vm0, %v21705_v41 }
 0x513   : > { %v20280_v1 = vmax.f32 %v21820_v10, %v3828_v21  ;;  %v4224_v20 = vpop.f32.mrb[112].mxu0  ;;  %v21822_v21 = vmax.f32 %v19579_v28, %v21821_v37  ;;  %v21823_v28 = vld [vmem:[#allocation60_spill] sm:$0xff] }
 0x514   : > { %v4372_v3 = vadd.f32 %v20254_v39, %v4323_v18  ;;  %v4225_v24 = vadd.f32 %v20257_v34, %v4224_v20  ;;  %v3832_v63 = vpop.f32.mrb[254].mxu1  ;;  %v14460_v43 = vpop.f32.mrb[113].mxu0  ;;  %v4518_v57 = vsel %vm4420_vm12, %v4371_v2, %v4469_v38 }
 0x515   : > { %v3833_v48 = vadd.f32 %v20108_v4, %v3832_v63  ;;  %v14291_v53 = vpop.f32.mrb[255].mxu1  ;;  %14616 = vmatmul.mubr.msk.f32.gmra.mrb[104].mxu1 %vm1389_vm2, %v4518_v57 }
 0x516   : > { %vm4421_vm13 = vcmp.ge.f32.partialorder %v4372_v3, 0.0  ;;  %v4470_v36 = vmul.f32 0.01, %v4372_v3  ;;  %v4324_v7 = vmul.f32 %v20244_v62, %v4225_v24  ;;  %14618 = vmatprep.mubr.msk.f32.mxu1 %vm16722_vm0, %v21705_v41 }
 0x517   : > { %v20292_v56 = vmax.f32 %v21822_v21, %v3833_v48  ;;  %v4229_v18 = vpop.f32.mrb[114].mxu0  ;;  %v21824_v48 = vmax.f32 %v19600_v60, %v21823_v28  ;;  %v21825_v60 = vld [vmem:[#allocation61_spill] sm:$0xff] }
 0x518   : > { %v4373_v2 = vadd.f32 %v20254_v39, %v4324_v7  ;;  %v4230_v38 = vadd.f32 %v20257_v34, %v4229_v18  ;;  %v3837_v49 = vpop.f32.mrb[0].mxu1  ;;  %v14463_v10 = vpop.f32.mrb[115].mxu0  ;;  %v4519_v20 = vsel %vm4421_vm13, %v4372_v3, %v4470_v36 }
 0x519   : > { %v3838_v63 = vadd.f32 %v20108_v4, %v3837_v49  ;;  %v14294_v43 = vpop.f32.mrb[1].mxu1  ;;  %14619 = vmatmul.mubr.msk.f32.gmra.mrb[106].mxu1 %vm1389_vm2, %v4519_v20 }
 0x51a   : > { %vm4422_vm14 = vcmp.ge.f32.partialorder %v4373_v2, 0.0  ;;  %v4471_v24 = vmul.f32 0.01, %v4373_v2  ;;  %v4325_v57 = vmul.f32 %v20244_v62, %v4230_v38  ;;  %14621 = vmatprep.mubr.msk.f32.mxu1 %vm16722_vm0, %v21705_v41 }
 0x51b   : > { %v20304_v53 = vmax.f32 %v21824_v48, %v3838_v63  ;;  %v4234_v7 = vpop.f32.mrb[116].mxu0  ;;  %v21826_v63 = vmax.f32 %v19621_v14, %v21825_v60  ;;  %v21827_v14 = vld [vmem:[#allocation62_spill] sm:$0xff] }
 0x51c   : > { %v4374_v3 = vadd.f32 %v20254_v39, %v4325_v57  ;;  %v4235_v36 = vadd.f32 %v20257_v34, %v4234_v7  ;;  %v3842_v37 = vpop.f32.mrb[2].mxu1  ;;  %v14466_v21 = vpop.f32.mrb[117].mxu0  ;;  %v4520_v18 = vsel %vm4422_vm14, %v4373_v2, %v4471_v24 }
 0x51d   : > { %v3843_v49 = vadd.f32 %v20108_v4, %v3842_v37  ;;  %v14297_v10 = vpop.f32.mrb[3].mxu1  ;;  %14622 = vmatmul.mubr.msk.f32.gmra.mrb[108].mxu1 %vm1389_vm2, %v4520_v18 }
 0x51e   : > { %vm4423_vm1 = vcmp.ge.f32.partialorder %v4374_v3, 0.0  ;;  %v4472_v38 = vmul.f32 0.01, %v4374_v3  ;;  %v4326_v20 = vmul.f32 %v20244_v62, %v4235_v36  ;;  %14624 = vmatprep.mubr.msk.f32.mxu1 %vm16722_vm0, %v21705_v41 }
 0x51f   : > { %v20316_v43 = vmax.f32 %v21826_v63, %v3843_v49  ;;  %v4239_v57 = vpop.f32.mrb[118].mxu0  ;;  %v21828_v49 = vmax.f32 %v19642_v55, %v21827_v14  ;;  %v21829_v55 = vld [vmem:[#allocation63_spill] sm:$0xff] }
 0x520   : > { %v4375_v2 = vadd.f32 %v20254_v39, %v4326_v20  ;;  %v4240_v24 = vadd.f32 %v20257_v34, %v4239_v57  ;;  %v3847_v28 = vpop.f32.mrb[4].mxu1  ;;  %v14469_v48 = vpop.f32.mrb[119].mxu0  ;;  %v4521_v7 = vsel %vm4423_vm1, %v4374_v3, %v4472_v38 }
 0x521   : > { %v3848_v37 = vadd.f32 %v20108_v4, %v3847_v28  ;;  %v14300_v21 = vpop.f32.mrb[5].mxu1  ;;  %14625 = vmatmul.mubr.msk.f32.gmra.mrb[110].mxu1 %vm1389_vm2, %v4521_v7 }
 0x522   : > { %vm4424_vm15 = vcmp.ge.f32.partialorder %v4375_v2, 0.0  ;;  %v4473_v36 = vmul.f32 0.01, %v4375_v2  ;;  %v4327_v18 = vmul.f32 %v20244_v62, %v4240_v24  ;;  %14627 = vmatprep.mubr.msk.f32.mxu1 %vm16722_vm0, %v21705_v41 }
 0x523   : > { %v20328_v10 = vmax.f32 %v21828_v49, %v3848_v37  ;;  %v4244_v20 = vpop.f32.mrb[120].mxu0  ;;  %v21830_v37 = vmax.f32 %v19663_v30, %v21829_v55  ;;  %v21831_v30 = vld [vmem:[#allocation64_spill] sm:$0xff] }
 0x524   : > { %v4376_v3 = vadd.f32 %v20254_v39, %v4327_v18  ;;  %v4245_v38 = vadd.f32 %v20257_v34, %v4244_v20  ;;  %v3852_v60 = vpop.f32.mrb[6].mxu1  ;;  %v14472_v63 = vpop.f32.mrb[121].mxu0  ;;  %v4522_v57 = vsel %vm4424_vm15, %v4375_v2, %v4473_v36 }
 0x525   : > { %v3853_v28 = vadd.f32 %v20108_v4, %v3852_v60  ;;  %v14303_v48 = vpop.f32.mrb[7].mxu1  ;;  %14628 = vmatmul.mubr.msk.f32.gmra.mrb[112].mxu1 %vm1389_vm2, %v4522_v57 }
 0x526   : > { %vm4425_vm3 = vcmp.ge.f32.partialorder %v4376_v3, 0.0  ;;  %v4474_v24 = vmul.f32 0.01, %v4376_v3  ;;  %v4328_v7 = vmul.f32 %v20244_v62, %v4245_v38  ;;  %14630 = vmatprep.mubr.msk.f32.mxu1 %vm16722_vm0, %v21705_v41 }
 0x527   : > { %v20340_v21 = vmax.f32 %v21830_v37, %v3853_v28  ;;  %v4249_v18 = vpop.f32.mrb[122].mxu0  ;;  %v21832_v28 = vmax.f32 %v19684_v52, %v21831_v30  ;;  %v21833_v52 = vld [vmem:[#allocation65_spill] sm:$0xff] }
 0x528   : > { %v4377_v2 = vadd.f32 %v20254_v39, %v4328_v7  ;;  %v4250_v36 = vadd.f32 %v20257_v34, %v4249_v18  ;;  %v3857_v14 = vpop.f32.mrb[8].mxu1  ;;  %v14475_v49 = vpop.f32.mrb[123].mxu0  ;;  %v4523_v20 = vsel %vm4425_vm3, %v4376_v3, %v4474_v24 }
 0x529   : > { %v3858_v60 = vadd.f32 %v20108_v4, %v3857_v14  ;;  %v14306_v63 = vpop.f32.mrb[9].mxu1  ;;  %14631 = vmatmul.mubr.msk.f32.gmra.mrb[114].mxu1 %vm1389_vm2, %v4523_v20 }
 0x52a   : > { %vm4426_vm4 = vcmp.ge.f32.partialorder %v4377_v2, 0.0  ;;  %v4475_v38 = vmul.f32 0.01, %v4377_v2  ;;  %v4329_v57 = vmul.f32 %v20244_v62, %v4250_v36  ;;  %14633 = vmatprep.mubr.msk.f32.mxu1 %vm16722_vm0, %v21705_v41 }
 0x52b   : > { %v20352_v48 = vmax.f32 %v21832_v28, %v3858_v60  ;;  %v4254_v7 = vpop.f32.mrb[124].mxu0  ;;  %v21834_v60 = vmax.f32 %v19705_v40, %v21833_v52  ;;  %v21835_v40 = vld [vmem:[#allocation66_spill] sm:$0xff] }
 0x52c   : > { %v4378_v3 = vadd.f32 %v20254_v39, %v4329_v57  ;;  %v4255_v24 = vadd.f32 %v20257_v34, %v4254_v7  ;;  %v3862_v55 = vpop.f32.mrb[10].mxu1  ;;  %v14478_v37 = vpop.f32.mrb[125].mxu0  ;;  %v4524_v18 = vsel %vm4426_vm4, %v4377_v2, %v4475_v38 }
 0x52d   : > { %v3863_v14 = vadd.f32 %v20108_v4, %v3862_v55  ;;  %v14309_v49 = vpop.f32.mrb[11].mxu1  ;;  %14634 = vmatmul.mubr.msk.f32.gmra.mrb[116].mxu1 %vm1389_vm2, %v4524_v18 }
 0x52e   : > { %vm4427_vm5 = vcmp.ge.f32.partialorder %v4378_v3, 0.0  ;;  %v4476_v36 = vmul.f32 0.01, %v4378_v3  ;;  %v4330_v20 = vmul.f32 %v20244_v62, %v4255_v24  ;;  %14636 = vmatprep.mubr.msk.f32.mxu1 %vm16722_vm0, %v21705_v41 }
 0x52f   : > { %v20364_v63 = vmax.f32 %v21834_v60, %v3863_v14  ;;  %v4259_v57 = vpop.f32.mrb[126].mxu0  ;;  %v21836_v14 = vld [vmem:[#allocation67_spill] sm:$0xff] }
 0x530   : > { %v4379_v2 = vadd.f32 %v20254_v39, %v4330_v20  ;;  %v4260_v38 = vadd.f32 %v20257_v34, %v4259_v57  ;;  %v3867_v30 = vpop.f32.mrb[12].mxu1  ;;  %v14481_v28 = vpop.f32.mrb[127].mxu0  ;;  %v4525_v7 = vsel %vm4427_vm5, %v4378_v3, %v4476_v36  ;;  %v21837_v49 = vmax.f32 %v21835_v40, %v21836_v14 }
 0x531   : > { %v3868_v55 = vadd.f32 %v20108_v4, %v3867_v30  ;;  %v14312_v37 = vpop.f32.mrb[13].mxu1  ;;  %14637 = vmatmul.mubr.msk.f32.gmra.mrb[118].mxu1 %vm1389_vm2, %v4525_v7 }
 0x532   : > { %vm4428_vm6 = vcmp.ge.f32.partialorder %v4379_v2, 0.0  ;;  %v4477_v24 = vmul.f32 0.01, %v4379_v2  ;;  %v4331_v18 = vmul.f32 %v20244_v62, %v4260_v38  ;;  %14639 = vmatprep.mubr.msk.f32.mxu1 %vm16722_vm0, %v21705_v41 }
 0x533   : > { %v20376_v20 = vmax.f32 %v21837_v49, %v3868_v55  ;;  %v4264_v52 = vpop.f32.mrb[128].mxu0  ;;  %v21838_v55 = vld [vmem:[#allocation68_spill] sm:$0xff] }
 0x534   : > { %v4380_v3 = vadd.f32 %v20254_v39, %v4331_v18  ;;  %v4265_v36 = vadd.f32 %v20257_v34, %v4264_v52  ;;  %v3872_v60 = vpop.f32.mrb[14].mxu1  ;;  %v14484_v57 = vpop.f32.mrb[129].mxu0  ;;  %v4526_v30 = vsel %vm4428_vm6, %v4379_v2, %v4477_v24  ;;  %v21839_v18 = vmax.f32 %v19747_v8, %v21838_v55 }
 0x535   : > { %v3873_v28 = vadd.f32 %v20108_v4, %v3872_v60  ;;  %v14315_v7 = vpop.f32.mrb[15].mxu1  ;;  %14640 = vmatmul.mubr.msk.f32.gmra.mrb[120].mxu1 %vm1389_vm2, %v4526_v30  ;;  %v21840_v8 = vmax.f32 %v19762_v15, %v19765_v17  ;;  %v21841_v15 = vld [vmem:[#allocation69_spill] sm:$0xff]  ;;  %v21842_v17 = vld [vmem:[#allocation70_spill] sm:$0xff] }
 0x536   : > { %vm4429_vm7 = vcmp.ge.f32.partialorder %v4380_v3, 0.0  ;;  %v4478_v38 = vmul.f32 0.01, %v4380_v3  ;;  %v4332_v37 = vmul.f32 %v20244_v62, %v4265_v36  ;;  %14642 = vmatprep.mubr.msk.f32.mxu1 %vm16722_vm0, %v21705_v41 }
 0x537   : > { %v20388_v40 = vmax.f32 %v21839_v18, %v3873_v28  ;;  %v4269_v14 = vpop.f32.mrb[130].mxu0 }
 0x538   : > { %v4381_v2 = vadd.f32 %v20254_v39, %v4332_v37  ;;  %v4270_v24 = vadd.f32 %v20257_v34, %v4269_v14  ;;  %v3877_v49 = vpop.f32.mrb[16].mxu1  ;;  %v14487_v52 = vpop.f32.mrb[131].mxu0  ;;  %v4527_v60 = vsel %vm4429_vm7, %v4380_v3, %v4478_v38 }
 0x539   : > { %v3878_v57 = vadd.f32 %v20108_v4, %v3877_v49  ;;  %v14318_v30 = vpop.f32.mrb[17].mxu1  ;;  %14643 = vmatmul.mubr.msk.f32.gmra.mrb[122].mxu1 %vm1389_vm2, %v4527_v60 }
 0x53a   : > { %vm4430_vm8 = vcmp.ge.f32.partialorder %v4381_v2, 0.0  ;;  %v4479_v36 = vmul.f32 0.01, %v4381_v2  ;;  %v4333_v7 = vmul.f32 %v20244_v62, %v4270_v24  ;;  %14645 = vmatprep.mubr.msk.f32.mxu1 %vm16722_vm0, %v21705_v41 }
 0x53b   : > { %v20400_v28 = vmax.f32 %v21840_v8, %v3878_v57  ;;  %v4274_v37 = vpop.f32.mrb[132].mxu0  ;;  %v21843_v57 = vmax.f32 %v21841_v15, %v21842_v17 }
 0x53c   : > { %v4382_v3 = vadd.f32 %v20254_v39, %v4333_v7  ;;  %v4275_v38 = vadd.f32 %v20257_v34, %v4274_v37  ;;  %v3882_v55 = vpop.f32.mrb[18].mxu1  ;;  %v14490_v18 = vpop.f32.mrb[133].mxu0  ;;  %v4528_v14 = vsel %vm4430_vm8, %v4381_v2, %v4479_v36 }
 0x53d   : > { %v3883_v49 = vadd.f32 %v20108_v4, %v3882_v55  ;;  %v14321_v52 = vpop.f32.mrb[19].mxu1  ;;  %14646 = vmatmul.mubr.msk.f32.gmra.mrb[124].mxu1 %vm1389_vm2, %v4528_v14 }
 0x53e   : > { %vm4431_vm9 = vcmp.ge.f32.partialorder %v4382_v3, 0.0  ;;  %v4480_v24 = vmul.f32 0.01, %v4382_v3  ;;  %v4334_v60 = vmul.f32 %v20244_v62, %v4275_v38  ;;  %14648 = vmatprep.mubr.msk.f32.mxu1 %vm16722_vm0, %v21705_v41 }
 0x53f   : > { %v20412_v30 = vmax.f32 %v21843_v57, %v3883_v49  ;;  %v4279_v7 = vpop.f32.mrb[134].mxu0  ;;  %v21844_v49 = vld [vmem:[#allocation71_spill] sm:$0xff] }
 0x540   : > { %v4383_v2 = vadd.f32 %v20254_v39, %v4334_v60  ;;  %v4280_v36 = vadd.f32 %v20257_v34, %v4279_v7  ;;  %v3887_v8 = vpop.f32.mrb[20].mxu1  ;;  %v14493_v37 = vpop.f32.mrb[135].mxu0  ;;  %v4529_v55 = vsel %vm4431_vm9, %v4382_v3, %v4480_v24  ;;  %v21845_v60 = vmax.f32 %v19798_v51, %v21844_v49  ;;  %v21846_v51 = vld [vmem:[#allocation72_spill] sm:$0xff] }
 0x541   : > { %v3888_v18 = vadd.f32 %v20108_v4, %v3887_v8  ;;  %v14324_v14 = vpop.f32.mrb[21].mxu1  ;;  %14649 = vmatmul.mubr.msk.f32.gmra.mrb[126].mxu1 %vm1389_vm2, %v4529_v55 }
 0x542   : > { %vm4432_vm10 = vcmp.ge.f32.partialorder %v4383_v2, 0.0  ;;  %v4481_v38 = vmul.f32 0.01, %v4383_v2  ;;  %v4335_v52 = vmul.f32 %v20244_v62, %v4280_v36  ;;  %14651 = vmatprep.mubr.msk.f32.mxu1 %vm16722_vm0, %v21705_v41 }
 0x543   : > { %v20424_v15 = vmax.f32 %v21845_v60, %v3888_v18  ;;  %v4284_v17 = vpop.f32.mrb[136].mxu0  ;;  %v21847_v18 = vld [vmem:[#allocation73_spill] sm:$0xff] }
 0x544   : > { %v4384_v3 = vadd.f32 %v20254_v39, %v4335_v52  ;;  %v4285_v24 = vadd.f32 %v20257_v34, %v4284_v17  ;;  %v3892_v57 = vpop.f32.mrb[22].mxu1  ;;  %v14496_v7 = vpop.f32.mrb[137].mxu0  ;;  %v4530_v8 = vsel %vm4432_vm10, %v4383_v2, %v4481_v38  ;;  %v21848_v52 = vmax.f32 %v21846_v51, %v21847_v18 }
 0x545   : > { %v3893_v37 = vadd.f32 %v20108_v4, %v3892_v57  ;;  %v14327_v55 = vpop.f32.mrb[23].mxu1  ;;  %14652 = vmatmul.mubr.msk.f32.gmra.mrb[128].mxu1 %vm1389_vm2, %v4530_v8 }
 0x546   : > { %vm4433_vm11 = vcmp.ge.f32.partialorder %v4384_v3, 0.0  ;;  %v4482_v36 = vmul.f32 0.01, %v4384_v3  ;;  %v4336_v14 = vmul.f32 %v20244_v62, %v4285_v24  ;;  %14654 = vmatprep.mubr.msk.f32.mxu1 %vm16722_vm0, %v21705_v41  ;;  %v21849_v62 = vld [vmem:[#allocation74_spill] sm:$0xff]  ;;  %v21850_v24 = vld [vmem:[#allocation75_spill] sm:$0xff] }
 0x547   : > { %v20436_v49 = vmax.f32 %v21848_v52, %v3893_v37  ;;  %v21851_v7 = vmax.f32 %v21849_v62, %v21850_v24  ;;  %v21858_v62 = vld [vmem:[#allocation77_spill] sm:$0xff] }
 0x548   : > { %v4385_v34 = vadd.f32 %v20254_v39, %v4336_v14  ;;  %v3897_v2 = vpop.f32.mrb[24].mxu1  ;;  %v4531_v38 = vsel %vm4433_vm11, %v4384_v3, %v4482_v36  ;;  %v21853_v36 = vld [vmem:[#allocation26_spill] sm:$0xff]  ;;  %v21854_v14 = vld [vmem:[#allocation76_spill] sm:$0xff] }
 0x549   : > { %v3898_v60 = vadd.f32 %v20108_v4, %v3897_v2  ;;  %v14330_v17 = vpop.f32.mrb[25].mxu1  ;;  %14655 = vmatmul.mubr.msk.f32.gmra.mrb[130].mxu1 %vm1389_vm2, %v4531_v38  ;;  %v21855_v51 = vmax.f32 %v21853_v36, %v21854_v14 }
 0x54a   : > { %vm4434_vm12 = vcmp.ge.f32.partialorder %v4385_v34, 0.0  ;;  %v4483_v57 = vmul.f32 0.01, %v4385_v34  ;;  %14657 = vmatprep.mubr.msk.f32.mxu1 %vm16722_vm0, %v21705_v41  ;;  %v21857_v17 = vld [vmem:[#allocation27_spill] sm:$0xff] }
 0x54b   : > { %v20446_v8 = vmax.f32 %v21851_v7, %v3898_v60  ;;  %v21859_v60 = vmax.f32 %v21857_v17, %v21858_v62 }
 0x54c   : > { %v3902_v37 = vpop.f32.mrb[26].mxu1  ;;  %v4532_v55 = vsel %vm4434_vm12, %v4385_v34, %v4483_v57 }
 0x54d   : > { %21852 = vst [vmem:[#allocation31_spill] sm:$0xff] %v20446_v8  ;;  %v3903_v39 = vadd.f32 %v20108_v4, %v3902_v37  ;;  %v14333_v3 = vpop.f32.mrb[27].mxu1  ;;  %14658 = vmatmul.mubr.msk.f32.gmra.mrb[132].mxu1 %vm1389_vm2, %v4532_v55  ;;  %v21861_v37 = vld [vmem:[#allocation28_spill] sm:$0xff]  ;;  %v21862_v55 = vld [vmem:[#allocation78_spill] sm:$0xff] }
 0x54e   : > { %v21863_v3 = vmax.f32 %v21861_v37, %v21862_v55 }
 0x54f   : > { %v20453_v18 = vmax.f32 %v21855_v51, %v3903_v39  ;;  %v21864_v51 = vld [vmem:[#allocation29_spill] sm:$0xff] }
 0x550   : > { %v3907_v52 = vpop.f32.mrb[28].mxu1 }
 0x551   : > { %21856 = vst [vmem:[#allocation32_spill] sm:$0xff] %v20453_v18  ;;  %v3908_v2 = vadd.f32 %v20108_v4, %v3907_v52  ;;  %v14336_v38 = vpop.f32.mrb[29].mxu1  ;;  %v21865_v52 = vld [vmem:[#allocation79_spill] sm:$0xff] }
 0x552   : > { %v21866_v38 = vmax.f32 %v21864_v51, %v21865_v52 }
 0x553   : > { %v20459_v24 = vmax.f32 %v21859_v60, %v3908_v2  ;;  %v21867_v60 = vld [vmem:[#allocation30_spill] sm:$0xff] }
 0x554   : > { %v3912_v34 = vpop.f32.mrb[30].mxu1 }
 0x555   : > { %21860 = vst [vmem:[#allocation33_spill] sm:$0xff] %v20459_v24  ;;  %v3913_v57 = vadd.f32 %v20108_v4, %v3912_v34  ;;  %v14339_v7 = vpop.f32.mrb[31].mxu1  ;;  %v21868_v34 = vld [vmem:[#allocation80_spill] sm:$0xff] }
 0x556   : > { %v21869_v7 = vmax.f32 %v21867_v60, %v21868_v34 }
 0x557   : > { %v20465_v8 = vmax.f32 %v21863_v3, %v3913_v57 }
 0x558   : > { %v3917_v39 = vpop.f32.mrb[32].mxu1 }
 0x559   : > { %v3918_v36 = vadd.f32 %v20108_v4, %v3917_v39  ;;  %v14342_v14 = vpop.f32.mrb[33].mxu1 }
 0x55b   : > { %v20471_v18 = vmax.f32 %v21866_v38, %v3918_v36 }
 0x55c   : > { %v3922_v2 = vpop.f32.mrb[34].mxu1 }
 0x55d   : > { %v3923_v17 = vadd.f32 %v20108_v4, %v3922_v2  ;;  %v14345_v62 = vpop.f32.mrb[35].mxu1 }
 0x55f   : > { %v20477_v24 = vmax.f32 %v21869_v7, %v3923_v17 }
 0x560   : > { %v4746_v57 = vpop.f32.mrb[36].mxu1 }
 0x561   : > { %v4747_v37 = vadd.f32 %v20108_v4, %v4746_v57  ;;  %v14515_v55 = vpop.f32.mrb[37].mxu1 }
 0x563   : > { %v4990_v3 = vmax.f32 %v19924_v58, %v4747_v37 }
 0x564   : > { %v4751_v39 = vpop.f32.mrb[38].mxu1 }
 0x565   : > { %v4752_v14 = vadd.f32 %v20108_v4, %v4751_v39  ;;  %v14518_v36 = vpop.f32.mrb[39].mxu1  ;;  %v5088_v51 = vmul.f32 0.01, %v4990_v3  ;;  %vm5039_vm0 = vcmp.ge.f32.partialorder %v4990_v3, 0.0 }
 0x567   : > { %v4991_v52 = vmax.f32 %v19936_v23, %v4752_v14  ;;  %v5137_v60 = vsel %vm5039_vm0, %v4990_v3, %v5088_v51 }
 0x568   : > { %v4756_v38 = vpop.f32.mrb[40].mxu1 }
 0x569   : > { %vm5040_vm2 = vcmp.ge.f32.partialorder %v4991_v52, 0.0  ;;  %v5089_v2 = vmul.f32 0.01, %v4991_v52  ;;  %v4757_v17 = vadd.f32 %v20108_v4, %v4756_v38  ;;  %v14521_v62 = vpop.f32.mrb[41].mxu1 }
 0x56b   : > { %v5138_v34 = vsel %vm5040_vm2, %v4991_v52, %v5089_v2  ;;  %v4992_v7 = vmax.f32 %v19948_v5, %v4757_v17 }
 0x56c   : > { %v12797_v57 = vpack.c.bf16 %v5138_v34, %v5137_v60  ;;  %v4761_v58 = vpop.f32.mrb[42].mxu1 }
 0x56d   : > { %v4762_v37 = vadd.f32 %v20108_v4, %v4761_v58  ;;  %v14524_v55 = vpop.f32.mrb[43].mxu1  ;;  %v5090_v39 = vmul.f32 0.01, %v4992_v7  ;;  %vm5041_vm13 = vcmp.ge.f32.partialorder %v4992_v7, 0.0 }
 0x56e   : > { %12798 = vst [vmem:[#allocation2] sm:$0xff] %v12797_v57  }
 0x56f   : > { %v4993_v23 = vmax.f32 %v19960_v6, %v4762_v37  ;;  %v5139_v3 = vsel %vm5041_vm13, %v4992_v7, %v5090_v39  ;;  %vm5284_vm13 = vcmask 15360  }
 0x570   : > { %v4766_v14 = vpop.f32.mrb[44].mxu1  ;;  %5285 = vst.msk [vmem:[%s17156_s4] sm:$0xff] %vm5284_vm13, %v21705_v41 }
 0x571   : > { %vm5042_vm14 = vcmp.ge.f32.partialorder %v4993_v23, 0.0  ;;  %v5091_v36 = vmul.f32 0.01, %v4993_v23  ;;  %v4767_v38 = vadd.f32 %v20108_v4, %v4766_v14  ;;  %v14527_v62 = vpop.f32.mrb[45].mxu1 }
 0x573   : > { %v5140_v51 = vsel %vm5042_vm14, %v4993_v23, %v5091_v36  ;;  %v4994_v5 = vmax.f32 %v19972_v61, %v4767_v38 }
 0x574   : > { %v12802_v52 = vpack.c.bf16 %v5140_v51, %v5139_v3  ;;  %v4771_v2 = vpop.f32.mrb[46].mxu1 }
 0x575   : > { %v4772_v17 = vadd.f32 %v20108_v4, %v4771_v2  ;;  %v14530_v60 = vpop.f32.mrb[47].mxu1  ;;  %v5092_v34 = vmul.f32 0.01, %v4994_v5  ;;  %vm5043_vm1 = vcmp.ge.f32.partialorder %v4994_v5, 0.0 }
 0x576   : > { %12914 = vst [vmem:[#allocation2 + $0x8] sm:$0xff] %v12802_v52  }
 0x577   : > { %v4995_v6 = vmax.f32 %v19984_v31, %v4772_v17  ;;  %v5141_v7 = vsel %vm5043_vm1, %v4994_v5, %v5092_v34 }
 0x578   : > { %v4776_v57 = vpop.f32.mrb[48].mxu1 }
 0x579   : > { %vm5044_vm15 = vcmp.ge.f32.partialorder %v4995_v6, 0.0  ;;  %v5093_v58 = vmul.f32 0.01, %v4995_v6  ;;  %v4777_v37 = vadd.f32 %v20108_v4, %v4776_v57  ;;  %v14533_v55 = vpop.f32.mrb[49].mxu1 }
 0x57b   : > { %v5142_v39 = vsel %vm5044_vm15, %v4995_v6, %v5093_v58  ;;  %v4996_v61 = vmax.f32 %v19996_v35, %v4777_v37 }
 0x57c   : > { %v12807_v23 = vpack.c.bf16 %v5142_v39, %v5141_v7  ;;  %v4781_v14 = vpop.f32.mrb[50].mxu1 }
 0x57d   : > { %v4782_v36 = vadd.f32 %v20108_v4, %v4781_v14  ;;  %v14536_v38 = vpop.f32.mrb[51].mxu1  ;;  %v5094_v62 = vmul.f32 0.01, %v4996_v61  ;;  %vm5045_vm3 = vcmp.ge.f32.partialorder %v4996_v61, 0.0 }
 0x57e   : > { %12915 = vst [vmem:[#allocation2 + $0x10] sm:$0xff] %v12807_v23  }
 0x57f   : > { %v4997_v31 = vmax.f32 %v20008_v47, %v4782_v36  ;;  %v5143_v5 = vsel %vm5045_vm3, %v4996_v61, %v5094_v62 }
 0x580   : > { %v4786_v3 = vpop.f32.mrb[52].mxu1 }
 0x581   : > { %vm5046_vm4 = vcmp.ge.f32.partialorder %v4997_v31, 0.0  ;;  %v5095_v51 = vmul.f32 0.01, %v4997_v31  ;;  %v4787_v52 = vadd.f32 %v20108_v4, %v4786_v3  ;;  %v14539_v2 = vpop.f32.mrb[53].mxu1 }
 0x583   : > { %v5144_v17 = vsel %vm5046_vm4, %v4997_v31, %v5095_v51  ;;  %v4998_v35 = vmax.f32 %v20020_v16, %v4787_v52 }
 0x584   : > { %v12812_v60 = vpack.c.bf16 %v5144_v17, %v5143_v5  ;;  %v4791_v34 = vpop.f32.mrb[54].mxu1 }
 0x585   : > { %v4792_v6 = vadd.f32 %v20108_v4, %v4791_v34  ;;  %v14542_v57 = vpop.f32.mrb[55].mxu1  ;;  %v5096_v58 = vmul.f32 0.01, %v4998_v35  ;;  %vm5047_vm5 = vcmp.ge.f32.partialorder %v4998_v35, 0.0 }
 0x586   : > { %12916 = vst [vmem:[#allocation2 + $0x18] sm:$0xff] %v12812_v60  }
 0x587   : > { %v4999_v47 = vmax.f32 %v20032_v0, %v4792_v6  ;;  %v5145_v61 = vsel %vm5047_vm5, %v4998_v35, %v5096_v58 }
 0x588   : > { %v4796_v37 = vpop.f32.mrb[56].mxu1 }
 0x589   : > { %vm5048_vm6 = vcmp.ge.f32.partialorder %v4999_v47, 0.0  ;;  %v5097_v55 = vmul.f32 0.01, %v4999_v47  ;;  %v4797_v7 = vadd.f32 %v20108_v4, %v4796_v37  ;;  %v14545_v39 = vpop.f32.mrb[57].mxu1  ;;  %v20507_v37 = vld [vmem:[#allocation11] ss:$0 sm:$0xff] }
 0x58b   : > { %v5146_v23 = vsel %vm5048_vm6, %v4999_v47, %v5097_v55  ;;  %v5000_v16 = vmax.f32 %v20044_v59, %v4797_v7 }
 0x58c   : > { %v12817_v14 = vpack.c.bf16 %v5146_v23, %v5145_v61  ;;  %v4801_v36 = vpop.f32.mrb[58].mxu1 }
 0x58d   : > { %v4802_v38 = vadd.f32 %v20108_v4, %v4801_v36  ;;  %v14548_v62 = vpop.f32.mrb[59].mxu1  ;;  %v5098_v31 = vmul.f32 0.01, %v5000_v16  ;;  %vm5049_vm7 = vcmp.ge.f32.partialorder %v5000_v16, 0.0 }
 0x58e   : > { %12917 = vst [vmem:[#allocation2 + $0x20] sm:$0xff] %v12817_v14  }
 0x58f   : > { %v5001_v0 = vmax.f32 %v20056_v54, %v4802_v38  ;;  %v5147_v5 = vsel %vm5049_vm7, %v5000_v16, %v5098_v31 }
 0x590   : > { %v4806_v3 = vpop.f32.mrb[60].mxu1 }
 0x591   : > { %vm5050_vm8 = vcmp.ge.f32.partialorder %v5001_v0, 0.0  ;;  %v5099_v51 = vmul.f32 0.01, %v5001_v0  ;;  %v4807_v52 = vadd.f32 %v20108_v4, %v4806_v3  ;;  %v14551_v2 = vpop.f32.mrb[61].mxu1 }
 0x593   : > { %v5148_v17 = vsel %vm5050_vm8, %v5001_v0, %v5099_v51  ;;  %v5002_v59 = vmax.f32 %v20068_v11, %v4807_v52 }
 0x594   : > { %v12822_v35 = vpack.c.bf16 %v5148_v17, %v5147_v5  ;;  %v4811_v60 = vpop.f32.mrb[62].mxu1 }
 0x595   : > { %v4812_v34 = vadd.f32 %v20108_v4, %v4811_v60  ;;  %v14554_v6 = vpop.f32.mrb[63].mxu1  ;;  %v5100_v57 = vmul.f32 0.01, %v5002_v59  ;;  %vm5051_vm9 = vcmp.ge.f32.partialorder %v5002_v59, 0.0 }
 0x596   : > { %12918 = vst [vmem:[#allocation2 + $0x28] sm:$0xff] %v12822_v35  }
 0x597   : > { %v5003_v54 = vmax.f32 %v20080_v45, %v4812_v34  ;;  %v5149_v39 = vsel %vm5051_vm9, %v5002_v59, %v5100_v57 }
 0x598   : > { %v4816_v58 = vpop.f32.mrb[64].mxu1 }
 0x599   : > { %vm5052_vm10 = vcmp.ge.f32.partialorder %v5003_v54, 0.0  ;;  %v5101_v47 = vmul.f32 0.01, %v5003_v54  ;;  %v4817_v55 = vadd.f32 %v20507_v37, %v4816_v58  ;;  %v14557_v7 = vpop.f32.mrb[65].mxu1 }
 0x59b   : > { %v5150_v11 = vsel %vm5052_vm10, %v5003_v54, %v5101_v47  ;;  %v5004_v61 = vmax.f32 %v20092_v44, %v4817_v55 }
 0x59c   : > { %v12827_v23 = vpack.c.bf16 %v5150_v11, %v5149_v39  ;;  %v4821_v4 = vpop.f32.mrb[66].mxu1 }
 0x59d   : > { %v4822_v16 = vadd.f32 %v20507_v37, %v4821_v4  ;;  %v14560_v14 = vpop.f32.mrb[67].mxu1  ;;  %v5102_v45 = vmul.f32 0.01, %v5004_v61  ;;  %vm5053_vm11 = vcmp.ge.f32.partialorder %v5004_v61, 0.0 }
 0x59e   : > { %12919 = vst [vmem:[#allocation2 + $0x30] sm:$0xff] %v12827_v23  }
 0x59f   : > { %v5005_v36 = vmax.f32 %v20104_v29, %v4822_v16  ;;  %v5151_v3 = vsel %vm5053_vm11, %v5004_v61, %v5102_v45 }
 0x5a0   : > { %v4826_v38 = vpop.f32.mrb[68].mxu1 }
 0x5a1   : > { %vm5054_vm12 = vcmp.ge.f32.partialorder %v5005_v36, 0.0  ;;  %v5103_v62 = vmul.f32 0.01, %v5005_v36  ;;  %v4827_v31 = vadd.f32 %v20507_v37, %v4826_v38  ;;  %v14563_v0 = vpop.f32.mrb[69].mxu1 }
 0x5a3   : > { %v5152_v51 = vsel %vm5054_vm12, %v5005_v36, %v5103_v62  ;;  %v5006_v44 = vmax.f32 %v20118_v9, %v4827_v31 }
 0x5a4   : > { %v12832_v52 = vpack.c.bf16 %v5152_v51, %v5151_v3  ;;  %v4831_v2 = vpop.f32.mrb[70].mxu1 }
 0x5a5   : > { %v4832_v5 = vadd.f32 %v20507_v37, %v4831_v2  ;;  %v14566_v17 = vpop.f32.mrb[71].mxu1  ;;  %v5104_v59 = vmul.f32 0.01, %v5006_v44  ;;  %vm5055_vm0 = vcmp.ge.f32.partialorder %v5006_v44, 0.0 }
 0x5a6   : > { %12920 = vst [vmem:[#allocation2 + $0x38] sm:$0xff] %v12832_v52  }
 0x5a7   : > { %v5007_v29 = vmax.f32 %v20130_v25, %v4832_v5  ;;  %v5153_v9 = vsel %vm5055_vm0, %v5006_v44, %v5104_v59 }
 0x5a8   : > { %v4836_v35 = vpop.f32.mrb[72].mxu1 }
 0x5a9   : > { %vm5056_vm2 = vcmp.ge.f32.partialorder %v5007_v29, 0.0  ;;  %v5105_v60 = vmul.f32 0.01, %v5007_v29  ;;  %v4837_v34 = vadd.f32 %v20507_v37, %v4836_v35  ;;  %v14569_v6 = vpop.f32.mrb[73].mxu1 }
 0x5ab   : > { %v5154_v57 = vsel %vm5056_vm2, %v5007_v29, %v5105_v60  ;;  %v5008_v54 = vmax.f32 %v20142_v33, %v4837_v34 }
 0x5ac   : > { %v12837_v58 = vpack.c.bf16 %v5154_v57, %v5153_v9  ;;  %v4841_v47 = vpop.f32.mrb[74].mxu1 }
 0x5ad   : > { %v4842_v55 = vadd.f32 %v20507_v37, %v4841_v47  ;;  %v14572_v7 = vpop.f32.mrb[75].mxu1  ;;  %v5106_v25 = vmul.f32 0.01, %v5008_v54  ;;  %vm5057_vm14 = vcmp.ge.f32.partialorder %v5008_v54, 0.0 }
 0x5ae   : > { %12921 = vst [vmem:[#allocation2 + $0x40] sm:$0xff] %v12837_v58  }
 0x5af   : > { %v5009_v39 = vmax.f32 %v20154_v22, %v4842_v55  ;;  %v5155_v4 = vsel %vm5057_vm14, %v5008_v54, %v5106_v25 }
 0x5b0   : > { %v4846_v11 = vpop.f32.mrb[76].mxu1 }
 0x5b1   : > { %vm5058_vm1 = vcmp.ge.f32.partialorder %v5009_v39, 0.0  ;;  %v5107_v61 = vmul.f32 0.01, %v5009_v39  ;;  %v4847_v23 = vadd.f32 %v20507_v37, %v4846_v11  ;;  %v14575_v41 = vpop.f32.mrb[77].mxu1 }
 0x5b3   : > { %v5156_v16 = vsel %vm5058_vm1, %v5009_v39, %v5107_v61  ;;  %v5010_v33 = vmax.f32 %v20166_v50, %v4847_v23 }
 0x5b4   : > { %v12842_v14 = vpack.c.bf16 %v5156_v16, %v5155_v4  ;;  %v4851_v45 = vpop.f32.mrb[78].mxu1 }
 0x5b5   : > { %v4852_v36 = vadd.f32 %v20507_v37, %v4851_v45  ;;  %v14578_v38 = vpop.f32.mrb[79].mxu1  ;;  %v5108_v62 = vmul.f32 0.01, %v5010_v33  ;;  %vm5059_vm15 = vcmp.ge.f32.partialorder %v5010_v33, 0.0 }
 0x5b6   : > { %12922 = vst [vmem:[#allocation2 + $0x48] sm:$0xff] %v12842_v14  }
 0x5b7   : > { %v5011_v22 = vmax.f32 %v20178_v32, %v4852_v36  ;;  %v5157_v44 = vsel %vm5059_vm15, %v5010_v33, %v5108_v62 }
 0x5b8   : > { %v4856_v31 = vpop.f32.mrb[80].mxu1 }
 0x5b9   : > { %vm5060_vm3 = vcmp.ge.f32.partialorder %v5011_v22, 0.0  ;;  %v5109_v0 = vmul.f32 0.01, %v5011_v22  ;;  %v4857_v3 = vadd.f32 %v20507_v37, %v4856_v31  ;;  %v14581_v51 = vpop.f32.mrb[81].mxu1 }
 0x5bb   : > { %v5158_v52 = vsel %vm5060_vm3, %v5011_v22, %v5109_v0  ;;  %v5012_v50 = vmax.f32 %v20190_v27, %v4857_v3 }
 0x5bc   : > { %v12847_v2 = vpack.c.bf16 %v5158_v52, %v5157_v44  ;;  %v4861_v5 = vpop.f32.mrb[82].mxu1 }
 0x5bd   : > { %v4862_v17 = vadd.f32 %v20507_v37, %v4861_v5  ;;  %v14584_v59 = vpop.f32.mrb[83].mxu1  ;;  %v5110_v29 = vmul.f32 0.01, %v5012_v50  ;;  %vm5061_vm4 = vcmp.ge.f32.partialorder %v5012_v50, 0.0 }
 0x5be   : > { %12923 = vst [vmem:[#allocation2 + $0x50] sm:$0xff] %v12847_v2  }
 0x5bf   : > { %v5013_v32 = vmax.f32 %v20202_v46, %v4862_v17  ;;  %v5159_v9 = vsel %vm5061_vm4, %v5012_v50, %v5110_v29 }
 0x5c0   : > { %v4866_v35 = vpop.f32.mrb[84].mxu1 }
 0x5c1   : > { %vm5062_vm5 = vcmp.ge.f32.partialorder %v5013_v32, 0.0  ;;  %v5111_v60 = vmul.f32 0.01, %v5013_v32  ;;  %v4867_v34 = vadd.f32 %v20507_v37, %v4866_v35  ;;  %v14587_v6 = vpop.f32.mrb[85].mxu1 }
 0x5c3   : > { %v5160_v57 = vsel %vm5062_vm5, %v5013_v32, %v5111_v60  ;;  %v5014_v27 = vmax.f32 %v20214_v19, %v4867_v34 }
 0x5c4   : > { %v12852_v54 = vpack.c.bf16 %v5160_v57, %v5159_v9  ;;  %v4871_v58 = vpop.f32.mrb[86].mxu1 }
 0x5c5   : > { %v4872_v47 = vadd.f32 %v20507_v37, %v4871_v58  ;;  %v14590_v55 = vpop.f32.mrb[87].mxu1  ;;  %v5112_v7 = vmul.f32 0.01, %v5014_v27  ;;  %vm5063_vm6 = vcmp.ge.f32.partialorder %v5014_v27, 0.0 }
 0x5c6   : > { %12924 = vst [vmem:[#allocation2 + $0x58] sm:$0xff] %v12852_v54  }
 0x5c7   : > { %v5015_v46 = vmax.f32 %v20226_v26, %v4872_v47  ;;  %v5161_v23 = vsel %vm5063_vm6, %v5014_v27, %v5112_v7 }
 0x5c8   : > { %v4876_v25 = vpop.f32.mrb[88].mxu1 }
 0x5c9   : > { %vm5064_vm7 = vcmp.ge.f32.partialorder %v5015_v46, 0.0  ;;  %v5113_v39 = vmul.f32 0.01, %v5015_v46  ;;  %v4877_v11 = vadd.f32 %v20507_v37, %v4876_v25  ;;  %v14593_v61 = vpop.f32.mrb[89].mxu1 }
 0x5cb   : > { %v5162_v41 = vsel %vm5064_vm7, %v5015_v46, %v5113_v39  ;;  %v5016_v19 = vmax.f32 %v20238_v12, %v4877_v11 }
 0x5cc   : > { %v12857_v4 = vpack.c.bf16 %v5162_v41, %v5161_v23  ;;  %v4881_v16 = vpop.f32.mrb[90].mxu1 }
 0x5cd   : > { %v4882_v33 = vadd.f32 %v20507_v37, %v4881_v16  ;;  %v14596_v14 = vpop.f32.mrb[91].mxu1  ;;  %v5114_v45 = vmul.f32 0.01, %v5016_v19  ;;  %vm5065_vm8 = vcmp.ge.f32.partialorder %v5016_v19, 0.0 }
 0x5ce   : > { %12925 = vst [vmem:[#allocation2 + $0x60] sm:$0xff] %v12857_v4  }
 0x5cf   : > { %v5017_v26 = vmax.f32 %v20252_v42, %v4882_v33  ;;  %v5163_v31 = vsel %vm5065_vm8, %v5016_v19, %v5114_v45 }
 0x5d0   : > { %v4886_v36 = vpop.f32.mrb[92].mxu1 }
 0x5d1   : > { %vm5066_vm9 = vcmp.ge.f32.partialorder %v5017_v26, 0.0  ;;  %v5115_v38 = vmul.f32 0.01, %v5017_v26  ;;  %v4887_v62 = vadd.f32 %v20507_v37, %v4886_v36  ;;  %v14599_v22 = vpop.f32.mrb[93].mxu1 }
 0x5d3   : > { %v5164_v0 = vsel %vm5066_vm9, %v5017_v26, %v5115_v38  ;;  %v5018_v12 = vmax.f32 %v20268_v13, %v4887_v62 }
 0x5d4   : > { %v12862_v3 = vpack.c.bf16 %v5164_v0, %v5163_v31  ;;  %v4891_v51 = vpop.f32.mrb[94].mxu1 }
 0x5d5   : > { %v4892_v44 = vadd.f32 %v20507_v37, %v4891_v51  ;;  %v14602_v52 = vpop.f32.mrb[95].mxu1  ;;  %v5116_v50 = vmul.f32 0.01, %v5018_v12  ;;  %vm5067_vm10 = vcmp.ge.f32.partialorder %v5018_v12, 0.0 }
 0x5d6   : > { %12926 = vst [vmem:[#allocation2 + $0x68] sm:$0xff] %v12862_v3  }
 0x5d7   : > { %v5019_v42 = vmax.f32 %v20280_v1, %v4892_v44  ;;  %v5165_v29 = vsel %vm5067_vm10, %v5018_v12, %v5116_v50 }
 0x5d8   : > { %v4896_v2 = vpop.f32.mrb[96].mxu1 }
 0x5d9   : > { %vm5068_vm11 = vcmp.ge.f32.partialorder %v5019_v42, 0.0  ;;  %v5117_v5 = vmul.f32 0.01, %v5019_v42  ;;  %v4897_v17 = vadd.f32 %v20507_v37, %v4896_v2  ;;  %v14605_v59 = vpop.f32.mrb[97].mxu1 }
 0x5db   : > { %v5166_v32 = vsel %vm5068_vm11, %v5019_v42, %v5117_v5  ;;  %v5020_v13 = vmax.f32 %v20292_v56, %v4897_v17 }
 0x5dc   : > { %v12867_v35 = vpack.c.bf16 %v5166_v32, %v5165_v29  ;;  %v4901_v60 = vpop.f32.mrb[98].mxu1 }
 0x5dd   : > { %v4902_v34 = vadd.f32 %v20507_v37, %v4901_v60  ;;  %v14608_v6 = vpop.f32.mrb[99].mxu1  ;;  %v5118_v9 = vmul.f32 0.01, %v5020_v13  ;;  %vm5069_vm12 = vcmp.ge.f32.partialorder %v5020_v13, 0.0 }
 0x5de   : > { %12927 = vst [vmem:[#allocation2 + $0x70] sm:$0xff] %v12867_v35  }
 0x5df   : > { %v5021_v1 = vmax.f32 %v20304_v53, %v4902_v34  ;;  %v5167_v47 = vsel %vm5069_vm12, %v5020_v13, %v5118_v9 }
 0x5e0   : > { %v4906_v57 = vpop.f32.mrb[100].mxu1 }
 0x5e1   : > { %vm5070_vm0 = vcmp.ge.f32.partialorder %v5021_v1, 0.0  ;;  %v5119_v27 = vmul.f32 0.01, %v5021_v1  ;;  %v4907_v54 = vadd.f32 %v20507_v37, %v4906_v57  ;;  %v14611_v58 = vpop.f32.mrb[101].mxu1 }
 0x5e3   : > { %v5168_v55 = vsel %vm5070_vm0, %v5021_v1, %v5119_v27  ;;  %v5022_v56 = vmax.f32 %v20316_v43, %v4907_v54 }
 0x5e4   : > { %v12872_v7 = vpack.c.bf16 %v5168_v55, %v5167_v47  ;;  %v4911_v46 = vpop.f32.mrb[102].mxu1 }
 0x5e5   : > { %v4912_v25 = vadd.f32 %v20507_v37, %v4911_v46  ;;  %v14614_v39 = vpop.f32.mrb[103].mxu1  ;;  %v5120_v11 = vmul.f32 0.01, %v5022_v56  ;;  %vm5071_vm2 = vcmp.ge.f32.partialorder %v5022_v56, 0.0 }
 0x5e6   : > { %12928 = vst [vmem:[#allocation2 + $0x78] sm:$0xff] %v12872_v7  }
 0x5e7   : > { %v5023_v53 = vmax.f32 %v20328_v10, %v4912_v25  ;;  %v5169_v4 = vsel %vm5071_vm2, %v5022_v56, %v5120_v11 }
 0x5e8   : > { %v4916_v61 = vpop.f32.mrb[104].mxu1 }
 0x5e9   : > { %vm5072_vm13 = vcmp.ge.f32.partialorder %v5023_v53, 0.0  ;;  %v5121_v23 = vmul.f32 0.01, %v5023_v53  ;;  %v4917_v41 = vadd.f32 %v20507_v37, %v4916_v61  ;;  %v14617_v19 = vpop.f32.mrb[105].mxu1 }
 0x5eb   : > { %v5170_v16 = vsel %vm5072_vm13, %v5023_v53, %v5121_v23  ;;  %v5024_v43 = vmax.f32 %v20340_v21, %v4917_v41 }
 0x5ec   : > { %v12877_v33 = vpack.c.bf16 %v5170_v16, %v5169_v4  ;;  %v4921_v14 = vpop.f32.mrb[106].mxu1 }
 0x5ed   : > { %v4922_v45 = vadd.f32 %v20507_v37, %v4921_v14  ;;  %v14620_v26 = vpop.f32.mrb[107].mxu1  ;;  %v5122_v36 = vmul.f32 0.01, %v5024_v43  ;;  %vm5073_vm14 = vcmp.ge.f32.partialorder %v5024_v43, 0.0 }
 0x5ee   : > { %12929 = vst [vmem:[#allocation2 + $0x80] sm:$0xff] %v12877_v33  }
 0x5ef   : > { %v5025_v10 = vmax.f32 %v20352_v48, %v4922_v45  ;;  %v5171_v0 = vsel %vm5073_vm14, %v5024_v43, %v5122_v36  ;;  %v21870_v43 = vld [vmem:[#allocation31_spill] sm:$0xff] }
 0x5f0   : > { %v4926_v38 = vpop.f32.mrb[108].mxu1 }
 0x5f1   : > { %vm5074_vm1 = vcmp.ge.f32.partialorder %v5025_v10, 0.0  ;;  %v5123_v62 = vmul.f32 0.01, %v5025_v10  ;;  %v4927_v22 = vadd.f32 %v20507_v37, %v4926_v38  ;;  %v14623_v31 = vpop.f32.mrb[109].mxu1  ;;  %v21871_v38 = vld [vmem:[#allocation32_spill] sm:$0xff] }
 0x5f3   : > { %v5172_v12 = vsel %vm5074_vm1, %v5025_v10, %v5123_v62  ;;  %v5026_v21 = vmax.f32 %v20364_v63, %v4927_v22 }
 0x5f4   : > { %v12882_v3 = vpack.c.bf16 %v5172_v12, %v5171_v0  ;;  %v4931_v51 = vpop.f32.mrb[110].mxu1 }
 0x5f5   : > { %v4932_v44 = vadd.f32 %v20507_v37, %v4931_v51  ;;  %v14626_v52 = vpop.f32.mrb[111].mxu1  ;;  %v5124_v50 = vmul.f32 0.01, %v5026_v21  ;;  %vm5075_vm15 = vcmp.ge.f32.partialorder %v5026_v21, 0.0 }
 0x5f6   : > { %12930 = vst [vmem:[#allocation2 + $0x88] sm:$0xff] %v12882_v3  }
 0x5f7   : > { %v5027_v48 = vmax.f32 %v20376_v20, %v4932_v44  ;;  %v5173_v59 = vsel %vm5075_vm15, %v5026_v21, %v5124_v50  ;;  %v21872_v21 = vld [vmem:[#allocation33_spill] sm:$0xff] }
 0x5f8   : > { %v4936_v42 = vpop.f32.mrb[112].mxu1 }
 0x5f9   : > { %vm5076_vm3 = vcmp.ge.f32.partialorder %v5027_v48, 0.0  ;;  %v5125_v2 = vmul.f32 0.01, %v5027_v48  ;;  %v4937_v5 = vadd.f32 %v20507_v37, %v4936_v42  ;;  %v14629_v17 = vpop.f32.mrb[113].mxu1 }
 0x5fb   : > { %v5174_v29 = vsel %vm5076_vm3, %v5027_v48, %v5125_v2  ;;  %v5028_v63 = vmax.f32 %v20388_v40, %v4937_v5 }
 0x5fc   : > { %v12887_v32 = vpack.c.bf16 %v5174_v29, %v5173_v59  ;;  %v4941_v13 = vpop.f32.mrb[114].mxu1 }
 0x5fd   : > { %v4942_v35 = vadd.f32 %v20507_v37, %v4941_v13  ;;  %v14632_v60 = vpop.f32.mrb[115].mxu1  ;;  %v5126_v34 = vmul.f32 0.01, %v5028_v63  ;;  %vm5077_vm4 = vcmp.ge.f32.partialorder %v5028_v63, 0.0 }
 0x5fe   : > { %12931 = vst [vmem:[#allocation2 + $0x90] sm:$0xff] %v12887_v32  }
 0x5ff   : > { %v5029_v20 = vmax.f32 %v20400_v28, %v4942_v35  ;;  %v5175_v27 = vsel %vm5077_vm4, %v5028_v63, %v5126_v34 }
 0x600   : > { %v4946_v6 = vpop.f32.mrb[116].mxu1 }
 0x601   : > { %vm5078_vm5 = vcmp.ge.f32.partialorder %v5029_v20, 0.0  ;;  %v5127_v9 = vmul.f32 0.01, %v5029_v20  ;;  %v4947_v1 = vadd.f32 %v20507_v37, %v4946_v6  ;;  %v14635_v57 = vpop.f32.mrb[117].mxu1 }
 0x603   : > { %v5176_v54 = vsel %vm5078_vm5, %v5029_v20, %v5127_v9  ;;  %v5030_v40 = vmax.f32 %v20412_v30, %v4947_v1 }
 0x604   : > { %v12892_v58 = vpack.c.bf16 %v5176_v54, %v5175_v27  ;;  %v4951_v47 = vpop.f32.mrb[118].mxu1 }
 0x605   : > { %v4952_v55 = vadd.f32 %v20507_v37, %v4951_v47  ;;  %v14638_v56 = vpop.f32.mrb[119].mxu1  ;;  %v5128_v7 = vmul.f32 0.01, %v5030_v40  ;;  %vm5079_vm6 = vcmp.ge.f32.partialorder %v5030_v40, 0.0 }
 0x606   : > { %12932 = vst [vmem:[#allocation2 + $0x98] sm:$0xff] %v12892_v58  }
 0x607   : > { %v5031_v28 = vmax.f32 %v20424_v15, %v4952_v55  ;;  %v5177_v53 = vsel %vm5079_vm6, %v5030_v40, %v5128_v7 }
 0x608   : > { %v4956_v46 = vpop.f32.mrb[120].mxu1 }
 0x609   : > { %vm5080_vm7 = vcmp.ge.f32.partialorder %v5031_v28, 0.0  ;;  %v5129_v25 = vmul.f32 0.01, %v5031_v28  ;;  %v4957_v39 = vadd.f32 %v20507_v37, %v4956_v46  ;;  %v14641_v11 = vpop.f32.mrb[121].mxu1 }
 0x60b   : > { %v5178_v61 = vsel %vm5080_vm7, %v5031_v28, %v5129_v25  ;;  %v5032_v30 = vmax.f32 %v20436_v49, %v4957_v39 }
 0x60c   : > { %v12897_v23 = vpack.c.bf16 %v5178_v61, %v5177_v53  ;;  %v4961_v41 = vpop.f32.mrb[122].mxu1 }
 0x60d   : > { %v4962_v19 = vadd.f32 %v20507_v37, %v4961_v41  ;;  %v14644_v4 = vpop.f32.mrb[123].mxu1  ;;  %v5130_v16 = vmul.f32 0.01, %v5032_v30  ;;  %vm5081_vm8 = vcmp.ge.f32.partialorder %v5032_v30, 0.0 }
 0x60e   : > { %12933 = vst [vmem:[#allocation2 + $0xa0] sm:$0xff] %v12897_v23  }
 0x60f   : > { %v5033_v15 = vmax.f32 %v21870_v43, %v4962_v19  ;;  %v5179_v36 = vsel %vm5081_vm8, %v5032_v30, %v5130_v16 }
 0x610   : > { %v4966_v33 = vpop.f32.mrb[124].mxu1 }
 0x611   : > { %vm5082_vm9 = vcmp.ge.f32.partialorder %v5033_v15, 0.0  ;;  %v5131_v14 = vmul.f32 0.01, %v5033_v15  ;;  %v4967_v45 = vadd.f32 %v20507_v37, %v4966_v33  ;;  %v14647_v26 = vpop.f32.mrb[125].mxu1 }
 0x613   : > { %v5180_v10 = vsel %vm5082_vm9, %v5033_v15, %v5131_v14  ;;  %v5034_v49 = vmax.f32 %v21871_v38, %v4967_v45 }
 0x614   : > { %v12902_v62 = vpack.c.bf16 %v5180_v10, %v5179_v36  ;;  %v4971_v22 = vpop.f32.mrb[126].mxu1 }
 0x615   : > { %v4972_v31 = vadd.f32 %v20507_v37, %v4971_v22  ;;  %v14650_v0 = vpop.f32.mrb[127].mxu1  ;;  %v5132_v12 = vmul.f32 0.01, %v5034_v49  ;;  %vm5083_vm10 = vcmp.ge.f32.partialorder %v5034_v49, 0.0 }
 0x616   : > { %12934 = vst [vmem:[#allocation2 + $0xa8] sm:$0xff] %v12902_v62  }
 0x617   : > { %v5035_v3 = vmax.f32 %v21872_v21, %v4972_v31  ;;  %v5181_v48 = vsel %vm5083_vm10, %v5034_v49, %v5132_v12 }
 0x618   : > { %v4976_v51 = vpop.f32.mrb[128].mxu1 }
 0x619   : > { %vm5084_vm11 = vcmp.ge.f32.partialorder %v5035_v3, 0.0  ;;  %v5133_v44 = vmul.f32 0.01, %v5035_v3  ;;  %v4977_v52 = vadd.f32 %v20507_v37, %v4976_v51  ;;  %v14653_v50 = vpop.f32.mrb[129].mxu1 }
 0x61b   : > { %v5182_v42 = vsel %vm5084_vm11, %v5035_v3, %v5133_v44  ;;  %v5036_v2 = vmax.f32 %v20465_v8, %v4977_v52 }
 0x61c   : > { %v12907_v5 = vpack.c.bf16 %v5182_v42, %v5181_v48  ;;  %v4981_v17 = vpop.f32.mrb[130].mxu1 }
 0x61d   : > { %v4982_v59 = vadd.f32 %v20507_v37, %v4981_v17  ;;  %v14656_v29 = vpop.f32.mrb[131].mxu1  ;;  %v5134_v63 = vmul.f32 0.01, %v5036_v2  ;;  %vm5085_vm12 = vcmp.ge.f32.partialorder %v5036_v2, 0.0 }
 0x61e   : > { %12935 = vst [vmem:[#allocation2 + $0xb0] sm:$0xff] %v12907_v5  }
 0x61f   : > { %v5037_v32 = vmax.f32 %v20471_v18, %v4982_v59  ;;  %v5183_v20 = vsel %vm5085_vm12, %v5036_v2, %v5134_v63 }
 0x620   : > { %v4986_v13 = vpop.f32.mrb[132].mxu1 }
 0x621   : > { %vm5086_vm0 = vcmp.ge.f32.partialorder %v5037_v32, 0.0  ;;  %v5135_v35 = vmul.f32 0.01, %v5037_v32  ;;  %v4987_v60 = vadd.f32 %v20507_v37, %v4986_v13  ;;  %v14659_v34 = vpop.f32.mrb[133].mxu1 }
 0x623   : > { %v5184_v6 = vsel %vm5086_vm0, %v5037_v32, %v5135_v35  ;;  %v5038_v8 = vmax.f32 %v20477_v24, %v4987_v60 }
 0x624   : > { %v12912_v9 = vpack.c.bf16 %v5184_v6, %v5183_v20 }
 0x625   : > { %vm5087_vm2 = vcmp.ge.f32.partialorder %v5038_v8, 0.0  ;;  %v5136_v1 = vmul.f32 0.01, %v5038_v8 }
 0x626   : > { %12936 = vst [vmem:[#allocation2 + $0xb8] sm:$0xff] %v12912_v9  }
 0x627   : > { %v5185_v57 = vsel %vm5087_vm2, %v5038_v8, %v5136_v1 }
 0x628   : > { %v5282_v27 = vpack.c.bf16 %v5185_v57, %v5185_v57 }
 0x62a   : > { %5283 = vst [vmem:[#allocation2 + $0xc0] sm:$0xf] %v5282_v27 }
 0x62b PF: > { %v15141_v18 = vld [vmem:[%s17136_s11 + $0x4] ss:$8 sps:$4 sm:$0xff]   ;;  %v15145_v37 = vld [vmem:[%s17136_s11] ss:$8 sps:$4 sm:$0xff]   ;;  %v15147_v40 = vld [vmem:[%s17136_s11 + $0x14] ss:$8 sps:$4 sm:$0xff]  }
 0x62c   : > { %v15143_v24 = vld [vmem:[%s17136_s11 + $0xc04] ss:$8 sps:$4 sm:$0xff]   ;;  %10199 = vmatprep.subr.bf16.mxu1 %v15141_v18  ;;  %v15146_v54 = vld [vmem:[%s17136_s11 + $0xc00] ss:$8 sps:$4 sm:$0xff]   ;;  %v15149_v58 = vld [vmem:[%s17136_s11 + $0xc14] ss:$8 sps:$4 sm:$0xff]  }
 0x62d   : > { %10691 = vmatprep.subr.bf16.mxu0 %v15143_v24  ;;  %10200 = vmatpush1.bf16.msra.mxu1 %v15145_v37  ;;  %v15151_v47 = vld [vmem:[%s17136_s11 + $0x10] ss:$8 sps:$4 sm:$0xff]   ;;  %v15153_v56 = vld [vmem:[%s17136_s11 + $0x24] ss:$8 sps:$4 sm:$0xff]   ;;  %v15157_v28 = vld [vmem:[%s17136_s11 + $0x20] ss:$8 sps:$4 sm:$0xff]  }
 0x62e   : > { %10692 = vmatpush1.bf16.msra.mxu0 %v15146_v54  ;;  %10201 = vmatprep.subr.bf16.mxu1 %v15147_v40  ;;  %v15152_v55 = vld [vmem:[%s17136_s11 + $0xc10] ss:$8 sps:$4 sm:$0xff]   ;;  %v15155_v7 = vld [vmem:[%s17136_s11 + $0xc24] ss:$8 sps:$4 sm:$0xff]   ;;  %v15158_v46 = vld [vmem:[%s17136_s11 + $0xc20] ss:$8 sps:$4 sm:$0xff]  }
 0x62f   : > { %10693 = vmatprep.subr.bf16.mxu0 %v15149_v58  ;;  %v15159_v25 = vld [vmem:[%s17136_s11 + $0x34] ss:$8 sps:$4 sm:$0xff]   ;;  %v15163_v11 = vld [vmem:[%s17136_s11 + $0x30] ss:$8 sps:$4 sm:$0xff]   ;;  %v15165_v61 = vld [vmem:[%s17136_s11 + $0x44] ss:$8 sps:$4 sm:$0xff]  }
 0x630   : > { %v15161_v39 = vld [vmem:[%s17136_s11 + $0xc34] ss:$8 sps:$4 sm:$0xff]   ;;  %v15164_v53 = vld [vmem:[%s17136_s11 + $0xc30] ss:$8 sps:$4 sm:$0xff]   ;;  %v15167_v30 = vld [vmem:[%s17136_s11 + $0xc44] ss:$8 sps:$4 sm:$0xff]  }
 0x631   : > { %10202 = vmatpush1.bf16.msra.mxu1 %v15151_v47  ;;  %v15169_v23 = vld [vmem:[%s17136_s11 + $0x40] ss:$8 sps:$4 sm:$0xff]   ;;  %v15171_v19 = vld [vmem:[%s17136_s11 + $0x54] ss:$8 sps:$4 sm:$0xff]   ;;  %v15175_v16 = vld [vmem:[%s17136_s11 + $0x50] ss:$8 sps:$4 sm:$0xff]  }
 0x632   : > { %10694 = vmatpush1.bf16.msra.mxu0 %v15152_v55  ;;  %10203 = vmatprep.subr.bf16.mxu1 %v15153_v56  ;;  %v15170_v41 = vld [vmem:[%s17136_s11 + $0xc40] ss:$8 sps:$4 sm:$0xff]   ;;  %v15173_v4 = vld [vmem:[%s17136_s11 + $0xc54] ss:$8 sps:$4 sm:$0xff]   ;;  %v15176_v43 = vld [vmem:[%s17136_s11 + $0xc50] ss:$8 sps:$4 sm:$0xff]  }
 0x633   : > { %10695 = vmatprep.subr.bf16.mxu0 %v15155_v7  ;;  %v15177_v15 = vld [vmem:[%s17136_s11 + $0x64] ss:$8 sps:$4 sm:$0xff]   ;;  %v15181_v14 = vld [vmem:[%s17136_s11 + $0x60] ss:$8 sps:$4 sm:$0xff]   ;;  %v15183_v26 = vld [vmem:[%s17136_s11 + $0x74] ss:$8 sps:$4 sm:$0xff]  }
 0x634   : > { %v15179_v33 = vld [vmem:[%s17136_s11 + $0xc64] ss:$8 sps:$4 sm:$0xff]   ;;  %v15182_v45 = vld [vmem:[%s17136_s11 + $0xc60] ss:$8 sps:$4 sm:$0xff]   ;;  %v15185_v36 = vld [vmem:[%s17136_s11 + $0xc74] ss:$8 sps:$4 sm:$0xff]  }
 0x635   : > { %10204 = vmatpush1.bf16.msra.mxu1 %v15157_v28  ;;  %v15187_v10 = vld [vmem:[%s17136_s11 + $0x70] ss:$8 sps:$4 sm:$0xff]   ;;  %v15189_v49 = vld [vmem:[%s17136_s11 + $0x84] ss:$8 sps:$4 sm:$0xff]   ;;  %v15193_v22 = vld [vmem:[%s17136_s11 + $0x80] ss:$8 sps:$4 sm:$0xff]  }
 0x636   : > { %10696 = vmatpush1.bf16.msra.mxu0 %v15158_v46  ;;  %10205 = vmatprep.subr.bf16.mxu1 %v15159_v25  ;;  %v15188_v38 = vld [vmem:[%s17136_s11 + $0xc70] ss:$8 sps:$4 sm:$0xff]   ;;  %v15191_v62 = vld [vmem:[%s17136_s11 + $0xc84] ss:$8 sps:$4 sm:$0xff]   ;;  %v15194_v31 = vld [vmem:[%s17136_s11 + $0xc80] ss:$8 sps:$4 sm:$0xff]  }
 0x637   : > { %10697 = vmatprep.subr.bf16.mxu0 %v15161_v39  ;;  %v15195_v0 = vld [vmem:[%s17136_s11 + $0x94] ss:$8 sps:$4 sm:$0xff]   ;;  %v15199_v21 = vld [vmem:[%s17136_s11 + $0x90] ss:$8 sps:$4 sm:$0xff]   ;;  %v15201_v51 = vld [vmem:[%s17136_s11 + $0xa4] ss:$8 sps:$4 sm:$0xff]  }
 0x638   : > { %v15197_v12 = vld [vmem:[%s17136_s11 + $0xc94] ss:$8 sps:$4 sm:$0xff]   ;;  %v15200_v3 = vld [vmem:[%s17136_s11 + $0xc90] ss:$8 sps:$4 sm:$0xff]   ;;  %v15203_v44 = vld [vmem:[%s17136_s11 + $0xca4] ss:$8 sps:$4 sm:$0xff]  }
 0x639   : > { %10206 = vmatpush1.bf16.msra.mxu1 %v15163_v11  ;;  %v15205_v52 = vld [vmem:[%s17136_s11 + $0xa0] ss:$8 sps:$4 sm:$0xff]   ;;  %v15207_v48 = vld [vmem:[%s17136_s11 + $0xb4] ss:$8 sps:$4 sm:$0xff]   ;;  %v15211_v5 = vld [vmem:[%s17136_s11 + $0xb0] ss:$8 sps:$4 sm:$0xff]  }
 0x63a   : > { %10698 = vmatpush1.bf16.msra.mxu0 %v15164_v53  ;;  %10207 = vmatprep.subr.bf16.mxu1 %v15165_v61  ;;  %v15206_v50 = vld [vmem:[%s17136_s11 + $0xca0] ss:$8 sps:$4 sm:$0xff]   ;;  %v15209_v42 = vld [vmem:[%s17136_s11 + $0xcb4] ss:$8 sps:$4 sm:$0xff]   ;;  %v15212_v59 = vld [vmem:[%s17136_s11 + $0xcb0] ss:$8 sps:$4 sm:$0xff]  }
 0x63b   : > { %10699 = vmatprep.subr.bf16.mxu0 %v15167_v30  ;;  %v5286_v2 = vld [vmem:[#allocation2] sm:$0xff]  ;;  %v15213_v63 = vld [vmem:[%s17136_s11 + $0xc4] ss:$8 sps:$4 sm:$0xff]   ;;  %v15217_v35 = vld [vmem:[%s17136_s11 + $0xc0] ss:$8 sps:$4 sm:$0xff]   ;;  %s21874_s17 = sld [smem:[#allocation23_spill]] }
 0x63c   : > { %v11958_v17 = vcombine.high %v5286_v2, %v5286_v2  ;;  %v5298_v29 = vld [vmem:[#allocation2 + $0x60] sm:$0xff]  ;;  %v15215_v32 = vld [vmem:[%s17136_s11 + $0xcc4] ss:$8 sps:$4 sm:$0xff]   ;;  %v15218_v60 = vld [vmem:[%s17136_s11 + $0xcc0] ss:$8 sps:$4 sm:$0xff]   ;;  %v11957_v47 = vcombine.low %v5286_v2, %v5286_v2  ;;  %vm11328_vm13 = vcmask 15360  }
 0x63d   : > { %10208 = vmatpush1.bf16.msra.mxu1 %v15169_v23  ;;  %v11982_v13 = vcombine.high %v5298_v29, %v5298_v29  ;;  %v15219_v34 = vld [vmem:[%s17136_s11 + $0xd4] ss:$8 sps:$4 sm:$0xff]   ;;  %v15223_v6 = vld [vmem:[%s17136_s11 + $0xd0] ss:$8 sps:$4 sm:$0xff]   ;;  %v15225_v9 = vld [vmem:[%s17136_s11 + $0xe4] ss:$8 sps:$4 sm:$0xff]   ;;  %v11981_v55 = vcombine.low %v5298_v29, %v5298_v29 }
 0x63e   : > { %10700 = vmatpush1.bf16.msra.mxu0 %v15170_v41  ;;  %10209 = vmatprep.subr.bf16.mxu1 %v15171_v19  ;;  %v15221_v20 = vld [vmem:[%s17136_s11 + $0xcd4] ss:$8 sps:$4 sm:$0xff]   ;;  %v15224_v8 = vld [vmem:[%s17136_s11 + $0xcd0] ss:$8 sps:$4 sm:$0xff]   ;;  %v15227_v1 = vld [vmem:[%s17136_s11 + $0xce4] ss:$8 sps:$4 sm:$0xff]  }
 0x63f   : > { %10701 = vmatprep.subr.bf16.mxu0 %v15173_v4  ;;  %10231 = vmatprep.mubr.bf16.mxu1 %v11958_v17  ;;  %v15229_v57 = vld [vmem:[%s17136_s11 + $0xe0] ss:$8 sps:$4 sm:$0xff]   ;;  %v15231_v18 = vld [vmem:[%s17136_s11 + $0xf4] ss:$8 sps:$4 sm:$0xff]   ;;  %v15235_v37 = vld [vmem:[%s17136_s11 + $0xf0] ss:$8 sps:$4 sm:$0xff]  }
 0x640   : > { %10723 = vmatprep.mubr.bf16.mxu0 %v11982_v13  ;;  %v15230_v27 = vld [vmem:[%s17136_s11 + $0xce0] ss:$8 sps:$4 sm:$0xff]   ;;  %v15233_v24 = vld [vmem:[%s17136_s11 + $0xcf4] ss:$8 sps:$4 sm:$0xff]   ;;  %v15236_v54 = vld [vmem:[%s17136_s11 + $0xcf0] ss:$8 sps:$4 sm:$0xff]  }
 0x641   : > { %10210 = vmatpush1.bf16.msra.mxu1 %v15175_v16  ;;  %v15241_v40 = vld [vmem:[%s17136_s11 + $0x104] ss:$8 sps:$4 sm:$0xff]   ;;  %v15239_v56 = vld [vmem:[%s17136_s11 + $0x100] ss:$8 sps:$4 sm:$0xff]   ;;  %v15249_v28 = vld [vmem:[%s17136_s11 + $0x114] ss:$8 sps:$4 sm:$0xff]  }
 0x642   : > { %10702 = vmatpush1.bf16.msra.mxu0 %v15176_v43  ;;  %10211 = vmatprep.subr.bf16.mxu1 %v15177_v15  ;;  %v15246_v58 = vld [vmem:[%s17136_s11 + $0xd04] ss:$8 sps:$4 sm:$0xff]   ;;  %v15244_v7 = vld [vmem:[%s17136_s11 + $0xd00] ss:$8 sps:$4 sm:$0xff]   ;;  %v15252_v46 = vld [vmem:[%s17136_s11 + $0xd14] ss:$8 sps:$4 sm:$0xff]  }
 0x643   : > { %10703 = vmatprep.subr.bf16.mxu0 %v15179_v33  ;;  %v15247_v25 = vld [vmem:[%s17136_s11 + $0x110] ss:$8 sps:$4 sm:$0xff]   ;;  %v15255_v11 = vld [vmem:[%s17136_s11 + $0x124] ss:$8 sps:$4 sm:$0xff]   ;;  %v15253_v61 = vld [vmem:[%s17136_s11 + $0x120] ss:$8 sps:$4 sm:$0xff]  }
 0x644   : > { %v15250_v39 = vld [vmem:[%s17136_s11 + $0xd10] ss:$8 sps:$4 sm:$0xff]   ;;  %v15258_v53 = vld [vmem:[%s17136_s11 + $0xd24] ss:$8 sps:$4 sm:$0xff]   ;;  %v15256_v30 = vld [vmem:[%s17136_s11 + $0xd20] ss:$8 sps:$4 sm:$0xff]  }
 0x645   : > { %10212 = vmatpush1.bf16.msra.mxu1 %v15181_v14  ;;  %v15261_v23 = vld [vmem:[%s17136_s11 + $0x134] ss:$8 sps:$4 sm:$0xff]   ;;  %v15259_v19 = vld [vmem:[%s17136_s11 + $0x130] ss:$8 sps:$4 sm:$0xff]   ;;  %v15267_v16 = vld [vmem:[%s17136_s11 + $0x144] ss:$8 sps:$4 sm:$0xff]  }
 0x646   : > { %10704 = vmatpush1.bf16.msra.mxu0 %v15182_v45  ;;  %10213 = vmatprep.subr.bf16.mxu1 %v15183_v26  ;;  %v15264_v41 = vld [vmem:[%s17136_s11 + $0xd34] ss:$8 sps:$4 sm:$0xff]   ;;  %v15262_v4 = vld [vmem:[%s17136_s11 + $0xd30] ss:$8 sps:$4 sm:$0xff]   ;;  %v15270_v43 = vld [vmem:[%s17136_s11 + $0xd44] ss:$8 sps:$4 sm:$0xff]  }
 0x647   : > { %10705 = vmatprep.subr.bf16.mxu0 %v15185_v36  ;;  %v15265_v15 = vld [vmem:[%s17136_s11 + $0x140] ss:$8 sps:$4 sm:$0xff]   ;;  %v15273_v14 = vld [vmem:[%s17136_s11 + $0x154] ss:$8 sps:$4 sm:$0xff]   ;;  %v15271_v26 = vld [vmem:[%s17136_s11 + $0x150] ss:$8 sps:$4 sm:$0xff]  }
 0x648   : > { %v15268_v33 = vld [vmem:[%s17136_s11 + $0xd40] ss:$8 sps:$4 sm:$0xff]   ;;  %v15276_v45 = vld [vmem:[%s17136_s11 + $0xd54] ss:$8 sps:$4 sm:$0xff]   ;;  %v15274_v36 = vld [vmem:[%s17136_s11 + $0xd50] ss:$8 sps:$4 sm:$0xff]  }
 0x649   : > { %10214 = vmatpush1.bf16.msra.mxu1 %v15187_v10  ;;  %v15279_v10 = vld [vmem:[%s17136_s11 + $0x164] ss:$8 sps:$4 sm:$0xff]   ;;  %v15297_v2 = vld [vmem:[%s17136_s11 + $0x194] ss:$8 sps:$4 sm:$0xff]   ;;  %v15295_v17 = vld [vmem:[%s17136_s11 + $0x190] ss:$8 sps:$4 sm:$0xff]  }
 0x64a   : > { %10706 = vmatpush1.bf16.msra.mxu0 %v15188_v38  ;;  %10215 = vmatprep.subr.bf16.mxu1 %v15189_v49  ;;  %v15282_v38 = vld [vmem:[%s17136_s11 + $0xd64] ss:$8 sps:$4 sm:$0xff]   ;;  %v20671_v49 = vld [vmem:[#allocation2 + $0x8] sm:$0xff]  ;;  %p11331_p0 = scmp.eq.s32.totalorder %s21874_s17, 0 }
 0x64b   : > { %10707 = vmatprep.subr.bf16.mxu0 %v15191_v62  ;;  %v15277_v62 = vld [vmem:[%s17136_s11 + $0x160] ss:$8 sps:$4 sm:$0xff]   ;;  %v15303_v29 = vld [vmem:[%s17136_s11 + $0x1a4] ss:$8 sps:$4 sm:$0xff]  }
 0x64c   : > { %v15304_v13 = vld [vmem:[%s17136_s11 + $0xda0] ss:$8 sps:$4 sm:$0xff]  }
 0x64d   : > { %10216 = vmatpush1.bf16.msra.mxu1 %v15193_v22  ;;  %v15280_v22 = vld [vmem:[%s17136_s11 + $0xd60] ss:$8 sps:$4 sm:$0xff]  }
 0x64e   : > { %10708 = vmatpush1.bf16.msra.mxu0 %v15194_v31  ;;  %10217 = vmatprep.subr.bf16.mxu1 %v15195_v0  ;;  %v11960_v31 = vcombine.high %v20671_v49, %v20671_v49  ;;  %v20677_v0 = vld [vmem:[#allocation2 + $0x68] sm:$0xff] }
 0x64f   : > { %10709 = vmatprep.subr.bf16.mxu0 %v15197_v12  ;;  %v15285_v12 = vld [vmem:[%s17136_s11 + $0x174] ss:$8 sps:$4 sm:$0xff]  }
 0x651   : > { %10218 = vmatpush1.bf16.msra.mxu1 %v15199_v21  ;;  %v11984_v21 = vcombine.high %v20677_v0, %v20677_v0 }
 0x652   : > { %10710 = vmatpush1.bf16.msra.mxu0 %v15200_v3  ;;  %10219 = vmatprep.subr.bf16.mxu1 %v15201_v51  ;;  %v15288_v3 = vld [vmem:[%s17136_s11 + $0xd74] ss:$8 sps:$4 sm:$0xff]   ;;  %v15283_v51 = vld [vmem:[%s17136_s11 + $0x170] ss:$8 sps:$4 sm:$0xff]  }
 0x653   : > { %10711 = vmatprep.subr.bf16.mxu0 %v15203_v44  ;;  %v15286_v44 = vld [vmem:[%s17136_s11 + $0xd70] ss:$8 sps:$4 sm:$0xff]  }
 0x655   : > { %10220 = vmatpush1.bf16.msra.mxu1 %v15205_v52  ;;  %v15291_v52 = vld [vmem:[%s17136_s11 + $0x184] ss:$8 sps:$4 sm:$0xff]  }
 0x656   : > { %10712 = vmatpush1.bf16.msra.mxu0 %v15206_v50  ;;  %10221 = vmatprep.subr.bf16.mxu1 %v15207_v48  ;;  %v15294_v50 = vld [vmem:[%s17136_s11 + $0xd84] ss:$8 sps:$4 sm:$0xff]   ;;  %v15289_v48 = vld [vmem:[%s17136_s11 + $0x180] ss:$8 sps:$4 sm:$0xff]  }
 0x657   : > { %10713 = vmatprep.subr.bf16.mxu0 %v15209_v42  ;;  %v15292_v42 = vld [vmem:[%s17136_s11 + $0xd80] ss:$8 sps:$4 sm:$0xff]  }
 0x659   : > { %10222 = vmatpush1.bf16.msra.mxu1 %v15211_v5  ;;  %v15300_v5 = vld [vmem:[%s17136_s11 + $0xd94] ss:$8 sps:$4 sm:$0xff]  }
 0x65a   : > { %10714 = vmatpush1.bf16.msra.mxu0 %v15212_v59  ;;  %10223 = vmatprep.subr.bf16.mxu1 %v15213_v63  ;;  %v15298_v59 = vld [vmem:[%s17136_s11 + $0xd90] ss:$8 sps:$4 sm:$0xff]   ;;  %v15306_v63 = vld [vmem:[%s17136_s11 + $0xda4] ss:$8 sps:$4 sm:$0xff]  }
 0x65b   : > { %10715 = vmatprep.subr.bf16.mxu0 %v15215_v32  ;;  %v15301_v32 = vld [vmem:[%s17136_s11 + $0x1a0] ss:$8 sps:$4 sm:$0xff]  }
 0x65d   : > { %10224 = vmatpush1.bf16.msra.mxu1 %v15217_v35  ;;  %v15309_v35 = vld [vmem:[%s17136_s11 + $0x1b4] ss:$8 sps:$4 sm:$0xff]  }
 0x65e   : > { %10716 = vmatpush1.bf16.msra.mxu0 %v15218_v60  ;;  %10225 = vmatprep.subr.bf16.mxu1 %v15219_v34  ;;  %v15312_v60 = vld [vmem:[%s17136_s11 + $0xdb4] ss:$8 sps:$4 sm:$0xff]   ;;  %v15307_v34 = vld [vmem:[%s17136_s11 + $0x1b0] ss:$8 sps:$4 sm:$0xff]  }
 0x65f   : > { %10717 = vmatprep.subr.bf16.mxu0 %v15221_v20  ;;  %v15310_v20 = vld [vmem:[%s17136_s11 + $0xdb0] ss:$8 sps:$4 sm:$0xff]  }
 0x661   : > { %10226 = vmatpush1.bf16.msra.mxu1 %v15223_v6  ;;  %v15315_v6 = vld [vmem:[%s17136_s11 + $0x1c4] ss:$8 sps:$4 sm:$0xff]  }
 0x662   : > { %10718 = vmatpush1.bf16.msra.mxu0 %v15224_v8  ;;  %10227 = vmatprep.subr.bf16.mxu1 %v15225_v9  ;;  %v15318_v8 = vld [vmem:[%s17136_s11 + $0xdc4] ss:$8 sps:$4 sm:$0xff]   ;;  %v15313_v9 = vld [vmem:[%s17136_s11 + $0x1c0] ss:$8 sps:$4 sm:$0xff]  }
 0x663   : > { %10719 = vmatprep.subr.bf16.mxu0 %v15227_v1  ;;  %v15316_v1 = vld [vmem:[%s17136_s11 + $0xdc0] ss:$8 sps:$4 sm:$0xff]  }
 0x665   : > { %10228 = vmatpush1.bf16.msra.mxu1 %v15229_v57  ;;  %v15321_v57 = vld [vmem:[%s17136_s11 + $0x1d4] ss:$8 sps:$4 sm:$0xff]  }
 0x666   : > { %10720 = vmatpush1.bf16.msra.mxu0 %v15230_v27  ;;  %10229 = vmatprep.subr.bf16.mxu1 %v15231_v18  ;;  %v15324_v27 = vld [vmem:[%s17136_s11 + $0xdd4] ss:$8 sps:$4 sm:$0xff]   ;;  %v15319_v18 = vld [vmem:[%s17136_s11 + $0x1d0] ss:$8 sps:$4 sm:$0xff]  }
 0x667   : > { %10721 = vmatprep.subr.bf16.mxu0 %v15233_v24  ;;  %v15322_v24 = vld [vmem:[%s17136_s11 + $0xdd0] ss:$8 sps:$4 sm:$0xff]  }
 0x669   : > { %10230 = vmatpush1.bf16.msra.mxu1 %v15235_v37  ;;  %v15327_v37 = vld [vmem:[%s17136_s11 + $0x1e4] ss:$8 sps:$4 sm:$0xff]  }
 0x66a   : > { %10722 = vmatpush1.bf16.msra.mxu0 %v15236_v54  ;;  %10240 = vmatprep.subr.bf16.mxu1 %v15241_v40  ;;  %v15330_v54 = vld [vmem:[%s17136_s11 + $0xde4] ss:$8 sps:$4 sm:$0xff]   ;;  %v15325_v40 = vld [vmem:[%s17136_s11 + $0x1e0] ss:$8 sps:$4 sm:$0xff]  }
 0x66b   : > { %10732 = vmatprep.subr.bf16.mxu0 %v15246_v58  ;;  %v15328_v58 = vld [vmem:[%s17136_s11 + $0xde0] ss:$8 sps:$4 sm:$0xff]  }
 0x66c   : > { %10232 = vmatmul.mubr.bf16.vlgmr.msra.gmra.mrb[0].mxu1 %v11957_v47  ;;  %v15333_v47 = vld [vmem:[%s17136_s11 + $0x1f4] ss:$8 sps:$4 sm:$0xff]  }
 0x66d   : > { %10724 = vmatmul.mubr.bf16.vlgmr.msra.gmra.mrb[0].mxu0 %v11981_v55  ;;  %10241 = vmatpush1.bf16.msra.mxu1 %v15239_v56  ;;  %v15336_v55 = vld [vmem:[%s17136_s11 + $0xdf4] ss:$8 sps:$4 sm:$0xff]   ;;  %v15331_v56 = vld [vmem:[%s17136_s11 + $0x1f0] ss:$8 sps:$4 sm:$0xff]  }
 0x66e   : > { %10733 = vmatpush1.bf16.msra.mxu0 %v15244_v7  ;;  %10242 = vmatprep.subr.bf16.mxu1 %v15249_v28  ;;  %v15334_v7 = vld [vmem:[%s17136_s11 + $0xdf0] ss:$8 sps:$4 sm:$0xff]   ;;  %v15341_v28 = vld [vmem:[%s17136_s11 + $0x204] ss:$8 sps:$4 sm:$0xff]  }
 0x66f   : > { %10734 = vmatprep.subr.bf16.mxu0 %v15252_v46  ;;  %10272 = vmatprep.mubr.bf16.mxu1 %v11960_v31  ;;  %v15346_v46 = vld [vmem:[%s17136_s11 + $0xe04] ss:$8 sps:$4 sm:$0xff]   ;;  %v15368_v31 = vld [vmem:[%s17136_s11 + $0xe40] ss:$8 sps:$4 sm:$0xff]  }
 0x670   : > { %10764 = vmatprep.mubr.bf16.mxu0 %v11984_v21  ;;  %v15371_v21 = vld [vmem:[%s17136_s11 + $0x250] ss:$8 sps:$4 sm:$0xff]  }
 0x671   : > { %10243 = vmatpush1.bf16.msra.mxu1 %v15247_v25  ;;  %v11959_v25 = vcombine.low %v20671_v49, %v20671_v49  ;;  %v15367_v49 = vld [vmem:[%s17136_s11 + $0x244] ss:$8 sps:$4 sm:$0xff]  }
 0x672   : > { %10735 = vmatpush1.bf16.msra.mxu0 %v15250_v39  ;;  %10244 = vmatprep.subr.bf16.mxu1 %v15255_v11  ;;  %v15339_v39 = vld [vmem:[%s17136_s11 + $0x200] ss:$8 sps:$4 sm:$0xff]   ;;  %v11983_v11 = vcombine.low %v20677_v0, %v20677_v0  ;;  %v15373_v0 = vld [vmem:[%s17136_s11 + $0x254] ss:$8 sps:$4 sm:$0xff]  }
 0x673   : > { %10736 = vmatprep.subr.bf16.mxu0 %v15258_v53  ;;  %v15344_v53 = vld [vmem:[%s17136_s11 + $0xe00] ss:$8 sps:$4 sm:$0xff]  }
 0x675   : > { %10245 = vmatpush1.bf16.msra.mxu1 %v15253_v61  ;;  %v15349_v61 = vld [vmem:[%s17136_s11 + $0x214] ss:$8 sps:$4 sm:$0xff]  }
 0x676   : > { %10737 = vmatpush1.bf16.msra.mxu0 %v15256_v30  ;;  %10246 = vmatprep.subr.bf16.mxu1 %v15261_v23  ;;  %v15352_v30 = vld [vmem:[%s17136_s11 + $0xe14] ss:$8 sps:$4 sm:$0xff]   ;;  %v20727_v23 = vld [vmem:[#allocation2 + $0x10] sm:$0xff] }
 0x677   : > { %10738 = vmatprep.subr.bf16.mxu0 %v15264_v41  ;;  %v11962_v41 = vcombine.high %v20727_v23, %v20727_v23 }
 0x679   : > { %10247 = vmatpush1.bf16.msra.mxu1 %v15259_v19  ;;  %v20731_v19 = vld [vmem:[#allocation2 + $0x70] sm:$0xff] }
 0x67a   : > { %10739 = vmatpush1.bf16.msra.mxu0 %v15262_v4  ;;  %10248 = vmatprep.subr.bf16.mxu1 %v15267_v16  ;;  %v15347_v4 = vld [vmem:[%s17136_s11 + $0x210] ss:$8 sps:$4 sm:$0xff]  }
 0x67b   : > { %10740 = vmatprep.subr.bf16.mxu0 %v15270_v43  ;;  %v15350_v16 = vld [vmem:[%s17136_s11 + $0xe10] ss:$8 sps:$4 sm:$0xff]   ;;  %v11986_v43 = vcombine.high %v20731_v19, %v20731_v19 }
 0x67d   : > { %10249 = vmatpush1.bf16.msra.mxu1 %v15265_v15  ;;  %v15355_v15 = vld [vmem:[%s17136_s11 + $0x224] ss:$8 sps:$4 sm:$0xff]  }
 0x67e   : > { %10741 = vmatpush1.bf16.msra.mxu0 %v15268_v33  ;;  %10250 = vmatprep.subr.bf16.mxu1 %v15273_v14  ;;  %v15358_v33 = vld [vmem:[%s17136_s11 + $0xe24] ss:$8 sps:$4 sm:$0xff]   ;;  %v15353_v14 = vld [vmem:[%s17136_s11 + $0x220] ss:$8 sps:$4 sm:$0xff]  }
 0x67f   : > { %10742 = vmatprep.subr.bf16.mxu0 %v15276_v45  ;;  %v15356_v45 = vld [vmem:[%s17136_s11 + $0xe20] ss:$8 sps:$4 sm:$0xff]  }
 0x681   : > { %10251 = vmatpush1.bf16.msra.mxu1 %v15271_v26  ;;  %v15361_v26 = vld [vmem:[%s17136_s11 + $0x234] ss:$8 sps:$4 sm:$0xff]  }
 0x682   : > { %10743 = vmatpush1.bf16.msra.mxu0 %v15274_v36  ;;  %10252 = vmatprep.subr.bf16.mxu1 %v15279_v10  ;;  %v15364_v36 = vld [vmem:[%s17136_s11 + $0xe34] ss:$8 sps:$4 sm:$0xff]   ;;  %v15359_v10 = vld [vmem:[%s17136_s11 + $0x230] ss:$8 sps:$4 sm:$0xff]  }
 0x683   : > { %10744 = vmatprep.subr.bf16.mxu0 %v15282_v38  ;;  %v15362_v38 = vld [vmem:[%s17136_s11 + $0xe30] ss:$8 sps:$4 sm:$0xff]  }
 0x685   : > { %10253 = vmatpush1.bf16.msra.mxu1 %v15277_v62  ;;  %v15370_v62 = vld [vmem:[%s17136_s11 + $0xe44] ss:$8 sps:$4 sm:$0xff]  }
 0x686   : > { %10745 = vmatpush1.bf16.msra.mxu0 %v15280_v22  ;;  %10254 = vmatprep.subr.bf16.mxu1 %v15285_v12  ;;  %v15365_v22 = vld [vmem:[%s17136_s11 + $0x240] ss:$8 sps:$4 sm:$0xff]   ;;  %v15376_v12 = vld [vmem:[%s17136_s11 + $0xe54] ss:$8 sps:$4 sm:$0xff]  }
 0x687   : > { %10746 = vmatprep.subr.bf16.mxu0 %v15288_v3  ;;  %v15374_v3 = vld [vmem:[%s17136_s11 + $0xe50] ss:$8 sps:$4 sm:$0xff]  }
 0x689   : > { %10255 = vmatpush1.bf16.msra.mxu1 %v15283_v51  ;;  %v15379_v51 = vld [vmem:[%s17136_s11 + $0x264] ss:$8 sps:$4 sm:$0xff]  }
 0x68a   : > { %10747 = vmatpush1.bf16.msra.mxu0 %v15286_v44  ;;  %10256 = vmatprep.subr.bf16.mxu1 %v15291_v52  ;;  %v15382_v44 = vld [vmem:[%s17136_s11 + $0xe64] ss:$8 sps:$4 sm:$0xff]   ;;  %v15377_v52 = vld [vmem:[%s17136_s11 + $0x260] ss:$8 sps:$4 sm:$0xff]  }
 0x68b   : > { %10748 = vmatprep.subr.bf16.mxu0 %v15294_v50  ;;  %v15380_v50 = vld [vmem:[%s17136_s11 + $0xe60] ss:$8 sps:$4 sm:$0xff]  }
 0x68d   : > { %10257 = vmatpush1.bf16.msra.mxu1 %v15289_v48  ;;  %v15385_v48 = vld [vmem:[%s17136_s11 + $0x274] ss:$8 sps:$4 sm:$0xff]  }
 0x68e   : > { %10749 = vmatpush1.bf16.msra.mxu0 %v15292_v42  ;;  %10258 = vmatprep.subr.bf16.mxu1 %v15297_v2  ;;  %v15388_v42 = vld [vmem:[%s17136_s11 + $0xe74] ss:$8 sps:$4 sm:$0xff]   ;;  %v15383_v2 = vld [vmem:[%s17136_s11 + $0x270] ss:$8 sps:$4 sm:$0xff]  }
 0x68f   : > { %10750 = vmatprep.subr.bf16.mxu0 %v15300_v5  ;;  %v15386_v5 = vld [vmem:[%s17136_s11 + $0xe70] ss:$8 sps:$4 sm:$0xff]  }
 0x691   : > { %10259 = vmatpush1.bf16.msra.mxu1 %v15295_v17  ;;  %v15391_v17 = vld [vmem:[%s17136_s11 + $0x284] ss:$8 sps:$4 sm:$0xff]  }
 0x692   : > { %10751 = vmatpush1.bf16.msra.mxu0 %v15298_v59  ;;  %10260 = vmatprep.subr.bf16.mxu1 %v15303_v29  ;;  %v15394_v59 = vld [vmem:[%s17136_s11 + $0xe84] ss:$8 sps:$4 sm:$0xff]   ;;  %v15389_v29 = vld [vmem:[%s17136_s11 + $0x280] ss:$8 sps:$4 sm:$0xff]  }
 0x693   : > { %10752 = vmatprep.subr.bf16.mxu0 %v15306_v63  ;;  %v15392_v63 = vld [vmem:[%s17136_s11 + $0xe80] ss:$8 sps:$4 sm:$0xff]  }
 0x695   : > { %10261 = vmatpush1.bf16.msra.mxu1 %v15301_v32  ;;  %v15397_v32 = vld [vmem:[%s17136_s11 + $0x294] ss:$8 sps:$4 sm:$0xff]  }
 0x696   : > { %10753 = vmatpush1.bf16.msra.mxu0 %v15304_v13  ;;  %10262 = vmatprep.subr.bf16.mxu1 %v15309_v35  ;;  %v15400_v13 = vld [vmem:[%s17136_s11 + $0xe94] ss:$8 sps:$4 sm:$0xff]   ;;  %v15395_v35 = vld [vmem:[%s17136_s11 + $0x290] ss:$8 sps:$4 sm:$0xff]  }
 0x697   : > { %10754 = vmatprep.subr.bf16.mxu0 %v15312_v60  ;;  %v15398_v60 = vld [vmem:[%s17136_s11 + $0xe90] ss:$8 sps:$4 sm:$0xff]  }
 0x699   : > { %10263 = vmatpush1.bf16.msra.mxu1 %v15307_v34  ;;  %v15403_v34 = vld [vmem:[%s17136_s11 + $0x2a4] ss:$8 sps:$4 sm:$0xff]  }
 0x69a   : > { %10755 = vmatpush1.bf16.msra.mxu0 %v15310_v20  ;;  %10264 = vmatprep.subr.bf16.mxu1 %v15315_v6  ;;  %v15406_v20 = vld [vmem:[%s17136_s11 + $0xea4] ss:$8 sps:$4 sm:$0xff]   ;;  %v15401_v6 = vld [vmem:[%s17136_s11 + $0x2a0] ss:$8 sps:$4 sm:$0xff]  }
 0x69b   : > { %10756 = vmatprep.subr.bf16.mxu0 %v15318_v8  ;;  %v15404_v8 = vld [vmem:[%s17136_s11 + $0xea0] ss:$8 sps:$4 sm:$0xff]  }
 0x69d   : > { %10265 = vmatpush1.bf16.msra.mxu1 %v15313_v9  ;;  %v15409_v9 = vld [vmem:[%s17136_s11 + $0x2b4] ss:$8 sps:$4 sm:$0xff]  }
 0x69e   : > { %10757 = vmatpush1.bf16.msra.mxu0 %v15316_v1  ;;  %10266 = vmatprep.subr.bf16.mxu1 %v15321_v57  ;;  %v15412_v1 = vld [vmem:[%s17136_s11 + $0xeb4] ss:$8 sps:$4 sm:$0xff]   ;;  %v15407_v57 = vld [vmem:[%s17136_s11 + $0x2b0] ss:$8 sps:$4 sm:$0xff]  }
 0x69f   : > { %10758 = vmatprep.subr.bf16.mxu0 %v15324_v27  ;;  %v15410_v27 = vld [vmem:[%s17136_s11 + $0xeb0] ss:$8 sps:$4 sm:$0xff]  }
 0x6a1   : > { %10267 = vmatpush1.bf16.msra.mxu1 %v15319_v18  ;;  %v15415_v18 = vld [vmem:[%s17136_s11 + $0x2c4] ss:$8 sps:$4 sm:$0xff]  }
 0x6a2   : > { %10759 = vmatpush1.bf16.msra.mxu0 %v15322_v24  ;;  %10268 = vmatprep.subr.bf16.mxu1 %v15327_v37  ;;  %v15418_v24 = vld [vmem:[%s17136_s11 + $0xec4] ss:$8 sps:$4 sm:$0xff]   ;;  %v15413_v37 = vld [vmem:[%s17136_s11 + $0x2c0] ss:$8 sps:$4 sm:$0xff]  }
 0x6a3   : > { %10760 = vmatprep.subr.bf16.mxu0 %v15330_v54  ;;  %v15416_v54 = vld [vmem:[%s17136_s11 + $0xec0] ss:$8 sps:$4 sm:$0xff]  }
 0x6a5   : > { %10269 = vmatpush1.bf16.msra.mxu1 %v15325_v40  ;;  %v15421_v40 = vld [vmem:[%s17136_s11 + $0x2d4] ss:$8 sps:$4 sm:$0xff]  }
 0x6a6   : > { %10761 = vmatpush1.bf16.msra.mxu0 %v15328_v58  ;;  %10270 = vmatprep.subr.bf16.mxu1 %v15333_v47  ;;  %v15424_v58 = vld [vmem:[%s17136_s11 + $0xed4] ss:$8 sps:$4 sm:$0xff]   ;;  %v15419_v47 = vld [vmem:[%s17136_s11 + $0x2d0] ss:$8 sps:$4 sm:$0xff]  }
 0x6a7   : > { %10762 = vmatprep.subr.bf16.mxu0 %v15336_v55  ;;  %v15422_v55 = vld [vmem:[%s17136_s11 + $0xed0] ss:$8 sps:$4 sm:$0xff]  }
 0x6a9   : > { %10271 = vmatpush1.bf16.msra.mxu1 %v15331_v56  ;;  %v15427_v56 = vld [vmem:[%s17136_s11 + $0x2e4] ss:$8 sps:$4 sm:$0xff]  }
 0x6aa   : > { %10763 = vmatpush1.bf16.msra.mxu0 %v15334_v7  ;;  %10281 = vmatprep.subr.bf16.mxu1 %v15341_v28  ;;  %v15430_v7 = vld [vmem:[%s17136_s11 + $0xee4] ss:$8 sps:$4 sm:$0xff]   ;;  %v15425_v28 = vld [vmem:[%s17136_s11 + $0x2e0] ss:$8 sps:$4 sm:$0xff]  }
 0x6ab   : > { %10773 = vmatprep.subr.bf16.mxu0 %v15346_v46  ;;  %v15428_v46 = vld [vmem:[%s17136_s11 + $0xee0] ss:$8 sps:$4 sm:$0xff]  }
 0x6ac   : > { %10273 = vmatmul.mubr.bf16.vlgmr.msra.gmra.mrb[0].mxu1 %v11959_v25  ;;  %v15433_v25 = vld [vmem:[%s17136_s11 + $0x2f4] ss:$8 sps:$4 sm:$0xff]  }
 0x6ad   : > { %10765 = vmatmul.mubr.bf16.vlgmr.msra.gmra.mrb[0].mxu0 %v11983_v11  ;;  %10282 = vmatpush1.bf16.msra.mxu1 %v15339_v39  ;;  %v15436_v39 = vld [vmem:[%s17136_s11 + $0xef4] ss:$8 sps:$4 sm:$0xff]   ;;  %v15431_v11 = vld [vmem:[%s17136_s11 + $0x2f0] ss:$8 sps:$4 sm:$0xff]  }
 0x6ae   : > { %10774 = vmatpush1.bf16.msra.mxu0 %v15344_v53  ;;  %10283 = vmatprep.subr.bf16.mxu1 %v15349_v61  ;;  %v15434_v53 = vld [vmem:[%s17136_s11 + $0xef0] ss:$8 sps:$4 sm:$0xff]   ;;  %v15441_v61 = vld [vmem:[%s17136_s11 + $0x304] ss:$8 sps:$4 sm:$0xff]  }
 0x6af   : > { %10775 = vmatprep.subr.bf16.mxu0 %v15352_v30  ;;  %10313 = vmatprep.mubr.bf16.mxu1 %v11962_v41  ;;  %v15446_v30 = vld [vmem:[%s17136_s11 + $0xf04] ss:$8 sps:$4 sm:$0xff]   ;;  %v15439_v41 = vld [vmem:[%s17136_s11 + $0x300] ss:$8 sps:$4 sm:$0xff]  }
 0x6b0   : > { %10805 = vmatprep.mubr.bf16.mxu0 %v11986_v43  ;;  %v11985_v43 = vcombine.low %v20731_v19, %v20731_v19 }
 0x6b1   : > { %10284 = vmatpush1.bf16.msra.mxu1 %v15347_v4  ;;  %v15444_v4 = vld [vmem:[%s17136_s11 + $0xf00] ss:$8 sps:$4 sm:$0xff]  }
 0x6b2   : > { %10776 = vmatpush1.bf16.msra.mxu0 %v15350_v16  ;;  %10285 = vmatprep.subr.bf16.mxu1 %v15355_v15  ;;  %v11961_v16 = vcombine.low %v20727_v23, %v20727_v23  ;;  %v20801_v15 = vld [vmem:[#allocation2 + $0x18] sm:$0xff] }
 0x6b3   : > { %10777 = vmatprep.subr.bf16.mxu0 %v15358_v33  ;;  %v20803_v33 = vld [vmem:[#allocation2 + $0x78] sm:$0xff]  ;;  %v11964_v23 = vcombine.high %v20801_v15, %v20801_v15 }
 0x6b4   : > { %v11988_v19 = vcombine.high %v20803_v33, %v20803_v33 }
 0x6b5   : > { %10286 = vmatpush1.bf16.msra.mxu1 %v15353_v14  ;;  %v15449_v14 = vld [vmem:[%s17136_s11 + $0x314] ss:$8 sps:$4 sm:$0xff]  }
 0x6b6   : > { %10778 = vmatpush1.bf16.msra.mxu0 %v15356_v45  ;;  %10287 = vmatprep.subr.bf16.mxu1 %v15361_v26  ;;  %v15452_v45 = vld [vmem:[%s17136_s11 + $0xf14] ss:$8 sps:$4 sm:$0xff]   ;;  %v15447_v26 = vld [vmem:[%s17136_s11 + $0x310] ss:$8 sps:$4 sm:$0xff]  }
 0x6b7   : > { %10779 = vmatprep.subr.bf16.mxu0 %v15364_v36  ;;  %v15450_v36 = vld [vmem:[%s17136_s11 + $0xf10] ss:$8 sps:$4 sm:$0xff]  }
 0x6b9   : > { %10288 = vmatpush1.bf16.msra.mxu1 %v15359_v10  ;;  %v15455_v10 = vld [vmem:[%s17136_s11 + $0x324] ss:$8 sps:$4 sm:$0xff]  }
 0x6ba   : > { %10780 = vmatpush1.bf16.msra.mxu0 %v15362_v38  ;;  %10289 = vmatprep.subr.bf16.mxu1 %v15367_v49  ;;  %v15458_v38 = vld [vmem:[%s17136_s11 + $0xf24] ss:$8 sps:$4 sm:$0xff]   ;;  %v15453_v49 = vld [vmem:[%s17136_s11 + $0x320] ss:$8 sps:$4 sm:$0xff]  }
 0x6bb   : > { %10781 = vmatprep.subr.bf16.mxu0 %v15370_v62  ;;  %v15456_v62 = vld [vmem:[%s17136_s11 + $0xf20] ss:$8 sps:$4 sm:$0xff]  }
 0x6bd   : > { %10290 = vmatpush1.bf16.msra.mxu1 %v15365_v22  ;;  %v15461_v22 = vld [vmem:[%s17136_s11 + $0x334] ss:$8 sps:$4 sm:$0xff]  }
 0x6be   : > { %10782 = vmatpush1.bf16.msra.mxu0 %v15368_v31  ;;  %10291 = vmatprep.subr.bf16.mxu1 %v15373_v0  ;;  %v15464_v31 = vld [vmem:[%s17136_s11 + $0xf34] ss:$8 sps:$4 sm:$0xff]   ;;  %v15459_v0 = vld [vmem:[%s17136_s11 + $0x330] ss:$8 sps:$4 sm:$0xff]  }
 0x6bf   : > { %10783 = vmatprep.subr.bf16.mxu0 %v15376_v12  ;;  %v15462_v12 = vld [vmem:[%s17136_s11 + $0xf30] ss:$8 sps:$4 sm:$0xff]  }
 0x6c1   : > { %10292 = vmatpush1.bf16.msra.mxu1 %v15371_v21  ;;  %v15467_v21 = vld [vmem:[%s17136_s11 + $0x344] ss:$8 sps:$4 sm:$0xff]  }
 0x6c2   : > { %10784 = vmatpush1.bf16.msra.mxu0 %v15374_v3  ;;  %10293 = vmatprep.subr.bf16.mxu1 %v15379_v51  ;;  %v15470_v3 = vld [vmem:[%s17136_s11 + $0xf44] ss:$8 sps:$4 sm:$0xff]   ;;  %v15465_v51 = vld [vmem:[%s17136_s11 + $0x340] ss:$8 sps:$4 sm:$0xff]  }
 0x6c3   : > { %10785 = vmatprep.subr.bf16.mxu0 %v15382_v44  ;;  %v15468_v44 = vld [vmem:[%s17136_s11 + $0xf40] ss:$8 sps:$4 sm:$0xff]  }
 0x6c5   : > { %10294 = vmatpush1.bf16.msra.mxu1 %v15377_v52  ;;  %v15473_v52 = vld [vmem:[%s17136_s11 + $0x354] ss:$8 sps:$4 sm:$0xff]  }
 0x6c6   : > { %10786 = vmatpush1.bf16.msra.mxu0 %v15380_v50  ;;  %10295 = vmatprep.subr.bf16.mxu1 %v15385_v48  ;;  %v15476_v50 = vld [vmem:[%s17136_s11 + $0xf54] ss:$8 sps:$4 sm:$0xff]   ;;  %v15471_v48 = vld [vmem:[%s17136_s11 + $0x350] ss:$8 sps:$4 sm:$0xff]  }
 0x6c7   : > { %10787 = vmatprep.subr.bf16.mxu0 %v15388_v42  ;;  %v15474_v42 = vld [vmem:[%s17136_s11 + $0xf50] ss:$8 sps:$4 sm:$0xff]  }
 0x6c9   : > { %10296 = vmatpush1.bf16.msra.mxu1 %v15383_v2  ;;  %v15479_v2 = vld [vmem:[%s17136_s11 + $0x364] ss:$8 sps:$4 sm:$0xff]  }
 0x6ca   : > { %10788 = vmatpush1.bf16.msra.mxu0 %v15386_v5  ;;  %10297 = vmatprep.subr.bf16.mxu1 %v15391_v17  ;;  %v15482_v5 = vld [vmem:[%s17136_s11 + $0xf64] ss:$8 sps:$4 sm:$0xff]   ;;  %v15477_v17 = vld [vmem:[%s17136_s11 + $0x360] ss:$8 sps:$4 sm:$0xff]  }
 0x6cb   : > { %10789 = vmatprep.subr.bf16.mxu0 %v15394_v59  ;;  %v15480_v59 = vld [vmem:[%s17136_s11 + $0xf60] ss:$8 sps:$4 sm:$0xff]  }
 0x6cd   : > { %10298 = vmatpush1.bf16.msra.mxu1 %v15389_v29  ;;  %v15485_v29 = vld [vmem:[%s17136_s11 + $0x374] ss:$8 sps:$4 sm:$0xff]  }
 0x6ce   : > { %10790 = vmatpush1.bf16.msra.mxu0 %v15392_v63  ;;  %10299 = vmatprep.subr.bf16.mxu1 %v15397_v32  ;;  %v15488_v63 = vld [vmem:[%s17136_s11 + $0xf74] ss:$8 sps:$4 sm:$0xff]   ;;  %v15483_v32 = vld [vmem:[%s17136_s11 + $0x370] ss:$8 sps:$4 sm:$0xff]  }
 0x6cf   : > { %10791 = vmatprep.subr.bf16.mxu0 %v15400_v13  ;;  %v15486_v13 = vld [vmem:[%s17136_s11 + $0xf70] ss:$8 sps:$4 sm:$0xff]  }
 0x6d1   : > { %10300 = vmatpush1.bf16.msra.mxu1 %v15395_v35  ;;  %v15491_v35 = vld [vmem:[%s17136_s11 + $0x384] ss:$8 sps:$4 sm:$0xff]  }
 0x6d2   : > { %10792 = vmatpush1.bf16.msra.mxu0 %v15398_v60  ;;  %10301 = vmatprep.subr.bf16.mxu1 %v15403_v34  ;;  %v15494_v60 = vld [vmem:[%s17136_s11 + $0xf84] ss:$8 sps:$4 sm:$0xff]   ;;  %v15489_v34 = vld [vmem:[%s17136_s11 + $0x380] ss:$8 sps:$4 sm:$0xff]  }
 0x6d3   : > { %10793 = vmatprep.subr.bf16.mxu0 %v15406_v20  ;;  %v15492_v20 = vld [vmem:[%s17136_s11 + $0xf80] ss:$8 sps:$4 sm:$0xff]  }
 0x6d5   : > { %10302 = vmatpush1.bf16.msra.mxu1 %v15401_v6  ;;  %v15497_v6 = vld [vmem:[%s17136_s11 + $0x394] ss:$8 sps:$4 sm:$0xff]  }
 0x6d6   : > { %10794 = vmatpush1.bf16.msra.mxu0 %v15404_v8  ;;  %10303 = vmatprep.subr.bf16.mxu1 %v15409_v9  ;;  %v15500_v8 = vld [vmem:[%s17136_s11 + $0xf94] ss:$8 sps:$4 sm:$0xff]   ;;  %v15495_v9 = vld [vmem:[%s17136_s11 + $0x390] ss:$8 sps:$4 sm:$0xff]  }
 0x6d7   : > { %10795 = vmatprep.subr.bf16.mxu0 %v15412_v1  ;;  %v15498_v1 = vld [vmem:[%s17136_s11 + $0xf90] ss:$8 sps:$4 sm:$0xff]  }
 0x6d9   : > { %10304 = vmatpush1.bf16.msra.mxu1 %v15407_v57  ;;  %v15503_v57 = vld [vmem:[%s17136_s11 + $0x3a4] ss:$8 sps:$4 sm:$0xff]  }
 0x6da   : > { %10796 = vmatpush1.bf16.msra.mxu0 %v15410_v27  ;;  %10305 = vmatprep.subr.bf16.mxu1 %v15415_v18  ;;  %v15506_v27 = vld [vmem:[%s17136_s11 + $0xfa4] ss:$8 sps:$4 sm:$0xff]   ;;  %v15501_v18 = vld [vmem:[%s17136_s11 + $0x3a0] ss:$8 sps:$4 sm:$0xff]  }
 0x6db   : > { %10797 = vmatprep.subr.bf16.mxu0 %v15418_v24  ;;  %v15504_v24 = vld [vmem:[%s17136_s11 + $0xfa0] ss:$8 sps:$4 sm:$0xff]  }
 0x6dd   : > { %10306 = vmatpush1.bf16.msra.mxu1 %v15413_v37  ;;  %v15509_v37 = vld [vmem:[%s17136_s11 + $0x3b4] ss:$8 sps:$4 sm:$0xff]  }
 0x6de   : > { %10798 = vmatpush1.bf16.msra.mxu0 %v15416_v54  ;;  %10307 = vmatprep.subr.bf16.mxu1 %v15421_v40  ;;  %v15512_v54 = vld [vmem:[%s17136_s11 + $0xfb4] ss:$8 sps:$4 sm:$0xff]   ;;  %v15507_v40 = vld [vmem:[%s17136_s11 + $0x3b0] ss:$8 sps:$4 sm:$0xff]  }
 0x6df   : > { %10799 = vmatprep.subr.bf16.mxu0 %v15424_v58  ;;  %v15510_v58 = vld [vmem:[%s17136_s11 + $0xfb0] ss:$8 sps:$4 sm:$0xff]  }
 0x6e1   : > { %10308 = vmatpush1.bf16.msra.mxu1 %v15419_v47  ;;  %v15515_v47 = vld [vmem:[%s17136_s11 + $0x3c4] ss:$8 sps:$4 sm:$0xff]  }
 0x6e2   : > { %10800 = vmatpush1.bf16.msra.mxu0 %v15422_v55  ;;  %10309 = vmatprep.subr.bf16.mxu1 %v15427_v56  ;;  %v15518_v55 = vld [vmem:[%s17136_s11 + $0xfc4] ss:$8 sps:$4 sm:$0xff]   ;;  %v15513_v56 = vld [vmem:[%s17136_s11 + $0x3c0] ss:$8 sps:$4 sm:$0xff]  }
 0x6e3   : > { %10801 = vmatprep.subr.bf16.mxu0 %v15430_v7  ;;  %v15516_v7 = vld [vmem:[%s17136_s11 + $0xfc0] ss:$8 sps:$4 sm:$0xff]  }
 0x6e5   : > { %10310 = vmatpush1.bf16.msra.mxu1 %v15425_v28  ;;  %v15521_v28 = vld [vmem:[%s17136_s11 + $0x3d4] ss:$8 sps:$4 sm:$0xff]  }
 0x6e6   : > { %10802 = vmatpush1.bf16.msra.mxu0 %v15428_v46  ;;  %10311 = vmatprep.subr.bf16.mxu1 %v15433_v25  ;;  %v15524_v46 = vld [vmem:[%s17136_s11 + $0xfd4] ss:$8 sps:$4 sm:$0xff]   ;;  %v15519_v25 = vld [vmem:[%s17136_s11 + $0x3d0] ss:$8 sps:$4 sm:$0xff]  }
 0x6e7   : > { %10803 = vmatprep.subr.bf16.mxu0 %v15436_v39  ;;  %v15522_v39 = vld [vmem:[%s17136_s11 + $0xfd0] ss:$8 sps:$4 sm:$0xff]  }
 0x6e9   : > { %10312 = vmatpush1.bf16.msra.mxu1 %v15431_v11  ;;  %v15527_v11 = vld [vmem:[%s17136_s11 + $0x3e4] ss:$8 sps:$4 sm:$0xff]  }
 0x6ea   : > { %10804 = vmatpush1.bf16.msra.mxu0 %v15434_v53  ;;  %10322 = vmatprep.subr.bf16.mxu1 %v15441_v61  ;;  %v15530_v53 = vld [vmem:[%s17136_s11 + $0xfe4] ss:$8 sps:$4 sm:$0xff]   ;;  %v15525_v61 = vld [vmem:[%s17136_s11 + $0x3e0] ss:$8 sps:$4 sm:$0xff]  }
 0x6eb   : > { %10814 = vmatprep.subr.bf16.mxu0 %v15446_v30  ;;  %v15528_v30 = vld [vmem:[%s17136_s11 + $0xfe0] ss:$8 sps:$4 sm:$0xff]  }
 0x6ec   : > { %10314 = vmatmul.mubr.bf16.vlgmr.msra.gmra.mrb[0].mxu1 %v11961_v16  ;;  %v15531_v16 = vld [vmem:[%s17136_s11 + $0x3f0] ss:$8 sps:$4 sm:$0xff]  }
 0x6ed   : > { %10806 = vmatmul.mubr.bf16.vlgmr.msra.gmra.mrb[0].mxu0 %v11985_v43  ;;  %10323 = vmatpush1.bf16.msra.mxu1 %v15439_v41  ;;  %v15533_v41 = vld [vmem:[%s17136_s11 + $0x3f4] ss:$8 sps:$4 sm:$0xff]   ;;  %v15534_v43 = vld [vmem:[%s17136_s11 + $0xff0] ss:$8 sps:$4 sm:$0xff]  }
 0x6ee   : > { %10815 = vmatpush1.bf16.msra.mxu0 %v15444_v4  ;;  %10324 = vmatprep.subr.bf16.mxu1 %v15449_v14  ;;  %v15536_v4 = vld [vmem:[%s17136_s11 + $0xff4] ss:$8 sps:$4 sm:$0xff]   ;;  %v15541_v14 = vld [vmem:[%s17136_s11 + $0x404] ss:$8 sps:$4 sm:$0xff]  }
 0x6ef   : > { %10816 = vmatprep.subr.bf16.mxu0 %v15452_v45  ;;  %10354 = vmatprep.mubr.bf16.mxu1 %v11964_v23  ;;  %v15546_v45 = vld [vmem:[%s17136_s11 + $0x1004] ss:$8 sps:$4 sm:$0xff]   ;;  %v20871_v23 = vld [vmem:[#allocation2 + $0x20] sm:$0xff] }
 0x6f0   : > { %10846 = vmatprep.mubr.bf16.mxu0 %v11988_v19  ;;  %v11963_v19 = vcombine.low %v20801_v15, %v20801_v15  ;;  %v11966_v15 = vcombine.high %v20871_v23, %v20871_v23 }
 0x6f1   : > { %10325 = vmatpush1.bf16.msra.mxu1 %v15447_v26  ;;  %v11987_v26 = vcombine.low %v20803_v33, %v20803_v33 }
 0x6f2   : > { %10817 = vmatpush1.bf16.msra.mxu0 %v15450_v36  ;;  %10326 = vmatprep.subr.bf16.mxu1 %v15455_v10  ;;  %v20877_v36 = vld [vmem:[#allocation2 + $0x80] sm:$0xff]  ;;  %v15539_v10 = vld [vmem:[%s17136_s11 + $0x400] ss:$8 sps:$4 sm:$0xff]  }
 0x6f3   : > { %10818 = vmatprep.subr.bf16.mxu0 %v15458_v38  ;;  %v15544_v38 = vld [vmem:[%s17136_s11 + $0x1000] ss:$8 sps:$4 sm:$0xff]   ;;  %v11990_v33 = vcombine.high %v20877_v36, %v20877_v36 }
 0x6f5   : > { %10327 = vmatpush1.bf16.msra.mxu1 %v15453_v49  ;;  %v15549_v49 = vld [vmem:[%s17136_s11 + $0x414] ss:$8 sps:$4 sm:$0xff]  }
 0x6f6   : > { %10819 = vmatpush1.bf16.msra.mxu0 %v15456_v62  ;;  %10328 = vmatprep.subr.bf16.mxu1 %v15461_v22  ;;  %v15552_v62 = vld [vmem:[%s17136_s11 + $0x1014] ss:$8 sps:$4 sm:$0xff]   ;;  %v15547_v22 = vld [vmem:[%s17136_s11 + $0x410] ss:$8 sps:$4 sm:$0xff]  }
 0x6f7   : > { %10820 = vmatprep.subr.bf16.mxu0 %v15464_v31  ;;  %v15550_v31 = vld [vmem:[%s17136_s11 + $0x1010] ss:$8 sps:$4 sm:$0xff]  }
 0x6f9   : > { %10329 = vmatpush1.bf16.msra.mxu1 %v15459_v0  ;;  %v15555_v0 = vld [vmem:[%s17136_s11 + $0x424] ss:$8 sps:$4 sm:$0xff]  }
 0x6fa   : > { %10821 = vmatpush1.bf16.msra.mxu0 %v15462_v12  ;;  %10330 = vmatprep.subr.bf16.mxu1 %v15467_v21  ;;  %v15558_v12 = vld [vmem:[%s17136_s11 + $0x1024] ss:$8 sps:$4 sm:$0xff]   ;;  %v15553_v21 = vld [vmem:[%s17136_s11 + $0x420] ss:$8 sps:$4 sm:$0xff]  }
 0x6fb   : > { %10822 = vmatprep.subr.bf16.mxu0 %v15470_v3  ;;  %v15556_v3 = vld [vmem:[%s17136_s11 + $0x1020] ss:$8 sps:$4 sm:$0xff]  }
 0x6fd   : > { %10331 = vmatpush1.bf16.msra.mxu1 %v15465_v51  ;;  %v15561_v51 = vld [vmem:[%s17136_s11 + $0x434] ss:$8 sps:$4 sm:$0xff]  }
 0x6fe   : > { %10823 = vmatpush1.bf16.msra.mxu0 %v15468_v44  ;;  %10332 = vmatprep.subr.bf16.mxu1 %v15473_v52  ;;  %v15564_v44 = vld [vmem:[%s17136_s11 + $0x1034] ss:$8 sps:$4 sm:$0xff]   ;;  %v15559_v52 = vld [vmem:[%s17136_s11 + $0x430] ss:$8 sps:$4 sm:$0xff]  }
 0x6ff   : > { %10824 = vmatprep.subr.bf16.mxu0 %v15476_v50  ;;  %v15562_v50 = vld [vmem:[%s17136_s11 + $0x1030] ss:$8 sps:$4 sm:$0xff]  }
 0x701   : > { %10333 = vmatpush1.bf16.msra.mxu1 %v15471_v48  ;;  %v15567_v48 = vld [vmem:[%s17136_s11 + $0x444] ss:$8 sps:$4 sm:$0xff]  }
 0x702   : > { %10825 = vmatpush1.bf16.msra.mxu0 %v15474_v42  ;;  %10334 = vmatprep.subr.bf16.mxu1 %v15479_v2  ;;  %v15570_v42 = vld [vmem:[%s17136_s11 + $0x1044] ss:$8 sps:$4 sm:$0xff]   ;;  %v15565_v2 = vld [vmem:[%s17136_s11 + $0x440] ss:$8 sps:$4 sm:$0xff]  }
 0x703   : > { %10826 = vmatprep.subr.bf16.mxu0 %v15482_v5  ;;  %v15568_v5 = vld [vmem:[%s17136_s11 + $0x1040] ss:$8 sps:$4 sm:$0xff]  }
 0x705   : > { %10335 = vmatpush1.bf16.msra.mxu1 %v15477_v17  ;;  %v15573_v17 = vld [vmem:[%s17136_s11 + $0x454] ss:$8 sps:$4 sm:$0xff]  }
 0x706   : > { %10827 = vmatpush1.bf16.msra.mxu0 %v15480_v59  ;;  %10336 = vmatprep.subr.bf16.mxu1 %v15485_v29  ;;  %v15576_v59 = vld [vmem:[%s17136_s11 + $0x1054] ss:$8 sps:$4 sm:$0xff]   ;;  %v15571_v29 = vld [vmem:[%s17136_s11 + $0x450] ss:$8 sps:$4 sm:$0xff]  }
 0x707   : > { %10828 = vmatprep.subr.bf16.mxu0 %v15488_v63  ;;  %v15574_v63 = vld [vmem:[%s17136_s11 + $0x1050] ss:$8 sps:$4 sm:$0xff]  }
 0x709   : > { %10337 = vmatpush1.bf16.msra.mxu1 %v15483_v32  ;;  %v15579_v32 = vld [vmem:[%s17136_s11 + $0x464] ss:$8 sps:$4 sm:$0xff]  }
 0x70a   : > { %10829 = vmatpush1.bf16.msra.mxu0 %v15486_v13  ;;  %10338 = vmatprep.subr.bf16.mxu1 %v15491_v35  ;;  %v15582_v13 = vld [vmem:[%s17136_s11 + $0x1064] ss:$8 sps:$4 sm:$0xff]   ;;  %v15577_v35 = vld [vmem:[%s17136_s11 + $0x460] ss:$8 sps:$4 sm:$0xff]  }
 0x70b   : > { %10830 = vmatprep.subr.bf16.mxu0 %v15494_v60  ;;  %v15580_v60 = vld [vmem:[%s17136_s11 + $0x1060] ss:$8 sps:$4 sm:$0xff]  }
 0x70d   : > { %10339 = vmatpush1.bf16.msra.mxu1 %v15489_v34  ;;  %v15585_v34 = vld [vmem:[%s17136_s11 + $0x474] ss:$8 sps:$4 sm:$0xff]  }
 0x70e   : > { %10831 = vmatpush1.bf16.msra.mxu0 %v15492_v20  ;;  %10340 = vmatprep.subr.bf16.mxu1 %v15497_v6  ;;  %v15588_v20 = vld [vmem:[%s17136_s11 + $0x1074] ss:$8 sps:$4 sm:$0xff]   ;;  %v15583_v6 = vld [vmem:[%s17136_s11 + $0x470] ss:$8 sps:$4 sm:$0xff]  }
 0x70f   : > { %10832 = vmatprep.subr.bf16.mxu0 %v15500_v8  ;;  %v15586_v8 = vld [vmem:[%s17136_s11 + $0x1070] ss:$8 sps:$4 sm:$0xff]  }
 0x711   : > { %10341 = vmatpush1.bf16.msra.mxu1 %v15495_v9  ;;  %v15591_v9 = vld [vmem:[%s17136_s11 + $0x484] ss:$8 sps:$4 sm:$0xff]  }
 0x712   : > { %10833 = vmatpush1.bf16.msra.mxu0 %v15498_v1  ;;  %10342 = vmatprep.subr.bf16.mxu1 %v15503_v57  ;;  %v15594_v1 = vld [vmem:[%s17136_s11 + $0x1084] ss:$8 sps:$4 sm:$0xff]   ;;  %v15589_v57 = vld [vmem:[%s17136_s11 + $0x480] ss:$8 sps:$4 sm:$0xff]  }
 0x713   : > { %10834 = vmatprep.subr.bf16.mxu0 %v15506_v27  ;;  %v15592_v27 = vld [vmem:[%s17136_s11 + $0x1080] ss:$8 sps:$4 sm:$0xff]  }
 0x715   : > { %10343 = vmatpush1.bf16.msra.mxu1 %v15501_v18  ;;  %v15597_v18 = vld [vmem:[%s17136_s11 + $0x494] ss:$8 sps:$4 sm:$0xff]  }
 0x716   : > { %10835 = vmatpush1.bf16.msra.mxu0 %v15504_v24  ;;  %10344 = vmatprep.subr.bf16.mxu1 %v15509_v37  ;;  %v15600_v24 = vld [vmem:[%s17136_s11 + $0x1094] ss:$8 sps:$4 sm:$0xff]   ;;  %v15595_v37 = vld [vmem:[%s17136_s11 + $0x490] ss:$8 sps:$4 sm:$0xff]  }
 0x717   : > { %10836 = vmatprep.subr.bf16.mxu0 %v15512_v54  ;;  %v15598_v54 = vld [vmem:[%s17136_s11 + $0x1090] ss:$8 sps:$4 sm:$0xff]  }
 0x719   : > { %10345 = vmatpush1.bf16.msra.mxu1 %v15507_v40  ;;  %v15603_v40 = vld [vmem:[%s17136_s11 + $0x4a4] ss:$8 sps:$4 sm:$0xff]  }
 0x71a   : > { %10837 = vmatpush1.bf16.msra.mxu0 %v15510_v58  ;;  %10346 = vmatprep.subr.bf16.mxu1 %v15515_v47  ;;  %v15606_v58 = vld [vmem:[%s17136_s11 + $0x10a4] ss:$8 sps:$4 sm:$0xff]   ;;  %v15601_v47 = vld [vmem:[%s17136_s11 + $0x4a0] ss:$8 sps:$4 sm:$0xff]  }
 0x71b   : > { %10838 = vmatprep.subr.bf16.mxu0 %v15518_v55  ;;  %v15604_v55 = vld [vmem:[%s17136_s11 + $0x10a0] ss:$8 sps:$4 sm:$0xff]  }
 0x71d   : > { %10347 = vmatpush1.bf16.msra.mxu1 %v15513_v56  ;;  %v15609_v56 = vld [vmem:[%s17136_s11 + $0x4b4] ss:$8 sps:$4 sm:$0xff]  }
 0x71e   : > { %10839 = vmatpush1.bf16.msra.mxu0 %v15516_v7  ;;  %10348 = vmatprep.subr.bf16.mxu1 %v15521_v28  ;;  %v15612_v7 = vld [vmem:[%s17136_s11 + $0x10b4] ss:$8 sps:$4 sm:$0xff]   ;;  %v15607_v28 = vld [vmem:[%s17136_s11 + $0x4b0] ss:$8 sps:$4 sm:$0xff]  }
 0x71f   : > { %10840 = vmatprep.subr.bf16.mxu0 %v15524_v46  ;;  %v15610_v46 = vld [vmem:[%s17136_s11 + $0x10b0] ss:$8 sps:$4 sm:$0xff]  }
 0x721   : > { %10349 = vmatpush1.bf16.msra.mxu1 %v15519_v25  ;;  %v15615_v25 = vld [vmem:[%s17136_s11 + $0x4c4] ss:$8 sps:$4 sm:$0xff]  }
 0x722   : > { %10841 = vmatpush1.bf16.msra.mxu0 %v15522_v39  ;;  %10350 = vmatprep.subr.bf16.mxu1 %v15527_v11  ;;  %v15618_v39 = vld [vmem:[%s17136_s11 + $0x10c4] ss:$8 sps:$4 sm:$0xff]   ;;  %v15613_v11 = vld [vmem:[%s17136_s11 + $0x4c0] ss:$8 sps:$4 sm:$0xff]  }
 0x723   : > { %10842 = vmatprep.subr.bf16.mxu0 %v15530_v53  ;;  %v15616_v53 = vld [vmem:[%s17136_s11 + $0x10c0] ss:$8 sps:$4 sm:$0xff]  }
 0x725   : > { %10351 = vmatpush1.bf16.msra.mxu1 %v15525_v61  ;;  %v15621_v61 = vld [vmem:[%s17136_s11 + $0x4d4] ss:$8 sps:$4 sm:$0xff]  }
 0x726   : > { %10843 = vmatpush1.bf16.msra.mxu0 %v15528_v30  ;;  %10352 = vmatprep.subr.bf16.mxu1 %v15533_v41  ;;  %v15624_v30 = vld [vmem:[%s17136_s11 + $0x10d4] ss:$8 sps:$4 sm:$0xff]   ;;  %v15619_v41 = vld [vmem:[%s17136_s11 + $0x4d0] ss:$8 sps:$4 sm:$0xff]  }
 0x727   : > { %10844 = vmatprep.subr.bf16.mxu0 %v15536_v4  ;;  %v15622_v4 = vld [vmem:[%s17136_s11 + $0x10d0] ss:$8 sps:$4 sm:$0xff]  }
 0x729   : > { %10353 = vmatpush1.bf16.msra.mxu1 %v15531_v16  ;;  %v15627_v16 = vld [vmem:[%s17136_s11 + $0x4e4] ss:$8 sps:$4 sm:$0xff]  }
 0x72a   : > { %10845 = vmatpush1.bf16.msra.mxu0 %v15534_v43  ;;  %10363 = vmatprep.subr.bf16.mxu1 %v15541_v14  ;;  %v15630_v43 = vld [vmem:[%s17136_s11 + $0x10e4] ss:$8 sps:$4 sm:$0xff]   ;;  %v15625_v14 = vld [vmem:[%s17136_s11 + $0x4e0] ss:$8 sps:$4 sm:$0xff]  }
 0x72b   : > { %10855 = vmatprep.subr.bf16.mxu0 %v15546_v45  ;;  %v15628_v45 = vld [vmem:[%s17136_s11 + $0x10e0] ss:$8 sps:$4 sm:$0xff]  }
 0x72c   : > { %10355 = vmatmul.mubr.bf16.vlgmr.msra.gmra.mrb[0].mxu1 %v11963_v19  ;;  %v15633_v19 = vld [vmem:[%s17136_s11 + $0x4f4] ss:$8 sps:$4 sm:$0xff]  }
 0x72d   : > { %10847 = vmatmul.mubr.bf16.vlgmr.msra.gmra.mrb[0].mxu0 %v11987_v26  ;;  %10364 = vmatpush1.bf16.msra.mxu1 %v15539_v10  ;;  %v15636_v26 = vld [vmem:[%s17136_s11 + $0x10f4] ss:$8 sps:$4 sm:$0xff]   ;;  %v15631_v10 = vld [vmem:[%s17136_s11 + $0x4f0] ss:$8 sps:$4 sm:$0xff]  }
 0x72e   : > { %10856 = vmatpush1.bf16.msra.mxu0 %v15544_v38  ;;  %10365 = vmatprep.subr.bf16.mxu1 %v15549_v49  ;;  %v15634_v38 = vld [vmem:[%s17136_s11 + $0x10f0] ss:$8 sps:$4 sm:$0xff]   ;;  %v15641_v49 = vld [vmem:[%s17136_s11 + $0x504] ss:$8 sps:$4 sm:$0xff]  }
 0x72f   : > { %10857 = vmatprep.subr.bf16.mxu0 %v15552_v62  ;;  %10395 = vmatprep.mubr.bf16.mxu1 %v11966_v15  ;;  %v15646_v62 = vld [vmem:[%s17136_s11 + $0x1104] ss:$8 sps:$4 sm:$0xff]   ;;  %v20947_v15 = vld [vmem:[#allocation2 + $0x28] sm:$0xff] }
 0x730   : > { %10887 = vmatprep.mubr.bf16.mxu0 %v11990_v33  ;;  %v20949_v33 = vld [vmem:[#allocation2 + $0x88] sm:$0xff] }
 0x731   : > { %10366 = vmatpush1.bf16.msra.mxu1 %v15547_v22  ;;  %v11965_v22 = vcombine.low %v20871_v23, %v20871_v23  ;;  %v11992_v23 = vcombine.high %v20949_v33, %v20949_v33 }
 0x732   : > { %10858 = vmatpush1.bf16.msra.mxu0 %v15550_v31  ;;  %10367 = vmatprep.subr.bf16.mxu1 %v15555_v0  ;;  %v11989_v31 = vcombine.low %v20877_v36, %v20877_v36  ;;  %v15639_v0 = vld [vmem:[%s17136_s11 + $0x500] ss:$8 sps:$4 sm:$0xff]   ;;  %v15647_v36 = vld [vmem:[%s17136_s11 + $0x510] ss:$8 sps:$4 sm:$0xff]  }
 0x733   : > { %10859 = vmatprep.subr.bf16.mxu0 %v15558_v12  ;;  %v15644_v12 = vld [vmem:[%s17136_s11 + $0x1100] ss:$8 sps:$4 sm:$0xff]  }
 0x735   : > { %10368 = vmatpush1.bf16.msra.mxu1 %v15553_v21  ;;  %v15649_v21 = vld [vmem:[%s17136_s11 + $0x514] ss:$8 sps:$4 sm:$0xff]  }
 0x736   : > { %10860 = vmatpush1.bf16.msra.mxu0 %v15556_v3  ;;  %10369 = vmatprep.subr.bf16.mxu1 %v15561_v51  ;;  %v15652_v3 = vld [vmem:[%s17136_s11 + $0x1114] ss:$8 sps:$4 sm:$0xff]   ;;  %v11968_v51 = vcombine.high %v20947_v15, %v20947_v15 }
 0x737   : > { %10861 = vmatprep.subr.bf16.mxu0 %v15564_v44  ;;  %v15650_v44 = vld [vmem:[%s17136_s11 + $0x1110] ss:$8 sps:$4 sm:$0xff]  }
 0x739   : > { %10370 = vmatpush1.bf16.msra.mxu1 %v15559_v52  ;;  %v15655_v52 = vld [vmem:[%s17136_s11 + $0x524] ss:$8 sps:$4 sm:$0xff]  }
 0x73a   : > { %10862 = vmatpush1.bf16.msra.mxu0 %v15562_v50  ;;  %10371 = vmatprep.subr.bf16.mxu1 %v15567_v48  ;;  %v15658_v50 = vld [vmem:[%s17136_s11 + $0x1124] ss:$8 sps:$4 sm:$0xff]   ;;  %v15653_v48 = vld [vmem:[%s17136_s11 + $0x520] ss:$8 sps:$4 sm:$0xff]  }
 0x73b   : > { %10863 = vmatprep.subr.bf16.mxu0 %v15570_v42  ;;  %v15656_v42 = vld [vmem:[%s17136_s11 + $0x1120] ss:$8 sps:$4 sm:$0xff]  }
 0x73d   : > { %10372 = vmatpush1.bf16.msra.mxu1 %v15565_v2  ;;  %v15661_v2 = vld [vmem:[%s17136_s11 + $0x534] ss:$8 sps:$4 sm:$0xff]  }
 0x73e   : > { %10864 = vmatpush1.bf16.msra.mxu0 %v15568_v5  ;;  %10373 = vmatprep.subr.bf16.mxu1 %v15573_v17  ;;  %v15664_v5 = vld [vmem:[%s17136_s11 + $0x1134] ss:$8 sps:$4 sm:$0xff]   ;;  %v15659_v17 = vld [vmem:[%s17136_s11 + $0x530] ss:$8 sps:$4 sm:$0xff]  }
 0x73f   : > { %10865 = vmatprep.subr.bf16.mxu0 %v15576_v59  ;;  %v15662_v59 = vld [vmem:[%s17136_s11 + $0x1130] ss:$8 sps:$4 sm:$0xff]  }
 0x741   : > { %10374 = vmatpush1.bf16.msra.mxu1 %v15571_v29  ;;  %v15667_v29 = vld [vmem:[%s17136_s11 + $0x544] ss:$8 sps:$4 sm:$0xff]  }
 0x742   : > { %10866 = vmatpush1.bf16.msra.mxu0 %v15574_v63  ;;  %10375 = vmatprep.subr.bf16.mxu1 %v15579_v32  ;;  %v15670_v63 = vld [vmem:[%s17136_s11 + $0x1144] ss:$8 sps:$4 sm:$0xff]   ;;  %v15665_v32 = vld [vmem:[%s17136_s11 + $0x540] ss:$8 sps:$4 sm:$0xff]  }
 0x743   : > { %10867 = vmatprep.subr.bf16.mxu0 %v15582_v13  ;;  %v15668_v13 = vld [vmem:[%s17136_s11 + $0x1140] ss:$8 sps:$4 sm:$0xff]  }
 0x745   : > { %10376 = vmatpush1.bf16.msra.mxu1 %v15577_v35  ;;  %v15673_v35 = vld [vmem:[%s17136_s11 + $0x554] ss:$8 sps:$4 sm:$0xff]  }
 0x746   : > { %10868 = vmatpush1.bf16.msra.mxu0 %v15580_v60  ;;  %10377 = vmatprep.subr.bf16.mxu1 %v15585_v34  ;;  %v15676_v60 = vld [vmem:[%s17136_s11 + $0x1154] ss:$8 sps:$4 sm:$0xff]   ;;  %v15671_v34 = vld [vmem:[%s17136_s11 + $0x550] ss:$8 sps:$4 sm:$0xff]  }
 0x747   : > { %10869 = vmatprep.subr.bf16.mxu0 %v15588_v20  ;;  %v15674_v20 = vld [vmem:[%s17136_s11 + $0x1150] ss:$8 sps:$4 sm:$0xff]  }
 0x749   : > { %10378 = vmatpush1.bf16.msra.mxu1 %v15583_v6  ;;  %v15679_v6 = vld [vmem:[%s17136_s11 + $0x564] ss:$8 sps:$4 sm:$0xff]  }
 0x74a   : > { %10870 = vmatpush1.bf16.msra.mxu0 %v15586_v8  ;;  %10379 = vmatprep.subr.bf16.mxu1 %v15591_v9  ;;  %v15682_v8 = vld [vmem:[%s17136_s11 + $0x1164] ss:$8 sps:$4 sm:$0xff]   ;;  %v15677_v9 = vld [vmem:[%s17136_s11 + $0x560] ss:$8 sps:$4 sm:$0xff]  }
 0x74b   : > { %10871 = vmatprep.subr.bf16.mxu0 %v15594_v1  ;;  %v15680_v1 = vld [vmem:[%s17136_s11 + $0x1160] ss:$8 sps:$4 sm:$0xff]  }
 0x74d   : > { %10380 = vmatpush1.bf16.msra.mxu1 %v15589_v57  ;;  %v15685_v57 = vld [vmem:[%s17136_s11 + $0x574] ss:$8 sps:$4 sm:$0xff]  }
 0x74e   : > { %10872 = vmatpush1.bf16.msra.mxu0 %v15592_v27  ;;  %10381 = vmatprep.subr.bf16.mxu1 %v15597_v18  ;;  %v15688_v27 = vld [vmem:[%s17136_s11 + $0x1174] ss:$8 sps:$4 sm:$0xff]   ;;  %v15683_v18 = vld [vmem:[%s17136_s11 + $0x570] ss:$8 sps:$4 sm:$0xff]  }
 0x74f   : > { %10873 = vmatprep.subr.bf16.mxu0 %v15600_v24  ;;  %v15686_v24 = vld [vmem:[%s17136_s11 + $0x1170] ss:$8 sps:$4 sm:$0xff]  }
 0x751   : > { %10382 = vmatpush1.bf16.msra.mxu1 %v15595_v37  ;;  %v15691_v37 = vld [vmem:[%s17136_s11 + $0x584] ss:$8 sps:$4 sm:$0xff]  }
 0x752   : > { %10874 = vmatpush1.bf16.msra.mxu0 %v15598_v54  ;;  %10383 = vmatprep.subr.bf16.mxu1 %v15603_v40  ;;  %v15694_v54 = vld [vmem:[%s17136_s11 + $0x1184] ss:$8 sps:$4 sm:$0xff]   ;;  %v15689_v40 = vld [vmem:[%s17136_s11 + $0x580] ss:$8 sps:$4 sm:$0xff]  }
 0x753   : > { %10875 = vmatprep.subr.bf16.mxu0 %v15606_v58  ;;  %v15692_v58 = vld [vmem:[%s17136_s11 + $0x1180] ss:$8 sps:$4 sm:$0xff]  }
 0x755   : > { %10384 = vmatpush1.bf16.msra.mxu1 %v15601_v47  ;;  %v15697_v47 = vld [vmem:[%s17136_s11 + $0x594] ss:$8 sps:$4 sm:$0xff]  }
 0x756   : > { %10876 = vmatpush1.bf16.msra.mxu0 %v15604_v55  ;;  %10385 = vmatprep.subr.bf16.mxu1 %v15609_v56  ;;  %v15700_v55 = vld [vmem:[%s17136_s11 + $0x1194] ss:$8 sps:$4 sm:$0xff]   ;;  %v15695_v56 = vld [vmem:[%s17136_s11 + $0x590] ss:$8 sps:$4 sm:$0xff]  }
 0x757   : > { %10877 = vmatprep.subr.bf16.mxu0 %v15612_v7  ;;  %v15698_v7 = vld [vmem:[%s17136_s11 + $0x1190] ss:$8 sps:$4 sm:$0xff]  }
 0x759   : > { %10386 = vmatpush1.bf16.msra.mxu1 %v15607_v28  ;;  %v15703_v28 = vld [vmem:[%s17136_s11 + $0x5a4] ss:$8 sps:$4 sm:$0xff]  }
 0x75a   : > { %10878 = vmatpush1.bf16.msra.mxu0 %v15610_v46  ;;  %10387 = vmatprep.subr.bf16.mxu1 %v15615_v25  ;;  %v15706_v46 = vld [vmem:[%s17136_s11 + $0x11a4] ss:$8 sps:$4 sm:$0xff]   ;;  %v15701_v25 = vld [vmem:[%s17136_s11 + $0x5a0] ss:$8 sps:$4 sm:$0xff]  }
 0x75b   : > { %10879 = vmatprep.subr.bf16.mxu0 %v15618_v39  ;;  %v15704_v39 = vld [vmem:[%s17136_s11 + $0x11a0] ss:$8 sps:$4 sm:$0xff]  }
 0x75d   : > { %10388 = vmatpush1.bf16.msra.mxu1 %v15613_v11  ;;  %v15709_v11 = vld [vmem:[%s17136_s11 + $0x5b4] ss:$8 sps:$4 sm:$0xff]  }
 0x75e   : > { %10880 = vmatpush1.bf16.msra.mxu0 %v15616_v53  ;;  %10389 = vmatprep.subr.bf16.mxu1 %v15621_v61  ;;  %v15712_v53 = vld [vmem:[%s17136_s11 + $0x11b4] ss:$8 sps:$4 sm:$0xff]   ;;  %v15707_v61 = vld [vmem:[%s17136_s11 + $0x5b0] ss:$8 sps:$4 sm:$0xff]  }
 0x75f   : > { %10881 = vmatprep.subr.bf16.mxu0 %v15624_v30  ;;  %v15710_v30 = vld [vmem:[%s17136_s11 + $0x11b0] ss:$8 sps:$4 sm:$0xff]  }
 0x761   : > { %10390 = vmatpush1.bf16.msra.mxu1 %v15619_v41  ;;  %v15715_v41 = vld [vmem:[%s17136_s11 + $0x5c4] ss:$8 sps:$4 sm:$0xff]  }
 0x762   : > { %10882 = vmatpush1.bf16.msra.mxu0 %v15622_v4  ;;  %10391 = vmatprep.subr.bf16.mxu1 %v15627_v16  ;;  %v15718_v4 = vld [vmem:[%s17136_s11 + $0x11c4] ss:$8 sps:$4 sm:$0xff]   ;;  %v15713_v16 = vld [vmem:[%s17136_s11 + $0x5c0] ss:$8 sps:$4 sm:$0xff]  }
 0x763   : > { %10883 = vmatprep.subr.bf16.mxu0 %v15630_v43  ;;  %v15716_v43 = vld [vmem:[%s17136_s11 + $0x11c0] ss:$8 sps:$4 sm:$0xff]  }
 0x765   : > { %10392 = vmatpush1.bf16.msra.mxu1 %v15625_v14  ;;  %v15721_v14 = vld [vmem:[%s17136_s11 + $0x5d4] ss:$8 sps:$4 sm:$0xff]  }
 0x766   : > { %10884 = vmatpush1.bf16.msra.mxu0 %v15628_v45  ;;  %10393 = vmatprep.subr.bf16.mxu1 %v15633_v19  ;;  %v15724_v45 = vld [vmem:[%s17136_s11 + $0x11d4] ss:$8 sps:$4 sm:$0xff]   ;;  %v15719_v19 = vld [vmem:[%s17136_s11 + $0x5d0] ss:$8 sps:$4 sm:$0xff]  }
 0x767   : > { %10885 = vmatprep.subr.bf16.mxu0 %v15636_v26  ;;  %v15722_v26 = vld [vmem:[%s17136_s11 + $0x11d0] ss:$8 sps:$4 sm:$0xff]  }
 0x769   : > { %10394 = vmatpush1.bf16.msra.mxu1 %v15631_v10  ;;  %v15727_v10 = vld [vmem:[%s17136_s11 + $0x5e4] ss:$8 sps:$4 sm:$0xff]  }
 0x76a   : > { %10886 = vmatpush1.bf16.msra.mxu0 %v15634_v38  ;;  %10404 = vmatprep.subr.bf16.mxu1 %v15641_v49  ;;  %v15730_v38 = vld [vmem:[%s17136_s11 + $0x11e4] ss:$8 sps:$4 sm:$0xff]   ;;  %v15725_v49 = vld [vmem:[%s17136_s11 + $0x5e0] ss:$8 sps:$4 sm:$0xff]  }
 0x76b   : > { %10896 = vmatprep.subr.bf16.mxu0 %v15646_v62  ;;  %v15728_v62 = vld [vmem:[%s17136_s11 + $0x11e0] ss:$8 sps:$4 sm:$0xff]  }
 0x76c   : > { %10396 = vmatmul.mubr.bf16.vlgmr.msra.gmra.mrb[0].mxu1 %v11965_v22  ;;  %v15733_v22 = vld [vmem:[%s17136_s11 + $0x5f4] ss:$8 sps:$4 sm:$0xff]  }
 0x76d   : > { %10888 = vmatmul.mubr.bf16.vlgmr.msra.gmra.mrb[0].mxu0 %v11989_v31  ;;  %10405 = vmatpush1.bf16.msra.mxu1 %v15639_v0  ;;  %v15736_v31 = vld [vmem:[%s17136_s11 + $0x11f4] ss:$8 sps:$4 sm:$0xff]   ;;  %v15731_v0 = vld [vmem:[%s17136_s11 + $0x5f0] ss:$8 sps:$4 sm:$0xff]  }
 0x76e   : > { %10897 = vmatpush1.bf16.msra.mxu0 %v15644_v12  ;;  %10406 = vmatprep.subr.bf16.mxu1 %v15649_v21  ;;  %v15734_v12 = vld [vmem:[%s17136_s11 + $0x11f0] ss:$8 sps:$4 sm:$0xff]   ;;  %v15741_v21 = vld [vmem:[%s17136_s11 + $0x604] ss:$8 sps:$4 sm:$0xff]  }
 0x76f   : > { %10898 = vmatprep.subr.bf16.mxu0 %v15652_v3  ;;  %10436 = vmatprep.mubr.bf16.mxu1 %v11968_v51  ;;  %v15746_v3 = vld [vmem:[%s17136_s11 + $0x1204] ss:$8 sps:$4 sm:$0xff]  }
 0x770   : > { %10928 = vmatprep.mubr.bf16.mxu0 %v11992_v23  ;;  %v21023_v51 = vld [vmem:[#allocation2 + $0x30] sm:$0xff] }
 0x771   : > { %10407 = vmatpush1.bf16.msra.mxu1 %v15647_v36  ;;  %v21025_v23 = vld [vmem:[#allocation2 + $0x90] sm:$0xff]  ;;  %v11967_v36 = vcombine.low %v20947_v15, %v20947_v15 }
 0x772   : > { %10899 = vmatpush1.bf16.msra.mxu0 %v15650_v44  ;;  %10408 = vmatprep.subr.bf16.mxu1 %v15655_v52  ;;  %v11991_v44 = vcombine.low %v20949_v33, %v20949_v33  ;;  %v15739_v52 = vld [vmem:[%s17136_s11 + $0x600] ss:$8 sps:$4 sm:$0xff]   ;;  %v11994_v15 = vcombine.high %v21025_v23, %v21025_v23  ;;  %v15747_v33 = vld [vmem:[%s17136_s11 + $0x610] ss:$8 sps:$4 sm:$0xff]  }
 0x773   : > { %10900 = vmatprep.subr.bf16.mxu0 %v15658_v50  ;;  %v15744_v50 = vld [vmem:[%s17136_s11 + $0x1200] ss:$8 sps:$4 sm:$0xff]  }
 0x775   : > { %10409 = vmatpush1.bf16.msra.mxu1 %v15653_v48  ;;  %v15749_v48 = vld [vmem:[%s17136_s11 + $0x614] ss:$8 sps:$4 sm:$0xff]  }
 0x776   : > { %10901 = vmatpush1.bf16.msra.mxu0 %v15656_v42  ;;  %10410 = vmatprep.subr.bf16.mxu1 %v15661_v2  ;;  %v15752_v42 = vld [vmem:[%s17136_s11 + $0x1214] ss:$8 sps:$4 sm:$0xff]   ;;  %v11970_v2 = vcombine.high %v21023_v51, %v21023_v51 }
 0x777   : > { %10902 = vmatprep.subr.bf16.mxu0 %v15664_v5  ;;  %v15750_v5 = vld [vmem:[%s17136_s11 + $0x1210] ss:$8 sps:$4 sm:$0xff]  }
 0x779   : > { %10411 = vmatpush1.bf16.msra.mxu1 %v15659_v17  ;;  %v15755_v17 = vld [vmem:[%s17136_s11 + $0x624] ss:$8 sps:$4 sm:$0xff]  }
 0x77a   : > { %10903 = vmatpush1.bf16.msra.mxu0 %v15662_v59  ;;  %10412 = vmatprep.subr.bf16.mxu1 %v15667_v29  ;;  %v15758_v59 = vld [vmem:[%s17136_s11 + $0x1224] ss:$8 sps:$4 sm:$0xff]   ;;  %v15753_v29 = vld [vmem:[%s17136_s11 + $0x620] ss:$8 sps:$4 sm:$0xff]  }
 0x77b   : > { %10904 = vmatprep.subr.bf16.mxu0 %v15670_v63  ;;  %v15756_v63 = vld [vmem:[%s17136_s11 + $0x1220] ss:$8 sps:$4 sm:$0xff]  }
 0x77d   : > { %10413 = vmatpush1.bf16.msra.mxu1 %v15665_v32  ;;  %v15761_v32 = vld [vmem:[%s17136_s11 + $0x634] ss:$8 sps:$4 sm:$0xff]  }
 0x77e   : > { %10905 = vmatpush1.bf16.msra.mxu0 %v15668_v13  ;;  %10414 = vmatprep.subr.bf16.mxu1 %v15673_v35  ;;  %v15764_v13 = vld [vmem:[%s17136_s11 + $0x1234] ss:$8 sps:$4 sm:$0xff]   ;;  %v15759_v35 = vld [vmem:[%s17136_s11 + $0x630] ss:$8 sps:$4 sm:$0xff]  }
 0x77f   : > { %10906 = vmatprep.subr.bf16.mxu0 %v15676_v60  ;;  %v15762_v60 = vld [vmem:[%s17136_s11 + $0x1230] ss:$8 sps:$4 sm:$0xff]  }
 0x781   : > { %10415 = vmatpush1.bf16.msra.mxu1 %v15671_v34  ;;  %v15767_v34 = vld [vmem:[%s17136_s11 + $0x644] ss:$8 sps:$4 sm:$0xff]  }
 0x782   : > { %10907 = vmatpush1.bf16.msra.mxu0 %v15674_v20  ;;  %10416 = vmatprep.subr.bf16.mxu1 %v15679_v6  ;;  %v15770_v20 = vld [vmem:[%s17136_s11 + $0x1244] ss:$8 sps:$4 sm:$0xff]   ;;  %v15765_v6 = vld [vmem:[%s17136_s11 + $0x640] ss:$8 sps:$4 sm:$0xff]  }
 0x783   : > { %10908 = vmatprep.subr.bf16.mxu0 %v15682_v8  ;;  %v15768_v8 = vld [vmem:[%s17136_s11 + $0x1240] ss:$8 sps:$4 sm:$0xff]  }
 0x785   : > { %10417 = vmatpush1.bf16.msra.mxu1 %v15677_v9  ;;  %v15773_v9 = vld [vmem:[%s17136_s11 + $0x654] ss:$8 sps:$4 sm:$0xff]  }
 0x786   : > { %10909 = vmatpush1.bf16.msra.mxu0 %v15680_v1  ;;  %10418 = vmatprep.subr.bf16.mxu1 %v15685_v57  ;;  %v15776_v1 = vld [vmem:[%s17136_s11 + $0x1254] ss:$8 sps:$4 sm:$0xff]   ;;  %v15771_v57 = vld [vmem:[%s17136_s11 + $0x650] ss:$8 sps:$4 sm:$0xff]  }
 0x787   : > { %10910 = vmatprep.subr.bf16.mxu0 %v15688_v27  ;;  %v15774_v27 = vld [vmem:[%s17136_s11 + $0x1250] ss:$8 sps:$4 sm:$0xff]  }
 0x789   : > { %10419 = vmatpush1.bf16.msra.mxu1 %v15683_v18  ;;  %v15779_v18 = vld [vmem:[%s17136_s11 + $0x664] ss:$8 sps:$4 sm:$0xff]  }
 0x78a   : > { %10911 = vmatpush1.bf16.msra.mxu0 %v15686_v24  ;;  %10420 = vmatprep.subr.bf16.mxu1 %v15691_v37  ;;  %v15782_v24 = vld [vmem:[%s17136_s11 + $0x1264] ss:$8 sps:$4 sm:$0xff]   ;;  %v15777_v37 = vld [vmem:[%s17136_s11 + $0x660] ss:$8 sps:$4 sm:$0xff]  }
 0x78b   : > { %10912 = vmatprep.subr.bf16.mxu0 %v15694_v54  ;;  %v15780_v54 = vld [vmem:[%s17136_s11 + $0x1260] ss:$8 sps:$4 sm:$0xff]  }
 0x78d   : > { %10421 = vmatpush1.bf16.msra.mxu1 %v15689_v40  ;;  %v15785_v40 = vld [vmem:[%s17136_s11 + $0x674] ss:$8 sps:$4 sm:$0xff]  }
 0x78e   : > { %10913 = vmatpush1.bf16.msra.mxu0 %v15692_v58  ;;  %10422 = vmatprep.subr.bf16.mxu1 %v15697_v47  ;;  %v15788_v58 = vld [vmem:[%s17136_s11 + $0x1274] ss:$8 sps:$4 sm:$0xff]   ;;  %v15783_v47 = vld [vmem:[%s17136_s11 + $0x670] ss:$8 sps:$4 sm:$0xff]  }
 0x78f   : > { %10914 = vmatprep.subr.bf16.mxu0 %v15700_v55  ;;  %v15786_v55 = vld [vmem:[%s17136_s11 + $0x1270] ss:$8 sps:$4 sm:$0xff]  }
 0x791   : > { %10423 = vmatpush1.bf16.msra.mxu1 %v15695_v56  ;;  %v15791_v56 = vld [vmem:[%s17136_s11 + $0x684] ss:$8 sps:$4 sm:$0xff]  }
 0x792   : > { %10915 = vmatpush1.bf16.msra.mxu0 %v15698_v7  ;;  %10424 = vmatprep.subr.bf16.mxu1 %v15703_v28  ;;  %v15794_v7 = vld [vmem:[%s17136_s11 + $0x1284] ss:$8 sps:$4 sm:$0xff]   ;;  %v15789_v28 = vld [vmem:[%s17136_s11 + $0x680] ss:$8 sps:$4 sm:$0xff]  }
 0x793   : > { %10916 = vmatprep.subr.bf16.mxu0 %v15706_v46  ;;  %v15792_v46 = vld [vmem:[%s17136_s11 + $0x1280] ss:$8 sps:$4 sm:$0xff]  }
 0x795   : > { %10425 = vmatpush1.bf16.msra.mxu1 %v15701_v25  ;;  %v15797_v25 = vld [vmem:[%s17136_s11 + $0x694] ss:$8 sps:$4 sm:$0xff]  }
 0x796   : > { %10917 = vmatpush1.bf16.msra.mxu0 %v15704_v39  ;;  %10426 = vmatprep.subr.bf16.mxu1 %v15709_v11  ;;  %v15800_v39 = vld [vmem:[%s17136_s11 + $0x1294] ss:$8 sps:$4 sm:$0xff]   ;;  %v15795_v11 = vld [vmem:[%s17136_s11 + $0x690] ss:$8 sps:$4 sm:$0xff]  }
 0x797   : > { %10918 = vmatprep.subr.bf16.mxu0 %v15712_v53  ;;  %v15798_v53 = vld [vmem:[%s17136_s11 + $0x1290] ss:$8 sps:$4 sm:$0xff]  }
 0x799   : > { %10427 = vmatpush1.bf16.msra.mxu1 %v15707_v61  ;;  %v15803_v61 = vld [vmem:[%s17136_s11 + $0x6a4] ss:$8 sps:$4 sm:$0xff]  }
 0x79a   : > { %10919 = vmatpush1.bf16.msra.mxu0 %v15710_v30  ;;  %10428 = vmatprep.subr.bf16.mxu1 %v15715_v41  ;;  %v15806_v30 = vld [vmem:[%s17136_s11 + $0x12a4] ss:$8 sps:$4 sm:$0xff]   ;;  %v15801_v41 = vld [vmem:[%s17136_s11 + $0x6a0] ss:$8 sps:$4 sm:$0xff]  }
 0x79b   : > { %10920 = vmatprep.subr.bf16.mxu0 %v15718_v4  ;;  %v15804_v4 = vld [vmem:[%s17136_s11 + $0x12a0] ss:$8 sps:$4 sm:$0xff]  }
 0x79d   : > { %10429 = vmatpush1.bf16.msra.mxu1 %v15713_v16  ;;  %v15809_v16 = vld [vmem:[%s17136_s11 + $0x6b4] ss:$8 sps:$4 sm:$0xff]  }
 0x79e   : > { %10921 = vmatpush1.bf16.msra.mxu0 %v15716_v43  ;;  %10430 = vmatprep.subr.bf16.mxu1 %v15721_v14  ;;  %v15812_v43 = vld [vmem:[%s17136_s11 + $0x12b4] ss:$8 sps:$4 sm:$0xff]   ;;  %v15807_v14 = vld [vmem:[%s17136_s11 + $0x6b0] ss:$8 sps:$4 sm:$0xff]  }
 0x79f   : > { %10922 = vmatprep.subr.bf16.mxu0 %v15724_v45  ;;  %v15810_v45 = vld [vmem:[%s17136_s11 + $0x12b0] ss:$8 sps:$4 sm:$0xff]  }
 0x7a1   : > { %10431 = vmatpush1.bf16.msra.mxu1 %v15719_v19  ;;  %v15815_v19 = vld [vmem:[%s17136_s11 + $0x6c4] ss:$8 sps:$4 sm:$0xff]  }
 0x7a2   : > { %10923 = vmatpush1.bf16.msra.mxu0 %v15722_v26  ;;  %10432 = vmatprep.subr.bf16.mxu1 %v15727_v10  ;;  %v15818_v26 = vld [vmem:[%s17136_s11 + $0x12c4] ss:$8 sps:$4 sm:$0xff]   ;;  %v15813_v10 = vld [vmem:[%s17136_s11 + $0x6c0] ss:$8 sps:$4 sm:$0xff]  }
 0x7a3   : > { %10924 = vmatprep.subr.bf16.mxu0 %v15730_v38  ;;  %v15816_v38 = vld [vmem:[%s17136_s11 + $0x12c0] ss:$8 sps:$4 sm:$0xff]  }
 0x7a5   : > { %10433 = vmatpush1.bf16.msra.mxu1 %v15725_v49  ;;  %v15821_v49 = vld [vmem:[%s17136_s11 + $0x6d4] ss:$8 sps:$4 sm:$0xff]  }
 0x7a6   : > { %10925 = vmatpush1.bf16.msra.mxu0 %v15728_v62  ;;  %10434 = vmatprep.subr.bf16.mxu1 %v15733_v22  ;;  %v15824_v62 = vld [vmem:[%s17136_s11 + $0x12d4] ss:$8 sps:$4 sm:$0xff]   ;;  %v15819_v22 = vld [vmem:[%s17136_s11 + $0x6d0] ss:$8 sps:$4 sm:$0xff]  }
 0x7a7   : > { %10926 = vmatprep.subr.bf16.mxu0 %v15736_v31  ;;  %v15822_v31 = vld [vmem:[%s17136_s11 + $0x12d0] ss:$8 sps:$4 sm:$0xff]  }
 0x7a9   : > { %10435 = vmatpush1.bf16.msra.mxu1 %v15731_v0  ;;  %v15827_v0 = vld [vmem:[%s17136_s11 + $0x6e4] ss:$8 sps:$4 sm:$0xff]  }
 0x7aa   : > { %10927 = vmatpush1.bf16.msra.mxu0 %v15734_v12  ;;  %10445 = vmatprep.subr.bf16.mxu1 %v15741_v21  ;;  %v15830_v12 = vld [vmem:[%s17136_s11 + $0x12e4] ss:$8 sps:$4 sm:$0xff]   ;;  %v15825_v21 = vld [vmem:[%s17136_s11 + $0x6e0] ss:$8 sps:$4 sm:$0xff]  }
 0x7ab   : > { %10937 = vmatprep.subr.bf16.mxu0 %v15746_v3  ;;  %v15828_v3 = vld [vmem:[%s17136_s11 + $0x12e0] ss:$8 sps:$4 sm:$0xff]  }
 0x7ac   : > { %10437 = vmatmul.mubr.bf16.vlgmr.msra.gmra.mrb[0].mxu1 %v11967_v36  ;;  %v15833_v36 = vld [vmem:[%s17136_s11 + $0x6f4] ss:$8 sps:$4 sm:$0xff]  }
 0x7ad   : > { %10929 = vmatmul.mubr.bf16.vlgmr.msra.gmra.mrb[0].mxu0 %v11991_v44  ;;  %10446 = vmatpush1.bf16.msra.mxu1 %v15739_v52  ;;  %v15836_v44 = vld [vmem:[%s17136_s11 + $0x12f4] ss:$8 sps:$4 sm:$0xff]   ;;  %v15831_v52 = vld [vmem:[%s17136_s11 + $0x6f0] ss:$8 sps:$4 sm:$0xff]  }
 0x7ae   : > { %10938 = vmatpush1.bf16.msra.mxu0 %v15744_v50  ;;  %10447 = vmatprep.subr.bf16.mxu1 %v15749_v48  ;;  %v15834_v50 = vld [vmem:[%s17136_s11 + $0x12f0] ss:$8 sps:$4 sm:$0xff]   ;;  %v15841_v48 = vld [vmem:[%s17136_s11 + $0x704] ss:$8 sps:$4 sm:$0xff]  }
 0x7af   : > { %10939 = vmatprep.subr.bf16.mxu0 %v15752_v42  ;;  %10477 = vmatprep.mubr.bf16.mxu1 %v11970_v2  ;;  %v15846_v42 = vld [vmem:[%s17136_s11 + $0x1304] ss:$8 sps:$4 sm:$0xff]  }
 0x7b0   : > { %10969 = vmatprep.mubr.bf16.mxu0 %v11994_v15  ;;  %v21099_v2 = vld [vmem:[#allocation2 + $0x38] sm:$0xff] }
 0x7b1   : > { %10448 = vmatpush1.bf16.msra.mxu1 %v15747_v33  ;;  %v21101_v15 = vld [vmem:[#allocation2 + $0x98] sm:$0xff]  ;;  %v11969_v33 = vcombine.low %v21023_v51, %v21023_v51 }
 0x7b2   : > { %10940 = vmatpush1.bf16.msra.mxu0 %v15750_v5  ;;  %10449 = vmatprep.subr.bf16.mxu1 %v15755_v17  ;;  %v11993_v5 = vcombine.low %v21025_v23, %v21025_v23  ;;  %v15839_v17 = vld [vmem:[%s17136_s11 + $0x700] ss:$8 sps:$4 sm:$0xff]   ;;  %v11996_v51 = vcombine.high %v21101_v15, %v21101_v15  ;;  %v15847_v23 = vld [vmem:[%s17136_s11 + $0x710] ss:$8 sps:$4 sm:$0xff]  }
 0x7b3   : > { %10941 = vmatprep.subr.bf16.mxu0 %v15758_v59  ;;  %v15844_v59 = vld [vmem:[%s17136_s11 + $0x1300] ss:$8 sps:$4 sm:$0xff]  }
 0x7b5   : > { %10450 = vmatpush1.bf16.msra.mxu1 %v15753_v29  ;;  %v15849_v29 = vld [vmem:[%s17136_s11 + $0x714] ss:$8 sps:$4 sm:$0xff]  }
 0x7b6   : > { %10942 = vmatpush1.bf16.msra.mxu0 %v15756_v63  ;;  %10451 = vmatprep.subr.bf16.mxu1 %v15761_v32  ;;  %v15852_v63 = vld [vmem:[%s17136_s11 + $0x1314] ss:$8 sps:$4 sm:$0xff]   ;;  %v11972_v32 = vcombine.high %v21099_v2, %v21099_v2 }
 0x7b7   : > { %10943 = vmatprep.subr.bf16.mxu0 %v15764_v13  ;;  %v15850_v13 = vld [vmem:[%s17136_s11 + $0x1310] ss:$8 sps:$4 sm:$0xff]  }
 0x7b9   : > { %10452 = vmatpush1.bf16.msra.mxu1 %v15759_v35  ;;  %v15855_v35 = vld [vmem:[%s17136_s11 + $0x724] ss:$8 sps:$4 sm:$0xff]  }
 0x7ba   : > { %10944 = vmatpush1.bf16.msra.mxu0 %v15762_v60  ;;  %10453 = vmatprep.subr.bf16.mxu1 %v15767_v34  ;;  %v15858_v60 = vld [vmem:[%s17136_s11 + $0x1324] ss:$8 sps:$4 sm:$0xff]   ;;  %v15853_v34 = vld [vmem:[%s17136_s11 + $0x720] ss:$8 sps:$4 sm:$0xff]  }
 0x7bb   : > { %10945 = vmatprep.subr.bf16.mxu0 %v15770_v20  ;;  %v15856_v20 = vld [vmem:[%s17136_s11 + $0x1320] ss:$8 sps:$4 sm:$0xff]  }
 0x7bd   : > { %10454 = vmatpush1.bf16.msra.mxu1 %v15765_v6  ;;  %v15861_v6 = vld [vmem:[%s17136_s11 + $0x734] ss:$8 sps:$4 sm:$0xff]  }
 0x7be   : > { %10946 = vmatpush1.bf16.msra.mxu0 %v15768_v8  ;;  %10455 = vmatprep.subr.bf16.mxu1 %v15773_v9  ;;  %v15864_v8 = vld [vmem:[%s17136_s11 + $0x1334] ss:$8 sps:$4 sm:$0xff]   ;;  %v15859_v9 = vld [vmem:[%s17136_s11 + $0x730] ss:$8 sps:$4 sm:$0xff]  }
 0x7bf   : > { %10947 = vmatprep.subr.bf16.mxu0 %v15776_v1  ;;  %v15862_v1 = vld [vmem:[%s17136_s11 + $0x1330] ss:$8 sps:$4 sm:$0xff]  }
 0x7c1   : > { %10456 = vmatpush1.bf16.msra.mxu1 %v15771_v57  ;;  %v15867_v57 = vld [vmem:[%s17136_s11 + $0x744] ss:$8 sps:$4 sm:$0xff]  }
 0x7c2   : > { %10948 = vmatpush1.bf16.msra.mxu0 %v15774_v27  ;;  %10457 = vmatprep.subr.bf16.mxu1 %v15779_v18  ;;  %v15870_v27 = vld [vmem:[%s17136_s11 + $0x1344] ss:$8 sps:$4 sm:$0xff]   ;;  %v15865_v18 = vld [vmem:[%s17136_s11 + $0x740] ss:$8 sps:$4 sm:$0xff]  }
 0x7c3   : > { %10949 = vmatprep.subr.bf16.mxu0 %v15782_v24  ;;  %v15868_v24 = vld [vmem:[%s17136_s11 + $0x1340] ss:$8 sps:$4 sm:$0xff]  }
 0x7c5   : > { %10458 = vmatpush1.bf16.msra.mxu1 %v15777_v37  ;;  %v15873_v37 = vld [vmem:[%s17136_s11 + $0x754] ss:$8 sps:$4 sm:$0xff]  }
 0x7c6   : > { %10950 = vmatpush1.bf16.msra.mxu0 %v15780_v54  ;;  %10459 = vmatprep.subr.bf16.mxu1 %v15785_v40  ;;  %v15876_v54 = vld [vmem:[%s17136_s11 + $0x1354] ss:$8 sps:$4 sm:$0xff]   ;;  %v15871_v40 = vld [vmem:[%s17136_s11 + $0x750] ss:$8 sps:$4 sm:$0xff]  }
 0x7c7   : > { %10951 = vmatprep.subr.bf16.mxu0 %v15788_v58  ;;  %v15874_v58 = vld [vmem:[%s17136_s11 + $0x1350] ss:$8 sps:$4 sm:$0xff]  }
 0x7c9   : > { %10460 = vmatpush1.bf16.msra.mxu1 %v15783_v47  ;;  %v15879_v47 = vld [vmem:[%s17136_s11 + $0x764] ss:$8 sps:$4 sm:$0xff]  }
 0x7ca   : > { %10952 = vmatpush1.bf16.msra.mxu0 %v15786_v55  ;;  %10461 = vmatprep.subr.bf16.mxu1 %v15791_v56  ;;  %v15882_v55 = vld [vmem:[%s17136_s11 + $0x1364] ss:$8 sps:$4 sm:$0xff]   ;;  %v15877_v56 = vld [vmem:[%s17136_s11 + $0x760] ss:$8 sps:$4 sm:$0xff]  }
 0x7cb   : > { %10953 = vmatprep.subr.bf16.mxu0 %v15794_v7  ;;  %v15880_v7 = vld [vmem:[%s17136_s11 + $0x1360] ss:$8 sps:$4 sm:$0xff]  }
 0x7cd   : > { %10462 = vmatpush1.bf16.msra.mxu1 %v15789_v28  ;;  %v15885_v28 = vld [vmem:[%s17136_s11 + $0x774] ss:$8 sps:$4 sm:$0xff]  }
 0x7ce   : > { %10954 = vmatpush1.bf16.msra.mxu0 %v15792_v46  ;;  %10463 = vmatprep.subr.bf16.mxu1 %v15797_v25  ;;  %v15888_v46 = vld [vmem:[%s17136_s11 + $0x1374] ss:$8 sps:$4 sm:$0xff]   ;;  %v15883_v25 = vld [vmem:[%s17136_s11 + $0x770] ss:$8 sps:$4 sm:$0xff]  }
 0x7cf   : > { %10955 = vmatprep.subr.bf16.mxu0 %v15800_v39  ;;  %v15886_v39 = vld [vmem:[%s17136_s11 + $0x1370] ss:$8 sps:$4 sm:$0xff]  }
 0x7d1   : > { %10464 = vmatpush1.bf16.msra.mxu1 %v15795_v11  ;;  %v15891_v11 = vld [vmem:[%s17136_s11 + $0x784] ss:$8 sps:$4 sm:$0xff]  }
 0x7d2   : > { %10956 = vmatpush1.bf16.msra.mxu0 %v15798_v53  ;;  %10465 = vmatprep.subr.bf16.mxu1 %v15803_v61  ;;  %v15894_v53 = vld [vmem:[%s17136_s11 + $0x1384] ss:$8 sps:$4 sm:$0xff]   ;;  %v15889_v61 = vld [vmem:[%s17136_s11 + $0x780] ss:$8 sps:$4 sm:$0xff]  }
 0x7d3   : > { %10957 = vmatprep.subr.bf16.mxu0 %v15806_v30  ;;  %v15892_v30 = vld [vmem:[%s17136_s11 + $0x1380] ss:$8 sps:$4 sm:$0xff]  }
 0x7d5   : > { %10466 = vmatpush1.bf16.msra.mxu1 %v15801_v41  ;;  %v15897_v41 = vld [vmem:[%s17136_s11 + $0x794] ss:$8 sps:$4 sm:$0xff]  }
 0x7d6   : > { %10958 = vmatpush1.bf16.msra.mxu0 %v15804_v4  ;;  %10467 = vmatprep.subr.bf16.mxu1 %v15809_v16  ;;  %v15900_v4 = vld [vmem:[%s17136_s11 + $0x1394] ss:$8 sps:$4 sm:$0xff]   ;;  %v15895_v16 = vld [vmem:[%s17136_s11 + $0x790] ss:$8 sps:$4 sm:$0xff]  }
 0x7d7   : > { %10959 = vmatprep.subr.bf16.mxu0 %v15812_v43  ;;  %v15898_v43 = vld [vmem:[%s17136_s11 + $0x1390] ss:$8 sps:$4 sm:$0xff]  }
 0x7d9   : > { %10468 = vmatpush1.bf16.msra.mxu1 %v15807_v14  ;;  %v15903_v14 = vld [vmem:[%s17136_s11 + $0x7a4] ss:$8 sps:$4 sm:$0xff]  }
 0x7da   : > { %10960 = vmatpush1.bf16.msra.mxu0 %v15810_v45  ;;  %10469 = vmatprep.subr.bf16.mxu1 %v15815_v19  ;;  %v15906_v45 = vld [vmem:[%s17136_s11 + $0x13a4] ss:$8 sps:$4 sm:$0xff]   ;;  %v15901_v19 = vld [vmem:[%s17136_s11 + $0x7a0] ss:$8 sps:$4 sm:$0xff]  }
 0x7db   : > { %10961 = vmatprep.subr.bf16.mxu0 %v15818_v26  ;;  %v15904_v26 = vld [vmem:[%s17136_s11 + $0x13a0] ss:$8 sps:$4 sm:$0xff]  }
 0x7dd   : > { %10470 = vmatpush1.bf16.msra.mxu1 %v15813_v10  ;;  %v15909_v10 = vld [vmem:[%s17136_s11 + $0x7b4] ss:$8 sps:$4 sm:$0xff]  }
 0x7de   : > { %10962 = vmatpush1.bf16.msra.mxu0 %v15816_v38  ;;  %10471 = vmatprep.subr.bf16.mxu1 %v15821_v49  ;;  %v15912_v38 = vld [vmem:[%s17136_s11 + $0x13b4] ss:$8 sps:$4 sm:$0xff]   ;;  %v15907_v49 = vld [vmem:[%s17136_s11 + $0x7b0] ss:$8 sps:$4 sm:$0xff]  }
 0x7df   : > { %10963 = vmatprep.subr.bf16.mxu0 %v15824_v62  ;;  %v15910_v62 = vld [vmem:[%s17136_s11 + $0x13b0] ss:$8 sps:$4 sm:$0xff]  }
 0x7e1   : > { %10472 = vmatpush1.bf16.msra.mxu1 %v15819_v22  ;;  %v15915_v22 = vld [vmem:[%s17136_s11 + $0x7c4] ss:$8 sps:$4 sm:$0xff]  }
 0x7e2   : > { %10964 = vmatpush1.bf16.msra.mxu0 %v15822_v31  ;;  %10473 = vmatprep.subr.bf16.mxu1 %v15827_v0  ;;  %v15918_v31 = vld [vmem:[%s17136_s11 + $0x13c4] ss:$8 sps:$4 sm:$0xff]   ;;  %v15913_v0 = vld [vmem:[%s17136_s11 + $0x7c0] ss:$8 sps:$4 sm:$0xff]  }
 0x7e3   : > { %10965 = vmatprep.subr.bf16.mxu0 %v15830_v12  ;;  %v15916_v12 = vld [vmem:[%s17136_s11 + $0x13c0] ss:$8 sps:$4 sm:$0xff]  }
 0x7e5   : > { %10474 = vmatpush1.bf16.msra.mxu1 %v15825_v21  ;;  %v15921_v21 = vld [vmem:[%s17136_s11 + $0x7d4] ss:$8 sps:$4 sm:$0xff]  }
 0x7e6   : > { %10966 = vmatpush1.bf16.msra.mxu0 %v15828_v3  ;;  %10475 = vmatprep.subr.bf16.mxu1 %v15833_v36  ;;  %v15924_v3 = vld [vmem:[%s17136_s11 + $0x13d4] ss:$8 sps:$4 sm:$0xff]   ;;  %v15919_v36 = vld [vmem:[%s17136_s11 + $0x7d0] ss:$8 sps:$4 sm:$0xff]  }
 0x7e7   : > { %10967 = vmatprep.subr.bf16.mxu0 %v15836_v44  ;;  %v15922_v44 = vld [vmem:[%s17136_s11 + $0x13d0] ss:$8 sps:$4 sm:$0xff]  }
 0x7e9   : > { %10476 = vmatpush1.bf16.msra.mxu1 %v15831_v52  ;;  %v15927_v52 = vld [vmem:[%s17136_s11 + $0x7e4] ss:$8 sps:$4 sm:$0xff]  }
 0x7ea   : > { %10968 = vmatpush1.bf16.msra.mxu0 %v15834_v50  ;;  %10486 = vmatprep.subr.bf16.mxu1 %v15841_v48  ;;  %v15930_v50 = vld [vmem:[%s17136_s11 + $0x13e4] ss:$8 sps:$4 sm:$0xff]   ;;  %v15925_v48 = vld [vmem:[%s17136_s11 + $0x7e0] ss:$8 sps:$4 sm:$0xff]  }
 0x7eb   : > { %10978 = vmatprep.subr.bf16.mxu0 %v15846_v42  ;;  %v15928_v42 = vld [vmem:[%s17136_s11 + $0x13e0] ss:$8 sps:$4 sm:$0xff]  }
 0x7ec   : > { %10478 = vmatmul.mubr.bf16.vlgmr.msra.gmra.mrb[0].mxu1 %v11969_v33  ;;  %v15933_v33 = vld [vmem:[%s17136_s11 + $0x7f4] ss:$8 sps:$4 sm:$0xff]  }
 0x7ed   : > { %10970 = vmatmul.mubr.bf16.vlgmr.msra.gmra.mrb[0].mxu0 %v11993_v5  ;;  %10487 = vmatpush1.bf16.msra.mxu1 %v15839_v17  ;;  %v15936_v5 = vld [vmem:[%s17136_s11 + $0x13f4] ss:$8 sps:$4 sm:$0xff]   ;;  %v15931_v17 = vld [vmem:[%s17136_s11 + $0x7f0] ss:$8 sps:$4 sm:$0xff]  }
 0x7ee   : > { %10979 = vmatpush1.bf16.msra.mxu0 %v15844_v59  ;;  %10488 = vmatprep.subr.bf16.mxu1 %v15849_v29  ;;  %v15934_v59 = vld [vmem:[%s17136_s11 + $0x13f0] ss:$8 sps:$4 sm:$0xff]   ;;  %v15941_v29 = vld [vmem:[%s17136_s11 + $0x804] ss:$8 sps:$4 sm:$0xff]  }
 0x7ef   : > { %10980 = vmatprep.subr.bf16.mxu0 %v15852_v63  ;;  %10518 = vmatprep.mubr.bf16.mxu1 %v11972_v32  ;;  %v15946_v63 = vld [vmem:[%s17136_s11 + $0x1404] ss:$8 sps:$4 sm:$0xff]   ;;  %v11971_v32 = vcombine.low %v21099_v2, %v21099_v2 }
 0x7f0   : > { %11010 = vmatprep.mubr.bf16.mxu0 %v11996_v51  ;;  %v11995_v51 = vcombine.low %v21101_v15, %v21101_v15 }
 0x7f1   : > { %10489 = vmatpush1.bf16.msra.mxu1 %v15847_v23  ;;  %v21179_v23 = vld [vmem:[#allocation2 + $0x40] sm:$0xff] }
 0x7f2   : > { %10981 = vmatpush1.bf16.msra.mxu0 %v15850_v13  ;;  %10490 = vmatprep.subr.bf16.mxu1 %v15855_v35  ;;  %v21181_v13 = vld [vmem:[#allocation2 + $0xa0] sm:$0xff]  ;;  %v15939_v35 = vld [vmem:[%s17136_s11 + $0x800] ss:$8 sps:$4 sm:$0xff]   ;;  %v11974_v2 = vcombine.high %v21179_v23, %v21179_v23 }
 0x7f3   : > { %10982 = vmatprep.subr.bf16.mxu0 %v15858_v60  ;;  %v15944_v60 = vld [vmem:[%s17136_s11 + $0x1400] ss:$8 sps:$4 sm:$0xff]   ;;  %v11998_v15 = vcombine.high %v21181_v13, %v21181_v13 }
 0x7f5   : > { %10491 = vmatpush1.bf16.msra.mxu1 %v15853_v34  ;;  %v15949_v34 = vld [vmem:[%s17136_s11 + $0x814] ss:$8 sps:$4 sm:$0xff]  }
 0x7f6   : > { %10983 = vmatpush1.bf16.msra.mxu0 %v15856_v20  ;;  %10492 = vmatprep.subr.bf16.mxu1 %v15861_v6  ;;  %v15952_v20 = vld [vmem:[%s17136_s11 + $0x1414] ss:$8 sps:$4 sm:$0xff]   ;;  %v15947_v6 = vld [vmem:[%s17136_s11 + $0x810] ss:$8 sps:$4 sm:$0xff]  }
 0x7f7   : > { %10984 = vmatprep.subr.bf16.mxu0 %v15864_v8  ;;  %v15950_v8 = vld [vmem:[%s17136_s11 + $0x1410] ss:$8 sps:$4 sm:$0xff]  }
 0x7f9   : > { %10493 = vmatpush1.bf16.msra.mxu1 %v15859_v9  ;;  %v15955_v9 = vld [vmem:[%s17136_s11 + $0x824] ss:$8 sps:$4 sm:$0xff]  }
 0x7fa   : > { %10985 = vmatpush1.bf16.msra.mxu0 %v15862_v1  ;;  %10494 = vmatprep.subr.bf16.mxu1 %v15867_v57  ;;  %v15958_v1 = vld [vmem:[%s17136_s11 + $0x1424] ss:$8 sps:$4 sm:$0xff]   ;;  %v15953_v57 = vld [vmem:[%s17136_s11 + $0x820] ss:$8 sps:$4 sm:$0xff]  }
 0x7fb   : > { %10986 = vmatprep.subr.bf16.mxu0 %v15870_v27  ;;  %v15956_v27 = vld [vmem:[%s17136_s11 + $0x1420] ss:$8 sps:$4 sm:$0xff]  }
 0x7fd   : > { %10495 = vmatpush1.bf16.msra.mxu1 %v15865_v18  ;;  %v15961_v18 = vld [vmem:[%s17136_s11 + $0x834] ss:$8 sps:$4 sm:$0xff]  }
 0x7fe   : > { %10987 = vmatpush1.bf16.msra.mxu0 %v15868_v24  ;;  %10496 = vmatprep.subr.bf16.mxu1 %v15873_v37  ;;  %v15964_v24 = vld [vmem:[%s17136_s11 + $0x1434] ss:$8 sps:$4 sm:$0xff]   ;;  %v15959_v37 = vld [vmem:[%s17136_s11 + $0x830] ss:$8 sps:$4 sm:$0xff]  }
 0x7ff   : > { %10988 = vmatprep.subr.bf16.mxu0 %v15876_v54  ;;  %v15962_v54 = vld [vmem:[%s17136_s11 + $0x1430] ss:$8 sps:$4 sm:$0xff]  }
 0x801   : > { %10497 = vmatpush1.bf16.msra.mxu1 %v15871_v40  ;;  %v15967_v40 = vld [vmem:[%s17136_s11 + $0x844] ss:$8 sps:$4 sm:$0xff]  }
 0x802   : > { %10989 = vmatpush1.bf16.msra.mxu0 %v15874_v58  ;;  %10498 = vmatprep.subr.bf16.mxu1 %v15879_v47  ;;  %v15970_v58 = vld [vmem:[%s17136_s11 + $0x1444] ss:$8 sps:$4 sm:$0xff]   ;;  %v15965_v47 = vld [vmem:[%s17136_s11 + $0x840] ss:$8 sps:$4 sm:$0xff]  }
 0x803   : > { %10990 = vmatprep.subr.bf16.mxu0 %v15882_v55  ;;  %v15968_v55 = vld [vmem:[%s17136_s11 + $0x1440] ss:$8 sps:$4 sm:$0xff]  }
 0x805   : > { %10499 = vmatpush1.bf16.msra.mxu1 %v15877_v56  ;;  %v15973_v56 = vld [vmem:[%s17136_s11 + $0x854] ss:$8 sps:$4 sm:$0xff]  }
 0x806   : > { %10991 = vmatpush1.bf16.msra.mxu0 %v15880_v7  ;;  %10500 = vmatprep.subr.bf16.mxu1 %v15885_v28  ;;  %v15976_v7 = vld [vmem:[%s17136_s11 + $0x1454] ss:$8 sps:$4 sm:$0xff]   ;;  %v15971_v28 = vld [vmem:[%s17136_s11 + $0x850] ss:$8 sps:$4 sm:$0xff]  }
 0x807   : > { %10992 = vmatprep.subr.bf16.mxu0 %v15888_v46  ;;  %v15974_v46 = vld [vmem:[%s17136_s11 + $0x1450] ss:$8 sps:$4 sm:$0xff]  }
 0x809   : > { %10501 = vmatpush1.bf16.msra.mxu1 %v15883_v25  ;;  %v15979_v25 = vld [vmem:[%s17136_s11 + $0x864] ss:$8 sps:$4 sm:$0xff]  }
 0x80a   : > { %10993 = vmatpush1.bf16.msra.mxu0 %v15886_v39  ;;  %10502 = vmatprep.subr.bf16.mxu1 %v15891_v11  ;;  %v15982_v39 = vld [vmem:[%s17136_s11 + $0x1464] ss:$8 sps:$4 sm:$0xff]   ;;  %v15977_v11 = vld [vmem:[%s17136_s11 + $0x860] ss:$8 sps:$4 sm:$0xff]  }
 0x80b   : > { %10994 = vmatprep.subr.bf16.mxu0 %v15894_v53  ;;  %v15980_v53 = vld [vmem:[%s17136_s11 + $0x1460] ss:$8 sps:$4 sm:$0xff]  }
 0x80d   : > { %10503 = vmatpush1.bf16.msra.mxu1 %v15889_v61  ;;  %v15985_v61 = vld [vmem:[%s17136_s11 + $0x874] ss:$8 sps:$4 sm:$0xff]  }
 0x80e   : > { %10995 = vmatpush1.bf16.msra.mxu0 %v15892_v30  ;;  %10504 = vmatprep.subr.bf16.mxu1 %v15897_v41  ;;  %v15988_v30 = vld [vmem:[%s17136_s11 + $0x1474] ss:$8 sps:$4 sm:$0xff]   ;;  %v15983_v41 = vld [vmem:[%s17136_s11 + $0x870] ss:$8 sps:$4 sm:$0xff]  }
 0x80f   : > { %10996 = vmatprep.subr.bf16.mxu0 %v15900_v4  ;;  %v15986_v4 = vld [vmem:[%s17136_s11 + $0x1470] ss:$8 sps:$4 sm:$0xff]  }
 0x811   : > { %10505 = vmatpush1.bf16.msra.mxu1 %v15895_v16  ;;  %v15991_v16 = vld [vmem:[%s17136_s11 + $0x884] ss:$8 sps:$4 sm:$0xff]  }
 0x812   : > { %10997 = vmatpush1.bf16.msra.mxu0 %v15898_v43  ;;  %10506 = vmatprep.subr.bf16.mxu1 %v15903_v14  ;;  %v15994_v43 = vld [vmem:[%s17136_s11 + $0x1484] ss:$8 sps:$4 sm:$0xff]   ;;  %v15989_v14 = vld [vmem:[%s17136_s11 + $0x880] ss:$8 sps:$4 sm:$0xff]  }
 0x813   : > { %10998 = vmatprep.subr.bf16.mxu0 %v15906_v45  ;;  %v15992_v45 = vld [vmem:[%s17136_s11 + $0x1480] ss:$8 sps:$4 sm:$0xff]  }
 0x815   : > { %10507 = vmatpush1.bf16.msra.mxu1 %v15901_v19  ;;  %v15997_v19 = vld [vmem:[%s17136_s11 + $0x894] ss:$8 sps:$4 sm:$0xff]  }
 0x816   : > { %10999 = vmatpush1.bf16.msra.mxu0 %v15904_v26  ;;  %10508 = vmatprep.subr.bf16.mxu1 %v15909_v10  ;;  %v16000_v26 = vld [vmem:[%s17136_s11 + $0x1494] ss:$8 sps:$4 sm:$0xff]   ;;  %v15995_v10 = vld [vmem:[%s17136_s11 + $0x890] ss:$8 sps:$4 sm:$0xff]  }
 0x817   : > { %11000 = vmatprep.subr.bf16.mxu0 %v15912_v38  ;;  %v15998_v38 = vld [vmem:[%s17136_s11 + $0x1490] ss:$8 sps:$4 sm:$0xff]  }
 0x819   : > { %10509 = vmatpush1.bf16.msra.mxu1 %v15907_v49  ;;  %v16003_v49 = vld [vmem:[%s17136_s11 + $0x8a4] ss:$8 sps:$4 sm:$0xff]  }
 0x81a   : > { %11001 = vmatpush1.bf16.msra.mxu0 %v15910_v62  ;;  %10510 = vmatprep.subr.bf16.mxu1 %v15915_v22  ;;  %v16006_v62 = vld [vmem:[%s17136_s11 + $0x14a4] ss:$8 sps:$4 sm:$0xff]   ;;  %v16001_v22 = vld [vmem:[%s17136_s11 + $0x8a0] ss:$8 sps:$4 sm:$0xff]  }
 0x81b   : > { %11002 = vmatprep.subr.bf16.mxu0 %v15918_v31  ;;  %v16004_v31 = vld [vmem:[%s17136_s11 + $0x14a0] ss:$8 sps:$4 sm:$0xff]  }
 0x81d   : > { %10511 = vmatpush1.bf16.msra.mxu1 %v15913_v0  ;;  %v16009_v0 = vld [vmem:[%s17136_s11 + $0x8b4] ss:$8 sps:$4 sm:$0xff]  }
 0x81e   : > { %11003 = vmatpush1.bf16.msra.mxu0 %v15916_v12  ;;  %10512 = vmatprep.subr.bf16.mxu1 %v15921_v21  ;;  %v16012_v12 = vld [vmem:[%s17136_s11 + $0x14b4] ss:$8 sps:$4 sm:$0xff]   ;;  %v16007_v21 = vld [vmem:[%s17136_s11 + $0x8b0] ss:$8 sps:$4 sm:$0xff]  }
 0x81f   : > { %11004 = vmatprep.subr.bf16.mxu0 %v15924_v3  ;;  %v16010_v3 = vld [vmem:[%s17136_s11 + $0x14b0] ss:$8 sps:$4 sm:$0xff]  }
 0x821   : > { %10513 = vmatpush1.bf16.msra.mxu1 %v15919_v36  ;;  %v16015_v36 = vld [vmem:[%s17136_s11 + $0x8c4] ss:$8 sps:$4 sm:$0xff]  }
 0x822   : > { %11005 = vmatpush1.bf16.msra.mxu0 %v15922_v44  ;;  %10514 = vmatprep.subr.bf16.mxu1 %v15927_v52  ;;  %v16018_v44 = vld [vmem:[%s17136_s11 + $0x14c4] ss:$8 sps:$4 sm:$0xff]   ;;  %v16013_v52 = vld [vmem:[%s17136_s11 + $0x8c0] ss:$8 sps:$4 sm:$0xff]  }
 0x823   : > { %11006 = vmatprep.subr.bf16.mxu0 %v15930_v50  ;;  %v16016_v50 = vld [vmem:[%s17136_s11 + $0x14c0] ss:$8 sps:$4 sm:$0xff]  }
 0x825   : > { %10515 = vmatpush1.bf16.msra.mxu1 %v15925_v48  ;;  %v16021_v48 = vld [vmem:[%s17136_s11 + $0x8d4] ss:$8 sps:$4 sm:$0xff]  }
 0x826   : > { %11007 = vmatpush1.bf16.msra.mxu0 %v15928_v42  ;;  %10516 = vmatprep.subr.bf16.mxu1 %v15933_v33  ;;  %v16024_v42 = vld [vmem:[%s17136_s11 + $0x14d4] ss:$8 sps:$4 sm:$0xff]   ;;  %v16019_v33 = vld [vmem:[%s17136_s11 + $0x8d0] ss:$8 sps:$4 sm:$0xff]  }
 0x827   : > { %11008 = vmatprep.subr.bf16.mxu0 %v15936_v5  ;;  %v16022_v5 = vld [vmem:[%s17136_s11 + $0x14d0] ss:$8 sps:$4 sm:$0xff]  }
 0x829   : > { %10517 = vmatpush1.bf16.msra.mxu1 %v15931_v17  ;;  %v16027_v17 = vld [vmem:[%s17136_s11 + $0x8e4] ss:$8 sps:$4 sm:$0xff]  }
 0x82a   : > { %11009 = vmatpush1.bf16.msra.mxu0 %v15934_v59  ;;  %10527 = vmatprep.subr.bf16.mxu1 %v15941_v29  ;;  %v16030_v59 = vld [vmem:[%s17136_s11 + $0x14e4] ss:$8 sps:$4 sm:$0xff]   ;;  %v16025_v29 = vld [vmem:[%s17136_s11 + $0x8e0] ss:$8 sps:$4 sm:$0xff]  }
 0x82b   : > { %11019 = vmatprep.subr.bf16.mxu0 %v15946_v63  ;;  %v16028_v63 = vld [vmem:[%s17136_s11 + $0x14e0] ss:$8 sps:$4 sm:$0xff]  }
 0x82c   : > { %10519 = vmatmul.mubr.bf16.vlgmr.msra.gmra.mrb[0].mxu1 %v11971_v32  ;;  %v16033_v32 = vld [vmem:[%s17136_s11 + $0x8f4] ss:$8 sps:$4 sm:$0xff]  }
 0x82d   : > { %11011 = vmatmul.mubr.bf16.vlgmr.msra.gmra.mrb[0].mxu0 %v11995_v51  ;;  %10528 = vmatpush1.bf16.msra.mxu1 %v15939_v35  ;;  %v16036_v51 = vld [vmem:[%s17136_s11 + $0x14f4] ss:$8 sps:$4 sm:$0xff]   ;;  %v16031_v35 = vld [vmem:[%s17136_s11 + $0x8f0] ss:$8 sps:$4 sm:$0xff]  }
 0x82e   : > { %11020 = vmatpush1.bf16.msra.mxu0 %v15944_v60  ;;  %10529 = vmatprep.subr.bf16.mxu1 %v15949_v34  ;;  %v16034_v60 = vld [vmem:[%s17136_s11 + $0x14f0] ss:$8 sps:$4 sm:$0xff]   ;;  %v16041_v34 = vld [vmem:[%s17136_s11 + $0x904] ss:$8 sps:$4 sm:$0xff]  }
 0x82f   : > { %11021 = vmatprep.subr.bf16.mxu0 %v15952_v20  ;;  %10559 = vmatprep.mubr.bf16.mxu1 %v11974_v2  ;;  %v16046_v20 = vld [vmem:[%s17136_s11 + $0x1504] ss:$8 sps:$4 sm:$0xff]   ;;  %v11973_v2 = vcombine.low %v21179_v23, %v21179_v23 }
 0x830   : > { %11051 = vmatprep.mubr.bf16.mxu0 %v11998_v15  ;;  %v11997_v15 = vcombine.low %v21181_v13, %v21181_v13 }
 0x831   : > { %10530 = vmatpush1.bf16.msra.mxu1 %v15947_v6  ;;  %v21255_v6 = vld [vmem:[#allocation2 + $0x48] sm:$0xff] }
 0x832   : > { %11022 = vmatpush1.bf16.msra.mxu0 %v15950_v8  ;;  %10531 = vmatprep.subr.bf16.mxu1 %v15955_v9  ;;  %v21257_v8 = vld [vmem:[#allocation2 + $0xa8] sm:$0xff]  ;;  %v11976_v23 = vcombine.high %v21255_v6, %v21255_v6 }
 0x833   : > { %11023 = vmatprep.subr.bf16.mxu0 %v15958_v1  ;;  %v16039_v9 = vld [vmem:[%s17136_s11 + $0x900] ss:$8 sps:$4 sm:$0xff]   ;;  %v12000_v13 = vcombine.high %v21257_v8, %v21257_v8 }
 0x834   : > { %v16044_v1 = vld [vmem:[%s17136_s11 + $0x1500] ss:$8 sps:$4 sm:$0xff]  }
 0x835   : > { %10532 = vmatpush1.bf16.msra.mxu1 %v15953_v57  ;;  %v16049_v57 = vld [vmem:[%s17136_s11 + $0x914] ss:$8 sps:$4 sm:$0xff]  }
 0x836   : > { %11024 = vmatpush1.bf16.msra.mxu0 %v15956_v27  ;;  %10533 = vmatprep.subr.bf16.mxu1 %v15961_v18  ;;  %v16052_v27 = vld [vmem:[%s17136_s11 + $0x1514] ss:$8 sps:$4 sm:$0xff]   ;;  %v16047_v18 = vld [vmem:[%s17136_s11 + $0x910] ss:$8 sps:$4 sm:$0xff]  }
 0x837   : > { %11025 = vmatprep.subr.bf16.mxu0 %v15964_v24  ;;  %v16050_v24 = vld [vmem:[%s17136_s11 + $0x1510] ss:$8 sps:$4 sm:$0xff]  }
 0x839   : > { %10534 = vmatpush1.bf16.msra.mxu1 %v15959_v37  ;;  %v16055_v37 = vld [vmem:[%s17136_s11 + $0x924] ss:$8 sps:$4 sm:$0xff]  }
 0x83a   : > { %11026 = vmatpush1.bf16.msra.mxu0 %v15962_v54  ;;  %10535 = vmatprep.subr.bf16.mxu1 %v15967_v40  ;;  %v16058_v54 = vld [vmem:[%s17136_s11 + $0x1524] ss:$8 sps:$4 sm:$0xff]   ;;  %v16053_v40 = vld [vmem:[%s17136_s11 + $0x920] ss:$8 sps:$4 sm:$0xff]  }
 0x83b   : > { %11027 = vmatprep.subr.bf16.mxu0 %v15970_v58  ;;  %v16056_v58 = vld [vmem:[%s17136_s11 + $0x1520] ss:$8 sps:$4 sm:$0xff]  }
 0x83d   : > { %10536 = vmatpush1.bf16.msra.mxu1 %v15965_v47  ;;  %v16061_v47 = vld [vmem:[%s17136_s11 + $0x934] ss:$8 sps:$4 sm:$0xff]  }
 0x83e   : > { %11028 = vmatpush1.bf16.msra.mxu0 %v15968_v55  ;;  %10537 = vmatprep.subr.bf16.mxu1 %v15973_v56  ;;  %v16064_v55 = vld [vmem:[%s17136_s11 + $0x1534] ss:$8 sps:$4 sm:$0xff]   ;;  %v16059_v56 = vld [vmem:[%s17136_s11 + $0x930] ss:$8 sps:$4 sm:$0xff]  }
 0x83f   : > { %11029 = vmatprep.subr.bf16.mxu0 %v15976_v7  ;;  %v16062_v7 = vld [vmem:[%s17136_s11 + $0x1530] ss:$8 sps:$4 sm:$0xff]  }
 0x841   : > { %10538 = vmatpush1.bf16.msra.mxu1 %v15971_v28  ;;  %v16067_v28 = vld [vmem:[%s17136_s11 + $0x944] ss:$8 sps:$4 sm:$0xff]  }
 0x842   : > { %11030 = vmatpush1.bf16.msra.mxu0 %v15974_v46  ;;  %10539 = vmatprep.subr.bf16.mxu1 %v15979_v25  ;;  %v16070_v46 = vld [vmem:[%s17136_s11 + $0x1544] ss:$8 sps:$4 sm:$0xff]   ;;  %v16065_v25 = vld [vmem:[%s17136_s11 + $0x940] ss:$8 sps:$4 sm:$0xff]  }
 0x843   : > { %11031 = vmatprep.subr.bf16.mxu0 %v15982_v39  ;;  %v16068_v39 = vld [vmem:[%s17136_s11 + $0x1540] ss:$8 sps:$4 sm:$0xff]  }
 0x845   : > { %10540 = vmatpush1.bf16.msra.mxu1 %v15977_v11  ;;  %v16073_v11 = vld [vmem:[%s17136_s11 + $0x954] ss:$8 sps:$4 sm:$0xff]  }
 0x846   : > { %11032 = vmatpush1.bf16.msra.mxu0 %v15980_v53  ;;  %10541 = vmatprep.subr.bf16.mxu1 %v15985_v61  ;;  %v16076_v53 = vld [vmem:[%s17136_s11 + $0x1554] ss:$8 sps:$4 sm:$0xff]   ;;  %v16071_v61 = vld [vmem:[%s17136_s11 + $0x950] ss:$8 sps:$4 sm:$0xff]  }
 0x847   : > { %11033 = vmatprep.subr.bf16.mxu0 %v15988_v30  ;;  %v16074_v30 = vld [vmem:[%s17136_s11 + $0x1550] ss:$8 sps:$4 sm:$0xff]  }
 0x849   : > { %10542 = vmatpush1.bf16.msra.mxu1 %v15983_v41  ;;  %v16079_v41 = vld [vmem:[%s17136_s11 + $0x964] ss:$8 sps:$4 sm:$0xff]  }
 0x84a   : > { %11034 = vmatpush1.bf16.msra.mxu0 %v15986_v4  ;;  %10543 = vmatprep.subr.bf16.mxu1 %v15991_v16  ;;  %v16082_v4 = vld [vmem:[%s17136_s11 + $0x1564] ss:$8 sps:$4 sm:$0xff]   ;;  %v16077_v16 = vld [vmem:[%s17136_s11 + $0x960] ss:$8 sps:$4 sm:$0xff]  }
 0x84b   : > { %11035 = vmatprep.subr.bf16.mxu0 %v15994_v43  ;;  %v16080_v43 = vld [vmem:[%s17136_s11 + $0x1560] ss:$8 sps:$4 sm:$0xff]  }
 0x84d   : > { %10544 = vmatpush1.bf16.msra.mxu1 %v15989_v14  ;;  %v16085_v14 = vld [vmem:[%s17136_s11 + $0x974] ss:$8 sps:$4 sm:$0xff]  }
 0x84e   : > { %11036 = vmatpush1.bf16.msra.mxu0 %v15992_v45  ;;  %10545 = vmatprep.subr.bf16.mxu1 %v15997_v19  ;;  %v16088_v45 = vld [vmem:[%s17136_s11 + $0x1574] ss:$8 sps:$4 sm:$0xff]   ;;  %v16083_v19 = vld [vmem:[%s17136_s11 + $0x970] ss:$8 sps:$4 sm:$0xff]  }
 0x84f   : > { %11037 = vmatprep.subr.bf16.mxu0 %v16000_v26  ;;  %v16086_v26 = vld [vmem:[%s17136_s11 + $0x1570] ss:$8 sps:$4 sm:$0xff]  }
 0x851   : > { %10546 = vmatpush1.bf16.msra.mxu1 %v15995_v10  ;;  %v16091_v10 = vld [vmem:[%s17136_s11 + $0x984] ss:$8 sps:$4 sm:$0xff]  }
 0x852   : > { %11038 = vmatpush1.bf16.msra.mxu0 %v15998_v38  ;;  %10547 = vmatprep.subr.bf16.mxu1 %v16003_v49  ;;  %v16094_v38 = vld [vmem:[%s17136_s11 + $0x1584] ss:$8 sps:$4 sm:$0xff]   ;;  %v16089_v49 = vld [vmem:[%s17136_s11 + $0x980] ss:$8 sps:$4 sm:$0xff]  }
 0x853   : > { %11039 = vmatprep.subr.bf16.mxu0 %v16006_v62  ;;  %v16092_v62 = vld [vmem:[%s17136_s11 + $0x1580] ss:$8 sps:$4 sm:$0xff]  }
 0x855   : > { %10548 = vmatpush1.bf16.msra.mxu1 %v16001_v22  ;;  %v16097_v22 = vld [vmem:[%s17136_s11 + $0x994] ss:$8 sps:$4 sm:$0xff]  }
 0x856   : > { %11040 = vmatpush1.bf16.msra.mxu0 %v16004_v31  ;;  %10549 = vmatprep.subr.bf16.mxu1 %v16009_v0  ;;  %v16100_v31 = vld [vmem:[%s17136_s11 + $0x1594] ss:$8 sps:$4 sm:$0xff]   ;;  %v16095_v0 = vld [vmem:[%s17136_s11 + $0x990] ss:$8 sps:$4 sm:$0xff]  }
 0x857   : > { %11041 = vmatprep.subr.bf16.mxu0 %v16012_v12  ;;  %v16098_v12 = vld [vmem:[%s17136_s11 + $0x1590] ss:$8 sps:$4 sm:$0xff]  }
 0x859   : > { %10550 = vmatpush1.bf16.msra.mxu1 %v16007_v21  ;;  %v16103_v21 = vld [vmem:[%s17136_s11 + $0x9a4] ss:$8 sps:$4 sm:$0xff]  }
 0x85a   : > { %11042 = vmatpush1.bf16.msra.mxu0 %v16010_v3  ;;  %10551 = vmatprep.subr.bf16.mxu1 %v16015_v36  ;;  %v16106_v3 = vld [vmem:[%s17136_s11 + $0x15a4] ss:$8 sps:$4 sm:$0xff]   ;;  %v16101_v36 = vld [vmem:[%s17136_s11 + $0x9a0] ss:$8 sps:$4 sm:$0xff]  }
 0x85b   : > { %11043 = vmatprep.subr.bf16.mxu0 %v16018_v44  ;;  %v16104_v44 = vld [vmem:[%s17136_s11 + $0x15a0] ss:$8 sps:$4 sm:$0xff]  }
 0x85d   : > { %10552 = vmatpush1.bf16.msra.mxu1 %v16013_v52  ;;  %v16109_v52 = vld [vmem:[%s17136_s11 + $0x9b4] ss:$8 sps:$4 sm:$0xff]  }
 0x85e   : > { %11044 = vmatpush1.bf16.msra.mxu0 %v16016_v50  ;;  %10553 = vmatprep.subr.bf16.mxu1 %v16021_v48  ;;  %v16112_v50 = vld [vmem:[%s17136_s11 + $0x15b4] ss:$8 sps:$4 sm:$0xff]   ;;  %v16107_v48 = vld [vmem:[%s17136_s11 + $0x9b0] ss:$8 sps:$4 sm:$0xff]  }
 0x85f   : > { %11045 = vmatprep.subr.bf16.mxu0 %v16024_v42  ;;  %v16110_v42 = vld [vmem:[%s17136_s11 + $0x15b0] ss:$8 sps:$4 sm:$0xff]  }
 0x861   : > { %10554 = vmatpush1.bf16.msra.mxu1 %v16019_v33  ;;  %v16115_v33 = vld [vmem:[%s17136_s11 + $0x9c4] ss:$8 sps:$4 sm:$0xff]  }
 0x862   : > { %11046 = vmatpush1.bf16.msra.mxu0 %v16022_v5  ;;  %10555 = vmatprep.subr.bf16.mxu1 %v16027_v17  ;;  %v16118_v5 = vld [vmem:[%s17136_s11 + $0x15c4] ss:$8 sps:$4 sm:$0xff]   ;;  %v16113_v17 = vld [vmem:[%s17136_s11 + $0x9c0] ss:$8 sps:$4 sm:$0xff]  }
 0x863   : > { %11047 = vmatprep.subr.bf16.mxu0 %v16030_v59  ;;  %v16116_v59 = vld [vmem:[%s17136_s11 + $0x15c0] ss:$8 sps:$4 sm:$0xff]  }
 0x865   : > { %10556 = vmatpush1.bf16.msra.mxu1 %v16025_v29  ;;  %v16121_v29 = vld [vmem:[%s17136_s11 + $0x9d4] ss:$8 sps:$4 sm:$0xff]  }
 0x866   : > { %11048 = vmatpush1.bf16.msra.mxu0 %v16028_v63  ;;  %10557 = vmatprep.subr.bf16.mxu1 %v16033_v32  ;;  %v16124_v63 = vld [vmem:[%s17136_s11 + $0x15d4] ss:$8 sps:$4 sm:$0xff]   ;;  %v16119_v32 = vld [vmem:[%s17136_s11 + $0x9d0] ss:$8 sps:$4 sm:$0xff]  }
 0x867   : > { %11049 = vmatprep.subr.bf16.mxu0 %v16036_v51  ;;  %v16122_v51 = vld [vmem:[%s17136_s11 + $0x15d0] ss:$8 sps:$4 sm:$0xff]  }
 0x869   : > { %10558 = vmatpush1.bf16.msra.mxu1 %v16031_v35  ;;  %v16127_v35 = vld [vmem:[%s17136_s11 + $0x9e4] ss:$8 sps:$4 sm:$0xff]  }
 0x86a   : > { %11050 = vmatpush1.bf16.msra.mxu0 %v16034_v60  ;;  %10568 = vmatprep.subr.bf16.mxu1 %v16041_v34  ;;  %v16130_v60 = vld [vmem:[%s17136_s11 + $0x15e4] ss:$8 sps:$4 sm:$0xff]   ;;  %v16125_v34 = vld [vmem:[%s17136_s11 + $0x9e0] ss:$8 sps:$4 sm:$0xff]  }
 0x86b   : > { %11060 = vmatprep.subr.bf16.mxu0 %v16046_v20  ;;  %v16128_v20 = vld [vmem:[%s17136_s11 + $0x15e0] ss:$8 sps:$4 sm:$0xff]  }
 0x86c   : > { %10560 = vmatmul.mubr.bf16.vlgmr.msra.gmra.mrb[0].mxu1 %v11973_v2  ;;  %v16133_v2 = vld [vmem:[%s17136_s11 + $0x9f4] ss:$8 sps:$4 sm:$0xff]  }
 0x86d   : > { %11052 = vmatmul.mubr.bf16.vlgmr.msra.gmra.mrb[0].mxu0 %v11997_v15  ;;  %10569 = vmatpush1.bf16.msra.mxu1 %v16039_v9  ;;  %v16136_v15 = vld [vmem:[%s17136_s11 + $0x15f4] ss:$8 sps:$4 sm:$0xff]   ;;  %v16131_v9 = vld [vmem:[%s17136_s11 + $0x9f0] ss:$8 sps:$4 sm:$0xff]  }
 0x86e   : > { %11061 = vmatpush1.bf16.msra.mxu0 %v16044_v1  ;;  %10570 = vmatprep.subr.bf16.mxu1 %v16049_v57  ;;  %v16134_v1 = vld [vmem:[%s17136_s11 + $0x15f0] ss:$8 sps:$4 sm:$0xff]   ;;  %v16141_v57 = vld [vmem:[%s17136_s11 + $0xa04] ss:$8 sps:$4 sm:$0xff]  }
 0x86f   : > { %11062 = vmatprep.subr.bf16.mxu0 %v16052_v27  ;;  %10600 = vmatprep.mubr.bf16.mxu1 %v11976_v23  ;;  %v16146_v27 = vld [vmem:[%s17136_s11 + $0x1604] ss:$8 sps:$4 sm:$0xff]   ;;  %v11975_v23 = vcombine.low %v21255_v6, %v21255_v6 }
 0x870   : > { %11092 = vmatprep.mubr.bf16.mxu0 %v12000_v13  ;;  %v11999_v13 = vcombine.low %v21257_v8, %v21257_v8 }
 0x871   : > { %10571 = vmatpush1.bf16.msra.mxu1 %v16047_v18  ;;  %v21331_v18 = vld [vmem:[#allocation2 + $0x50] sm:$0xff] }
 0x872   : > { %11063 = vmatpush1.bf16.msra.mxu0 %v16050_v24  ;;  %10572 = vmatprep.subr.bf16.mxu1 %v16055_v37  ;;  %v21333_v24 = vld [vmem:[#allocation2 + $0xb0] sm:$0xff]  ;;  %v11978_v6 = vcombine.high %v21331_v18, %v21331_v18 }
 0x873   : > { %11064 = vmatprep.subr.bf16.mxu0 %v16058_v54  ;;  %v16139_v37 = vld [vmem:[%s17136_s11 + $0xa00] ss:$8 sps:$4 sm:$0xff]   ;;  %v12002_v8 = vcombine.high %v21333_v24, %v21333_v24 }
 0x874   : > { %v16144_v54 = vld [vmem:[%s17136_s11 + $0x1600] ss:$8 sps:$4 sm:$0xff]  }
 0x875   : > { %10573 = vmatpush1.bf16.msra.mxu1 %v16053_v40  ;;  %v16149_v40 = vld [vmem:[%s17136_s11 + $0xa14] ss:$8 sps:$4 sm:$0xff]  }
 0x876   : > { %11065 = vmatpush1.bf16.msra.mxu0 %v16056_v58  ;;  %10574 = vmatprep.subr.bf16.mxu1 %v16061_v47  ;;  %v16152_v58 = vld [vmem:[%s17136_s11 + $0x1614] ss:$8 sps:$4 sm:$0xff]   ;;  %v16147_v47 = vld [vmem:[%s17136_s11 + $0xa10] ss:$8 sps:$4 sm:$0xff]  }
 0x877   : > { %11066 = vmatprep.subr.bf16.mxu0 %v16064_v55  ;;  %v16150_v55 = vld [vmem:[%s17136_s11 + $0x1610] ss:$8 sps:$4 sm:$0xff]  }
 0x879   : > { %10575 = vmatpush1.bf16.msra.mxu1 %v16059_v56  ;;  %v16155_v56 = vld [vmem:[%s17136_s11 + $0xa24] ss:$8 sps:$4 sm:$0xff]  }
 0x87a   : > { %11067 = vmatpush1.bf16.msra.mxu0 %v16062_v7  ;;  %10576 = vmatprep.subr.bf16.mxu1 %v16067_v28  ;;  %v16158_v7 = vld [vmem:[%s17136_s11 + $0x1624] ss:$8 sps:$4 sm:$0xff]   ;;  %v16153_v28 = vld [vmem:[%s17136_s11 + $0xa20] ss:$8 sps:$4 sm:$0xff]  }
 0x87b   : > { %11068 = vmatprep.subr.bf16.mxu0 %v16070_v46  ;;  %v16156_v46 = vld [vmem:[%s17136_s11 + $0x1620] ss:$8 sps:$4 sm:$0xff]  }
 0x87d   : > { %10577 = vmatpush1.bf16.msra.mxu1 %v16065_v25  ;;  %v16161_v25 = vld [vmem:[%s17136_s11 + $0xa34] ss:$8 sps:$4 sm:$0xff]  }
 0x87e   : > { %11069 = vmatpush1.bf16.msra.mxu0 %v16068_v39  ;;  %10578 = vmatprep.subr.bf16.mxu1 %v16073_v11  ;;  %v16164_v39 = vld [vmem:[%s17136_s11 + $0x1634] ss:$8 sps:$4 sm:$0xff]   ;;  %v16159_v11 = vld [vmem:[%s17136_s11 + $0xa30] ss:$8 sps:$4 sm:$0xff]  }
 0x87f   : > { %11070 = vmatprep.subr.bf16.mxu0 %v16076_v53  ;;  %v16162_v53 = vld [vmem:[%s17136_s11 + $0x1630] ss:$8 sps:$4 sm:$0xff]  }
 0x881   : > { %10579 = vmatpush1.bf16.msra.mxu1 %v16071_v61  ;;  %v16167_v61 = vld [vmem:[%s17136_s11 + $0xa44] ss:$8 sps:$4 sm:$0xff]  }
 0x882   : > { %11071 = vmatpush1.bf16.msra.mxu0 %v16074_v30  ;;  %10580 = vmatprep.subr.bf16.mxu1 %v16079_v41  ;;  %v16170_v30 = vld [vmem:[%s17136_s11 + $0x1644] ss:$8 sps:$4 sm:$0xff]   ;;  %v16165_v41 = vld [vmem:[%s17136_s11 + $0xa40] ss:$8 sps:$4 sm:$0xff]  }
 0x883   : > { %11072 = vmatprep.subr.bf16.mxu0 %v16082_v4  ;;  %v16168_v4 = vld [vmem:[%s17136_s11 + $0x1640] ss:$8 sps:$4 sm:$0xff]  }
 0x885   : > { %10581 = vmatpush1.bf16.msra.mxu1 %v16077_v16  ;;  %v16173_v16 = vld [vmem:[%s17136_s11 + $0xa54] ss:$8 sps:$4 sm:$0xff]  }
 0x886   : > { %11073 = vmatpush1.bf16.msra.mxu0 %v16080_v43  ;;  %10582 = vmatprep.subr.bf16.mxu1 %v16085_v14  ;;  %v16176_v43 = vld [vmem:[%s17136_s11 + $0x1654] ss:$8 sps:$4 sm:$0xff]   ;;  %v16171_v14 = vld [vmem:[%s17136_s11 + $0xa50] ss:$8 sps:$4 sm:$0xff]  }
 0x887   : > { %11074 = vmatprep.subr.bf16.mxu0 %v16088_v45  ;;  %v16174_v45 = vld [vmem:[%s17136_s11 + $0x1650] ss:$8 sps:$4 sm:$0xff]  }
 0x889   : > { %10583 = vmatpush1.bf16.msra.mxu1 %v16083_v19  ;;  %v16179_v19 = vld [vmem:[%s17136_s11 + $0xa64] ss:$8 sps:$4 sm:$0xff]  }
 0x88a   : > { %11075 = vmatpush1.bf16.msra.mxu0 %v16086_v26  ;;  %10584 = vmatprep.subr.bf16.mxu1 %v16091_v10  ;;  %v16182_v26 = vld [vmem:[%s17136_s11 + $0x1664] ss:$8 sps:$4 sm:$0xff]   ;;  %v16177_v10 = vld [vmem:[%s17136_s11 + $0xa60] ss:$8 sps:$4 sm:$0xff]  }
 0x88b   : > { %11076 = vmatprep.subr.bf16.mxu0 %v16094_v38  ;;  %v16180_v38 = vld [vmem:[%s17136_s11 + $0x1660] ss:$8 sps:$4 sm:$0xff]  }
 0x88d   : > { %10585 = vmatpush1.bf16.msra.mxu1 %v16089_v49  ;;  %v16185_v49 = vld [vmem:[%s17136_s11 + $0xa74] ss:$8 sps:$4 sm:$0xff]  }
 0x88e   : > { %11077 = vmatpush1.bf16.msra.mxu0 %v16092_v62  ;;  %10586 = vmatprep.subr.bf16.mxu1 %v16097_v22  ;;  %v16188_v62 = vld [vmem:[%s17136_s11 + $0x1674] ss:$8 sps:$4 sm:$0xff]   ;;  %v16183_v22 = vld [vmem:[%s17136_s11 + $0xa70] ss:$8 sps:$4 sm:$0xff]  }
 0x88f   : > { %11078 = vmatprep.subr.bf16.mxu0 %v16100_v31  ;;  %v16186_v31 = vld [vmem:[%s17136_s11 + $0x1670] ss:$8 sps:$4 sm:$0xff]  }
 0x891   : > { %10587 = vmatpush1.bf16.msra.mxu1 %v16095_v0  ;;  %v16191_v0 = vld [vmem:[%s17136_s11 + $0xa84] ss:$8 sps:$4 sm:$0xff]  }
 0x892   : > { %11079 = vmatpush1.bf16.msra.mxu0 %v16098_v12  ;;  %10588 = vmatprep.subr.bf16.mxu1 %v16103_v21  ;;  %v16194_v12 = vld [vmem:[%s17136_s11 + $0x1684] ss:$8 sps:$4 sm:$0xff]   ;;  %v16189_v21 = vld [vmem:[%s17136_s11 + $0xa80] ss:$8 sps:$4 sm:$0xff]  }
 0x893   : > { %11080 = vmatprep.subr.bf16.mxu0 %v16106_v3  ;;  %v16192_v3 = vld [vmem:[%s17136_s11 + $0x1680] ss:$8 sps:$4 sm:$0xff]  }
 0x895   : > { %10589 = vmatpush1.bf16.msra.mxu1 %v16101_v36  ;;  %v16197_v36 = vld [vmem:[%s17136_s11 + $0xa94] ss:$8 sps:$4 sm:$0xff]  }
 0x896   : > { %11081 = vmatpush1.bf16.msra.mxu0 %v16104_v44  ;;  %10590 = vmatprep.subr.bf16.mxu1 %v16109_v52  ;;  %v16200_v44 = vld [vmem:[%s17136_s11 + $0x1694] ss:$8 sps:$4 sm:$0xff]   ;;  %v16195_v52 = vld [vmem:[%s17136_s11 + $0xa90] ss:$8 sps:$4 sm:$0xff]  }
 0x897   : > { %11082 = vmatprep.subr.bf16.mxu0 %v16112_v50  ;;  %v16198_v50 = vld [vmem:[%s17136_s11 + $0x1690] ss:$8 sps:$4 sm:$0xff]  }
 0x899   : > { %10591 = vmatpush1.bf16.msra.mxu1 %v16107_v48  ;;  %v16203_v48 = vld [vmem:[%s17136_s11 + $0xaa4] ss:$8 sps:$4 sm:$0xff]  }
 0x89a   : > { %11083 = vmatpush1.bf16.msra.mxu0 %v16110_v42  ;;  %10592 = vmatprep.subr.bf16.mxu1 %v16115_v33  ;;  %v16206_v42 = vld [vmem:[%s17136_s11 + $0x16a4] ss:$8 sps:$4 sm:$0xff]   ;;  %v16201_v33 = vld [vmem:[%s17136_s11 + $0xaa0] ss:$8 sps:$4 sm:$0xff]  }
 0x89b   : > { %11084 = vmatprep.subr.bf16.mxu0 %v16118_v5  ;;  %v16204_v5 = vld [vmem:[%s17136_s11 + $0x16a0] ss:$8 sps:$4 sm:$0xff]  }
 0x89d   : > { %10593 = vmatpush1.bf16.msra.mxu1 %v16113_v17  ;;  %v16209_v17 = vld [vmem:[%s17136_s11 + $0xab4] ss:$8 sps:$4 sm:$0xff]  }
 0x89e   : > { %11085 = vmatpush1.bf16.msra.mxu0 %v16116_v59  ;;  %10594 = vmatprep.subr.bf16.mxu1 %v16121_v29  ;;  %v16212_v59 = vld [vmem:[%s17136_s11 + $0x16b4] ss:$8 sps:$4 sm:$0xff]   ;;  %v16207_v29 = vld [vmem:[%s17136_s11 + $0xab0] ss:$8 sps:$4 sm:$0xff]  }
 0x89f   : > { %11086 = vmatprep.subr.bf16.mxu0 %v16124_v63  ;;  %v16210_v63 = vld [vmem:[%s17136_s11 + $0x16b0] ss:$8 sps:$4 sm:$0xff]  }
 0x8a1   : > { %10595 = vmatpush1.bf16.msra.mxu1 %v16119_v32  ;;  %v16215_v32 = vld [vmem:[%s17136_s11 + $0xac4] ss:$8 sps:$4 sm:$0xff]  }
 0x8a2   : > { %11087 = vmatpush1.bf16.msra.mxu0 %v16122_v51  ;;  %10596 = vmatprep.subr.bf16.mxu1 %v16127_v35  ;;  %v16218_v51 = vld [vmem:[%s17136_s11 + $0x16c4] ss:$8 sps:$4 sm:$0xff]   ;;  %v16213_v35 = vld [vmem:[%s17136_s11 + $0xac0] ss:$8 sps:$4 sm:$0xff]  }
 0x8a3   : > { %11088 = vmatprep.subr.bf16.mxu0 %v16130_v60  ;;  %v16216_v60 = vld [vmem:[%s17136_s11 + $0x16c0] ss:$8 sps:$4 sm:$0xff]  }
 0x8a5   : > { %10597 = vmatpush1.bf16.msra.mxu1 %v16125_v34  ;;  %v16221_v34 = vld [vmem:[%s17136_s11 + $0xad4] ss:$8 sps:$4 sm:$0xff]  }
 0x8a6   : > { %11089 = vmatpush1.bf16.msra.mxu0 %v16128_v20  ;;  %10598 = vmatprep.subr.bf16.mxu1 %v16133_v2  ;;  %v16224_v20 = vld [vmem:[%s17136_s11 + $0x16d4] ss:$8 sps:$4 sm:$0xff]   ;;  %v16219_v2 = vld [vmem:[%s17136_s11 + $0xad0] ss:$8 sps:$4 sm:$0xff]  }
 0x8a7   : > { %11090 = vmatprep.subr.bf16.mxu0 %v16136_v15  ;;  %v16222_v15 = vld [vmem:[%s17136_s11 + $0x16d0] ss:$8 sps:$4 sm:$0xff]  }
 0x8a9   : > { %10599 = vmatpush1.bf16.msra.mxu1 %v16131_v9  ;;  %v16227_v9 = vld [vmem:[%s17136_s11 + $0xae4] ss:$8 sps:$4 sm:$0xff]  }
 0x8aa   : > { %11091 = vmatpush1.bf16.msra.mxu0 %v16134_v1  ;;  %10609 = vmatprep.subr.bf16.mxu1 %v16141_v57  ;;  %v16230_v1 = vld [vmem:[%s17136_s11 + $0x16e4] ss:$8 sps:$4 sm:$0xff]   ;;  %v16225_v57 = vld [vmem:[%s17136_s11 + $0xae0] ss:$8 sps:$4 sm:$0xff]  }
 0x8ab   : > { %11101 = vmatprep.subr.bf16.mxu0 %v16146_v27  ;;  %v16228_v27 = vld [vmem:[%s17136_s11 + $0x16e0] ss:$8 sps:$4 sm:$0xff]  }
 0x8ac   : > { %10601 = vmatmul.mubr.bf16.vlgmr.msra.gmra.mrb[0].mxu1 %v11975_v23  ;;  %v16233_v23 = vld [vmem:[%s17136_s11 + $0xaf4] ss:$8 sps:$4 sm:$0xff]  }
 0x8ad   : > { %11093 = vmatmul.mubr.bf16.vlgmr.msra.gmra.mrb[0].mxu0 %v11999_v13  ;;  %10610 = vmatpush1.bf16.msra.mxu1 %v16139_v37  ;;  %v16236_v13 = vld [vmem:[%s17136_s11 + $0x16f4] ss:$8 sps:$4 sm:$0xff]   ;;  %v16231_v37 = vld [vmem:[%s17136_s11 + $0xaf0] ss:$8 sps:$4 sm:$0xff]  }
 0x8ae   : > { %11102 = vmatpush1.bf16.msra.mxu0 %v16144_v54  ;;  %10611 = vmatprep.subr.bf16.mxu1 %v16149_v40  ;;  %v16234_v54 = vld [vmem:[%s17136_s11 + $0x16f0] ss:$8 sps:$4 sm:$0xff]   ;;  %v16241_v40 = vld [vmem:[%s17136_s11 + $0xb04] ss:$8 sps:$4 sm:$0xff]  }
 0x8af   : > { %11103 = vmatprep.subr.bf16.mxu0 %v16152_v58  ;;  %10641 = vmatprep.mubr.bf16.mxu1 %v11978_v6  ;;  %v16246_v58 = vld [vmem:[%s17136_s11 + $0x1704] ss:$8 sps:$4 sm:$0xff]   ;;  %v11977_v6 = vcombine.low %v21331_v18, %v21331_v18 }
 0x8b0   : > { %11133 = vmatprep.mubr.bf16.mxu0 %v12002_v8  ;;  %v12001_v8 = vcombine.low %v21333_v24, %v21333_v24 }
 0x8b1   : > { %10612 = vmatpush1.bf16.msra.mxu1 %v16147_v47  ;;  %v21407_v47 = vld [vmem:[#allocation2 + $0x58] sm:$0xff] }
 0x8b2   : > { %11104 = vmatpush1.bf16.msra.mxu0 %v16150_v55  ;;  %10613 = vmatprep.subr.bf16.mxu1 %v16155_v56  ;;  %v21409_v55 = vld [vmem:[#allocation2 + $0xb8] sm:$0xff]  ;;  %v16239_v56 = vld [vmem:[%s17136_s11 + $0xb00] ss:$8 sps:$4 sm:$0xff]   ;;  %v11980_v18 = vcombine.high %v21407_v47, %v21407_v47 }
 0x8b3   : > { %11105 = vmatprep.subr.bf16.mxu0 %v16158_v7  ;;  %v16244_v7 = vld [vmem:[%s17136_s11 + $0x1700] ss:$8 sps:$4 sm:$0xff]   ;;  %v12004_v24 = vcombine.high %v21409_v55, %v21409_v55 }
 0x8b5   : > { %10614 = vmatpush1.bf16.msra.mxu1 %v16153_v28  ;;  %v16249_v28 = vld [vmem:[%s17136_s11 + $0xb14] ss:$8 sps:$4 sm:$0xff]  }
 0x8b6   : > { %11106 = vmatpush1.bf16.msra.mxu0 %v16156_v46  ;;  %10615 = vmatprep.subr.bf16.mxu1 %v16161_v25  ;;  %v16252_v46 = vld [vmem:[%s17136_s11 + $0x1714] ss:$8 sps:$4 sm:$0xff]   ;;  %v16247_v25 = vld [vmem:[%s17136_s11 + $0xb10] ss:$8 sps:$4 sm:$0xff]  }
 0x8b7   : > { %11107 = vmatprep.subr.bf16.mxu0 %v16164_v39  ;;  %v16250_v39 = vld [vmem:[%s17136_s11 + $0x1710] ss:$8 sps:$4 sm:$0xff]  }
 0x8b9   : > { %10616 = vmatpush1.bf16.msra.mxu1 %v16159_v11  ;;  %v16255_v11 = vld [vmem:[%s17136_s11 + $0xb24] ss:$8 sps:$4 sm:$0xff]  }
 0x8ba   : > { %11108 = vmatpush1.bf16.msra.mxu0 %v16162_v53  ;;  %10617 = vmatprep.subr.bf16.mxu1 %v16167_v61  ;;  %v16258_v53 = vld [vmem:[%s17136_s11 + $0x1724] ss:$8 sps:$4 sm:$0xff]   ;;  %v16253_v61 = vld [vmem:[%s17136_s11 + $0xb20] ss:$8 sps:$4 sm:$0xff]  }
 0x8bb   : > { %11109 = vmatprep.subr.bf16.mxu0 %v16170_v30  ;;  %v16256_v30 = vld [vmem:[%s17136_s11 + $0x1720] ss:$8 sps:$4 sm:$0xff]  }
 0x8bd   : > { %10618 = vmatpush1.bf16.msra.mxu1 %v16165_v41  ;;  %v16261_v41 = vld [vmem:[%s17136_s11 + $0xb34] ss:$8 sps:$4 sm:$0xff]  }
 0x8be   : > { %11110 = vmatpush1.bf16.msra.mxu0 %v16168_v4  ;;  %10619 = vmatprep.subr.bf16.mxu1 %v16173_v16  ;;  %v16264_v4 = vld [vmem:[%s17136_s11 + $0x1734] ss:$8 sps:$4 sm:$0xff]   ;;  %v16259_v16 = vld [vmem:[%s17136_s11 + $0xb30] ss:$8 sps:$4 sm:$0xff]  }
 0x8bf   : > { %11111 = vmatprep.subr.bf16.mxu0 %v16176_v43  ;;  %v16262_v43 = vld [vmem:[%s17136_s11 + $0x1730] ss:$8 sps:$4 sm:$0xff]  }
 0x8c1   : > { %10620 = vmatpush1.bf16.msra.mxu1 %v16171_v14  ;;  %v16267_v14 = vld [vmem:[%s17136_s11 + $0xb44] ss:$8 sps:$4 sm:$0xff]  }
 0x8c2   : > { %11112 = vmatpush1.bf16.msra.mxu0 %v16174_v45  ;;  %10621 = vmatprep.subr.bf16.mxu1 %v16179_v19  ;;  %v16270_v45 = vld [vmem:[%s17136_s11 + $0x1744] ss:$8 sps:$4 sm:$0xff]   ;;  %v16265_v19 = vld [vmem:[%s17136_s11 + $0xb40] ss:$8 sps:$4 sm:$0xff]  }
 0x8c3   : > { %11113 = vmatprep.subr.bf16.mxu0 %v16182_v26  ;;  %v16268_v26 = vld [vmem:[%s17136_s11 + $0x1740] ss:$8 sps:$4 sm:$0xff]  }
 0x8c5   : > { %10622 = vmatpush1.bf16.msra.mxu1 %v16177_v10  ;;  %v16273_v10 = vld [vmem:[%s17136_s11 + $0xb54] ss:$8 sps:$4 sm:$0xff]  }
 0x8c6   : > { %11114 = vmatpush1.bf16.msra.mxu0 %v16180_v38  ;;  %10623 = vmatprep.subr.bf16.mxu1 %v16185_v49  ;;  %v16276_v38 = vld [vmem:[%s17136_s11 + $0x1754] ss:$8 sps:$4 sm:$0xff]   ;;  %v16271_v49 = vld [vmem:[%s17136_s11 + $0xb50] ss:$8 sps:$4 sm:$0xff]  }
 0x8c7   : > { %11115 = vmatprep.subr.bf16.mxu0 %v16188_v62  ;;  %v16274_v62 = vld [vmem:[%s17136_s11 + $0x1750] ss:$8 sps:$4 sm:$0xff]  }
 0x8c9   : > { %10624 = vmatpush1.bf16.msra.mxu1 %v16183_v22  ;;  %v16279_v22 = vld [vmem:[%s17136_s11 + $0xb64] ss:$8 sps:$4 sm:$0xff]  }
 0x8ca   : > { %11116 = vmatpush1.bf16.msra.mxu0 %v16186_v31  ;;  %10625 = vmatprep.subr.bf16.mxu1 %v16191_v0  ;;  %v16282_v31 = vld [vmem:[%s17136_s11 + $0x1764] ss:$8 sps:$4 sm:$0xff]   ;;  %v16277_v0 = vld [vmem:[%s17136_s11 + $0xb60] ss:$8 sps:$4 sm:$0xff]  }
 0x8cb   : > { %11117 = vmatprep.subr.bf16.mxu0 %v16194_v12  ;;  %v16280_v12 = vld [vmem:[%s17136_s11 + $0x1760] ss:$8 sps:$4 sm:$0xff]  }
 0x8cd   : > { %10626 = vmatpush1.bf16.msra.mxu1 %v16189_v21  ;;  %v16285_v21 = vld [vmem:[%s17136_s11 + $0xb74] ss:$8 sps:$4 sm:$0xff]  }
 0x8ce   : > { %11118 = vmatpush1.bf16.msra.mxu0 %v16192_v3  ;;  %10627 = vmatprep.subr.bf16.mxu1 %v16197_v36  ;;  %v16288_v3 = vld [vmem:[%s17136_s11 + $0x1774] ss:$8 sps:$4 sm:$0xff]   ;;  %v16283_v36 = vld [vmem:[%s17136_s11 + $0xb70] ss:$8 sps:$4 sm:$0xff]  }
 0x8cf   : > { %11119 = vmatprep.subr.bf16.mxu0 %v16200_v44  ;;  %v16286_v44 = vld [vmem:[%s17136_s11 + $0x1770] ss:$8 sps:$4 sm:$0xff]  }
 0x8d1   : > { %10628 = vmatpush1.bf16.msra.mxu1 %v16195_v52  ;;  %v16291_v52 = vld [vmem:[%s17136_s11 + $0xb84] ss:$8 sps:$4 sm:$0xff]  }
 0x8d2   : > { %11120 = vmatpush1.bf16.msra.mxu0 %v16198_v50  ;;  %10629 = vmatprep.subr.bf16.mxu1 %v16203_v48  ;;  %v16294_v50 = vld [vmem:[%s17136_s11 + $0x1784] ss:$8 sps:$4 sm:$0xff]   ;;  %v16289_v48 = vld [vmem:[%s17136_s11 + $0xb80] ss:$8 sps:$4 sm:$0xff]  }
 0x8d3   : > { %11121 = vmatprep.subr.bf16.mxu0 %v16206_v42  ;;  %v16292_v42 = vld [vmem:[%s17136_s11 + $0x1780] ss:$8 sps:$4 sm:$0xff]  }
 0x8d5   : > { %10630 = vmatpush1.bf16.msra.mxu1 %v16201_v33  ;;  %v16297_v33 = vld [vmem:[%s17136_s11 + $0xb94] ss:$8 sps:$4 sm:$0xff]  }
 0x8d6   : > { %11122 = vmatpush1.bf16.msra.mxu0 %v16204_v5  ;;  %10631 = vmatprep.subr.bf16.mxu1 %v16209_v17  ;;  %v16300_v5 = vld [vmem:[%s17136_s11 + $0x1794] ss:$8 sps:$4 sm:$0xff]   ;;  %v16295_v17 = vld [vmem:[%s17136_s11 + $0xb90] ss:$8 sps:$4 sm:$0xff]  }
 0x8d7   : > { %11123 = vmatprep.subr.bf16.mxu0 %v16212_v59  ;;  %v16298_v59 = vld [vmem:[%s17136_s11 + $0x1790] ss:$8 sps:$4 sm:$0xff]  }
 0x8d9   : > { %10632 = vmatpush1.bf16.msra.mxu1 %v16207_v29  ;;  %v16303_v29 = vld [vmem:[%s17136_s11 + $0xba4] ss:$8 sps:$4 sm:$0xff]  }
 0x8da   : > { %11124 = vmatpush1.bf16.msra.mxu0 %v16210_v63  ;;  %10633 = vmatprep.subr.bf16.mxu1 %v16215_v32  ;;  %v16306_v63 = vld [vmem:[%s17136_s11 + $0x17a4] ss:$8 sps:$4 sm:$0xff]   ;;  %v16301_v32 = vld [vmem:[%s17136_s11 + $0xba0] ss:$8 sps:$4 sm:$0xff]  }
 0x8db   : > { %11125 = vmatprep.subr.bf16.mxu0 %v16218_v51  ;;  %v16304_v51 = vld [vmem:[%s17136_s11 + $0x17a0] ss:$8 sps:$4 sm:$0xff]  }
 0x8dd   : > { %10634 = vmatpush1.bf16.msra.mxu1 %v16213_v35  ;;  %v16309_v35 = vld [vmem:[%s17136_s11 + $0xbb4] ss:$8 sps:$4 sm:$0xff]  }
 0x8de   : > { %11126 = vmatpush1.bf16.msra.mxu0 %v16216_v60  ;;  %10635 = vmatprep.subr.bf16.mxu1 %v16221_v34  ;;  %v16312_v60 = vld [vmem:[%s17136_s11 + $0x17b4] ss:$8 sps:$4 sm:$0xff]   ;;  %v16307_v34 = vld [vmem:[%s17136_s11 + $0xbb0] ss:$8 sps:$4 sm:$0xff]  }
 0x8df   : > { %11127 = vmatprep.subr.bf16.mxu0 %v16224_v20  ;;  %v16310_v20 = vld [vmem:[%s17136_s11 + $0x17b0] ss:$8 sps:$4 sm:$0xff]  }
 0x8e1   : > { %10636 = vmatpush1.bf16.msra.mxu1 %v16219_v2  ;;  %v16315_v2 = vld [vmem:[%s17136_s11 + $0xbc4] ss:$8 sps:$4 sm:$0xff]  }
 0x8e2   : > { %11128 = vmatpush1.bf16.msra.mxu0 %v16222_v15  ;;  %10637 = vmatprep.subr.bf16.mxu1 %v16227_v9  ;;  %v16318_v15 = vld [vmem:[%s17136_s11 + $0x17c4] ss:$8 sps:$4 sm:$0xff]   ;;  %v16313_v9 = vld [vmem:[%s17136_s11 + $0xbc0] ss:$8 sps:$4 sm:$0xff]  }
 0x8e3   : > { %11129 = vmatprep.subr.bf16.mxu0 %v16230_v1  ;;  %v16316_v1 = vld [vmem:[%s17136_s11 + $0x17c0] ss:$8 sps:$4 sm:$0xff]  }
 0x8e5   : > { %10638 = vmatpush1.bf16.msra.mxu1 %v16225_v57  ;;  %v16321_v57 = vld [vmem:[%s17136_s11 + $0xbd4] ss:$8 sps:$4 sm:$0xff]  }
 0x8e6   : > { %11130 = vmatpush1.bf16.msra.mxu0 %v16228_v27  ;;  %10639 = vmatprep.subr.bf16.mxu1 %v16233_v23  ;;  %v16324_v27 = vld [vmem:[%s17136_s11 + $0x17d4] ss:$8 sps:$4 sm:$0xff]   ;;  %v16319_v23 = vld [vmem:[%s17136_s11 + $0xbd0] ss:$8 sps:$4 sm:$0xff]  }
 0x8e7   : > { %11131 = vmatprep.subr.bf16.mxu0 %v16236_v13  ;;  %v16322_v13 = vld [vmem:[%s17136_s11 + $0x17d0] ss:$8 sps:$4 sm:$0xff]  }
 0x8e9   : > { %10640 = vmatpush1.bf16.msra.mxu1 %v16231_v37  ;;  %v16327_v37 = vld [vmem:[%s17136_s11 + $0xbe4] ss:$8 sps:$4 sm:$0xff]  }
 0x8ea   : > { %11132 = vmatpush1.bf16.msra.mxu0 %v16234_v54  ;;  %10650 = vmatprep.subr.bf16.mxu1 %v16241_v40  ;;  %v16330_v54 = vld [vmem:[%s17136_s11 + $0x17e4] ss:$8 sps:$4 sm:$0xff]   ;;  %v16325_v40 = vld [vmem:[%s17136_s11 + $0xbe0] ss:$8 sps:$4 sm:$0xff]  }
 0x8eb   : > { %11142 = vmatprep.subr.bf16.mxu0 %v16246_v58  ;;  %v16328_v58 = vld [vmem:[%s17136_s11 + $0x17e0] ss:$8 sps:$4 sm:$0xff]  }
 0x8ec   : > { %10642 = vmatmul.mubr.bf16.vlgmr.msra.gmra.mrb[0].mxu1 %v11977_v6  ;;  %v16333_v6 = vld [vmem:[%s17136_s11 + $0xbf4] ss:$8 sps:$4 sm:$0xff]  }
 0x8ed   : > { %11134 = vmatmul.mubr.bf16.vlgmr.msra.gmra.mrb[0].mxu0 %v12001_v8  ;;  %10651 = vmatpush1.bf16.msra.mxu1 %v16239_v56  ;;  %v16336_v8 = vld [vmem:[%s17136_s11 + $0x17f4] ss:$8 sps:$4 sm:$0xff]   ;;  %v16331_v56 = vld [vmem:[%s17136_s11 + $0xbf0] ss:$8 sps:$4 sm:$0xff]  }
 0x8ee   : > { %11143 = vmatpush1.bf16.msra.mxu0 %v16244_v7  ;;  %10652 = vmatprep.subr.bf16.mxu1 %v16249_v28  ;;  %v16334_v7 = vld [vmem:[%s17136_s11 + $0x17f0] ss:$8 sps:$4 sm:$0xff]   ;;  %v16343_v28 = vld [vmem:[%s17136_s11 + $0x1804] ss:$8 sps:$4 sm:$0xff]  }
 0x8ef   : > { %11144 = vmatprep.subr.bf16.mxu0 %v16252_v46  ;;  %10682 = vmatprep.mubr.bf16.mxu1 %v11980_v18  ;;  %v11979_v46 = vcombine.low %v21407_v47, %v21407_v47  ;;  %v12003_v18 = vcombine.low %v21409_v55, %v21409_v55  ;;  %v16349_v47 = vld [vmem:[%s17136_s11 + $0x1824] ss:$8 sps:$4 sm:$0xff]   ;;  %v16347_v55 = vld [vmem:[%s17136_s11 + $0x1820] ss:$8 sps:$4 sm:$0xff]  }
 0x8f0   : > { %11174 = vmatprep.mubr.bf16.mxu0 %v12004_v24  ;;  %v16341_v24 = vld [vmem:[%s17136_s11 + $0x1800] ss:$8 sps:$4 sm:$0xff]  }
 0x8f1   : > { %10653 = vmatpush1.bf16.msra.mxu1 %v16247_v25  ;;  %v16346_v25 = vld [vmem:[%s17136_s11 + $0x1814] ss:$8 sps:$4 sm:$0xff]  }
 0x8f2   : > { %11145 = vmatpush1.bf16.msra.mxu0 %v16250_v39  ;;  %10654 = vmatprep.subr.bf16.mxu1 %v16255_v11  ;;  %v16344_v39 = vld [vmem:[%s17136_s11 + $0x1810] ss:$8 sps:$4 sm:$0xff]   ;;  %v16724_v11 = vmov 0  }
 0x8f3   : > { %11146 = vmatprep.subr.bf16.mxu0 %v16258_v53  ;;  %v16352_v53 = vld [vmem:[%s17136_s11 + $0x1834] ss:$8 sps:$4 sm:$0xff]  }
 0x8f5   : > { %10655 = vmatpush1.bf16.msra.mxu1 %v16253_v61  ;;  %v16350_v61 = vld [vmem:[%s17136_s11 + $0x1830] ss:$8 sps:$4 sm:$0xff]  }
 0x8f6   : > { %11147 = vmatpush1.bf16.msra.mxu0 %v16256_v30  ;;  %10656 = vmatprep.subr.bf16.mxu1 %v16261_v41  ;;  %v16355_v30 = vld [vmem:[%s17136_s11 + $0x1844] ss:$8 sps:$4 sm:$0xff]   ;;  %v16353_v41 = vld [vmem:[%s17136_s11 + $0x1840] ss:$8 sps:$4 sm:$0xff]  }
 0x8f7   : > { %11148 = vmatprep.subr.bf16.mxu0 %v16264_v4  ;;  %v16358_v4 = vld [vmem:[%s17136_s11 + $0x1854] ss:$8 sps:$4 sm:$0xff]  }
 0x8f9   : > { %10657 = vmatpush1.bf16.msra.mxu1 %v16259_v16  ;;  %v16356_v16 = vld [vmem:[%s17136_s11 + $0x1850] ss:$8 sps:$4 sm:$0xff]  }
 0x8fa   : > { %11149 = vmatpush1.bf16.msra.mxu0 %v16262_v43  ;;  %10658 = vmatprep.subr.bf16.mxu1 %v16267_v14  ;;  %v16361_v43 = vld [vmem:[%s17136_s11 + $0x1864] ss:$8 sps:$4 sm:$0xff]   ;;  %v16359_v14 = vld [vmem:[%s17136_s11 + $0x1860] ss:$8 sps:$4 sm:$0xff]  }
 0x8fb   : > { %11150 = vmatprep.subr.bf16.mxu0 %v16270_v45  ;;  %v16364_v45 = vld [vmem:[%s17136_s11 + $0x1874] ss:$8 sps:$4 sm:$0xff]  }
 0x8fd   : > { %10659 = vmatpush1.bf16.msra.mxu1 %v16265_v19  ;;  %v16362_v19 = vld [vmem:[%s17136_s11 + $0x1870] ss:$8 sps:$4 sm:$0xff]   ;;  %s21873_s11 = sld [smem:[#allocation22_spill]] }
 0x8fe   : > { %11151 = vmatpush1.bf16.msra.mxu0 %v16268_v26  ;;  %10660 = vmatprep.subr.bf16.mxu1 %v16273_v10  ;;  %v16365_v26 = vld [vmem:[#allocation2 + $0xc0] ss:$0 sps:$4 sm:$0xff]  }
 0x8ff   : > { %11152 = vmatprep.subr.bf16.mxu0 %v16276_v38  ;;  %v11241_v10 = vld [vmem:[%s17161_s12 + $0x80] sm:$0xff]  ;;  %v11242_v38 = vld [vmem:[%s17161_s12 + $0x88] sm:$0xff] }
 0x901   : > { %10661 = vmatpush1.bf16.msra.mxu1 %v16271_v49  ;;  %v14720_v49 = vpack.c.bf16 %v11242_v38, %v11241_v10 }
 0x902   : > { %11153 = vmatpush1.bf16.msra.mxu0 %v16274_v62  ;;  %10662 = vmatprep.subr.bf16.mxu1 %v16279_v22  ;;  %v11225_v62 = vld [vmem:[%s17161_s12] sm:$0xff]  ;;  %v11226_v22 = vld [vmem:[%s17161_s12 + $0x8] sm:$0xff] }
 0x903   : > { %11154 = vmatprep.subr.bf16.mxu0 %v16282_v31  ;;  %v11243_v31 = vld [vmem:[%s17161_s12 + $0x90] sm:$0xff]  ;;  %p11330_p13 = scmp.eq.s32.totalorder %s21873_s11, 1 }
 0x905   : > { %10663 = vmatpush1.bf16.msra.mxu1 %v16277_v0  ;;  %v14722_v0 = vpack.c.bf16 %v11226_v22, %v11225_v62  ;;  %p11332_p6 = pnand %p11331_p0, %p11330_p13  ;;  %v11224_v22 = vld [vmem:[%s17156_s4] sm:$0xff] }
 0x906   : > { %11155 = vmatpush1.bf16.msra.mxu0 %v16280_v12  ;;  %10664 = vmatprep.subr.bf16.mxu1 %v16285_v21  ;;  %v11244_v12 = vld [vmem:[%s17161_s12 + $0x98] sm:$0xff]  ;;  %v11227_v21 = vld [vmem:[%s17161_s12 + $0x10] sm:$0xff] }
 0x907   : > { %11156 = vmatprep.subr.bf16.mxu0 %v16288_v3  ;;  %v11228_v3 = vld [vmem:[%s17161_s12 + $0x18] sm:$0xff] }
 0x909   : > { %10665 = vmatpush1.bf16.msra.mxu1 %v16283_v36  ;;  %v14724_v36 = vpack.c.bf16 %v11244_v12, %v11243_v31 }
 0x90a   : > { %11157 = vmatpush1.bf16.msra.mxu0 %v16286_v44  ;;  %10666 = vmatprep.subr.bf16.mxu1 %v16291_v52  ;;  %v11245_v44 = vld [vmem:[%s17161_s12 + $0xa0] sm:$0xff]  ;;  %v11246_v52 = vld [vmem:[%s17161_s12 + $0xa8] sm:$0xff] }
 0x90b   : > { %11158 = vmatprep.subr.bf16.mxu0 %v16294_v50  ;;  %v14726_v50 = vpack.c.bf16 %v11228_v3, %v11227_v21  ;;  %v12790_v3 = vld [vmem:[#allocation15] ss:$0 sm:$0xff] (!%p11332_p6) }
 0x90d   : > { %10667 = vmatpush1.bf16.msra.mxu1 %v16289_v48  ;;  %v14728_v48 = vpack.c.bf16 %v11246_v52, %v11245_v44 }
 0x90e   : > { %11159 = vmatpush1.bf16.msra.mxu0 %v16292_v42  ;;  %10668 = vmatprep.subr.bf16.mxu1 %v16297_v33  ;;  %v11229_v42 = vld [vmem:[%s17161_s12 + $0x20] sm:$0xff]  ;;  %v11230_v33 = vld [vmem:[%s17161_s12 + $0x28] sm:$0xff] }
 0x90f   : > { %11160 = vmatprep.subr.bf16.mxu0 %v16300_v5  ;;  %v11247_v5 = vld [vmem:[%s17161_s12 + $0xb0] sm:$0xff] }
 0x911   : > { %10669 = vmatpush1.bf16.msra.mxu1 %v16295_v17  ;;  %v11248_v17 = vld [vmem:[%s17161_s12 + $0xb8] sm:$0xff] }
 0x912   : > { %11161 = vmatpush1.bf16.msra.mxu0 %v16298_v59  ;;  %10670 = vmatprep.subr.bf16.mxu1 %v16303_v29  ;;  %v14730_v59 = vpack.c.bf16 %v11230_v33, %v11229_v42  ;;  %v14732_v29 = vpack.c.bf16 %v11248_v17, %v11247_v5 }
 0x913   : > { %11162 = vmatprep.subr.bf16.mxu0 %v16306_v63  ;;  %v11231_v63 = vld [vmem:[%s17161_s12 + $0x30] sm:$0xff] }
 0x915   : > { %10671 = vmatpush1.bf16.msra.mxu1 %v16301_v32  ;;  %v11232_v32 = vld [vmem:[%s17161_s12 + $0x38] sm:$0xff] }
 0x916   : > { %11163 = vmatpush1.bf16.msra.mxu0 %v16304_v51  ;;  %10672 = vmatprep.subr.bf16.mxu1 %v16309_v35  ;;  %v11249_v51 = vld [vmem:[%s17161_s12 + $0xc0] sm:$0xff]  ;;  %v11250_v35 = vld [vmem:[%s17161_s12 + $0xc8] sm:$0xff] }
 0x917   : > { %11164 = vmatprep.subr.bf16.mxu0 %v16312_v60  ;;  %v14734_v60 = vpack.c.bf16 %v11232_v32, %v11231_v63 }
 0x919   : > { %10673 = vmatpush1.bf16.msra.mxu1 %v16307_v34  ;;  %v14736_v34 = vpack.c.bf16 %v11250_v35, %v11249_v51 }
 0x91a   : > { %11165 = vmatpush1.bf16.msra.mxu0 %v16310_v20  ;;  %10674 = vmatprep.subr.bf16.mxu1 %v16315_v2  ;;  %v11233_v20 = vld [vmem:[%s17161_s12 + $0x40] sm:$0xff]  ;;  %v11234_v2 = vld [vmem:[%s17161_s12 + $0x48] sm:$0xff] }
 0x91b   : > { %11166 = vmatprep.subr.bf16.mxu0 %v16318_v15  ;;  %v11251_v15 = vld [vmem:[%s17161_s12 + $0xd0] sm:$0xff] }
 0x91d   : > { %10675 = vmatpush1.bf16.msra.mxu1 %v16313_v9  ;;  %v11252_v9 = vld [vmem:[%s17161_s12 + $0xd8] sm:$0xff] }
 0x91e   : > { %11167 = vmatpush1.bf16.msra.mxu0 %v16316_v1  ;;  %10676 = vmatprep.subr.bf16.mxu1 %v16321_v57  ;;  %v14738_v1 = vpack.c.bf16 %v11234_v2, %v11233_v20  ;;  %v14740_v57 = vpack.c.bf16 %v11252_v9, %v11251_v15 }
 0x91f   : > { %11168 = vmatprep.subr.bf16.mxu0 %v16324_v27  ;;  %v11235_v27 = vld [vmem:[%s17161_s12 + $0x50] sm:$0xff] }
 0x921   : > { %10677 = vmatpush1.bf16.msra.mxu1 %v16319_v23  ;;  %v11236_v23 = vld [vmem:[%s17161_s12 + $0x58] sm:$0xff] }
 0x922   : > { %11169 = vmatpush1.bf16.msra.mxu0 %v16322_v13  ;;  %10678 = vmatprep.subr.bf16.mxu1 %v16327_v37  ;;  %v11253_v13 = vld [vmem:[%s17161_s12 + $0xe0] sm:$0xff]  ;;  %v11254_v37 = vld [vmem:[%s17161_s12 + $0xe8] sm:$0xff] }
 0x923   : > { %11170 = vmatprep.subr.bf16.mxu0 %v16330_v54  ;;  %v14742_v54 = vpack.c.bf16 %v11236_v23, %v11235_v27 }
 0x925   : > { %10679 = vmatpush1.bf16.msra.mxu1 %v16325_v40  ;;  %v14744_v40 = vpack.c.bf16 %v11254_v37, %v11253_v13 }
 0x926   : > { %11171 = vmatpush1.bf16.msra.mxu0 %v16328_v58  ;;  %10680 = vmatprep.subr.bf16.mxu1 %v16333_v6  ;;  %v11237_v58 = vld [vmem:[%s17161_s12 + $0x60] sm:$0xff]  ;;  %v11238_v6 = vld [vmem:[%s17161_s12 + $0x68] sm:$0xff] }
 0x927   : > { %11172 = vmatprep.subr.bf16.mxu0 %v16336_v8  ;;  %v14746_v8 = vpack.c.bf16 %v11238_v6, %v11237_v58 }
 0x929   : > { %10681 = vmatpush1.bf16.msra.mxu1 %v16331_v56  ;;  %v11255_v56 = vld [vmem:[%s17161_s12 + $0xf0] sm:$0xff] }
 0x92a   : > { %11173 = vmatpush1.bf16.msra.mxu0 %v16334_v7  ;;  %14721 = vmatprep.subr.bf16.mxu1 %v14720_v49  ;;  %v11256_v7 = vld [vmem:[%s17161_s12 + $0xf8] sm:$0xff] }
 0x92b   : > { %11183 = vmatprep.subr.bf16.mxu0 %v16343_v28  ;;  %v14748_v28 = vpack.c.bf16 %v11256_v7, %v11255_v56 }
 0x92c   : > { %10683 = vmatmul.mubr.bf16.vlgmr.msra.gmra.mrb[0].mxu1 %v11979_v46  ;;  %v11239_v46 = vld [vmem:[%s17161_s12 + $0x70] sm:$0xff] }
 0x92d   : > { %11175 = vmatmul.mubr.bf16.vlgmr.msra.gmra.mrb[0].mxu0 %v12003_v18  ;;  %14723 = vmatpush3.bf16.msra.mxu1 %v14722_v0  ;;  %v11240_v18 = vld [vmem:[%s17161_s12 + $0x78] sm:$0xff] }
 0x92e   : > { %11184 = vmatpush1.bf16.msra.mxu0 %v16341_v24  ;;  %11215 = vmatprep.mubr.bf16.mxu0 %v16724_v11  ;;  %v14750_v24 = vpack.c.bf16 %v11240_v18, %v11239_v46 }
 0x92f   : > { %11185 = vmatprep.subr.bf16.mxu0 %v16346_v25  ;;  %14725 = vmatprep.subr.bf16.mxu1 %v14724_v36 }
 0x931   : > { %14727 = vmatpush3.bf16.msra.mxu1 %v14726_v50 }
 0x932   : > { %11186 = vmatpush1.bf16.msra.mxu0 %v16344_v39  ;;  %14729 = vmatprep.subr.bf16.mxu1 %v14728_v48 }
 0x933   : > { %11187 = vmatprep.subr.bf16.mxu0 %v16349_v47 }
 0x935   : > { %14731 = vmatpush3.bf16.msra.mxu1 %v14730_v59 }
 0x936   : > { %11188 = vmatpush1.bf16.msra.mxu0 %v16347_v55  ;;  %14733 = vmatprep.subr.bf16.mxu1 %v14732_v29  ;;  %v6097_v55 = vlaneseq }
 0x937   : > { %11189 = vmatprep.subr.bf16.mxu0 %v16352_v53 }
 0x938   : > { %v6098_v53 = vshrl.u32 %v6097_v55, 7 }
 0x939   : > { %14735 = vmatpush3.bf16.msra.mxu1 %v14734_v60 }
 0x93a   : > { %11190 = vmatpush1.bf16.msra.mxu0 %v16350_v61  ;;  %14737 = vmatprep.subr.bf16.mxu1 %v14736_v34  ;;  %v6099_v61 = vsub.s32 0, %v6098_v53 }
 0x93b   : > { %11191 = vmatprep.subr.bf16.mxu0 %v16355_v30  ;;  %v6095_v30 = vld [vmem:[%s521_s8] sm:$0x3] }
 0x93d   : > { %14739 = vmatpush3.bf16.msra.mxu1 %v14738_v1 }
 0x93e   : > { %11192 = vmatpush1.bf16.msra.mxu0 %v16353_v41  ;;  %14741 = vmatprep.subr.bf16.mxu1 %v14740_v57  ;;  %v6103_v41 = vsub.s32 1, %v6098_v53 }
 0x93f   : > { %11193 = vmatprep.subr.bf16.mxu0 %v16358_v4  ;;  %v6100_v4 = vrot.slane %v6095_v30, %v6099_v61 }
 0x941   : > { %14743 = vmatpush3.bf16.msra.mxu1 %v14742_v54 }
 0x942   : > { %11194 = vmatpush1.bf16.msra.mxu0 %v16356_v16  ;;  %14745 = vmatprep.subr.bf16.mxu1 %v14744_v40  ;;  %v6104_v16 = vrot.slane %v6095_v30, %v6103_v41 }
 0x943   : > { %11195 = vmatprep.subr.bf16.mxu0 %v16361_v43 }
 0x945   : > { %14747 = vmatpush3.bf16.msra.mxu1 %v14746_v8 }
 0x946   : > { %11196 = vmatpush1.bf16.msra.mxu0 %v16359_v14  ;;  %14749 = vmatprep.subr.bf16.mxu1 %v14748_v28 }
 0x947   : > { %11197 = vmatprep.subr.bf16.mxu0 %v16364_v45 }
 0x949   : > { %14751 = vmatpush3.bf16.msra.mxu1 %v14750_v24 }
 0x94a   : > { %11198 = vmatpush1.bf16.msra.mxu0 %v16362_v19 }
 0x94d   : > { %11216 = vmatmul.mubr.bf16.vlgmr.msra.gmra.mrb[0].mxu0 %v16365_v26 }
 0x9ff   : > { %v10684_v25 = vpop.f32.mrb[0].mxu1 }
 0xa00   : > { %v10686_v39 = vpop.f32.mrb[1].mxu1  ;;  %v14760_v43 = vadd.f32 %v10684_v25, %v6100_v4 }
 0xa01   : > { %v10688_v11 = vpop.f32.mrb[2].mxu1  ;;  %v14762_v14 = vadd.f32 %v10686_v39, %v6104_v16 }
 0xa02   : > { %v10689_v47 = vpop.f32.mrb[3].mxu1 }
 0xa20   : > { %v11217_v45 = vpop.f32.mrb[0].mxu0 }
 0xa21   : > { %v14761_v19 = vadd.f32 %v14760_v43, %v11217_v45  ;;  %v11219_v26 = vpop.f32.mrb[1].mxu0 }
 0xa22   : > { %v14763_v10 = vadd.f32 %v14762_v14, %v11219_v26  ;;  %v11221_v38 = vpop.f32.mrb[2].mxu0 }
 0xa23   : > { %v11222_v49 = vpop.f32.mrb[3].mxu0 }
 0xa24   : > { %11321 = vmatprep.mubr.f32.mxu1 %v14763_v10 }
 0xa25   : > { %11322 = vmatmul.mubr.f32.vlgmr.msra.gmra.mrb[4].mxu1 %v14761_v19 }
 0xaf8   : > { %v13401_v62 = vpop.f32.mrb[4].mxu1  ;;  %11335 = sbr.rel (%p11332_p6) target bundleno = 2825 (0xb09), region = 108 }
 0xaf9   : > { %v13402_v31 = vpop.f32.mrb[5].mxu1 }
 0xafa   : > { %v13403_v0 = vadd.f32 %v13402_v31, %v13401_v62 }
 0xafc   : > { %v11327_v12 = vadd.f32 %v13403_v0, %v11224_v22 }
 0xafe   : > { %11329 = vst.msk [vmem:[%s17156_s4] sm:$0xff] %vm11328_vm13, %v11327_v12 }
 0xb05   : > { %v11336_v21 = vld [vmem:[%s17156_s4] sm:$0xff] }
 0xb06   : > { %v11344_v36 = vadd.f32 %v12790_v3, %v11336_v21 }
 0xb08   : > { %11345 = vst.msk [vmem:[%s17156_s4] sm:$0xff] %vm11328_vm13, %v11344_v36 }
 0xb09 PF: > { %s25_s24 = sadd.s32 1, %s16708_s24   ;;  %s21875_s2 = sld [smem:[#allocation25_spill]] }
 0xb0a   : > { %p22_p7 = scmp.ge.s32.totalorder %s25_s24, 6   ;;  %s21876_s17 = smov %s16684_s18 }
 0xb0b   : > { %s21877_s18 = smov %s16688_s19  ;;  %s21878_s19 = smov %s16982_s9 }
 0xb0c   : > { %s21879_s20 = smov %s16700_s22  ;;  %s21880_s21 = smov %s16704_s23 }
 0xb0d   : > { %s21881_s22 = smov %s21884_s28  ;;  %24 = sbr.rel (!%p22_p7) target bundleno = 17 (0x11), region = 156 }
 0xb0f   : > { %s21882_s23 = smov %s21875_s2 }
 0xb14   :  { %11365 = vsyncpa [#allocation4], 1 }
 0xb15   :  { %11367 = vsyncpa [#allocation4 + $0x1], 1 }
 0xb16   :  { %11368 = vsyncpa [#allocation6], 1 }
 0xb17   :  { %11369 = vsyncpa [#allocation9], 1 }
 0xb18   :  { %11370 = vsyncpa [#allocation12], 1 }

</bundles_post_ra>
